<compile_context>
chip_gen: v7x
topology: tpu7x:2x2x1
jax: 0.10.0
libtpu: 0.0.40
codegen_flags: <defaults>
</compile_context>

<pallas_src>
import functools

import jax
import jax.numpy as jnp
from jax.experimental import pallas as pl
from jax.experimental.pallas import tpu as pltpu

VGG_MEAN = (0.485, 0.456, 0.406)
VGG_STD = (0.229, 0.224, 0.225)

# VGG19 "features" configuration (conv channel counts, 'M' = maxpool2x2).
VGG19_CFG = [64, 64, 'M', 128, 128, 'M', 256, 256, 256, 256, 'M',
             512, 512, 512, 512, 'M', 512, 512, 512, 512, 'M']

_DEVICE_VMEM_BYTES = None
_SINGLE_BUFFER_CONSTS = True    # flipped to False if pl.Buffered(1) is rejected


def _device_vmem_bytes():
    global _DEVICE_VMEM_BYTES
    if _DEVICE_VMEM_BYTES is None:
        try:
            _DEVICE_VMEM_BYTES = int(pltpu.get_tpu_info().vmem_capacity_bytes)
        except Exception:
            _DEVICE_VMEM_BYTES = 64 * 1024 * 1024   # conservative (v7x per-TC)
    return _DEVICE_VMEM_BYTES


def _ceil_to(a, m):
    return -(-a // m) * m


# ----------------------------- Pallas kernels -----------------------------

def _conv3x3_bias_act_kernel(x_ref, w_ref, b_ref, pv_ref, o_ref, xs_ref, acc_ref,
                             *, apply_relu, apply_input_relu):
    """Fused 3x3 'same' conv + bias (+ ReLU) for one batch element.

    x_ref : (1, H, W, Cin)         activation tile (f32 or bf16)
    w_ref : (9, Cin, Cout)   bf16  taps, tap index = dy*3 + dx
    b_ref : (1, Cout)        f32   bias
    pv_ref: (1, Cin)         f32   halo pad value (zeros; 2*mean-1 for the
                                   normalize-folded first layer)
    o_ref : (1, H, W, Cout)        output tile (bf16 between layers; f32 when
                                   the layer output is a collected feature)
    xs_ref: (3, H+2, W, Cin) bf16  VMEM scratch: three dx-shifted, halo-padded
                                   copies (dx-major) so every MXU operand is an
                                   aligned ref slice (dy selects whole rows).
    acc_ref: (H*W, Cout)     f32   VMEM accumulator (keeps the 9-tap accumulation
                                   out of the vreg file -> no spills).
    """
    _, H, W, Cin = x_ref.shape
    Cout = w_ref.shape[-1]

    # ---- fill phase: build the pre-shifted bf16 operand copies in VMEM ----
    pad = pv_ref[...].astype(jnp.bfloat16).reshape(1, 1, 1, Cin)
    xs_ref[...] = jnp.broadcast_to(pad, (3, H + 2, W, Cin))

    x = x_ref[0]
    if apply_input_relu:                     # deferred ReLU from previous layer
        x = jnp.maximum(x, 0)
    xb = x.astype(jnp.bfloat16)              # single cast (scratch/output only)
    xs_ref[1, pl.ds(1, H), :, :] = xb                                 # dx = 1
    xs_ref[0, pl.ds(1, H), pl.ds(1, W - 1), :] = xb[:, :W - 1, :]     # dx = 0
    xs_ref[2, pl.ds(1, H), pl.ds(0, W - 1), :] = xb[:, 1:, :]         # dx = 2

    # ---- MXU phase: 9 taps accumulate into the f32 VMEM accumulator ----
    # TODO(synk): collapse to 3 matmuls with K=3*Cin once a relayout-free lane
    #             concat is guaranteed (Cin % 128 == 0 layers).
    for dy in range(3):
        for dx in range(3):
            patch = xs_ref[dx, pl.ds(dy, H), :, :].reshape(H * W, Cin)
            t = jnp.dot(patch, w_ref[dy * 3 + dx],
                        preferred_element_type=jnp.float32)
            if dy == 0 and dx == 0:
                acc_ref[...] = t
            else:
                acc_ref[...] += t

    res = acc_ref[...] + b_ref[...]
    if apply_relu:
        res = jnp.maximum(res, 0.0)
    o_ref[0] = res.reshape(H, W, Cout).astype(o_ref.dtype)


def _relu_kernel(x_ref, o_ref):
    o_ref[...] = jnp.maximum(x_ref[...], 0).astype(o_ref.dtype)


def _maxpool2_kernel(x_ref, o_ref, *, apply_input_relu):
    # x_ref: (1, Ho, 2, Wo, 2C) lane-dense 2x2 windows; o_ref: (1, Ho, Wo, C)
    C = o_ref.shape[-1]
    a = x_ref[0, :, 0, :, :]                      # even rows   (Ho, Wo, 2C)
    b = x_ref[0, :, 1, :, :]                      # odd rows
    m = jnp.maximum(a, b)                         # row-pair max
    r = jnp.maximum(m[..., :C], m[..., C:])       # column-pair max (lane halves)
    if apply_input_relu:                          # relu∘maxpool == maxpool∘relu
        r = jnp.maximum(r, 0)
    o_ref[0] = r.astype(o_ref.dtype)


def _normalize_kernel(x_ref, mean_ref, std_ref, o_ref):
    # Fallback only (used if the first layer is not a conv to fold into).
    x = x_ref[...]
    o_ref[...] = ((x + 1.0) * 0.5 - mean_ref[...]) / std_ref[...]


# ----------------------------- wrappers -----------------------------

def _const_block_spec(shape, single_buffer):
    """BlockSpec for an operand whose block index is constant across the grid."""
    n = len(shape)

    def zero_map(i):
        return (0,) * n

    if single_buffer:
        return pl.BlockSpec(shape, zero_map, pipeline_mode=pl.Buffered(1))
    return pl.BlockSpec(shape, zero_map)


def conv3x3_bias_relu(x, w, b, *, apply_relu=True, apply_input_relu=False,
                      fold_normalize=False, out_dtype=jnp.bfloat16):
    """3x3 'same' conv + bias (+ ReLU) as one fused pallas_call, grid over batch."""
    global _SINGLE_BUFFER_CONSTS
    B, H, W, Cin = x.shape
    Cout = w.shape[-1]

    w32 = w.astype(jnp.float32)
    b32 = b.astype(jnp.float32).reshape(1, Cout)
    if fold_normalize:
        # ((x+1)/2 - mean)/std == a*x + c with a = 0.5/std, c = (0.5-mean)/std.
        # Fold into the conv: w' = w*a (per input channel),
        # b' = b + sum_{tap,cin} w*c, and the halo pad value becomes
        # 2*mean - 1 (the raw value whose normalized value is 0, so it matches
        # zero padding of the normalized input exactly).
        mean = jnp.asarray(VGG_MEAN, jnp.float32)
        std = jnp.asarray(VGG_STD, jnp.float32)
        a = 0.5 / std
        c = (0.5 - mean) / std
        b32 = b32 + jnp.einsum('hwio,i->o', w32, c).reshape(1, Cout)
        w32 = w32 * a.reshape(1, 1, Cin, 1)
        pad_val = (2.0 * mean - 1.0).reshape(1, Cin)
    else:
        pad_val = jnp.zeros((1, Cin), jnp.float32)

    w_taps = w32.reshape(9, Cin, Cout).astype(jnp.bfloat16)   # bf16 MXU operand

    # VMEM accounting (lane dim pads to 128; sublane to 8 f32 / 16 bf16), and a
    # device-aware clamp of the scoped VMEM limit (never above physical VMEM).
    cin_l, cout_l = _ceil_to(Cin, 128), _ceil_to(Cout, 128)
    x_b = jnp.dtype(x.dtype).itemsize
    o_b = jnp.dtype(out_dtype).itemsize
    blk_bytes = (
        2 * H * _ceil_to(W, 8) * cin_l * x_b             # input block (double-buffered)
        + 2 * H * _ceil_to(W, 8) * cout_l * o_b          # output block (double-buffered)
        + 2 * (9 * _ceil_to(Cin, 16) * cout_l * 2        # weights / bias / pad value
               + 8 * cout_l * 4 + 8 * cin_l * 4)
        + 3 * (H + 2) * _ceil_to(W, 16) * cin_l * 2      # pre-shifted bf16 scratch
        + _ceil_to(H * W, 8) * cout_l * 4)               # f32 accumulator scratch
    vmem_limit = int(min(max(blk_bytes + (4 << 20), 32 << 20),
                         _device_vmem_bytes() - (8 << 20)))
    vmem_limit = max(vmem_limit, 16 << 20)

    kernel = functools.partial(_conv3x3_bias_act_kernel,
                               apply_relu=apply_relu,
                               apply_input_relu=apply_input_relu)

    def run(single_buffer_consts):
        return pl.pallas_call(
            kernel,
            out_shape=jax.ShapeDtypeStruct((B, H, W, Cout), out_dtype),
            grid=(B,),
            in_specs=[pl.BlockSpec((1, H, W, Cin), lambda i: (i, 0, 0, 0)),
                      _const_block_spec((9, Cin, Cout), single_buffer_consts),
                      _const_block_spec((1, Cout), single_buffer_consts),
                      _const_block_spec((1, Cin), single_buffer_consts)],
            out_specs=pl.BlockSpec((1, H, W, Cout), lambda i: (i, 0, 0, 0)),
            scratch_shapes=[pltpu.VMEM((3, H + 2, W, Cin), jnp.bfloat16),
                            pltpu.VMEM((H * W, Cout), jnp.float32)],
            compiler_params=pltpu.CompilerParams(
                dimension_semantics=("parallel",),
                vmem_limit_bytes=vmem_limit),
        )(x, w_taps, b32, pad_val)

    if _SINGLE_BUFFER_CONSTS:
        try:
            return run(True)
        except Exception:
            _SINGLE_BUFFER_CONSTS = False   # pl.Buffered(1) unsupported here
    return run(False)


def maxpool2(x, *, apply_input_relu=False, out_dtype=None):
    """2x2 stride-2 max pooling; one image per grid step, lane-dense blocks."""
    B, H, W, C = x.shape
    Ho, Wo = H // 2, W // 2
    out_dtype = x.dtype if out_dtype is None else out_dtype
    # Free HBM view exposing the 2x2 windows without a size-2 sublane dim:
    # last dim holds [even column | odd column] channel blocks.
    xr = x.reshape(B, Ho, 2, Wo, 2 * C)
    kernel = functools.partial(_maxpool2_kernel, apply_input_relu=apply_input_relu)
    return pl.pallas_call(
        kernel,
        out_shape=jax.ShapeDtypeStruct((B, Ho, Wo, C), out_dtype),
        grid=(B,),
        in_specs=[pl.BlockSpec((1, Ho, 2, Wo, 2 * C), lambda i: (i, 0, 0, 0, 0))],
        out_specs=pl.BlockSpec((1, Ho, Wo, C), lambda i: (i, 0, 0, 0)),
        compiler_params=pltpu.CompilerParams(dimension_semantics=("parallel",)),
    )(xr)


def relu(x, out_dtype=jnp.float32):
    """Standalone ReLU: only needed when both a conv's pre-ReLU output AND the
    following ReLU's output are requested features (cannot fuse either way)."""
    B, H, W, C = x.shape
    return pl.pallas_call(
        _relu_kernel,
        out_shape=jax.ShapeDtypeStruct((B, H, W, C), out_dtype),
        grid=(B,),
        in_specs=[pl.BlockSpec((1, H, W, C), lambda i: (i, 0, 0, 0))],
        out_specs=pl.BlockSpec((1, H, W, C), lambda i: (i, 0, 0, 0)),
        compiler_params=pltpu.CompilerParams(dimension_semantics=("parallel",)),
    )(x)


def normalize(x):
    """Fallback normalization pass (unused when the first layer is a conv)."""
    B, H, W, C = x.shape
    mean = jnp.asarray(VGG_MEAN, jnp.float32).reshape(1, 1, 1, 3)
    std = jnp.asarray(VGG_STD, jnp.float32).reshape(1, 1, 1, 3)
    return pl.pallas_call(
        _normalize_kernel,
        out_shape=jax.ShapeDtypeStruct((B, H, W, C), jnp.float32),
        grid=(B,),
        in_specs=[pl.BlockSpec((1, H, W, C), lambda b: (b, 0, 0, 0)),
                  pl.BlockSpec((1, 1, 1, C), lambda b: (0, 0, 0, 0)),
                  pl.BlockSpec((1, 1, 1, C), lambda b: (0, 0, 0, 0))],
        out_specs=pl.BlockSpec((1, H, W, C), lambda b: (b, 0, 0, 0)),
        compiler_params=pltpu.CompilerParams(dimension_semantics=("parallel",)),
    )(x, mean, std)


# ----------------------------- model glue -----------------------------

def build_vgg_layers(key, max_layer):
    """Deterministic synthetic VGG19.features[0 .. max_layer] parameters."""
    layers = []  # list of (kind, w, b) with kind in {'conv','relu','pool'}
    in_c = 3
    for v in VGG19_CFG:
        if v == 'M':
            layers.append(('pool', None, None))
        else:
            key, kw, kb = jax.random.split(key, 3)
            fan_in = 3 * 3 * in_c
            w = jax.random.normal(kw, (3, 3, in_c, v), jnp.float32) * (2.0 / fan_in) ** 0.5
            b = jax.random.normal(kb, (1, v), jnp.float32) * 0.01
            layers.append(('conv', w, b))
            layers.append(('relu', None, None))
            in_c = v
        if len(layers) > max_layer:
            break
    return layers[:max_layer + 1]


def perceptual_vgg19_forward(x_nchw, layers, feature_layers, is_style=False):
    """Mirrors PerceptualVGG19.forward: normalize, run features, collect/concat.

    conv + bias + ReLU fuse into one kernel whenever possible; a ReLU that
    cannot be fused into its conv (because the conv's pre-ReLU output is a
    collected feature) is deferred into the NEXT consumer (conv/pool) instead
    of running as a standalone HBM pass. Inter-layer activations are bf16;
    collected features are produced directly in f32."""
    x = jnp.transpose(x_nchw, (0, 2, 3, 1)).astype(jnp.float32)   # NCHW -> NHWC
    feature_set = {int(i) for i in feature_layers}
    n = len(layers)

    h = x
    fold_into_first_conv = n > 0 and layers[0][0] == 'conv'
    if not fold_into_first_conv:
        h = normalize(h)                                          # fallback path

    features = {}
    pending_relu = False
    idx = 0
    while idx < n:
        kind, w, b = layers[idx]
        if kind == 'conv':
            has_next_relu = idx + 1 < n and layers[idx + 1][0] == 'relu'
            conv_collect = idx in feature_set
            fuse_out_relu = has_next_relu and not conv_collect
            relu_collect = has_next_relu and (idx + 1) in feature_set
            collect_here = conv_collect or (fuse_out_relu and relu_collect)
            out_dtype = jnp.float32 if collect_here else jnp.bfloat16
            h = conv3x3_bias_relu(
                h, w, b,
                apply_relu=fuse_out_relu,
                apply_input_relu=pending_relu,
                fold_normalize=(idx == 0 and fold_into_first_conv),
                out_dtype=out_dtype)
            pending_relu = False
            if conv_collect:
                features[idx] = h
                if has_next_relu:
                    if relu_collect:
                        h = relu(h)                  # need both pre- and post-ReLU
                        features[idx + 1] = h
                    else:
                        pending_relu = True          # fuse into next consumer
            elif fuse_out_relu and relu_collect:
                features[idx + 1] = h
            idx += 2 if has_next_relu else 1
        elif kind == 'relu':
            # Only reached if a ReLU does not directly follow a conv (never in
            # VGG19); relu is idempotent so any pending ReLU is absorbed.
            out_dtype = jnp.float32 if idx in feature_set else jnp.bfloat16
            h = relu(h, out_dtype=out_dtype)
            pending_relu = False
            if idx in feature_set:
                features[idx] = h
            idx += 1
        else:  # 'pool'
            collect = idx in feature_set
            out_dtype = jnp.float32 if collect else jnp.bfloat16
            h = maxpool2(h, apply_input_relu=pending_relu, out_dtype=out_dtype)
            pending_relu = False
            if collect:
                features[idx] = h
            idx += 1

    outs = []
    for i in sorted(features):            # torch appends in increasing layer index
        f_nchw = jnp.transpose(features[i], (0, 3, 1, 2))         # back to NCHW
        outs.append(f_nchw if is_style else f_nchw.reshape(f_nchw.shape[0], -1))
    if is_style:
        return outs
    return jnp.concatenate(outs, axis=1)


# ----------------------------- pure-JAX reference -----------------------------

def _reference_forward(x_nchw, layers, feature_layers):
    """f32 XLA reference of the same forward, for a tolerance check."""
    x = jnp.transpose(x_nchw, (0, 2, 3, 1)).astype(jnp.float32)
    mean = jnp.asarray(VGG_MEAN, jnp.float32).reshape(1, 1, 1, 3)
    std = jnp.asarray(VGG_STD, jnp.float32).reshape(1, 1, 1, 3)
    h = ((x + 1.0) * 0.5 - mean) / std
    feats = {}
    fset = {int(i) for i in feature_layers}
    for idx, (kind, w, b) in enumerate(layers):
        if kind == 'conv':
            h = jax.lax.conv_general_dilated(
                h, w, window_strides=(1, 1), padding='SAME',
                dimension_numbers=('NHWC', 'HWIO', 'NHWC')) + b.reshape(1, 1, 1, -1)
        elif kind == 'relu':
            h = jnp.maximum(h, 0)
        else:
            h = jax.lax.reduce_window(h, -jnp.inf, jax.lax.max,
                                      (1, 2, 2, 1), (1, 2, 2, 1), 'VALID')
        if idx in fset:
            feats[idx] = h
    outs = [jnp.transpose(feats[i], (0, 3, 1, 2)).reshape(x.shape[0], -1)
            for i in sorted(feats)]
    return jnp.concatenate(outs, axis=1)


if __name__ == "__main__":
    key = jax.random.PRNGKey(0)
    key, xk, wk = jax.random.split(key, 3)

    # small shapes consistent with the module: batch=2, 3 input channels, 16x16
    x = jax.random.normal(xk, (2, 3, 16, 16), jnp.float32)

    feature_layers = (1, 4, 6)          # relu1, maxpool, relu3 of VGG19.features
    layers = build_vgg_layers(wk, max(feature_layers))

    out = perceptual_vgg19_forward(x, layers, feature_layers)
    out = jax.block_until_ready(out)

    expected = 64 * 16 * 16 + 64 * 8 * 8 + 128 * 8 * 8   # 16384 + 4096 + 8192
    assert out.shape == (2, expected), out.shape
    assert bool(jnp.all(jnp.isfinite(out)))

    # bf16-tolerant correctness check against an f32 XLA reference.
    ref = _reference_forward(x, layers, feature_layers)
    err = float(jnp.max(jnp.abs(out - ref)) / (jnp.max(jnp.abs(ref)) + 1e-6))
    assert err < 6e-2, f"max scaled error too large: {err}"

    print("KERNEL_OK")
</pallas_src>

<mosaic_0001>
module attributes {stable_mosaic.version = 11 : i64} {
  func.func @_conv3x3_bias_act_kernel(%arg0: i32, %arg1: memref<1x16x16x3xf32, #tpu.memory_space<vmem>>, %arg2: memref<9x3x64xbf16, #tpu.memory_space<vmem>>, %arg3: memref<1x64xf32, #tpu.memory_space<vmem>>, %arg4: memref<1x3xf32, #tpu.memory_space<vmem>>, %arg5: memref<1x16x16x64xf32, #tpu.memory_space<vmem>>, %arg6: memref<3x18x16x3xbf16, #tpu.memory_space<vmem>>, %arg7: memref<256x64xf32, #tpu.memory_space<vmem>>) attributes {dimension_semantics = [#tpu.dimension_semantics<parallel>], iteration_bounds = array<i64: 2>, scalar_prefetch = 0 : i64, scratch_operands = 2 : i64, tpu.core_type = #tpu.core_type<tc>, window_params = [{transform_indices = @transform_0, window_bounds = array<i64: 1, 16, 16, 3>}, {pipeline_mode = #tpu.pipeline_mode<synchronous>, transform_indices = @transform_1, window_bounds = array<i64: 9, 3, 64>}, {pipeline_mode = #tpu.pipeline_mode<synchronous>, transform_indices = @transform_2, window_bounds = array<i64: 1, 64>}, {pipeline_mode = #tpu.pipeline_mode<synchronous>, transform_indices = @transform_3, window_bounds = array<i64: 1, 3>}, {transform_indices = @transform_4, window_bounds = array<i64: 1, 16, 16, 64>}]} {
    %c0 = arith.constant 0 : index
    %c0_0 = arith.constant 0 : index
    %0 = vector.load %arg4[%c0, %c0_0] : memref<1x3xf32, #tpu.memory_space<vmem>>, vector<1x3xf32>
    %1 = arith.truncf %0 : vector<1x3xf32> to vector<1x3xbf16>
    %2 = vector.shape_cast %1 : vector<1x3xbf16> to vector<1x1x1x3xbf16>
    %3 = vector.shape_cast %2 : vector<1x1x1x3xbf16> to vector<1x1x1x3xbf16>
    %4 = vector.broadcast %3 : vector<1x1x1x3xbf16> to vector<3x18x16x3xbf16>
    %c0_1 = arith.constant 0 : index
    %c0_2 = arith.constant 0 : index
    %c0_3 = arith.constant 0 : index
    %c0_4 = arith.constant 0 : index
    %5 = vector.load %arg6[%c0_1, %c0_2, %c0_3, %c0_4] : memref<3x18x16x3xbf16, #tpu.memory_space<vmem>>, vector<3x18x16x3xbf16>
    tpu.vector_store %arg6[%c0_1, %c0_2, %c0_3, %c0_4], %4 {strides = array<i32>} : memref<3x18x16x3xbf16, #tpu.memory_space<vmem>>, vector<3x18x16x3xbf16>,
    %c0_5 = arith.constant 0 : index
    %c0_6 = arith.constant 0 : index
    %c0_7 = arith.constant 0 : index
    %c0_8 = arith.constant 0 : index
    %6 = vector.load %arg1[%c0_5, %c0_6, %c0_7, %c0_8] : memref<1x16x16x3xf32, #tpu.memory_space<vmem>>, vector<1x16x16x3xf32>
    %7 = vector.shape_cast %6 : vector<1x16x16x3xf32> to vector<16x16x3xf32>
    %8 = arith.truncf %7 : vector<16x16x3xf32> to vector<16x16x3xbf16>
    %c1 = arith.constant 1 : index
    %c1_9 = arith.constant 1 : index
    %c0_10 = arith.constant 0 : index
    %c0_11 = arith.constant 0 : index
    %9 = vector.load %arg6[%c1, %c1_9, %c0_10, %c0_11] : memref<3x18x16x3xbf16, #tpu.memory_space<vmem>>, vector<1x16x16x3xbf16>
    %10 = vector.shape_cast %9 : vector<1x16x16x3xbf16> to vector<16x16x3xbf16>
    %11 = vector.shape_cast %8 : vector<16x16x3xbf16> to vector<1x16x16x3xbf16>
    tpu.vector_store %arg6[%c1, %c1_9, %c0_10, %c0_11], %11 {strides = array<i32>} : memref<3x18x16x3xbf16, #tpu.memory_space<vmem>>, vector<1x16x16x3xbf16>,
    %12 = vector.extract_strided_slice %8 {offsets = [0, 0, 0], sizes = [16, 15, 3], strides = [1, 1, 1]} : vector<16x16x3xbf16> to vector<16x15x3xbf16>
    %c0_12 = arith.constant 0 : index
    %c1_13 = arith.constant 1 : index
    %c1_14 = arith.constant 1 : index
    %c0_15 = arith.constant 0 : index
    %13 = vector.load %arg6[%c0_12, %c1_13, %c1_14, %c0_15] : memref<3x18x16x3xbf16, #tpu.memory_space<vmem>>, vector<1x16x15x3xbf16>
    %14 = vector.shape_cast %13 : vector<1x16x15x3xbf16> to vector<16x15x3xbf16>
    %15 = vector.shape_cast %12 : vector<16x15x3xbf16> to vector<1x16x15x3xbf16>
    tpu.vector_store %arg6[%c0_12, %c1_13, %c1_14, %c0_15], %15 {strides = array<i32>} : memref<3x18x16x3xbf16, #tpu.memory_space<vmem>>, vector<1x16x15x3xbf16>,
    %16 = vector.extract_strided_slice %8 {offsets = [0, 1, 0], sizes = [16, 15, 3], strides = [1, 1, 1]} : vector<16x16x3xbf16> to vector<16x15x3xbf16>
    %c2 = arith.constant 2 : index
    %c1_16 = arith.constant 1 : index
    %c0_17 = arith.constant 0 : index
    %c0_18 = arith.constant 0 : index
    %17 = vector.load %arg6[%c2, %c1_16, %c0_17, %c0_18] : memref<3x18x16x3xbf16, #tpu.memory_space<vmem>>, vector<1x16x15x3xbf16>
    %18 = vector.shape_cast %17 : vector<1x16x15x3xbf16> to vector<16x15x3xbf16>
    %19 = vector.shape_cast %16 : vector<16x15x3xbf16> to vector<1x16x15x3xbf16>
    tpu.vector_store %arg6[%c2, %c1_16, %c0_17, %c0_18], %19 {strides = array<i32>} : memref<3x18x16x3xbf16, #tpu.memory_space<vmem>>, vector<1x16x15x3xbf16>,
    %c0_19 = arith.constant 0 : index
    %c0_20 = arith.constant 0 : index
    %c0_21 = arith.constant 0 : index
    %c0_22 = arith.constant 0 : index
    %20 = vector.load %arg6[%c0_19, %c0_20, %c0_21, %c0_22] : memref<3x18x16x3xbf16, #tpu.memory_space<vmem>>, vector<1x16x16x3xbf16>
    %21 = vector.shape_cast %20 : vector<1x16x16x3xbf16> to vector<16x16x3xbf16>
    %22 = vector.shape_cast %21 : vector<16x16x3xbf16> to vector<256x3xbf16>
    %c0_23 = arith.constant 0 : index
    %c0_24 = arith.constant 0 : index
    %c0_25 = arith.constant 0 : index
    %23 = vector.load %arg2[%c0_23, %c0_24, %c0_25] : memref<9x3x64xbf16, #tpu.memory_space<vmem>>, vector<1x3x64xbf16>
    %24 = vector.shape_cast %23 : vector<1x3x64xbf16> to vector<3x64xbf16>
    %cst = arith.constant dense<0.000000e+00> : vector<256x64xf32>
    %25 = tpu.matmul %22, %24, %cst {dimension_numbers = #tpu.dot_dimension_numbers<[1], [0], [0], [1], [0, 0, 1, 1], [], []>} : vector<256x3xbf16>, vector<3x64xbf16>, vector<256x64xf32> -> vector<256x64xf32>
    %c0_26 = arith.constant 0 : index
    %c0_27 = arith.constant 0 : index
    %26 = vector.load %arg7[%c0_26, %c0_27] : memref<256x64xf32, #tpu.memory_space<vmem>>, vector<256x64xf32>
    tpu.vector_store %arg7[%c0_26, %c0_27], %25 {strides = array<i32>} : memref<256x64xf32, #tpu.memory_space<vmem>>, vector<256x64xf32>,
    %c1_28 = arith.constant 1 : index
    %c0_29 = arith.constant 0 : index
    %c0_30 = arith.constant 0 : index
    %c0_31 = arith.constant 0 : index
    %27 = vector.load %arg6[%c1_28, %c0_29, %c0_30, %c0_31] : memref<3x18x16x3xbf16, #tpu.memory_space<vmem>>, vector<1x16x16x3xbf16>
    %28 = vector.shape_cast %27 : vector<1x16x16x3xbf16> to vector<16x16x3xbf16>
    %29 = vector.shape_cast %28 : vector<16x16x3xbf16> to vector<256x3xbf16>
    %c1_32 = arith.constant 1 : index
    %c0_33 = arith.constant 0 : index
    %c0_34 = arith.constant 0 : index
    %30 = vector.load %arg2[%c1_32, %c0_33, %c0_34] : memref<9x3x64xbf16, #tpu.memory_space<vmem>>, vector<1x3x64xbf16>
    %31 = vector.shape_cast %30 : vector<1x3x64xbf16> to vector<3x64xbf16>
    %cst_35 = arith.constant dense<0.000000e+00> : vector<256x64xf32>
    %32 = tpu.matmul %29, %31, %cst_35 {dimension_numbers = #tpu.dot_dimension_numbers<[1], [0], [0], [1], [0, 0, 1, 1], [], []>} : vector<256x3xbf16>, vector<3x64xbf16>, vector<256x64xf32> -> vector<256x64xf32>
    %c0_36 = arith.constant 0 : index
    %c0_37 = arith.constant 0 : index
    %33 = vector.load %arg7[%c0_36, %c0_37] : memref<256x64xf32, #tpu.memory_space<vmem>>, vector<256x64xf32>
    %34 = arith.addf %33, %32 : vector<256x64xf32>
    %c0_38 = arith.constant 0 : index
    %c0_39 = arith.constant 0 : index
    %35 = vector.load %arg7[%c0_38, %c0_39] : memref<256x64xf32, #tpu.memory_space<vmem>>, vector<256x64xf32>
    tpu.vector_store %arg7[%c0_38, %c0_39], %34 {strides = array<i32>} : memref<256x64xf32, #tpu.memory_space<vmem>>, vector<256x64xf32>,
    %c2_40 = arith.constant 2 : index
    %c0_41 = arith.constant 0 : index
    %c0_42 = arith.constant 0 : index
    %c0_43 = arith.constant 0 : index
    %36 = vector.load %arg6[%c2_40, %c0_41, %c0_42, %c0_43] : memref<3x18x16x3xbf16, #tpu.memory_space<vmem>>, vector<1x16x16x3xbf16>
    %37 = vector.shape_cast %36 : vector<1x16x16x3xbf16> to vector<16x16x3xbf16>
    %38 = vector.shape_cast %37 : vector<16x16x3xbf16> to vector<256x3xbf16>
    %c2_44 = arith.constant 2 : index
    %c0_45 = arith.constant 0 : index
    %c0_46 = arith.constant 0 : index
    %39 = vector.load %arg2[%c2_44, %c0_45, %c0_46] : memref<9x3x64xbf16, #tpu.memory_space<vmem>>, vector<1x3x64xbf16>
    %40 = vector.shape_cast %39 : vector<1x3x64xbf16> to vector<3x64xbf16>
    %cst_47 = arith.constant dense<0.000000e+00> : vector<256x64xf32>
    %41 = tpu.matmul %38, %40, %cst_47 {dimension_numbers = #tpu.dot_dimension_numbers<[1], [0], [0], [1], [0, 0, 1, 1], [], []>} : vector<256x3xbf16>, vector<3x64xbf16>, vector<256x64xf32> -> vector<256x64xf32>
    %c0_48 = arith.constant 0 : index
    %c0_49 = arith.constant 0 : index
    %42 = vector.load %arg7[%c0_48, %c0_49] : memref<256x64xf32, #tpu.memory_space<vmem>>, vector<256x64xf32>
    %43 = arith.addf %42, %41 : vector<256x64xf32>
    %c0_50 = arith.constant 0 : index
    %c0_51 = arith.constant 0 : index
    %44 = vector.load %arg7[%c0_50, %c0_51] : memref<256x64xf32, #tpu.memory_space<vmem>>, vector<256x64xf32>
    tpu.vector_store %arg7[%c0_50, %c0_51], %43 {strides = array<i32>} : memref<256x64xf32, #tpu.memory_space<vmem>>, vector<256x64xf32>,
    %c0_52 = arith.constant 0 : index
    %c1_53 = arith.constant 1 : index
    %c0_54 = arith.constant 0 : index
    %c0_55 = arith.constant 0 : index
    %45 = vector.load %arg6[%c0_52, %c1_53, %c0_54, %c0_55] : memref<3x18x16x3xbf16, #tpu.memory_space<vmem>>, vector<1x16x16x3xbf16>
    %46 = vector.shape_cast %45 : vector<1x16x16x3xbf16> to vector<16x16x3xbf16>
    %47 = vector.shape_cast %46 : vector<16x16x3xbf16> to vector<256x3xbf16>
    %c3 = arith.constant 3 : index
    %c0_56 = arith.constant 0 : index
    %c0_57 = arith.constant 0 : index
    %48 = vector.load %arg2[%c3, %c0_56, %c0_57] : memref<9x3x64xbf16, #tpu.memory_space<vmem>>, vector<1x3x64xbf16>
    %49 = vector.shape_cast %48 : vector<1x3x64xbf16> to vector<3x64xbf16>
    %cst_58 = arith.constant dense<0.000000e+00> : vector<256x64xf32>
    %50 = tpu.matmul %47, %49, %cst_58 {dimension_numbers = #tpu.dot_dimension_numbers<[1], [0], [0], [1], [0, 0, 1, 1], [], []>} : vector<256x3xbf16>, vector<3x64xbf16>, vector<256x64xf32> -> vector<256x64xf32>
    %c0_59 = arith.constant 0 : index
    %c0_60 = arith.constant 0 : index
    %51 = vector.load %arg7[%c0_59, %c0_60] : memref<256x64xf32, #tpu.memory_space<vmem>>, vector<256x64xf32>
    %52 = arith.addf %51, %50 : vector<256x64xf32>
    %c0_61 = arith.constant 0 : index
    %c0_62 = arith.constant 0 : index
    %53 = vector.load %arg7[%c0_61, %c0_62] : memref<256x64xf32, #tpu.memory_space<vmem>>, vector<256x64xf32>
    tpu.vector_store %arg7[%c0_61, %c0_62], %52 {strides = array<i32>} : memref<256x64xf32, #tpu.memory_space<vmem>>, vector<256x64xf32>,
    %c1_63 = arith.constant 1 : index
    %c1_64 = arith.constant 1 : index
    %c0_65 = arith.constant 0 : index
    %c0_66 = arith.constant 0 : index
    %54 = vector.load %arg6[%c1_63, %c1_64, %c0_65, %c0_66] : memref<3x18x16x3xbf16, #tpu.memory_space<vmem>>, vector<1x16x16x3xbf16>
    %55 = vector.shape_cast %54 : vector<1x16x16x3xbf16> to vector<16x16x3xbf16>
    %56 = vector.shape_cast %55 : vector<16x16x3xbf16> to vector<256x3xbf16>
    %c4 = arith.constant 4 : index
    %c0_67 = arith.constant 0 : index
    %c0_68 = arith.constant 0 : index
    %57 = vector.load %arg2[%c4, %c0_67, %c0_68] : memref<9x3x64xbf16, #tpu.memory_space<vmem>>, vector<1x3x64xbf16>
    %58 = vector.shape_cast %57 : vector<1x3x64xbf16> to vector<3x64xbf16>
    %cst_69 = arith.constant dense<0.000000e+00> : vector<256x64xf32>
    %59 = tpu.matmul %56, %58, %cst_69 {dimension_numbers = #tpu.dot_dimension_numbers<[1], [0], [0], [1], [0, 0, 1, 1], [], []>} : vector<256x3xbf16>, vector<3x64xbf16>, vector<256x64xf32> -> vector<256x64xf32>
    %c0_70 = arith.constant 0 : index
    %c0_71 = arith.constant 0 : index
    %60 = vector.load %arg7[%c0_70, %c0_71] : memref<256x64xf32, #tpu.memory_space<vmem>>, vector<256x64xf32>
    %61 = arith.addf %60, %59 : vector<256x64xf32>
    %c0_72 = arith.constant 0 : index
    %c0_73 = arith.constant 0 : index
    %62 = vector.load %arg7[%c0_72, %c0_73] : memref<256x64xf32, #tpu.memory_space<vmem>>, vector<256x64xf32>
    tpu.vector_store %arg7[%c0_72, %c0_73], %61 {strides = array<i32>} : memref<256x64xf32, #tpu.memory_space<vmem>>, vector<256x64xf32>,
    %c2_74 = arith.constant 2 : index
    %c1_75 = arith.constant 1 : index
    %c0_76 = arith.constant 0 : index
    %c0_77 = arith.constant 0 : index
    %63 = vector.load %arg6[%c2_74, %c1_75, %c0_76, %c0_77] : memref<3x18x16x3xbf16, #tpu.memory_space<vmem>>, vector<1x16x16x3xbf16>
    %64 = vector.shape_cast %63 : vector<1x16x16x3xbf16> to vector<16x16x3xbf16>
    %65 = vector.shape_cast %64 : vector<16x16x3xbf16> to vector<256x3xbf16>
    %c5 = arith.constant 5 : index
    %c0_78 = arith.constant 0 : index
    %c0_79 = arith.constant 0 : index
    %66 = vector.load %arg2[%c5, %c0_78, %c0_79] : memref<9x3x64xbf16, #tpu.memory_space<vmem>>, vector<1x3x64xbf16>
    %67 = vector.shape_cast %66 : vector<1x3x64xbf16> to vector<3x64xbf16>
    %cst_80 = arith.constant dense<0.000000e+00> : vector<256x64xf32>
    %68 = tpu.matmul %65, %67, %cst_80 {dimension_numbers = #tpu.dot_dimension_numbers<[1], [0], [0], [1], [0, 0, 1, 1], [], []>} : vector<256x3xbf16>, vector<3x64xbf16>, vector<256x64xf32> -> vector<256x64xf32>
    %c0_81 = arith.constant 0 : index
    %c0_82 = arith.constant 0 : index
    %69 = vector.load %arg7[%c0_81, %c0_82] : memref<256x64xf32, #tpu.memory_space<vmem>>, vector<256x64xf32>
    %70 = arith.addf %69, %68 : vector<256x64xf32>
    %c0_83 = arith.constant 0 : index
    %c0_84 = arith.constant 0 : index
    %71 = vector.load %arg7[%c0_83, %c0_84] : memref<256x64xf32, #tpu.memory_space<vmem>>, vector<256x64xf32>
    tpu.vector_store %arg7[%c0_83, %c0_84], %70 {strides = array<i32>} : memref<256x64xf32, #tpu.memory_space<vmem>>, vector<256x64xf32>,
    %c0_85 = arith.constant 0 : index
    %c2_86 = arith.constant 2 : index
    %c0_87 = arith.constant 0 : index
    %c0_88 = arith.constant 0 : index
    %72 = vector.load %arg6[%c0_85, %c2_86, %c0_87, %c0_88] : memref<3x18x16x3xbf16, #tpu.memory_space<vmem>>, vector<1x16x16x3xbf16>
    %73 = vector.shape_cast %72 : vector<1x16x16x3xbf16> to vector<16x16x3xbf16>
    %74 = vector.shape_cast %73 : vector<16x16x3xbf16> to vector<256x3xbf16>
    %c6 = arith.constant 6 : index
    %c0_89 = arith.constant 0 : index
    %c0_90 = arith.constant 0 : index
    %75 = vector.load %arg2[%c6, %c0_89, %c0_90] : memref<9x3x64xbf16, #tpu.memory_space<vmem>>, vector<1x3x64xbf16>
    %76 = vector.shape_cast %75 : vector<1x3x64xbf16> to vector<3x64xbf16>
    %cst_91 = arith.constant dense<0.000000e+00> : vector<256x64xf32>
    %77 = tpu.matmul %74, %76, %cst_91 {dimension_numbers = #tpu.dot_dimension_numbers<[1], [0], [0], [1], [0, 0, 1, 1], [], []>} : vector<256x3xbf16>, vector<3x64xbf16>, vector<256x64xf32> -> vector<256x64xf32>
    %c0_92 = arith.constant 0 : index
    %c0_93 = arith.constant 0 : index
    %78 = vector.load %arg7[%c0_92, %c0_93] : memref<256x64xf32, #tpu.memory_space<vmem>>, vector<256x64xf32>
    %79 = arith.addf %78, %77 : vector<256x64xf32>
    %c0_94 = arith.constant 0 : index
    %c0_95 = arith.constant 0 : index
    %80 = vector.load %arg7[%c0_94, %c0_95] : memref<256x64xf32, #tpu.memory_space<vmem>>, vector<256x64xf32>
    tpu.vector_store %arg7[%c0_94, %c0_95], %79 {strides = array<i32>} : memref<256x64xf32, #tpu.memory_space<vmem>>, vector<256x64xf32>,
    %c1_96 = arith.constant 1 : index
    %c2_97 = arith.constant 2 : index
    %c0_98 = arith.constant 0 : index
    %c0_99 = arith.constant 0 : index
    %81 = vector.load %arg6[%c1_96, %c2_97, %c0_98, %c0_99] : memref<3x18x16x3xbf16, #tpu.memory_space<vmem>>, vector<1x16x16x3xbf16>
    %82 = vector.shape_cast %81 : vector<1x16x16x3xbf16> to vector<16x16x3xbf16>
    %83 = vector.shape_cast %82 : vector<16x16x3xbf16> to vector<256x3xbf16>
    %c7 = arith.constant 7 : index
    %c0_100 = arith.constant 0 : index
    %c0_101 = arith.constant 0 : index
    %84 = vector.load %arg2[%c7, %c0_100, %c0_101] : memref<9x3x64xbf16, #tpu.memory_space<vmem>>, vector<1x3x64xbf16>
    %85 = vector.shape_cast %84 : vector<1x3x64xbf16> to vector<3x64xbf16>
    %cst_102 = arith.constant dense<0.000000e+00> : vector<256x64xf32>
    %86 = tpu.matmul %83, %85, %cst_102 {dimension_numbers = #tpu.dot_dimension_numbers<[1], [0], [0], [1], [0, 0, 1, 1], [], []>} : vector<256x3xbf16>, vector<3x64xbf16>, vector<256x64xf32> -> vector<256x64xf32>
    %c0_103 = arith.constant 0 : index
    %c0_104 = arith.constant 0 : index
    %87 = vector.load %arg7[%c0_103, %c0_104] : memref<256x64xf32, #tpu.memory_space<vmem>>, vector<256x64xf32>
    %88 = arith.addf %87, %86 : vector<256x64xf32>
    %c0_105 = arith.constant 0 : index
    %c0_106 = arith.constant 0 : index
    %89 = vector.load %arg7[%c0_105, %c0_106] : memref<256x64xf32, #tpu.memory_space<vmem>>, vector<256x64xf32>
    tpu.vector_store %arg7[%c0_105, %c0_106], %88 {strides = array<i32>} : memref<256x64xf32, #tpu.memory_space<vmem>>, vector<256x64xf32>,
    %c2_107 = arith.constant 2 : index
    %c2_108 = arith.constant 2 : index
    %c0_109 = arith.constant 0 : index
    %c0_110 = arith.constant 0 : index
    %90 = vector.load %arg6[%c2_107, %c2_108, %c0_109, %c0_110] : memref<3x18x16x3xbf16, #tpu.memory_space<vmem>>, vector<1x16x16x3xbf16>
    %91 = vector.shape_cast %90 : vector<1x16x16x3xbf16> to vector<16x16x3xbf16>
    %92 = vector.shape_cast %91 : vector<16x16x3xbf16> to vector<256x3xbf16>
    %c8 = arith.constant 8 : index
    %c0_111 = arith.constant 0 : index
    %c0_112 = arith.constant 0 : index
    %93 = vector.load %arg2[%c8, %c0_111, %c0_112] : memref<9x3x64xbf16, #tpu.memory_space<vmem>>, vector<1x3x64xbf16>
    %94 = vector.shape_cast %93 : vector<1x3x64xbf16> to vector<3x64xbf16>
    %cst_113 = arith.constant dense<0.000000e+00> : vector<256x64xf32>
    %95 = tpu.matmul %92, %94, %cst_113 {dimension_numbers = #tpu.dot_dimension_numbers<[1], [0], [0], [1], [0, 0, 1, 1], [], []>} : vector<256x3xbf16>, vector<3x64xbf16>, vector<256x64xf32> -> vector<256x64xf32>
    %c0_114 = arith.constant 0 : index
    %c0_115 = arith.constant 0 : index
    %96 = vector.load %arg7[%c0_114, %c0_115] : memref<256x64xf32, #tpu.memory_space<vmem>>, vector<256x64xf32>
    %97 = arith.addf %96, %95 : vector<256x64xf32>
    %c0_116 = arith.constant 0 : index
    %c0_117 = arith.constant 0 : index
    %98 = vector.load %arg7[%c0_116, %c0_117] : memref<256x64xf32, #tpu.memory_space<vmem>>, vector<256x64xf32>
    tpu.vector_store %arg7[%c0_116, %c0_117], %97 {strides = array<i32>} : memref<256x64xf32, #tpu.memory_space<vmem>>, vector<256x64xf32>,
    %c0_118 = arith.constant 0 : index
    %c0_119 = arith.constant 0 : index
    %99 = vector.load %arg7[%c0_118, %c0_119] : memref<256x64xf32, #tpu.memory_space<vmem>>, vector<256x64xf32>
    %c0_120 = arith.constant 0 : index
    %c0_121 = arith.constant 0 : index
    %100 = vector.load %arg3[%c0_120, %c0_121] : memref<1x64xf32, #tpu.memory_space<vmem>>, vector<1x64xf32>
    %101 = vector.broadcast %100 : vector<1x64xf32> to vector<256x64xf32>
    %102 = arith.addf %99, %101 : vector<256x64xf32>
    %cst_122 = arith.constant 0.000000e+00 : f32
    %103 = vector.broadcast %cst_122 : f32 to vector<256x64xf32>
    %104 = arith.maximumf %102, %103 : vector<256x64xf32>
    %105 = vector.shape_cast %104 : vector<256x64xf32> to vector<16x16x64xf32>
    %c0_123 = arith.constant 0 : index
    %c0_124 = arith.constant 0 : index
    %c0_125 = arith.constant 0 : index
    %c0_126 = arith.constant 0 : index
    %106 = vector.load %arg5[%c0_123, %c0_124, %c0_125, %c0_126] : memref<1x16x16x64xf32, #tpu.memory_space<vmem>>, vector<1x16x16x64xf32>
    %107 = vector.shape_cast %106 : vector<1x16x16x64xf32> to vector<16x16x64xf32>
    %108 = vector.shape_cast %105 : vector<16x16x64xf32> to vector<1x16x16x64xf32>
    tpu.vector_store %arg5[%c0_123, %c0_124, %c0_125, %c0_126], %108 {strides = array<i32>} : memref<1x16x16x64xf32, #tpu.memory_space<vmem>>, vector<1x16x16x64xf32>,
    return
  }
  func.func @transform_0(%arg0: i32) -> (i32, i32, i32, i32) {
    %c0_i32 = arith.constant 0 : i32
    %c0_i32_0 = arith.constant 0 : i32
    %c0_i32_1 = arith.constant 0 : i32
    %c0_i32_2 = arith.constant 0 : i32
    return %arg0, %c0_i32, %c0_i32_0, %c0_i32_1 : i32, i32, i32, i32
  }
  func.func @transform_1(%arg0: i32) -> (i32, i32, i32) {
    %c0_i32 = arith.constant 0 : i32
    %c0_i32_0 = arith.constant 0 : i32
    %c0_i32_1 = arith.constant 0 : i32
    %c0_i32_2 = arith.constant 0 : i32
    return %c0_i32, %c0_i32_0, %c0_i32_1 : i32, i32, i32
  }
  func.func @transform_2(%arg0: i32) -> (i32, i32) {
    %c0_i32 = arith.constant 0 : i32
    %c0_i32_0 = arith.constant 0 : i32
    %c0_i32_1 = arith.constant 0 : i32
    return %c0_i32, %c0_i32_0 : i32, i32
  }
  func.func @transform_3(%arg0: i32) -> (i32, i32) {
    %c0_i32 = arith.constant 0 : i32
    %c0_i32_0 = arith.constant 0 : i32
    %c0_i32_1 = arith.constant 0 : i32
    return %c0_i32, %c0_i32_0 : i32, i32
  }
  func.func @transform_4(%arg0: i32) -> (i32, i32, i32, i32) {
    %c0_i32 = arith.constant 0 : i32
    %c0_i32_0 = arith.constant 0 : i32
    %c0_i32_1 = arith.constant 0 : i32
    %c0_i32_2 = arith.constant 0 : i32
    return %arg0, %c0_i32, %c0_i32_0, %c0_i32_1 : i32, i32, i32, i32
  }
}

module attributes {stable_mosaic.version = 11 : i64} {
  func.func @_conv3x3_bias_act_kernel(%arg0: i32, %arg1: memref<1x16x16x3xf32, #tpu.memory_space<vmem>>, %arg2: memref<9x3x64xbf16, #tpu.memory_space<vmem>>, %arg3: memref<1x64xf32, #tpu.memory_space<vmem>>, %arg4: memref<1x3xf32, #tpu.memory_space<vmem>>, %arg5: memref<1x16x16x64xf32, #tpu.memory_space<vmem>>, %arg6: memref<3x18x16x3xbf16, #tpu.memory_space<vmem>>, %arg7: memref<256x64xf32, #tpu.memory_space<vmem>>) attributes {dimension_semantics = [#tpu.dimension_semantics<parallel>], iteration_bounds = array<i64: 2>, scalar_prefetch = 0 : i64, scratch_operands = 2 : i64, tpu.core_type = #tpu.core_type<tc>, window_params = [{transform_indices = @transform_0, window_bounds = array<i64: 1, 16, 16, 3>}, {pipeline_mode = #tpu.pipeline_mode<synchronous>, transform_indices = @transform_1, window_bounds = array<i64: 9, 3, 64>}, {pipeline_mode = #tpu.pipeline_mode<synchronous>, transform_indices = @transform_2, window_bounds = array<i64: 1, 64>}, {pipeline_mode = #tpu.pipeline_mode<synchronous>, transform_indices = @transform_3, window_bounds = array<i64: 1, 3>}, {transform_indices = @transform_4, window_bounds = array<i64: 1, 16, 16, 64>}]} {
    %c0 = arith.constant 0 : index
    %c0_0 = arith.constant 0 : index
    %0 = vector.load %arg4[%c0, %c0_0] : memref<1x3xf32, #tpu.memory_space<vmem>>, vector<1x3xf32>
    %1 = arith.truncf %0 : vector<1x3xf32> to vector<1x3xbf16>
    %2 = vector.shape_cast %1 : vector<1x3xbf16> to vector<1x1x1x3xbf16>
    %3 = vector.shape_cast %2 : vector<1x1x1x3xbf16> to vector<1x1x1x3xbf16>
    %4 = vector.broadcast %3 : vector<1x1x1x3xbf16> to vector<3x18x16x3xbf16>
    %c0_1 = arith.constant 0 : index
    %c0_2 = arith.constant 0 : index
    %c0_3 = arith.constant 0 : index
    %c0_4 = arith.constant 0 : index
    %5 = vector.load %arg6[%c0_1, %c0_2, %c0_3, %c0_4] : memref<3x18x16x3xbf16, #tpu.memory_space<vmem>>, vector<3x18x16x3xbf16>
    tpu.vector_store %arg6[%c0_1, %c0_2, %c0_3, %c0_4], %4 {strides = array<i32>} : memref<3x18x16x3xbf16, #tpu.memory_space<vmem>>, vector<3x18x16x3xbf16>,
    %c0_5 = arith.constant 0 : index
    %c0_6 = arith.constant 0 : index
    %c0_7 = arith.constant 0 : index
    %c0_8 = arith.constant 0 : index
    %6 = vector.load %arg1[%c0_5, %c0_6, %c0_7, %c0_8] : memref<1x16x16x3xf32, #tpu.memory_space<vmem>>, vector<1x16x16x3xf32>
    %7 = vector.shape_cast %6 : vector<1x16x16x3xf32> to vector<16x16x3xf32>
    %8 = arith.truncf %7 : vector<16x16x3xf32> to vector<16x16x3xbf16>
    %c1 = arith.constant 1 : index
    %c1_9 = arith.constant 1 : index
    %c0_10 = arith.constant 0 : index
    %c0_11 = arith.constant 0 : index
    %9 = vector.load %arg6[%c1, %c1_9, %c0_10, %c0_11] : memref<3x18x16x3xbf16, #tpu.memory_space<vmem>>, vector<1x16x16x3xbf16>
    %10 = vector.shape_cast %9 : vector<1x16x16x3xbf16> to vector<16x16x3xbf16>
    %11 = vector.shape_cast %8 : vector<16x16x3xbf16> to vector<1x16x16x3xbf16>
    tpu.vector_store %arg6[%c1, %c1_9, %c0_10, %c0_11], %11 {strides = array<i32>} : memref<3x18x16x3xbf16, #tpu.memory_space<vmem>>, vector<1x16x16x3xbf16>,
    %12 = vector.extract_strided_slice %8 {offsets = [0, 0, 0], sizes = [16, 15, 3], strides = [1, 1, 1]} : vector<16x16x3xbf16> to vector<16x15x3xbf16>
    %c0_12 = arith.constant 0 : index
    %c1_13 = arith.constant 1 : index
    %c1_14 = arith.constant 1 : index
    %c0_15 = arith.constant 0 : index
    %13 = vector.load %arg6[%c0_12, %c1_13, %c1_14, %c0_15] : memref<3x18x16x3xbf16, #tpu.memory_space<vmem>>, vector<1x16x15x3xbf16>
    %14 = vector.shape_cast %13 : vector<1x16x15x3xbf16> to vector<16x15x3xbf16>
    %15 = vector.shape_cast %12 : vector<16x15x3xbf16> to vector<1x16x15x3xbf16>
    tpu.vector_store %arg6[%c0_12, %c1_13, %c1_14, %c0_15], %15 {strides = array<i32>} : memref<3x18x16x3xbf16, #tpu.memory_space<vmem>>, vector<1x16x15x3xbf16>,
    %16 = vector.extract_strided_slice %8 {offsets = [0, 1, 0], sizes = [16, 15, 3], strides = [1, 1, 1]} : vector<16x16x3xbf16> to vector<16x15x3xbf16>
    %c2 = arith.constant 2 : index
    %c1_16 = arith.constant 1 : index
    %c0_17 = arith.constant 0 : index
    %c0_18 = arith.constant 0 : index
    %17 = vector.load %arg6[%c2, %c1_16, %c0_17, %c0_18] : memref<3x18x16x3xbf16, #tpu.memory_space<vmem>>, vector<1x16x15x3xbf16>
    %18 = vector.shape_cast %17 : vector<1x16x15x3xbf16> to vector<16x15x3xbf16>
    %19 = vector.shape_cast %16 : vector<16x15x3xbf16> to vector<1x16x15x3xbf16>
    tpu.vector_store %arg6[%c2, %c1_16, %c0_17, %c0_18], %19 {strides = array<i32>} : memref<3x18x16x3xbf16, #tpu.memory_space<vmem>>, vector<1x16x15x3xbf16>,
    %c0_19 = arith.constant 0 : index
    %c0_20 = arith.constant 0 : index
    %c0_21 = arith.constant 0 : index
    %c0_22 = arith.constant 0 : index
    %20 = vector.load %arg6[%c0_19, %c0_20, %c0_21, %c0_22] : memref<3x18x16x3xbf16, #tpu.memory_space<vmem>>, vector<1x16x16x3xbf16>
    %21 = vector.shape_cast %20 : vector<1x16x16x3xbf16> to vector<16x16x3xbf16>
    %22 = vector.shape_cast %21 : vector<16x16x3xbf16> to vector<256x3xbf16>
    %c0_23 = arith.constant 0 : index
    %c0_24 = arith.constant 0 : index
    %c0_25 = arith.constant 0 : index
    %23 = vector.load %arg2[%c0_23, %c0_24, %c0_25] : memref<9x3x64xbf16, #tpu.memory_space<vmem>>, vector<1x3x64xbf16>
    %24 = vector.shape_cast %23 : vector<1x3x64xbf16> to vector<3x64xbf16>
    %cst = arith.constant dense<0.000000e+00> : vector<256x64xf32>
    %25 = tpu.matmul %22, %24, %cst {dimension_numbers = #tpu.dot_dimension_numbers<[1], [0], [0], [1], [0, 0, 1, 1], [], []>} : vector<256x3xbf16>, vector<3x64xbf16>, vector<256x64xf32> -> vector<256x64xf32>
    %c0_26 = arith.constant 0 : index
    %c0_27 = arith.constant 0 : index
    %26 = vector.load %arg7[%c0_26, %c0_27] : memref<256x64xf32, #tpu.memory_space<vmem>>, vector<256x64xf32>
    tpu.vector_store %arg7[%c0_26, %c0_27], %25 {strides = array<i32>} : memref<256x64xf32, #tpu.memory_space<vmem>>, vector<256x64xf32>,
    %c1_28 = arith.constant 1 : index
    %c0_29 = arith.constant 0 : index
    %c0_30 = arith.constant 0 : index
    %c0_31 = arith.constant 0 : index
    %27 = vector.load %arg6[%c1_28, %c0_29, %c0_30, %c0_31] : memref<3x18x16x3xbf16, #tpu.memory_space<vmem>>, vector<1x16x16x3xbf16>
    %28 = vector.shape_cast %27 : vector<1x16x16x3xbf16> to vector<16x16x3xbf16>
    %29 = vector.shape_cast %28 : vector<16x16x3xbf16> to vector<256x3xbf16>
    %c1_32 = arith.constant 1 : index
    %c0_33 = arith.constant 0 : index
    %c0_34 = arith.constant 0 : index
    %30 = vector.load %arg2[%c1_32, %c0_33, %c0_34] : memref<9x3x64xbf16, #tpu.memory_space<vmem>>, vector<1x3x64xbf16>
    %31 = vector.shape_cast %30 : vector<1x3x64xbf16> to vector<3x64xbf16>
    %cst_35 = arith.constant dense<0.000000e+00> : vector<256x64xf32>
    %32 = tpu.matmul %29, %31, %cst_35 {dimension_numbers = #tpu.dot_dimension_numbers<[1], [0], [0], [1], [0, 0, 1, 1], [], []>} : vector<256x3xbf16>, vector<3x64xbf16>, vector<256x64xf32> -> vector<256x64xf32>
    %c0_36 = arith.constant 0 : index
    %c0_37 = arith.constant 0 : index
    %33 = vector.load %arg7[%c0_36, %c0_37] : memref<256x64xf32, #tpu.memory_space<vmem>>, vector<256x64xf32>
    %34 = arith.addf %33, %32 : vector<256x64xf32>
    %c0_38 = arith.constant 0 : index
    %c0_39 = arith.constant 0 : index
    %35 = vector.load %arg7[%c0_38, %c0_39] : memref<256x64xf32, #tpu.memory_space<vmem>>, vector<256x64xf32>
    tpu.vector_store %arg7[%c0_38, %c0_39], %34 {strides = array<i32>} : memref<256x64xf32, #tpu.memory_space<vmem>>, vector<256x64xf32>,
    %c2_40 = arith.constant 2 : index
    %c0_41 = arith.constant 0 : index
    %c0_42 = arith.constant 0 : index
    %c0_43 = arith.constant 0 : index
    %36 = vector.load %arg6[%c2_40, %c0_41, %c0_42, %c0_43] : memref<3x18x16x3xbf16, #tpu.memory_space<vmem>>, vector<1x16x16x3xbf16>
    %37 = vector.shape_cast %36 : vector<1x16x16x3xbf16> to vector<16x16x3xbf16>
    %38 = vector.shape_cast %37 : vector<16x16x3xbf16> to vector<256x3xbf16>
    %c2_44 = arith.constant 2 : index
    %c0_45 = arith.constant 0 : index
    %c0_46 = arith.constant 0 : index
    %39 = vector.load %arg2[%c2_44, %c0_45, %c0_46] : memref<9x3x64xbf16, #tpu.memory_space<vmem>>, vector<1x3x64xbf16>
    %40 = vector.shape_cast %39 : vector<1x3x64xbf16> to vector<3x64xbf16>
    %cst_47 = arith.constant dense<0.000000e+00> : vector<256x64xf32>
    %41 = tpu.matmul %38, %40, %cst_47 {dimension_numbers = #tpu.dot_dimension_numbers<[1], [0], [0], [1], [0, 0, 1, 1], [], []>} : vector<256x3xbf16>, vector<3x64xbf16>, vector<256x64xf32> -> vector<256x64xf32>
    %c0_48 = arith.constant 0 : index
    %c0_49 = arith.constant 0 : index
    %42 = vector.load %arg7[%c0_48, %c0_49] : memref<256x64xf32, #tpu.memory_space<vmem>>, vector<256x64xf32>
    %43 = arith.addf %42, %41 : vector<256x64xf32>
    %c0_50 = arith.constant 0 : index
    %c0_51 = arith.constant 0 : index
    %44 = vector.load %arg7[%c0_50, %c0_51] : memref<256x64xf32, #tpu.memory_space<vmem>>, vector<256x64xf32>
    tpu.vector_store %arg7[%c0_50, %c0_51], %43 {strides = array<i32>} : memref<256x64xf32, #tpu.memory_space<vmem>>, vector<256x64xf32>,
    %c0_52 = arith.constant 0 : index
    %c1_53 = arith.constant 1 : index
    %c0_54 = arith.constant 0 : index
    %c0_55 = arith.constant 0 : index
    %45 = vector.load %arg6[%c0_52, %c1_53, %c0_54, %c0_55] : memref<3x18x16x3xbf16, #tpu.memory_space<vmem>>, vector<1x16x16x3xbf16>
    %46 = vector.shape_cast %45 : vector<1x16x16x3xbf16> to vector<16x16x3xbf16>
    %47 = vector.shape_cast %46 : vector<16x16x3xbf16> to vector<256x3xbf16>
    %c3 = arith.constant 3 : index
    %c0_56 = arith.constant 0 : index
    %c0_57 = arith.constant 0 : index
    %48 = vector.load %arg2[%c3, %c0_56, %c0_57] : memref<9x3x64xbf16, #tpu.memory_space<vmem>>, vector<1x3x64xbf16>
    %49 = vector.shape_cast %48 : vector<1x3x64xbf16> to vector<3x64xbf16>
    %cst_58 = arith.constant dense<0.000000e+00> : vector<256x64xf32>
    %50 = tpu.matmul %47, %49, %cst_58 {dimension_numbers = #tpu.dot_dimension_numbers<[1], [0], [0], [1], [0, 0, 1, 1], [], []>} : vector<256x3xbf16>, vector<3x64xbf16>, vector<256x64xf32> -> vector<256x64xf32>
    %c0_59 = arith.constant 0 : index
    %c0_60 = arith.constant 0 : index
    %51 = vector.load %arg7[%c0_59, %c0_60] : memref<256x64xf32, #tpu.memory_space<vmem>>, vector<256x64xf32>
    %52 = arith.addf %51, %50 : vector<256x64xf32>
    %c0_61 = arith.constant 0 : index
    %c0_62 = arith.constant 0 : index
    %53 = vector.load %arg7[%c0_61, %c0_62] : memref<256x64xf32, #tpu.memory_space<vmem>>, vector<256x64xf32>
    tpu.vector_store %arg7[%c0_61, %c0_62], %52 {strides = array<i32>} : memref<256x64xf32, #tpu.memory_space<vmem>>, vector<256x64xf32>,
    %c1_63 = arith.constant 1 : index
    %c1_64 = arith.constant 1 : index
    %c0_65 = arith.constant 0 : index
    %c0_66 = arith.constant 0 : index
    %54 = vector.load %arg6[%c1_63, %c1_64, %c0_65, %c0_66] : memref<3x18x16x3xbf16, #tpu.memory_space<vmem>>, vector<1x16x16x3xbf16>
    %55 = vector.shape_cast %54 : vector<1x16x16x3xbf16> to vector<16x16x3xbf16>
    %56 = vector.shape_cast %55 : vector<16x16x3xbf16> to vector<256x3xbf16>
    %c4 = arith.constant 4 : index
    %c0_67 = arith.constant 0 : index
    %c0_68 = arith.constant 0 : index
    %57 = vector.load %arg2[%c4, %c0_67, %c0_68] : memref<9x3x64xbf16, #tpu.memory_space<vmem>>, vector<1x3x64xbf16>
    %58 = vector.shape_cast %57 : vector<1x3x64xbf16> to vector<3x64xbf16>
    %cst_69 = arith.constant dense<0.000000e+00> : vector<256x64xf32>
    %59 = tpu.matmul %56, %58, %cst_69 {dimension_numbers = #tpu.dot_dimension_numbers<[1], [0], [0], [1], [0, 0, 1, 1], [], []>} : vector<256x3xbf16>, vector<3x64xbf16>, vector<256x64xf32> -> vector<256x64xf32>
    %c0_70 = arith.constant 0 : index
    %c0_71 = arith.constant 0 : index
    %60 = vector.load %arg7[%c0_70, %c0_71] : memref<256x64xf32, #tpu.memory_space<vmem>>, vector<256x64xf32>
    %61 = arith.addf %60, %59 : vector<256x64xf32>
    %c0_72 = arith.constant 0 : index
    %c0_73 = arith.constant 0 : index
    %62 = vector.load %arg7[%c0_72, %c0_73] : memref<256x64xf32, #tpu.memory_space<vmem>>, vector<256x64xf32>
    tpu.vector_store %arg7[%c0_72, %c0_73], %61 {strides = array<i32>} : memref<256x64xf32, #tpu.memory_space<vmem>>, vector<256x64xf32>,
    %c2_74 = arith.constant 2 : index
    %c1_75 = arith.constant 1 : index
    %c0_76 = arith.constant 0 : index
    %c0_77 = arith.constant 0 : index
    %63 = vector.load %arg6[%c2_74, %c1_75, %c0_76, %c0_77] : memref<3x18x16x3xbf16, #tpu.memory_space<vmem>>, vector<1x16x16x3xbf16>
    %64 = vector.shape_cast %63 : vector<1x16x16x3xbf16> to vector<16x16x3xbf16>
    %65 = vector.shape_cast %64 : vector<16x16x3xbf16> to vector<256x3xbf16>
    %c5 = arith.constant 5 : index
    %c0_78 = arith.constant 0 : index
    %c0_79 = arith.constant 0 : index
    %66 = vector.load %arg2[%c5, %c0_78, %c0_79] : memref<9x3x64xbf16, #tpu.memory_space<vmem>>, vector<1x3x64xbf16>
    %67 = vector.shape_cast %66 : vector<1x3x64xbf16> to vector<3x64xbf16>
    %cst_80 = arith.constant dense<0.000000e+00> : vector<256x64xf32>
    %68 = tpu.matmul %65, %67, %cst_80 {dimension_numbers = #tpu.dot_dimension_numbers<[1], [0], [0], [1], [0, 0, 1, 1], [], []>} : vector<256x3xbf16>, vector<3x64xbf16>, vector<256x64xf32> -> vector<256x64xf32>
    %c0_81 = arith.constant 0 : index
    %c0_82 = arith.constant 0 : index
    %69 = vector.load %arg7[%c0_81, %c0_82] : memref<256x64xf32, #tpu.memory_space<vmem>>, vector<256x64xf32>
    %70 = arith.addf %69, %68 : vector<256x64xf32>
    %c0_83 = arith.constant 0 : index
    %c0_84 = arith.constant 0 : index
    %71 = vector.load %arg7[%c0_83, %c0_84] : memref<256x64xf32, #tpu.memory_space<vmem>>, vector<256x64xf32>
    tpu.vector_store %arg7[%c0_83, %c0_84], %70 {strides = array<i32>} : memref<256x64xf32, #tpu.memory_space<vmem>>, vector<256x64xf32>,
    %c0_85 = arith.constant 0 : index
    %c2_86 = arith.constant 2 : index
    %c0_87 = arith.constant 0 : index
    %c0_88 = arith.constant 0 : index
    %72 = vector.load %arg6[%c0_85, %c2_86, %c0_87, %c0_88] : memref<3x18x16x3xbf16, #tpu.memory_space<vmem>>, vector<1x16x16x3xbf16>
    %73 = vector.shape_cast %72 : vector<1x16x16x3xbf16> to vector<16x16x3xbf16>
    %74 = vector.shape_cast %73 : vector<16x16x3xbf16> to vector<256x3xbf16>
    %c6 = arith.constant 6 : index
    %c0_89 = arith.constant 0 : index
    %c0_90 = arith.constant 0 : index
    %75 = vector.load %arg2[%c6, %c0_89, %c0_90] : memref<9x3x64xbf16, #tpu.memory_space<vmem>>, vector<1x3x64xbf16>
    %76 = vector.shape_cast %75 : vector<1x3x64xbf16> to vector<3x64xbf16>
    %cst_91 = arith.constant dense<0.000000e+00> : vector<256x64xf32>
    %77 = tpu.matmul %74, %76, %cst_91 {dimension_numbers = #tpu.dot_dimension_numbers<[1], [0], [0], [1], [0, 0, 1, 1], [], []>} : vector<256x3xbf16>, vector<3x64xbf16>, vector<256x64xf32> -> vector<256x64xf32>
    %c0_92 = arith.constant 0 : index
    %c0_93 = arith.constant 0 : index
    %78 = vector.load %arg7[%c0_92, %c0_93] : memref<256x64xf32, #tpu.memory_space<vmem>>, vector<256x64xf32>
    %79 = arith.addf %78, %77 : vector<256x64xf32>
    %c0_94 = arith.constant 0 : index
    %c0_95 = arith.constant 0 : index
    %80 = vector.load %arg7[%c0_94, %c0_95] : memref<256x64xf32, #tpu.memory_space<vmem>>, vector<256x64xf32>
    tpu.vector_store %arg7[%c0_94, %c0_95], %79 {strides = array<i32>} : memref<256x64xf32, #tpu.memory_space<vmem>>, vector<256x64xf32>,
    %c1_96 = arith.constant 1 : index
    %c2_97 = arith.constant 2 : index
    %c0_98 = arith.constant 0 : index
    %c0_99 = arith.constant 0 : index
    %81 = vector.load %arg6[%c1_96, %c2_97, %c0_98, %c0_99] : memref<3x18x16x3xbf16, #tpu.memory_space<vmem>>, vector<1x16x16x3xbf16>
    %82 = vector.shape_cast %81 : vector<1x16x16x3xbf16> to vector<16x16x3xbf16>
    %83 = vector.shape_cast %82 : vector<16x16x3xbf16> to vector<256x3xbf16>
    %c7 = arith.constant 7 : index
    %c0_100 = arith.constant 0 : index
    %c0_101 = arith.constant 0 : index
    %84 = vector.load %arg2[%c7, %c0_100, %c0_101] : memref<9x3x64xbf16, #tpu.memory_space<vmem>>, vector<1x3x64xbf16>
    %85 = vector.shape_cast %84 : vector<1x3x64xbf16> to vector<3x64xbf16>
    %cst_102 = arith.constant dense<0.000000e+00> : vector<256x64xf32>
    %86 = tpu.matmul %83, %85, %cst_102 {dimension_numbers = #tpu.dot_dimension_numbers<[1], [0], [0], [1], [0, 0, 1, 1], [], []>} : vector<256x3xbf16>, vector<3x64xbf16>, vector<256x64xf32> -> vector<256x64xf32>
    %c0_103 = arith.constant 0 : index
    %c0_104 = arith.constant 0 : index
    %87 = vector.load %arg7[%c0_103, %c0_104] : memref<256x64xf32, #tpu.memory_space<vmem>>, vector<256x64xf32>
    %88 = arith.addf %87, %86 : vector<256x64xf32>
    %c0_105 = arith.constant 0 : index
    %c0_106 = arith.constant 0 : index
    %89 = vector.load %arg7[%c0_105, %c0_106] : memref<256x64xf32, #tpu.memory_space<vmem>>, vector<256x64xf32>
    tpu.vector_store %arg7[%c0_105, %c0_106], %88 {strides = array<i32>} : memref<256x64xf32, #tpu.memory_space<vmem>>, vector<256x64xf32>,
    %c2_107 = arith.constant 2 : index
    %c2_108 = arith.constant 2 : index
    %c0_109 = arith.constant 0 : index
    %c0_110 = arith.constant 0 : index
    %90 = vector.load %arg6[%c2_107, %c2_108, %c0_109, %c0_110] : memref<3x18x16x3xbf16, #tpu.memory_space<vmem>>, vector<1x16x16x3xbf16>
    %91 = vector.shape_cast %90 : vector<1x16x16x3xbf16> to vector<16x16x3xbf16>
    %92 = vector.shape_cast %91 : vector<16x16x3xbf16> to vector<256x3xbf16>
    %c8 = arith.constant 8 : index
    %c0_111 = arith.constant 0 : index
    %c0_112 = arith.constant 0 : index
    %93 = vector.load %arg2[%c8, %c0_111, %c0_112] : memref<9x3x64xbf16, #tpu.memory_space<vmem>>, vector<1x3x64xbf16>
    %94 = vector.shape_cast %93 : vector<1x3x64xbf16> to vector<3x64xbf16>
    %cst_113 = arith.constant dense<0.000000e+00> : vector<256x64xf32>
    %95 = tpu.matmul %92, %94, %cst_113 {dimension_numbers = #tpu.dot_dimension_numbers<[1], [0], [0], [1], [0, 0, 1, 1], [], []>} : vector<256x3xbf16>, vector<3x64xbf16>, vector<256x64xf32> -> vector<256x64xf32>
    %c0_114 = arith.constant 0 : index
    %c0_115 = arith.constant 0 : index
    %96 = vector.load %arg7[%c0_114, %c0_115] : memref<256x64xf32, #tpu.memory_space<vmem>>, vector<256x64xf32>
    %97 = arith.addf %96, %95 : vector<256x64xf32>
    %c0_116 = arith.constant 0 : index
    %c0_117 = arith.constant 0 : index
    %98 = vector.load %arg7[%c0_116, %c0_117] : memref<256x64xf32, #tpu.memory_space<vmem>>, vector<256x64xf32>
    tpu.vector_store %arg7[%c0_116, %c0_117], %97 {strides = array<i32>} : memref<256x64xf32, #tpu.memory_space<vmem>>, vector<256x64xf32>,
    %c0_118 = arith.constant 0 : index
    %c0_119 = arith.constant 0 : index
    %99 = vector.load %arg7[%c0_118, %c0_119] : memref<256x64xf32, #tpu.memory_space<vmem>>, vector<256x64xf32>
    %c0_120 = arith.constant 0 : index
    %c0_121 = arith.constant 0 : index
    %100 = vector.load %arg3[%c0_120, %c0_121] : memref<1x64xf32, #tpu.memory_space<vmem>>, vector<1x64xf32>
    %101 = vector.broadcast %100 : vector<1x64xf32> to vector<256x64xf32>
    %102 = arith.addf %99, %101 : vector<256x64xf32>
    %cst_122 = arith.constant 0.000000e+00 : f32
    %103 = vector.broadcast %cst_122 : f32 to vector<256x64xf32>
    %104 = arith.maximumf %102, %103 : vector<256x64xf32>
    %105 = vector.shape_cast %104 : vector<256x64xf32> to vector<16x16x64xf32>
    %c0_123 = arith.constant 0 : index
    %c0_124 = arith.constant 0 : index
    %c0_125 = arith.constant 0 : index
    %c0_126 = arith.constant 0 : index
    %106 = vector.load %arg5[%c0_123, %c0_124, %c0_125, %c0_126] : memref<1x16x16x64xf32, #tpu.memory_space<vmem>>, vector<1x16x16x64xf32>
    %107 = vector.shape_cast %106 : vector<1x16x16x64xf32> to vector<16x16x64xf32>
    %108 = vector.shape_cast %105 : vector<16x16x64xf32> to vector<1x16x16x64xf32>
    tpu.vector_store %arg5[%c0_123, %c0_124, %c0_125, %c0_126], %108 {strides = array<i32>} : memref<1x16x16x64xf32, #tpu.memory_space<vmem>>, vector<1x16x16x64xf32>,
    return
  }
  func.func @transform_0(%arg0: i32) -> (i32, i32, i32, i32) {
    %c0_i32 = arith.constant 0 : i32
    %c0_i32_0 = arith.constant 0 : i32
    %c0_i32_1 = arith.constant 0 : i32
    %c0_i32_2 = arith.constant 0 : i32
    return %arg0, %c0_i32, %c0_i32_0, %c0_i32_1 : i32, i32, i32, i32
  }
  func.func @transform_1(%arg0: i32) -> (i32, i32, i32) {
    %c0_i32 = arith.constant 0 : i32
    %c0_i32_0 = arith.constant 0 : i32
    %c0_i32_1 = arith.constant 0 : i32
    %c0_i32_2 = arith.constant 0 : i32
    return %c0_i32, %c0_i32_0, %c0_i32_1 : i32, i32, i32
  }
  func.func @transform_2(%arg0: i32) -> (i32, i32) {
    %c0_i32 = arith.constant 0 : i32
    %c0_i32_0 = arith.constant 0 : i32
    %c0_i32_1 = arith.constant 0 : i32
    return %c0_i32, %c0_i32_0 : i32, i32
  }
  func.func @transform_3(%arg0: i32) -> (i32, i32) {
    %c0_i32 = arith.constant 0 : i32
    %c0_i32_0 = arith.constant 0 : i32
    %c0_i32_1 = arith.constant 0 : i32
    return %c0_i32, %c0_i32_0 : i32, i32
  }
  func.func @transform_4(%arg0: i32) -> (i32, i32, i32, i32) {
    %c0_i32 = arith.constant 0 : i32
    %c0_i32_0 = arith.constant 0 : i32
    %c0_i32_1 = arith.constant 0 : i32
    %c0_i32_2 = arith.constant 0 : i32
    return %arg0, %c0_i32, %c0_i32_0, %c0_i32_1 : i32, i32, i32, i32
  }
}

</mosaic_0001>

<bundles_post_ra>
// kernel: tpu_custom_call.1
= control target key start
LH: loop header
LB: loop body
LE: loop exit
PB: predicated region body
PF: predicated region fallthrough
CT: control target
= control target key end

     0   :  { %9 = vsyncpa [#allocation5], 0  ;;  %s5907_s0 = inlined_call_operand.vmem [shape: f32[2,16,16,3], index: 0, kind: input, shape index: {}]   ;;  %s5908_s1 = inlined_call_operand.vmem [shape: bf16[9,3,64], index: 1, kind: input, shape index: {}]   ;;  %s5909_s2 = inlined_call_operand.vmem [shape: f32[1,64], index: 2, kind: input, shape index: {}]   ;;  %s5910_s3 = inlined_call_operand.vmem [shape: f32[1,3], index: 3, kind: input, shape index: {}]   ;;  %s5911_s4 = inlined_call_operand.hbm [shape: f32[2,16,16,64], index: 4, kind: output, shape index: {}]  }
   0x1   :  { %11 = vsyncpa [#allocation5 + $0x1], 0  ;;  %s4458_s15 = smov 0   ;;  %s4460_s16 = smov 0  }
   0x2   :  { %s4462_s17 = smov 0   ;;  %s4464_s18 = smov 0  }
   0x3 LB: > { %s4479_s19 = sadd.s32 4294967295, %s4427_s18   ;;  %s3695_s20 = sadd.s32 4294967294, %s4427_s18   ;;  %s4427_s18 = sphi %s4464_s18, %s5939_s18   ;;  %s4423_s17 = sphi %s4462_s17, %s5938_s17   ;;  %s4419_s16 = sphi %s4460_s16, %s5937_s16   ;;  %s4415_s15 = sphi %s4458_s15, %s5936_s15  }
   0x4   : > { %s4483_s21 = sadd.s32 1, %s4427_s18   ;;  %s113_s22 = sadd.s32 1, %s4423_s17 }
   0x5   : > { %s110_s23 = ssub.s32 %s4427_s18, %s4483_s21  ;;  %p123_p0 = scmp.ne.s32.totalorder %s4423_s17, %s4419_s16 }
   0x6   : > { %p111_p1 = scmp.eq.s32.totalorder %s110_s23, 0  ;;  %p124_p2 = scmp.eq.s32.totalorder %s4479_s19, 1 }
   0x7   : > { %p129_p3 = scmp.ne.s32.totalorder %s4419_s16, %s4415_s15  ;;  %p130_p4 = scmp.eq.s32.totalorder %s3695_s20, 1 }
   0x8   : > { %s4494_s24 = scalar_select %p111_p1, %s4423_s17, %s113_s22  }
   0x9   : > { %p4496_p5 = por %p124_p2, %p123_p0  ;;  %p4500_p6 = por %p130_p4, %p129_p3 }
   0xa   : > { %p3698_p7 = scmp.ge.s32.totalorder %s4427_s18, 1  ;;  %p165_p8 = scmp.lt.s32.totalorder %s4427_s18, 3 }
   0xc   : > { %p166_p9 = pnand %p3698_p7, %p165_p8 }
   0xd   : > { %v621_v0 = vld [vmem:[%s5908_s1] sm:$0x3] (!%p166_p9)  ;;  %vm670_vm0 = vcmask (!%p166_p9), 1040384   ;;  %vm671_vm1 = vcmask (!%p166_p9), 1041408   ;;  %p191_p10 = scmp.lt.s32.totalorder (!%p166_p9), %s4479_s19, 1  ;;  %v202_v1 = vlaneseq (!%p166_p9)  ;;  %v4429_v2 = vmov (!%p166_p9), 65535  }
   0xe   : > { %169 = sbr.rel (%p166_p9) target bundleno = 574 (0x23e), region = 36  ;;  %v672_v3 = vsel (!%p166_p9), %vm670_vm0, 4294967295, %v4429_v2  ;;  %v197_v4 = vld [vmem:[%s5910_s3] sm:$0x1] (!%p166_p9)  ;;  %v3718_v8 = vld [vmem:[%s5908_s1 + $0x2] sm:$0x3] (!%p166_p9) }
   0xf   : > { %v4513_v5 = vsel (!%p166_p9), %vm671_vm1, %v672_v3, 0  ;;  %v198_v6 = vpack.c.bf16 (!%p166_p9), %v197_v4, %v197_v4  ;;  %v203_v7 = vshrl.u32 (!%p166_p9), %v202_v1, 7  ;;  %v3735_v11 = vld [vmem:[%s5908_s1 + $0x4] sm:$0x3] (!%p166_p9)  ;;  %vm206_vm2 = vcmask (!%p166_p9), 23552   ;;  %s188_s9 = sand.u32 (!%p166_p9), 1, %s4419_s16  }
  0x10   : > { %v675_v9 = vand.u32 (!%p166_p9), %v4513_v5, %v621_v0  ;;  %v4521_v10 = vand.u32 (!%p166_p9), %v3718_v8, %v4513_v5  ;;  %v4527_v14 = vand.u32 (!%p166_p9), %v3735_v11, %v4513_v5  ;;  %v4537_v15 = vld [vmem:[%s5908_s1 + $0x6] sm:$0x3] (!%p166_p9)  ;;  %v4542_v16 = vld [vmem:[%s5908_s1 + $0x8] sm:$0x3] (!%p166_p9)  ;;  %vm456_vm3 = vsmask.f32 (!%p166_p9), 7938 }
  0x11   : > { %v200_v12 = vpack.i.b16 (!%p166_p9), %v198_v6, %v198_v6  ;;  %v204_v13 = vsub.s32 (!%p166_p9), 0, %v203_v7  ;;  %v4676_v30 = vand.u32 (!%p166_p9), %v4537_v15, %v4513_v5  ;;  %v4689_v37 = vand.u32 (!%p166_p9), %v4542_v16, %v4513_v5  ;;  %vm4719_vm4 = vmand (!%p166_p9), %vm206_vm2, %vm456_vm3  ;;  %s5649_s12 = sshll.u32 (!%p166_p9), %s188_s9, 8  ;;  %s3861_s14 = sshll.u32 (!%p166_p9), %s4479_s19, 12 }
  0x12   : > { %4321 = vmatprep.subr.bf16.mxu1 (!%p166_p9), %v675_v9  ;;  %4015 = vmatprep.subr.bf16.mxu0 (!%p166_p9), %v675_v9  ;;  %vm555_vm5 = vsmask.f32 (!%p166_p9), 7424  ;;  %vm838_vm7 = vcmask (!%p166_p9), 523264   ;;  %s5854_s27 = scalar_lea.hbm (!%p166_p9), %s5911_s4, %s3861_s14  ;;  %s4430_s29 = smov (!%p166_p9), [#allocation4]  }
  0x13   : > { %4322 = vmatpush3.bf16.msra.mxu1 (!%p166_p9), %v675_v9  ;;  %v4544_v17 = vrot.slane (!%p166_p9), %v200_v12, %v204_v13  ;;  %4016 = vmatpush3.bf16.msra.mxu0 (!%p166_p9), %v675_v9  ;;  %vm4904_vm6 = vmand (!%p166_p9), %vm206_vm2, %vm555_vm5  ;;  %s4369_s30 = sshll.u32 (!%p166_p9), %s4430_s29, 4  ;;  %s4370_s30 = int_to_ptr.vmem [resolvable:$false] %s4369_s30 }
  0x14   : > { %4049 = vmatprep.subr.bf16.mxu1 (!%p166_p9), %v4521_v10  ;;  %4083 = vmatprep.subr.bf16.mxu0 (!%p166_p9), %v4527_v14 }
  0x15   : > { %s192_s5 = scalar_select %p191_p10, %s4479_s19, 1  ;;  %215 = vst.msk [vmem:[#allocation2 + $0x40] sm:$0xff] %vm206_vm2, %v4544_v17  ;;  %207 = vst.msk [vmem:[#allocation2] sm:$0xff] %vm206_vm2, %v4544_v17 }
  0x16   : > { %208 = vst.msk [vmem:[#allocation2 + $0x8] sm:$0xff] %vm206_vm2, %v4544_v17  ;;  %209 = vst.msk [vmem:[#allocation2 + $0x10] sm:$0xff] %vm206_vm2, %v4544_v17  ;;  %s5866_s19 = scalar_lea.sflag [#allocation5], %s188_s9 }
  0x17   : > { %s3860_s10 = sshll.u32 %s192_s5, 8  ;;  %210 = vst.msk [vmem:[#allocation2 + $0x18] sm:$0xff] %vm206_vm2, %v4544_v17  ;;  %211 = vst.msk [vmem:[#allocation2 + $0x20] sm:$0xff] %vm206_vm2, %v4544_v17  ;;  %s4371_s5 = scalar_lea.vmem %s4370_s30, 8192 }
  0x18   : > { %s4532_s13 = scalar_lea.vmem %s5907_s0, %s3860_s10  ;;  %212 = vst.msk [vmem:[#allocation2 + $0x28] sm:$0xff] %vm206_vm2, %v4544_v17  ;;  %213 = vst.msk [vmem:[#allocation2 + $0x30] sm:$0xff] %vm206_vm2, %v4544_v17 }
  0x19   : > { %v275_v18 = vld [vmem:[%s4532_s13 + $0x70] sm:$0xff]  ;;  %v276_v19 = vld [vmem:[%s4532_s13 + $0x78] sm:$0xff]  ;;  %v4549_v20 = vld [vmem:[%s4532_s13 + $0x80] sm:$0xff]  ;;  %214 = vst.msk [vmem:[#allocation2 + $0x38] sm:$0xff] %vm206_vm2, %v4544_v17 }
  0x1a   : > { %v4551_v21 = vpack.c.bf16 %v276_v19, %v275_v18  ;;  %v278_v22 = vld [vmem:[%s4532_s13 + $0x88] sm:$0xff]  ;;  %v261_v23 = vld [vmem:[%s4532_s13] sm:$0xff]  ;;  %216 = vst.msk [vmem:[#allocation2 + $0x48] sm:$0xff] %vm206_vm2, %v4544_v17  ;;  %217 = vst.msk [vmem:[#allocation2 + $0x50] sm:$0xff] %vm206_vm2, %v4544_v17 }
  0x1b   : > { %v262_v24 = vld [vmem:[%s4532_s13 + $0x8] sm:$0xff]  ;;  %218 = vst.msk [vmem:[#allocation2 + $0x58] sm:$0xff] %vm206_vm2, %v4544_v17  ;;  %219 = vst.msk [vmem:[#allocation2 + $0x60] sm:$0xff] %vm206_vm2, %v4544_v17  ;;  %v4667_v25 = vpack.c.bf16 %v278_v22, %v4549_v20  ;;  %v279_v27 = vld [vmem:[%s4532_s13 + $0x90] sm:$0xff] }
  0x1c   : > { %220 = vst.msk [vmem:[#allocation2 + $0x68] sm:$0xff] %vm206_vm2, %v4544_v17  ;;  %221 = vst.msk [vmem:[#allocation2 + $0x70] sm:$0xff] %vm206_vm2, %v4544_v17  ;;  %v4669_v26 = vpack.c.bf16 %v262_v24, %v261_v23  ;;  %v280_v28 = vld [vmem:[%s4532_s13 + $0x98] sm:$0xff]  ;;  %v281_v29 = vld [vmem:[%s4532_s13 + $0xa0] sm:$0xff]  ;;  %v376_v31 = vshrl.u32 %v4551_v21, 16  ;;  %v379_v32 = vshll.u32 %v4551_v21, 16 }
  0x1d   : > { %222 = vst.msk [vmem:[#allocation2 + $0x78] sm:$0xff] %vm206_vm2, %v4544_v17  ;;  %223 = vst.msk [vmem:[#allocation2 + $0x80] sm:$0xff] %vm206_vm2, %v4544_v17  ;;  %v4682_v33 = vpack.c.bf16 %v280_v28, %v279_v27  ;;  %v282_v34 = vld [vmem:[%s4532_s13 + $0xa8] sm:$0xff]  ;;  %v263_v35 = vld [vmem:[%s4532_s13 + $0x10] sm:$0xff]  ;;  %v383_v38 = vshrl.u32 %v4667_v25, 16  ;;  %v386_v39 = vshll.u32 %v4667_v25, 16 }
  0x1e   : > { %224 = vst.msk [vmem:[#allocation2 + $0x88] sm:$0xff] %vm206_vm2, %v4544_v17  ;;  %225 = vst.msk [vmem:[#allocation2 + $0x90] sm:$0xff] %vm206_vm2, %v4544_v17  ;;  %v264_v36 = vld [vmem:[%s4532_s13 + $0x18] sm:$0xff]  ;;  %v327_v40 = vshrl.u32 %v4669_v26, 16  ;;  %v330_v41 = vshll.u32 %v4669_v26, 16  ;;  %v265_v42 = vld [vmem:[%s4532_s13 + $0x20] sm:$0xff]  ;;  %v4715_v51 = vpack.c.bf16 %v282_v34, %v281_v29 }
  0x1f   : > { %226 = vst.msk [vmem:[#allocation2 + $0x98] sm:$0xff] %vm206_vm2, %v4544_v17  ;;  %227 = vst.msk [vmem:[#allocation2 + $0xa0] sm:$0xff] %vm206_vm2, %v4544_v17  ;;  %v266_v43 = vld [vmem:[%s4532_s13 + $0x28] sm:$0xff]  ;;  %v378_v44 = vrot.slane %v376_v31, 7  ;;  %v4703_v45 = vrot.slane %v379_v32, 1  ;;  %v5920_v46 = vshrl.u32 %v4682_v33, 16  ;;  %v4725_v55 = vpack.c.bf16 %v264_v36, %v263_v35 }
  0x20   : > { %228 = vst.msk [vmem:[#allocation2 + $0xa8] sm:$0xff] %vm206_vm2, %v4544_v17  ;;  %229 = vst.msk [vmem:[#allocation2 + $0xb0] sm:$0xff] %vm206_vm2, %v4544_v17  ;;  %v393_v47 = vshll.u32 %v4682_v33, 16  ;;  %v385_v48 = vrot.slane %v383_v38, 7  ;;  %v329_v49 = vrot.slane %v327_v40, 7  ;;  %v4713_v50 = vrot.slane %v330_v41, 1 }
  0x21   : > { %230 = vst.msk [vmem:[#allocation2 + $0xb8] sm:$0xff] %vm206_vm2, %v4544_v17  ;;  %231 = vst.msk [vmem:[#allocation2 + $0xc0] sm:$0xff] %vm206_vm2, %v4544_v17  ;;  %v381_v52 = vor.u32 %v379_v32, %v378_v44  ;;  %v392_v54 = vrot.slane %v5920_v46, 7  ;;  %v4727_v56 = vpack.c.bf16 %v266_v43, %v265_v42  ;;  %v283_v57 = vld [vmem:[%s4532_s13 + $0xb0] sm:$0xff]  ;;  %v284_v58 = vld [vmem:[%s4532_s13 + $0xb8] sm:$0xff]  ;;  %v5916_v61 = vshrl.u32 %v4715_v51, 16 }
  0x22   : > { %232 = vst.msk [vmem:[#allocation2 + $0xc8] sm:$0xff] %vm206_vm2, %v4544_v17  ;;  %233 = vst.msk [vmem:[#allocation2 + $0xd0] sm:$0xff] %vm206_vm2, %v4544_v17  ;;  %v388_v59 = vor.u32 %v386_v39, %v385_v48  ;;  %v332_v60 = vor.u32 %v330_v41, %v329_v49  ;;  %v5919_v62 = vshll.u32 %v4715_v51, 16  ;;  %v285_v63 = vld [vmem:[%s4532_s13 + $0xc0] sm:$0xff]  ;;  %v286_v0 = vld [vmem:[%s4532_s13 + $0xc8] sm:$0xff]  ;;  %v334_v7 = vshrl.u32 %v4725_v55, 16 }
  0x23   : > { %234 = vst.msk [vmem:[#allocation2 + $0xd8] sm:$0xff] %vm206_vm2, %v4544_v17  ;;  %235 = vst.msk [vmem:[#allocation2 + $0xe0] sm:$0xff] %vm206_vm2, %v4544_v17  ;;  %v267_v1 = vld [vmem:[%s4532_s13 + $0x30] sm:$0xff]  ;;  %v479_v2 = vld [vmem:[#allocation2 + $0x40] sm:$0xff]  ;;  %v395_v6 = vor.u32 %v393_v47, %v392_v54  ;;  %v337_v8 = vshll.u32 %v4725_v55, 16  ;;  %v341_v9 = vshrl.u32 %v4727_v56, 16  ;;  %v4787_v34 = vpack.c.bf16 %v284_v58, %v283_v57 }
  0x24   : > { %236 = vst.msk [vmem:[#allocation2 + $0xe8] sm:$0xff] %vm206_vm2, %v4544_v17  ;;  %237 = vst.msk [vmem:[#allocation2 + $0xf0] sm:$0xff] %vm206_vm2, %v4544_v17  ;;  %v482_v3 = vld [vmem:[#allocation2 + $0x48] sm:$0xff]  ;;  %v605_v4 = vld [vmem:[#allocation2] sm:$0xff]  ;;  %v4751_v11 = vsel %vm4719_vm4, %v381_v52, %v479_v2  ;;  %v399_v16 = vrot.slane %v5916_v61, 7  ;;  %v336_v23 = vrot.slane %v334_v7, 7  ;;  %v4789_v35 = vpack.c.bf16 %v286_v0, %v285_v63 }
  0x25   : > { %238 = vst.msk [vmem:[#allocation2 + $0xf8] sm:$0xff] %vm206_vm2, %v4544_v17  ;;  %239 = vst.msk [vmem:[#allocation2 + $0x100] sm:$0xff] %vm206_vm2, %v4544_v17  ;;  %v4755_v12 = vsel %vm4719_vm4, %v388_v59, %v482_v3  ;;  %4017 = vmatprep.mubr.msk.bf16.mxu0 %vm206_vm2, %v605_v4  ;;  %v458_v13 = vld [vmem:[#allocation2 + $0x8] sm:$0xff]  ;;  %v485_v15 = vld [vmem:[#allocation2 + $0x50] sm:$0xff]  ;;  %4033 = vmatprep.mubr.msk.bf16.mxu1 %vm206_vm2, %v4751_v11  ;;  %v343_v24 = vrot.slane %v341_v9, 7  ;;  %v4792_v41 = vrot.slane %v337_v8, 1 }
  0x26   : > { %240 = vst.msk [vmem:[#allocation2 + $0x108] sm:$0xff] %vm206_vm2, %v4544_v17  ;;  %241 = vst.msk [vmem:[#allocation2 + $0x110] sm:$0xff] %vm206_vm2, %v4544_v17  ;;  %v268_v18 = vld [vmem:[%s4532_s13 + $0x38] sm:$0xff]  ;;  %v4768_v19 = vsel %vm4719_vm4, %v332_v60, %v458_v13  ;;  %v4772_v20 = vsel %vm4719_vm4, %v395_v6, %v485_v15  ;;  %v269_v27 = vld [vmem:[%s4532_s13 + $0x40] sm:$0xff]  ;;  %4034 = vmatmul.mubr.msk.bf16.vlgmr.msra.gmra.mrb[0].mxu1 %vm206_vm2, %v4755_v12  ;;  %v402_v28 = vor.u32 %v5919_v62, %v399_v16 }
  0x27   : > { %242 = vst.msk [vmem:[#allocation2 + $0x118] sm:$0xff] %vm206_vm2, %v4544_v17  ;;  %243 = vst.msk [vmem:[#allocation2 + $0x120] sm:$0xff] %vm206_vm2, %v4544_v17  ;;  %v488_v22 = vld [vmem:[#allocation2 + $0x58] sm:$0xff]  ;;  %4018 = vmatmul.mubr.msk.bf16.vlgmr.msra.gmra.mrb[0].mxu0 %vm206_vm2, %v4768_v19  ;;  %v461_v29 = vld [vmem:[#allocation2 + $0x10] sm:$0xff]  ;;  %4050 = vmatpush3.bf16.msra.mxu1 %v4521_v10  ;;  %v339_v42 = vor.u32 %v337_v8, %v336_v23  ;;  %v4797_v44 = vpack.c.bf16 %v268_v18, %v267_v1  ;;  %v5914_v10 = vshrl.u32 %v4787_v34, 16 }
  0x28   : > { %244 = vst.msk [vmem:[#allocation2 + $0x128] sm:$0xff] %vm206_vm2, %v4544_v17  ;;  %245 = vst.msk [vmem:[#allocation2 + $0x130] sm:$0xff] %vm206_vm2, %v4544_v17  ;;  %v464_v32 = vld [vmem:[#allocation2 + $0x18] sm:$0xff]  ;;  %v270_v36 = vld [vmem:[%s4532_s13 + $0x48] sm:$0xff]  ;;  %4037 = vmatprep.mubr.msk.bf16.mxu1 %vm206_vm2, %v4772_v20  ;;  %v4806_v57 = vsel %vm4719_vm4, %v402_v28, %v488_v22  ;;  %4084 = vmatpush3.bf16.msra.mxu0 %v4527_v14  ;;  %v5918_v58 = vshll.u32 %v4787_v34, 16  ;;  %v5912_v59 = vshrl.u32 %v4789_v35, 16 }
  0x29   : > { %246 = vst.msk [vmem:[#allocation2 + $0x138] sm:$0xff] %vm206_vm2, %v4544_v17  ;;  %247 = vst.msk [vmem:[#allocation2 + $0x140] sm:$0xff] %vm206_vm2, %v4544_v17  ;;  %v287_v48 = vld [vmem:[%s4532_s13 + $0xd0] sm:$0xff]  ;;  %v288_v49 = vld [vmem:[%s4532_s13 + $0xd8] sm:$0xff]  ;;  %4117 = vmatprep.subr.bf16.mxu1 %v4676_v30  ;;  %v4823_v14 = vsel %vm4719_vm4, %v339_v42, %v461_v29  ;;  %v5917_v2 = vshll.u32 %v4789_v35, 16  ;;  %v348_v3 = vshrl.u32 %v4797_v44, 16  ;;  %4151 = vmatprep.subr.bf16.mxu0 %v4689_v37 }
  0x2a   : > { %248 = vst.msk [vmem:[#allocation2 + $0x148] sm:$0xff] %vm206_vm2, %v4544_v17  ;;  %249 = vst.msk [vmem:[#allocation2 + $0x150] sm:$0xff] %vm206_vm2, %v4544_v17  ;;  %v289_v52 = vld [vmem:[%s4532_s13 + $0xe0] sm:$0xff]  ;;  %v290_v60 = vld [vmem:[%s4532_s13 + $0xe8] sm:$0xff]  ;;  %4021 = vmatprep.mubr.msk.bf16.mxu0 %vm206_vm2, %v4823_v14  ;;  %v406_v4 = vrot.slane %v5914_v10, 7  ;;  %v413_v6 = vrot.slane %v5912_v59, 7  ;;  %v4843_v13 = vpack.c.bf16 %v270_v36, %v269_v27  ;;  %v4847_v18 = vpack.c.bf16 %v288_v49, %v287_v48 }
  0x2b   : > { %250 = vst.msk [vmem:[#allocation2 + $0x158] sm:$0xff] %vm206_vm2, %v4544_v17  ;;  %251 = vst.msk [vmem:[#allocation2 + $0x160] sm:$0xff] %vm206_vm2, %v4544_v17  ;;  %v271_v63 = vld [vmem:[%s4532_s13 + $0x50] sm:$0xff]  ;;  %v272_v0 = vld [vmem:[%s4532_s13 + $0x58] sm:$0xff]  ;;  %v351_v8 = vshll.u32 %v4797_v44, 16  ;;  %v4849_v22 = vpack.c.bf16 %v290_v60, %v289_v52  ;;  %v507_v61 = vor.u32 %v4713_v50, %v327_v40 }
  0x2c   : > { %252 = vst.msk [vmem:[#allocation2 + $0x168] sm:$0xff] %vm206_vm2, %v4544_v17  ;;  %253 = vst.msk [vmem:[#allocation2 + $0x170] sm:$0xff] %vm206_vm2, %v4544_v17  ;;  %v491_v15 = vld [vmem:[#allocation2 + $0x60] sm:$0xff]  ;;  %v494_v16 = vld [vmem:[#allocation2 + $0x68] sm:$0xff]  ;;  %v4851_v23 = vpack.c.bf16 %v272_v0, %v271_v63  ;;  %v416_v27 = vor.u32 %v5917_v2, %v413_v6  ;;  %v355_v29 = vshrl.u32 %v4843_v13, 16  ;;  %v5913_v42 = vshrl.u32 %v4847_v18, 16 }
  0x2d   : > { %254 = vst.msk [vmem:[#allocation2 + $0x178] sm:$0xff] %vm206_vm2, %v4544_v17  ;;  %255 = vst.msk [vmem:[#allocation2 + $0x180] sm:$0xff] %vm206_vm2, %v4544_v17  ;;  %v467_v28 = vld [vmem:[#allocation2 + $0x20] sm:$0xff]  ;;  %v5915_v48 = vshrl.u32 %v4849_v22, 16  ;;  %v274_v52 = vld [vmem:[%s4532_s13 + $0x68] sm:$0xff] }
  0x2e   : > { %256 = vst.msk [vmem:[#allocation2 + $0x188] sm:$0xff] %vm206_vm2, %v4544_v17  ;;  %257 = vst.msk [vmem:[#allocation2 + $0x190] sm:$0xff] %vm206_vm2, %v4544_v17  ;;  %v273_v49 = vld [vmem:[%s4532_s13 + $0x60] sm:$0xff]  ;;  %4038 = vmatmul.mubr.msk.bf16.gmra.mrb[4].mxu1 %vm206_vm2, %v4806_v57  ;;  %v4884_v63 = vsel %vm4719_vm4, %v416_v27, %v494_v16  ;;  %v357_v0 = vrot.slane %v355_v29, 7  ;;  %v420_v16 = vrot.slane %v5913_v42, 7  ;;  %v500_v42 = vld [vmem:[#allocation2 + $0x78] sm:$0xff] }
  0x2f   : > { %258 = vst.msk [vmem:[#allocation2 + $0x198] sm:$0xff] %vm206_vm2, %v4544_v17  ;;  %259 = vst.msk [vmem:[#allocation2 + $0x1a0] sm:$0xff] %vm206_vm2, %v4544_v17  ;;  %v557_v59 = vld [vmem:[#allocation2 + $0x128] sm:$0xff]  ;;  %v365_v10 = vshll.u32 %v4851_v23, 16  ;;  %v560_v2 = vld [vmem:[#allocation2 + $0x130] sm:$0xff] }
  0x30   : > { %260 = vst.msk [vmem:[#allocation2 + $0x1a8] sm:$0xff] %vm206_vm2, %v4544_v17  ;;  %317 = vst.msk [vmem:[#allocation2 + $0xd0] sm:$0xff] %vm206_vm2, %v4551_v21  ;;  %v344_v17 = vshll.u32 %v4727_v56, 16  ;;  %v4929_v40 = vsel %vm4904_vm6, %v507_v61, %v557_v59  ;;  %v3837_v27 = vld [vmem:[%s5908_s1 + $0x10] sm:$0x3] }
  0x31   : > { %318 = vst.msk [vmem:[#allocation2 + $0xd8] sm:$0xff] %vm206_vm2, %v4667_v25  ;;  %310 = vst.msk [vmem:[#allocation2 + $0x98] sm:$0xff] %vm206_vm2, %v4669_v26  ;;  %v569_v21 = vld [vmem:[#allocation2 + $0x148] sm:$0xff]  ;;  %v5927_v25 = vshrl.u32 %v4682_v33, 16 }
  0x32   : > { %319 = vst.msk [vmem:[#allocation2 + $0xe0] sm:$0xff] %vm206_vm2, %v4682_v33  ;;  %320 = vst.msk [vmem:[#allocation2 + $0xe8] sm:$0xff] %vm206_vm2, %v4715_v51  ;;  %v346_v43 = vor.u32 %v344_v17, %v343_v24  ;;  %v4802_v54 = vrot.slane %v344_v17, 1  ;;  %v350_v17 = vrot.slane %v348_v3, 7  ;;  %v409_v24 = vor.u32 %v5918_v58, %v406_v4 }
  0x33   : > { %311 = vst.msk [vmem:[#allocation2 + $0xa0] sm:$0xff] %vm206_vm2, %v4725_v55  ;;  %312 = vst.msk [vmem:[#allocation2 + $0xa8] sm:$0xff] %vm206_vm2, %v4727_v56  ;;  %v428_v4 = vshll.u32 %v4849_v22, 16  ;;  %v5930_v33 = vshll.u32 %v4789_v35, 16 }
  0x34   : > { %481 = vst [vmem:[#allocation2 + $0x40] sm:$0xff] %v4751_v11  ;;  %484 = vst [vmem:[#allocation2 + $0x48] sm:$0xff] %v4755_v12  ;;  %v4827_v1 = vsel %vm4719_vm4, %v346_v43, %v464_v32  ;;  %v358_v32 = vshll.u32 %v4843_v13, 16  ;;  %v353_v36 = vor.u32 %v351_v8, %v350_v17  ;;  %v421_v43 = vshll.u32 %v4847_v18, 16 }
  0x35   : > { %460 = vst [vmem:[#allocation2 + $0x8] sm:$0xff] %v4768_v19  ;;  %487 = vst [vmem:[#allocation2 + $0x50] sm:$0xff] %v4772_v20  ;;  %4022 = vmatmul.mubr.msk.bf16.gmra.mrb[4].mxu0 %vm206_vm2, %v4827_v1  ;;  %v4880_v60 = vsel %vm4719_vm4, %v409_v24, %v491_v15  ;;  %v470_v15 = vld [vmem:[#allocation2 + $0x28] sm:$0xff]  ;;  %v427_v17 = vrot.slane %v5915_v48, 7  ;;  %v362_v24 = vshrl.u32 %v4851_v23, 16  ;;  %v299_v48 = vpack.c.bf16 %v274_v52, %v273_v49  ;;  %v473_v49 = vld [vmem:[#allocation2 + $0x30] sm:$0xff] }
  0x36   : > { %321 = vst.msk [vmem:[#allocation2 + $0xf0] sm:$0xff] %vm206_vm2, %v4787_v34  ;;  %322 = vst.msk [vmem:[#allocation2 + $0xf8] sm:$0xff] %vm206_vm2, %v4789_v35  ;;  %4041 = vmatprep.mubr.msk.bf16.mxu1 %vm206_vm2, %v4880_v60  ;;  %v4895_v6 = vsel %vm4719_vm4, %v353_v36, %v467_v28  ;;  %v360_v28 = vor.u32 %v358_v32, %v357_v0  ;;  %v497_v36 = vld [vmem:[#allocation2 + $0x70] sm:$0xff]  ;;  %v423_v58 = vor.u32 %v421_v43, %v420_v16 }
  0x37   : > { %490 = vst [vmem:[#allocation2 + $0x58] sm:$0xff] %v4806_v57  ;;  %313 = vst.msk [vmem:[#allocation2 + $0xb0] sm:$0xff] %vm206_vm2, %v4797_v44  ;;  %4025 = vmatprep.mubr.msk.bf16.mxu0 %vm206_vm2, %v4895_v6  ;;  %v430_v62 = vor.u32 %v428_v4, %v427_v17  ;;  %v364_v46 = vrot.slane %v362_v24, 7  ;;  %v509_v0 = vor.u32 %v4792_v41, %v334_v7  ;;  %v369_v26 = vshrl.u32 %v299_v48, 16 }
  0x38   : > { %463 = vst [vmem:[#allocation2 + $0x10] sm:$0xff] %v4823_v14  ;;  %466 = vst [vmem:[#allocation2 + $0x18] sm:$0xff] %v4827_v1  ;;  %v372_v52 = vshll.u32 %v299_v48, 16  ;;  %v4934_v50 = vsel %vm4719_vm4, %v423_v58, %v497_v36  ;;  %v514_v58 = vrot.slane %v358_v32, 1  ;;  %v521_v17 = vor.u32 %v4703_v45, %v376_v31  ;;  %4042 = vmatmul.mubr.msk.bf16.gmra.mrb[8].mxu1 %vm206_vm2, %v4884_v63  ;;  %v575_v31 = vld [vmem:[#allocation2 + $0x158] sm:$0xff]  ;;  %v581_v32 = vld [vmem:[#allocation2 + $0x168] sm:$0xff] }
  0x39   : > { %314 = vst.msk [vmem:[#allocation2 + $0xb8] sm:$0xff] %vm206_vm2, %v4843_v13  ;;  %323 = vst.msk [vmem:[#allocation2 + $0x100] sm:$0xff] %vm206_vm2, %v4847_v18  ;;  %v4938_v55 = vsel %vm4719_vm4, %v430_v62, %v500_v42  ;;  %v367_v7 = vor.u32 %v365_v10, %v364_v46  ;;  %v4943_v41 = vsel %vm4904_vm6, %v509_v0, %v560_v2  ;;  %v371_v61 = vrot.slane %v369_v26, 7  ;;  %v476_v2 = vld [vmem:[#allocation2 + $0x38] sm:$0xff]  ;;  %v566_v42 = vld [vmem:[#allocation2 + $0x140] sm:$0xff] }
  0x3a   : > { %324 = vst.msk [vmem:[#allocation2 + $0x108] sm:$0xff] %vm206_vm2, %v4849_v22  ;;  %315 = vst.msk [vmem:[#allocation2 + $0xc0] sm:$0xff] %vm206_vm2, %v4851_v23  ;;  %v4924_v23 = vsel %vm4719_vm4, %v360_v28, %v470_v15  ;;  %v511_v62 = vor.u32 %v4802_v54, %v341_v9  ;;  %v512_v46 = vrot.slane %v351_v8, 1  ;;  %v516_v15 = vrot.slane %v365_v10, 1  ;;  %v578_v28 = vld [vmem:[#allocation2 + $0x160] sm:$0xff]  ;;  %v572_v10 = vld [vmem:[#allocation2 + $0x150] sm:$0xff]  ;;  %4045 = vmatprep.mubr.msk.bf16.mxu1 %vm206_vm2, %v4934_v50 }
  0x3b   : > { %493 = vst [vmem:[#allocation2 + $0x60] sm:$0xff] %v4880_v60  ;;  %496 = vst [vmem:[#allocation2 + $0x68] sm:$0xff] %v4884_v63  ;;  %v4955_v59 = vsel %vm4719_vm4, %v367_v7, %v473_v49  ;;  %v518_v16 = vrot.slane %v372_v52, 1  ;;  %v374_v56 = vor.u32 %v372_v52, %v371_v61  ;;  %v522_v45 = vrot.slane %v386_v39, 1  ;;  %v5116_v53 = vld [vmem:[#allocation2 + $0xa8] sm:$0xff] }
  0x3c   : > { %469 = vst [vmem:[#allocation2 + $0x20] sm:$0xff] %v4895_v6  ;;  %316 = vst.msk [vmem:[#allocation2 + $0xc8] sm:$0xff] %vm206_vm2, %v299_v48  ;;  %v563_v48 = vld [vmem:[#allocation2 + $0x138] sm:$0xff]  ;;  %v513_v54 = vor.u32 %v512_v46, %v348_v3  ;;  %v515_v44 = vor.u32 %v514_v58, %v355_v29  ;;  %v517_v3 = vor.u32 %v516_v15, %v362_v24  ;;  %v524_v36 = vrot.slane %v393_v47, 1  ;;  %v584_v29 = vld [vmem:[#allocation2 + $0x170] sm:$0xff] }
  0x3d   : > { %472 = vst [vmem:[#allocation2 + $0x28] sm:$0xff] %v4924_v23  ;;  %559 = vst [vmem:[#allocation2 + $0x128] sm:$0xff] %v4929_v40  ;;  %4026 = vmatmul.mubr.msk.bf16.gmra.mrb[8].mxu0 %vm206_vm2, %v4924_v23  ;;  %v4967_v9 = vsel %vm4904_vm6, %v511_v62, %v563_v48  ;;  %v519_v8 = vor.u32 %v518_v16, %v369_v26  ;;  %v4984_v39 = vsel %vm4719_vm4, %v374_v56, %v476_v2  ;;  %v291_v24 = vld [vmem:[%s4532_s13 + $0xf0] sm:$0xff]  ;;  %v292_v26 = vld [vmem:[%s4532_s13 + $0xf8] sm:$0xff]  ;;  %s5668_s13 = scalar_lea.vmem [#allocation4], %s5649_s12 }
  0x3e   : > { %499 = vst [vmem:[#allocation2 + $0x70] sm:$0xff] %v4934_v50  ;;  %502 = vst [vmem:[#allocation2 + $0x78] sm:$0xff] %v4938_v55  ;;  %4029 = vmatprep.mubr.msk.bf16.mxu0 %vm206_vm2, %v4955_v59  ;;  %v4988_v0 = vsel %vm4904_vm6, %v513_v54, %v566_v42  ;;  %v4992_v49 = vsel %vm4904_vm6, %v521_v17, %v578_v28  ;;  %v523_v13 = vor.u32 %v522_v45, %v383_v38  ;;  %v872_v48 = vld [vmem:[#allocation2 + $0x90] sm:$0xff]  ;;  %v587_v16 = vld [vmem:[#allocation2 + $0x178] sm:$0xff]  ;;  %s3633_s20 = sshll.u32 %s5668_s13, 4  ;;  %s5856_s20 = int_to_ptr.vmem [resolvable:$true] %s3633_s20 }
  0x3f   : > { %562 = vst [vmem:[#allocation2 + $0x130] sm:$0xff] %v4943_v41  ;;  %475 = vst [vmem:[#allocation2 + $0x30] sm:$0xff] %v4955_v59  ;;  %v5002_v47 = vsel %vm4904_vm6, %v515_v44, %v569_v21  ;;  %v5006_v52 = vsel %vm4904_vm6, %v517_v3, %v572_v10  ;;  %v5010_v7 = vsel %vm4904_vm6, %v519_v8, %v575_v31  ;;  %v5928_v62 = vshll.u32 %v4715_v51, 16  ;;  %v590_v17 = vld [vmem:[#allocation2 + $0x180] sm:$0xff]  ;;  %v593_v28 = vld [vmem:[#allocation2 + $0x188] sm:$0xff]  ;;  %s4365_s28 = scalar_lea.vmem %s5856_s20, 4096  ;;  %p4372_p0 = scmp.lt.s32.totalorder %s5856_s20, %s4370_s30 }
  0x40   : > { %565 = vst [vmem:[#allocation2 + $0x138] sm:$0xff] %v4967_v9  ;;  %478 = vst [vmem:[#allocation2 + $0x38] sm:$0xff] %v4984_v39  ;;  %v525_v38 = vor.u32 %v524_v36, %v5927_v25  ;;  %v5020_v61 = vsel %vm4904_vm6, %v523_v13, %v581_v32  ;;  %v5929_v58 = vshll.u32 %v4787_v34, 16  ;;  %v530_v42 = vrot.slane %v5930_v33, 1  ;;  %v1199_v10 = vld [vmem:[#allocation2 + $0x120] sm:$0xff]  ;;  %v596_v36 = vld [vmem:[#allocation2 + $0x190] sm:$0xff]  ;;  %4046 = vmatmul.mubr.msk.bf16.gmra.mrb[12].mxu1 %vm206_vm2, %v4938_v55  ;;  %p4366_p11 = scmp.ne.s32.totalorder %s5856_s20, %s4365_s28  ;;  %p4373_p1 = scmp.lt.s32.totalorder %s4371_s5, %s4365_s28 }
  0x41   : > { %568 = vst [vmem:[#allocation2 + $0x140] sm:$0xff] %v4988_v0  ;;  %580 = vst [vmem:[#allocation2 + $0x160] sm:$0xff] %v4992_v49  ;;  %v526_v46 = vrot.slane %v5928_v62, 1  ;;  %v532_v56 = vrot.slane %v421_v43, 1  ;;  %v534_v54 = vrot.slane %v428_v4, 1  ;;  %v5037_v21 = vpack.c.bf16 %v292_v26, %v291_v24  ;;  %v599_v13 = vld [vmem:[#allocation2 + $0x198] sm:$0xff]  ;;  %4051 = vmatprep.mubr.msk.bf16.mxu1 %vm206_vm2, %v872_v48 }
  0x42   : > { %571 = vst [vmem:[#allocation2 + $0x148] sm:$0xff] %v5002_v47  ;;  %574 = vst [vmem:[#allocation2 + $0x150] sm:$0xff] %v5006_v52  ;;  %v528_v2 = vrot.slane %v5929_v58, 1  ;;  %v5031_v15 = vsel %vm4904_vm6, %v525_v38, %v584_v29  ;;  %v5931_v31 = vshrl.u32 %v4715_v51, 16  ;;  %v5932_v44 = vshrl.u32 %v4787_v34, 16  ;;  %v503_v48 = vld [vmem:[#allocation2 + $0x80] sm:$0xff]  ;;  %p4367_p12 = pnand %p4366_p11, %p4496_p5  ;;  %p4374_p2 = por %p4373_p1, %p4372_p0 }
  0x43   : > { %577 = vst [vmem:[#allocation2 + $0x158] sm:$0xff] %v5010_v7  ;;  %583 = vst [vmem:[#allocation2 + $0x168] sm:$0xff] %v5020_v61  ;;  %v5933_v8 = vshrl.u32 %v4789_v35, 16  ;;  %v5934_v43 = vshrl.u32 %v4847_v18, 16  ;;  %v5935_v4 = vshrl.u32 %v4849_v22, 16  ;;  %v432_v26 = vshrl.u32 %v5037_v21, 16 }
  0x44   : > { %586 = vst [vmem:[#allocation2 + $0x170] sm:$0xff] %v5031_v15  ;;  %v527_v45 = vor.u32 %v526_v46, %v5931_v31  ;;  %v529_v3 = vor.u32 %v528_v2, %v5932_v44  ;;  %v435_v25 = vshll.u32 %v5037_v21, 16  ;;  %325 = vst.msk [vmem:[#allocation2 + $0x110] sm:$0xff] %vm206_vm2, %v5037_v21  ;;  %v3786_v46 = vld [vmem:[%s5908_s1 + $0xa] sm:$0x3]  ;;  %v873_v2 = vld [vmem:[#allocation2 + $0x98] sm:$0xff]  ;;  %p4368_p13 = pneg %p4367_p12 }
  0x45   : > { %v531_v32 = vor.u32 %v530_v42, %v5933_v8  ;;  %v533_v29 = vor.u32 %v532_v56, %v5934_v43  ;;  %v535_v24 = vor.u32 %v534_v54, %v5935_v4  ;;  %4030 = vmatmul.mubr.msk.bf16.gmra.mrb[12].mxu0 %vm206_vm2, %v4984_v39  ;;  %v434_v38 = vrot.slane %v432_v26, 7  ;;  %v3803_v58 = vld [vmem:[%s5908_s1 + $0xc] sm:$0x3]  ;;  %v5099_v42 = vld [vmem:[#allocation2 + $0xa0] sm:$0xff]  ;;  %v5142_v54 = vld [vmem:[#allocation2 + $0xd0] sm:$0xff] }
  0x46   : > { %v5060_v51 = vsel %vm4904_vm6, %v527_v45, %v587_v16  ;;  %v5064_v34 = vsel %vm4904_vm6, %v529_v3, %v590_v17  ;;  %4085 = vmatprep.mubr.msk.bf16.mxu0 %vm206_vm2, %v1199_v10  ;;  %v2244_v16 = vand.u32 %v3786_v46, %v4513_v5  ;;  %v5104_v17 = vand.u32 %v3803_v58, %v4513_v5  ;;  %v5140_v56 = vld [vmem:[#allocation2 + $0xc8] sm:$0xff]  ;;  %v5152_v10 = vld [vmem:[#allocation2 + $0xd8] sm:$0xff]  ;;  %v5154_v31 = vld [vmem:[#allocation2 + $0xe0] sm:$0xff]  ;;  %p4375_p3 = pnand %p4374_p2, %p4368_p13 }
  0x47   : > { %v5068_v35 = vsel %vm4904_vm6, %v531_v32, %v593_v28  ;;  %589 = vst [vmem:[#allocation2 + $0x178] sm:$0xff] %v5060_v51  ;;  %592 = vst [vmem:[#allocation2 + $0x180] sm:$0xff] %v5064_v34  ;;  %v5077_v18 = vsel %vm4904_vm6, %v533_v29, %v596_v36  ;;  %v5081_v22 = vsel %vm4904_vm6, %v535_v24, %v599_v13  ;;  %v5118_v28 = vld [vmem:[#allocation2 + $0xb0] sm:$0xff]  ;;  %v5164_v45 = vld [vmem:[#allocation2 + $0xe8] sm:$0xff]  ;;  %v536_v32 = vrot.slane %v435_v25, 1 }
  0x48   : > { %595 = vst [vmem:[#allocation2 + $0x188] sm:$0xff] %v5068_v35  ;;  %598 = vst [vmem:[#allocation2 + $0x190] sm:$0xff] %v5077_v18  ;;  %v437_v62 = vor.u32 %v435_v25, %v434_v38  ;;  %4052 = vmatmul.mubr.msk.bf16.vlgmr.msra.gmra.mrb[16].mxu1 %vm206_vm2, %v873_v2  ;;  %v5166_v44 = vld [vmem:[#allocation2 + $0xf0] sm:$0xff]  ;;  %v5176_v3 = vld [vmem:[#allocation2 + $0xf8] sm:$0xff]  ;;  %v3225_v24 = vand.u32 %v3837_v27, %v4513_v5 }
  0x49   : > { %601 = vst [vmem:[#allocation2 + $0x198] sm:$0xff] %v5081_v22  ;;  %4118 = vmatpush3.bf16.msra.mxu1 %v4676_v30  ;;  %4055 = vmatprep.mubr.msk.bf16.mxu1 %vm206_vm2, %v5099_v42  ;;  %v5128_v30 = vld [vmem:[#allocation2 + $0xb8] sm:$0xff]  ;;  %v5178_v8 = vld [vmem:[#allocation2 + $0x100] sm:$0xff]  ;;  %v5190_v36 = vld [vmem:[#allocation2 + $0x108] sm:$0xff]  ;;  %v537_v13 = vor.u32 %v536_v32, %v432_v26 }
  0x4a   : > { %v5097_v33 = vsel %vm4719_vm4, %v437_v62, %v503_v48  ;;  %4185 = vmatprep.subr.bf16.mxu1 %v2244_v16  ;;  %v602_v43 = vld [vmem:[#allocation2 + $0x1a0] sm:$0xff]  ;;  %v3820_v21 = vld [vmem:[%s5908_s1 + $0xe] sm:$0x3] }
  0x4b   : > { %505 = vst [vmem:[#allocation2 + $0x80] sm:$0xff] %v5097_v33  ;;  %v5196_v29 = vsel %vm4904_vm6, %v537_v13, %v602_v43  ;;  %v2898_v4 = vand.u32 %v3820_v21, %v4513_v5  ;;  %v5271_v5 = vld [vmem:[#allocation2 + $0x110] sm:$0xff] }
  0x4c   : > { %604 = vst [vmem:[#allocation2 + $0x1a0] sm:$0xff] %v5196_v29 }
  0x4d   : > { %4086 = vmatmul.mubr.msk.bf16.vlgmr.msra.gmra.mrb[16].mxu0 %vm206_vm2, %v4929_v40 }
  0x4e   : > { %4152 = vmatpush3.bf16.msra.mxu0 %v4689_v37  ;;  %4089 = vmatprep.mubr.msk.bf16.mxu0 %vm206_vm2, %v4943_v41  ;;  %v5130_v37 = vld [vmem:[#allocation2 + $0xc0] sm:$0xff] }
  0x4f   : > { %4219 = vmatprep.subr.bf16.mxu0 %v5104_v17 }
  0x50   : > { %4056 = vmatmul.mubr.msk.bf16.gmra.mrb[20].mxu1 %vm206_vm2, %v5116_v53 }
  0x51   : > { %4059 = vmatprep.mubr.msk.bf16.mxu1 %vm206_vm2, %v5118_v28 }
  0x55   : > { %4090 = vmatmul.mubr.msk.bf16.gmra.mrb[20].mxu0 %vm206_vm2, %v4967_v9 }
  0x56   : > { %4093 = vmatprep.mubr.msk.bf16.mxu0 %vm206_vm2, %v4988_v0 }
  0x58   : > { %4060 = vmatmul.mubr.msk.bf16.gmra.mrb[24].mxu1 %vm206_vm2, %v5128_v30 }
  0x59   : > { %4063 = vmatprep.mubr.msk.bf16.mxu1 %vm206_vm2, %v5130_v37 }
  0x5d   : > { %4094 = vmatmul.mubr.msk.bf16.gmra.mrb[24].mxu0 %vm206_vm2, %v5002_v47 }
  0x5e   : > { %4097 = vmatprep.mubr.msk.bf16.mxu0 %vm206_vm2, %v5006_v52 }
  0x60   : > { %4064 = vmatmul.mubr.msk.bf16.gmra.mrb[28].mxu1 %vm206_vm2, %v5140_v56 }
  0x61   : > { %4067 = vmatprep.mubr.msk.bf16.mxu1 %vm206_vm2, %v5142_v54 }
  0x65   : > { %4098 = vmatmul.mubr.msk.bf16.gmra.mrb[28].mxu0 %vm206_vm2, %v5010_v7 }
  0x66   : > { %4101 = vmatprep.mubr.msk.bf16.mxu0 %vm206_vm2, %v4992_v49 }
  0x68   : > { %4068 = vmatmul.mubr.msk.bf16.gmra.mrb[32].mxu1 %vm206_vm2, %v5152_v10 }
  0x69   : > { %4071 = vmatprep.mubr.msk.bf16.mxu1 %vm206_vm2, %v5154_v31 }
  0x6d   : > { %4102 = vmatmul.mubr.msk.bf16.gmra.mrb[32].mxu0 %vm206_vm2, %v5020_v61 }
  0x6e   : > { %4105 = vmatprep.mubr.msk.bf16.mxu0 %vm206_vm2, %v5031_v15 }
  0x70   : > { %4072 = vmatmul.mubr.msk.bf16.gmra.mrb[36].mxu1 %vm206_vm2, %v5164_v45 }
  0x71   : > { %4075 = vmatprep.mubr.msk.bf16.mxu1 %vm206_vm2, %v5166_v44 }
  0x75   : > { %4106 = vmatmul.mubr.msk.bf16.gmra.mrb[36].mxu0 %vm206_vm2, %v5060_v51 }
  0x76   : > { %4109 = vmatprep.mubr.msk.bf16.mxu0 %vm206_vm2, %v5064_v34 }
  0x78   : > { %4076 = vmatmul.mubr.msk.bf16.gmra.mrb[40].mxu1 %vm206_vm2, %v5176_v3 }
  0x79   : > { %4079 = vmatprep.mubr.msk.bf16.mxu1 %vm206_vm2, %v5178_v8 }
  0x7d   : > { %4110 = vmatmul.mubr.msk.bf16.gmra.mrb[40].mxu0 %vm206_vm2, %v5068_v35 }
  0x7e   : > { %4113 = vmatprep.mubr.msk.bf16.mxu0 %vm206_vm2, %v5077_v18 }
  0x80   : > { %4080 = vmatmul.mubr.msk.bf16.gmra.mrb[44].mxu1 %vm206_vm2, %v5190_v36 }
  0x81   : > { %4119 = vmatprep.mubr.msk.bf16.mxu1 %vm206_vm2, %v4768_v19 }
  0x85   : > { %4114 = vmatmul.mubr.msk.bf16.gmra.mrb[44].mxu0 %vm206_vm2, %v5081_v22 }
  0x86   : > { %4153 = vmatprep.mubr.msk.bf16.mxu0 %vm206_vm2, %v873_v2 }
  0x88   : > { %4120 = vmatmul.mubr.msk.bf16.vlgmr.msra.gmra.mrb[48].mxu1 %vm206_vm2, %v4823_v14 }
  0x89   : > { %4186 = vmatpush3.bf16.msra.mxu1 %v2244_v16  ;;  %4123 = vmatprep.mubr.msk.bf16.mxu1 %vm206_vm2, %v4827_v1 }
  0x8a   : > { %4253 = vmatprep.subr.bf16.mxu1 %v2898_v4 }
  0x8d   : > { %4154 = vmatmul.mubr.msk.bf16.vlgmr.msra.gmra.mrb[48].mxu0 %vm206_vm2, %v5099_v42 }
  0x8e   : > { %4220 = vmatpush3.bf16.msra.mxu0 %v5104_v17  ;;  %4157 = vmatprep.mubr.msk.bf16.mxu0 %vm206_vm2, %v5116_v53 }
  0x8f   : > { %4287 = vmatprep.subr.bf16.mxu0 %v3225_v24 }
  0x90   : > { %4124 = vmatmul.mubr.msk.bf16.gmra.mrb[52].mxu1 %vm206_vm2, %v4895_v6 }
  0x91   : > { %4127 = vmatprep.mubr.msk.bf16.mxu1 %vm206_vm2, %v4924_v23 }
  0x95   : > { %4158 = vmatmul.mubr.msk.bf16.gmra.mrb[52].mxu0 %vm206_vm2, %v5118_v28 }
  0x96   : > { %4161 = vmatprep.mubr.msk.bf16.mxu0 %vm206_vm2, %v5128_v30 }
  0x98   : > { %4128 = vmatmul.mubr.msk.bf16.gmra.mrb[56].mxu1 %vm206_vm2, %v4955_v59 }
  0x99   : > { %4131 = vmatprep.mubr.msk.bf16.mxu1 %vm206_vm2, %v4984_v39 }
  0x9d   : > { %4162 = vmatmul.mubr.msk.bf16.gmra.mrb[56].mxu0 %vm206_vm2, %v5130_v37 }
  0x9e   : > { %4165 = vmatprep.mubr.msk.bf16.mxu0 %vm206_vm2, %v5140_v56 }
  0xa0   : > { %4132 = vmatmul.mubr.msk.bf16.gmra.mrb[60].mxu1 %vm206_vm2, %v4751_v11  ;;  %v2510_v11 = vld [vmem:[#allocation2 + $0x40] sm:$0xff] }
  0xa1   : > { %4135 = vmatprep.mubr.msk.bf16.mxu1 %vm206_vm2, %v4755_v12 }
  0xa5   : > { %4166 = vmatmul.mubr.msk.bf16.gmra.mrb[60].mxu0 %vm206_vm2, %v5142_v54 }
  0xa6   : > { %4169 = vmatprep.mubr.msk.bf16.mxu0 %vm206_vm2, %v5152_v10 }
  0xa8   : > { %4136 = vmatmul.mubr.msk.bf16.gmra.mrb[64].mxu1 %vm206_vm2, %v4772_v20 }
  0xa9   : > { %4139 = vmatprep.mubr.msk.bf16.mxu1 %vm206_vm2, %v4806_v57 }
  0xad   : > { %4170 = vmatmul.mubr.msk.bf16.gmra.mrb[64].mxu0 %vm206_vm2, %v5154_v31 }
  0xae   : > { %4173 = vmatprep.mubr.msk.bf16.mxu0 %vm206_vm2, %v5164_v45 }
  0xb0   : > { %4140 = vmatmul.mubr.msk.bf16.gmra.mrb[68].mxu1 %vm206_vm2, %v4880_v60 }
  0xb1   : > { %4143 = vmatprep.mubr.msk.bf16.mxu1 %vm206_vm2, %v4884_v63 }
  0xb5   : > { %4174 = vmatmul.mubr.msk.bf16.gmra.mrb[68].mxu0 %vm206_vm2, %v5166_v44 }
  0xb6   : > { %4177 = vmatprep.mubr.msk.bf16.mxu0 %vm206_vm2, %v5176_v3 }
  0xb8   : > { %4144 = vmatmul.mubr.msk.bf16.gmra.mrb[72].mxu1 %vm206_vm2, %v4934_v50 }
  0xb9   : > { %4147 = vmatprep.mubr.msk.bf16.mxu1 %vm206_vm2, %v4938_v55 }
  0xbd   : > { %4178 = vmatmul.mubr.msk.bf16.gmra.mrb[72].mxu0 %vm206_vm2, %v5178_v8 }
  0xbe   : > { %4181 = vmatprep.mubr.msk.bf16.mxu0 %vm206_vm2, %v5190_v36 }
  0xc0   : > { %4148 = vmatmul.mubr.msk.bf16.gmra.mrb[76].mxu1 %vm206_vm2, %v5097_v33 }
  0xc1   : > { %4187 = vmatprep.mubr.msk.bf16.mxu1 %vm206_vm2, %v4929_v40 }
  0xc5   : > { %4182 = vmatmul.mubr.msk.bf16.gmra.mrb[76].mxu0 %vm206_vm2, %v5271_v5 }
  0xc6   : > { %4221 = vmatprep.mubr.msk.bf16.mxu0 %vm206_vm2, %v4823_v14 }
  0xc8   : > { %4188 = vmatmul.mubr.msk.bf16.vlgmr.msra.gmra.mrb[80].mxu1 %vm206_vm2, %v4943_v41 }
  0xc9   : > { %4254 = vmatpush3.bf16.msra.mxu1 %v2898_v4  ;;  %4191 = vmatprep.mubr.msk.bf16.mxu1 %vm206_vm2, %v4967_v9 }
  0xcd   : > { %4222 = vmatmul.mubr.msk.bf16.vlgmr.msra.gmra.mrb[80].mxu0 %vm206_vm2, %v4827_v1 }
  0xce   : > { %4288 = vmatpush3.bf16.msra.mxu0 %v3225_v24  ;;  %4225 = vmatprep.mubr.msk.bf16.mxu0 %vm206_vm2, %v4895_v6 }
  0xd0   : > { %4192 = vmatmul.mubr.msk.bf16.gmra.mrb[84].mxu1 %vm206_vm2, %v4988_v0 }
  0xd1   : > { %4195 = vmatprep.mubr.msk.bf16.mxu1 %vm206_vm2, %v5002_v47 }
  0xd5   : > { %4226 = vmatmul.mubr.msk.bf16.gmra.mrb[84].mxu0 %vm206_vm2, %v4924_v23 }
  0xd6   : > { %4229 = vmatprep.mubr.msk.bf16.mxu0 %vm206_vm2, %v4955_v59 }
  0xd8   : > { %4196 = vmatmul.mubr.msk.bf16.gmra.mrb[88].mxu1 %vm206_vm2, %v5006_v52 }
  0xd9   : > { %4199 = vmatprep.mubr.msk.bf16.mxu1 %vm206_vm2, %v5010_v7 }
  0xdd   : > { %4230 = vmatmul.mubr.msk.bf16.gmra.mrb[88].mxu0 %vm206_vm2, %v4984_v39 }
  0xde   : > { %4233 = vmatprep.mubr.msk.bf16.mxu0 %vm206_vm2, %v2510_v11 }
  0xe0   : > { %4200 = vmatmul.mubr.msk.bf16.gmra.mrb[92].mxu1 %vm206_vm2, %v4992_v49 }
  0xe1   : > { %4203 = vmatprep.mubr.msk.bf16.mxu1 %vm206_vm2, %v5020_v61 }
  0xe5   : > { %4234 = vmatmul.mubr.msk.bf16.gmra.mrb[92].mxu0 %vm206_vm2, %v4755_v12 }
  0xe6   : > { %4237 = vmatprep.mubr.msk.bf16.mxu0 %vm206_vm2, %v4772_v20 }
  0xe8   : > { %4204 = vmatmul.mubr.msk.bf16.gmra.mrb[96].mxu1 %vm206_vm2, %v5031_v15 }
  0xe9   : > { %4207 = vmatprep.mubr.msk.bf16.mxu1 %vm206_vm2, %v5060_v51 }
  0xed   : > { %4238 = vmatmul.mubr.msk.bf16.gmra.mrb[96].mxu0 %vm206_vm2, %v4806_v57 }
  0xee   : > { %4241 = vmatprep.mubr.msk.bf16.mxu0 %vm206_vm2, %v4880_v60  ;;  %v2519_v60 = vld [vmem:[#allocation2 + $0x88] sm:$0xff] }
  0xf0   : > { %4208 = vmatmul.mubr.msk.bf16.gmra.mrb[100].mxu1 %vm206_vm2, %v5064_v34 }
  0xf1   : > { %4211 = vmatprep.mubr.msk.bf16.mxu1 %vm206_vm2, %v5068_v35 }
  0xf5   : > { %4242 = vmatmul.mubr.msk.bf16.gmra.mrb[100].mxu0 %vm206_vm2, %v4884_v63 }
  0xf6   : > { %4245 = vmatprep.mubr.msk.bf16.mxu0 %vm206_vm2, %v4934_v50 }
  0xf8   : > { %4212 = vmatmul.mubr.msk.bf16.gmra.mrb[104].mxu1 %vm206_vm2, %v5077_v18 }
  0xf9   : > { %4215 = vmatprep.mubr.msk.bf16.mxu1 %vm206_vm2, %v5081_v22  ;;  %v4035_v12 = vpop.f32.mrb[0].mxu1 }
  0xfa   : > { %v4019_v19 = vpop.f32.mrb[0].mxu0  ;;  %857 = vst.msk [vmem:[#allocation3 + $0x90] sm:$0xff] %vm838_vm7, %v4035_v12  ;;  %v775_v20 = vpop.f32.mrb[1].mxu1 }
  0xfb   : > { %841 = vst.msk [vmem:[#allocation3 + $0x10] sm:$0xff] %vm838_vm7, %v4019_v19  ;;  %v711_v57 = vpop.f32.mrb[1].mxu0  ;;  %855 = vst.msk [vmem:[#allocation3 + $0x80] sm:$0xff] %vm838_vm7, %v775_v20  ;;  %v4036_v14 = vpop.f32.mrb[2].mxu1 }
  0xfc   : > { %839 = vst.msk [vmem:[#allocation3] sm:$0xff] %vm838_vm7, %v711_v57  ;;  %v4020_v1 = vpop.f32.mrb[2].mxu0  ;;  %858 = vst.msk [vmem:[#allocation3 + $0x98] sm:$0xff] %vm838_vm7, %v4036_v14  ;;  %v778_v63 = vpop.f32.mrb[3].mxu1 }
  0xfd   : > { %4246 = vmatmul.mubr.msk.bf16.gmra.mrb[104].mxu0 %vm206_vm2, %v4938_v55  ;;  %842 = vst.msk [vmem:[#allocation3 + $0x18] sm:$0xff] %vm838_vm7, %v4020_v1  ;;  %v714_v6 = vpop.f32.mrb[3].mxu0  ;;  %856 = vst.msk [vmem:[#allocation3 + $0x88] sm:$0xff] %vm838_vm7, %v778_v63 }
  0xfe   : > { %4249 = vmatprep.mubr.msk.bf16.mxu0 %vm206_vm2, %v5097_v33  ;;  %840 = vst.msk [vmem:[#allocation3 + $0x8] sm:$0xff] %vm838_vm7, %v714_v6 }
 0x100   : > { %4216 = vmatmul.mubr.msk.bf16.gmra.mrb[108].mxu1 %vm206_vm2, %v5196_v29 }
 0x101   : > { %4255 = vmatprep.mubr.msk.bf16.mxu1 %vm206_vm2, %v5099_v42  ;;  %v4039_v23 = vpop.f32.mrb[4].mxu1 }
 0x102   : > { %861 = vst.msk [vmem:[#allocation3 + $0xb0] sm:$0xff] %vm838_vm7, %v4039_v23  ;;  %v791_v50 = vpop.f32.mrb[5].mxu1 }
 0x103   : > { %859 = vst.msk [vmem:[#allocation3 + $0xa0] sm:$0xff] %vm838_vm7, %v791_v50  ;;  %v4040_v59 = vpop.f32.mrb[6].mxu1  ;;  %v1102_v43 = vld [vmem:[#allocation3] sm:$0xff] }
 0x104   : > { %862 = vst.msk [vmem:[#allocation3 + $0xb8] sm:$0xff] %vm838_vm7, %v4040_v59  ;;  %v794_v26 = vpop.f32.mrb[7].mxu1  ;;  %v1105_v24 = vld [vmem:[#allocation3 + $0x18] sm:$0xff] }
 0x105   : > { %4250 = vmatmul.mubr.msk.bf16.gmra.mrb[108].mxu0 %vm206_vm2, %v2519_v60  ;;  %860 = vst.msk [vmem:[#allocation3 + $0xa8] sm:$0xff] %vm838_vm7, %v794_v26  ;;  %v1103_v12 = vld [vmem:[#allocation3 + $0x8] sm:$0xff] }
 0x106   : > { %4289 = vmatprep.mubr.msk.bf16.mxu0 %vm206_vm2, %v4943_v41 }
 0x108   : > { %v4023_v40 = vpop.f32.mrb[4].mxu0  ;;  %4256 = vmatmul.mubr.msk.bf16.vlgmr.msra.gmra.mrb[112].mxu1 %vm206_vm2, %v5116_v53 }
 0x109   : > { %845 = vst.msk [vmem:[#allocation3 + $0x30] sm:$0xff] %vm838_vm7, %v4023_v40  ;;  %v727_v55 = vpop.f32.mrb[5].mxu0  ;;  %4259 = vmatprep.mubr.msk.bf16.mxu1 %vm206_vm2, %v5118_v28 }
 0x10a   : > { %843 = vst.msk [vmem:[#allocation3 + $0x20] sm:$0xff] %vm838_vm7, %v727_v55  ;;  %v4024_v39 = vpop.f32.mrb[6].mxu0 }
 0x10b   : > { %846 = vst.msk [vmem:[#allocation3 + $0x38] sm:$0xff] %vm838_vm7, %v4024_v39  ;;  %v730_v41 = vpop.f32.mrb[7].mxu0  ;;  %v4043_v25 = vpop.f32.mrb[8].mxu1 }
 0x10c   : > { %844 = vst.msk [vmem:[#allocation3 + $0x28] sm:$0xff] %vm838_vm7, %v730_v41  ;;  %865 = vst.msk [vmem:[#allocation3 + $0xd0] sm:$0xff] %vm838_vm7, %v4043_v25  ;;  %v807_v48 = vpop.f32.mrb[9].mxu1 }
 0x10d   : > { %4290 = vmatmul.mubr.msk.bf16.vlgmr.msra.gmra.mrb[112].mxu0 %vm206_vm2, %v4967_v9  ;;  %863 = vst.msk [vmem:[#allocation3 + $0xc0] sm:$0xff] %vm838_vm7, %v807_v48  ;;  %v4044_v46 = vpop.f32.mrb[10].mxu1 }
 0x10e   : > { %4293 = vmatprep.mubr.msk.bf16.mxu0 %vm206_vm2, %v4988_v0  ;;  %866 = vst.msk [vmem:[#allocation3 + $0xd8] sm:$0xff] %vm838_vm7, %v4044_v46  ;;  %v810_v58 = vpop.f32.mrb[11].mxu1 }
 0x10f   : > { %864 = vst.msk [vmem:[#allocation3 + $0xc8] sm:$0xff] %vm838_vm7, %v810_v58 }
 0x110   : > { %v4027_v38 = vpop.f32.mrb[8].mxu0  ;;  %4260 = vmatmul.mubr.msk.bf16.gmra.mrb[116].mxu1 %vm206_vm2, %v5128_v30  ;;  %v1104_v30 = vld [vmem:[#allocation3 + $0x10] sm:$0xff] }
 0x111   : > { %849 = vst.msk [vmem:[#allocation3 + $0x50] sm:$0xff] %vm838_vm7, %v4027_v38  ;;  %v743_v62 = vpop.f32.mrb[9].mxu0  ;;  %4263 = vmatprep.mubr.msk.bf16.mxu1 %vm206_vm2, %v5130_v37  ;;  %v1108_v20 = vld [vmem:[#allocation3 + $0x30] sm:$0xff]  ;;  %v1106_v60 = vld [vmem:[#allocation3 + $0x20] sm:$0xff] }
 0x112   : > { %847 = vst.msk [vmem:[#allocation3 + $0x40] sm:$0xff] %vm838_vm7, %v743_v62  ;;  %v4028_v9 = vpop.f32.mrb[10].mxu0  ;;  %v1109_v40 = vld [vmem:[#allocation3 + $0x38] sm:$0xff] }
 0x113   : > { %850 = vst.msk [vmem:[#allocation3 + $0x58] sm:$0xff] %vm838_vm7, %v4028_v9  ;;  %v746_v0 = vpop.f32.mrb[11].mxu0  ;;  %v4047_v2 = vpop.f32.mrb[12].mxu1  ;;  %v1107_v39 = vld [vmem:[#allocation3 + $0x28] sm:$0xff] }
 0x114   : > { %848 = vst.msk [vmem:[#allocation3 + $0x48] sm:$0xff] %vm838_vm7, %v746_v0  ;;  %869 = vst.msk [vmem:[#allocation3 + $0xf0] sm:$0xff] %vm838_vm7, %v4047_v2  ;;  %v823_v42 = vpop.f32.mrb[13].mxu1 }
 0x115   : > { %4294 = vmatmul.mubr.msk.bf16.gmra.mrb[116].mxu0 %vm206_vm2, %v5002_v47  ;;  %867 = vst.msk [vmem:[#allocation3 + $0xe0] sm:$0xff] %vm838_vm7, %v823_v42  ;;  %v4048_v17 = vpop.f32.mrb[14].mxu1 }
 0x116   : > { %4297 = vmatprep.mubr.msk.bf16.mxu0 %vm206_vm2, %v5006_v52  ;;  %870 = vst.msk [vmem:[#allocation3 + $0xf8] sm:$0xff] %vm838_vm7, %v4048_v17  ;;  %v826_v53 = vpop.f32.mrb[15].mxu1 }
 0x117   : > { %868 = vst.msk [vmem:[#allocation3 + $0xe8] sm:$0xff] %vm838_vm7, %v826_v53 }
 0x118   : > { %v4031_v33 = vpop.f32.mrb[12].mxu0  ;;  %4264 = vmatmul.mubr.msk.bf16.gmra.mrb[120].mxu1 %vm206_vm2, %v5140_v56 }
 0x119   : > { %853 = vst.msk [vmem:[#allocation3 + $0x70] sm:$0xff] %vm838_vm7, %v4031_v33  ;;  %v759_v16 = vpop.f32.mrb[13].mxu0  ;;  %4267 = vmatprep.mubr.msk.bf16.mxu1 %vm206_vm2, %v5142_v54  ;;  %v1110_v0 = vld [vmem:[#allocation3 + $0x40] sm:$0xff] }
 0x11a   : > { %851 = vst.msk [vmem:[#allocation3 + $0x60] sm:$0xff] %vm838_vm7, %v759_v16  ;;  %v4032_v47 = vpop.f32.mrb[14].mxu0  ;;  %v1113_v17 = vld [vmem:[#allocation3 + $0x58] sm:$0xff] }
 0x11b   : > { %854 = vst.msk [vmem:[#allocation3 + $0x78] sm:$0xff] %vm838_vm7, %v4032_v47  ;;  %v762_v52 = vpop.f32.mrb[15].mxu0  ;;  %v4053_v28 = vpop.f32.mrb[16].mxu1 }
 0x11c   : > { %852 = vst.msk [vmem:[#allocation3 + $0x68] sm:$0xff] %vm838_vm7, %v762_v52  ;;  %v1136_v32 = vadd.f32 %v4053_v28, %v1104_v30  ;;  %v975_v13 = vpop.f32.mrb[17].mxu1  ;;  %v1111_v28 = vld [vmem:[#allocation3 + $0x48] sm:$0xff] }
 0x11d   : > { %4298 = vmatmul.mubr.msk.bf16.gmra.mrb[120].mxu0 %vm206_vm2, %v5010_v7  ;;  %v1134_v27 = vadd.f32 %v1102_v43, %v975_v13  ;;  %v4054_v4 = vpop.f32.mrb[18].mxu1 }
 0x11e   : > { %4301 = vmatprep.mubr.msk.bf16.mxu0 %vm206_vm2, %v4992_v49  ;;  %1168 = vst.msk [vmem:[#allocation3 + $0x10] sm:$0xff] %vm838_vm7, %v1136_v32  ;;  %v1137_v7 = vadd.f32 %v4054_v4, %v1105_v24  ;;  %v978_v11 = vpop.f32.mrb[19].mxu1 }
 0x11f   : > { %1166 = vst.msk [vmem:[#allocation3] sm:$0xff] %vm838_vm7, %v1134_v27  ;;  %v1135_v49 = vadd.f32 %v1103_v12, %v978_v11 }
 0x120   : > { %v4087_v37 = vpop.f32.mrb[16].mxu0  ;;  %1169 = vst.msk [vmem:[#allocation3 + $0x18] sm:$0xff] %vm838_vm7, %v1137_v7  ;;  %4268 = vmatmul.mubr.msk.bf16.gmra.mrb[124].mxu1 %vm206_vm2, %v5152_v10 }
 0x121   : > { %v1302_v21 = vpop.f32.mrb[17].mxu0  ;;  %1167 = vst.msk [vmem:[#allocation3 + $0x8] sm:$0xff] %vm838_vm7, %v1135_v49  ;;  %4271 = vmatprep.mubr.msk.bf16.mxu1 %vm206_vm2, %v5154_v31  ;;  %v1114_v7 = vld [vmem:[#allocation3 + $0x60] sm:$0xff] }
 0x122   : > { %v4088_v56 = vpop.f32.mrb[18].mxu0 }
 0x123   : > { %v1305_v54 = vpop.f32.mrb[19].mxu0  ;;  %v4057_v19 = vpop.f32.mrb[20].mxu1 }
 0x124   : > { %v1140_v14 = vadd.f32 %v4057_v19, %v1108_v20  ;;  %v991_v1 = vpop.f32.mrb[21].mxu1  ;;  %v1117_v19 = vld [vmem:[#allocation3 + $0x78] sm:$0xff] }
 0x125   : > { %4302 = vmatmul.mubr.msk.bf16.gmra.mrb[124].mxu0 %vm206_vm2, %v5020_v61  ;;  %v1431_v6 = vld [vmem:[#allocation3 + $0x10] sm:$0xff]  ;;  %v1138_v10 = vadd.f32 %v1106_v60, %v991_v1  ;;  %v4058_v23 = vpop.f32.mrb[22].mxu1  ;;  %v1115_v1 = vld [vmem:[#allocation3 + $0x68] sm:$0xff] }
 0x126   : > { %4305 = vmatprep.mubr.msk.bf16.mxu0 %vm206_vm2, %v5031_v15  ;;  %v1463_v50 = vadd.f32 %v4087_v37, %v1431_v6  ;;  %1172 = vst.msk [vmem:[#allocation3 + $0x30] sm:$0xff] %vm838_vm7, %v1140_v14  ;;  %v1429_v55 = vld [vmem:[#allocation3] sm:$0xff]  ;;  %v1141_v31 = vadd.f32 %v4058_v23, %v1109_v40  ;;  %v994_v59 = vpop.f32.mrb[23].mxu1 }
 0x127   : > { %v1461_v26 = vadd.f32 %v1429_v55, %v1302_v21  ;;  %1170 = vst.msk [vmem:[#allocation3 + $0x20] sm:$0xff] %vm838_vm7, %v1138_v10  ;;  %v1432_v41 = vld [vmem:[#allocation3 + $0x18] sm:$0xff]  ;;  %v1139_v25 = vadd.f32 %v1107_v39, %v994_v59  ;;  %v1118_v59 = vld [vmem:[#allocation3 + $0x80] sm:$0xff]  ;;  %v2846_v39 = vld [vmem:[#allocation2 + $0x118] sm:$0xff] }
 0x128   : > { %v4091_v57 = vpop.f32.mrb[20].mxu0  ;;  %1495 = vst.msk [vmem:[#allocation3 + $0x10] sm:$0xff] %vm838_vm7, %v1463_v50  ;;  %v1464_v38 = vadd.f32 %v4088_v56, %v1432_v41  ;;  %1173 = vst.msk [vmem:[#allocation3 + $0x38] sm:$0xff] %vm838_vm7, %v1141_v31  ;;  %v1430_v48 = vld [vmem:[#allocation3 + $0x8] sm:$0xff]  ;;  %4272 = vmatmul.mubr.msk.bf16.gmra.mrb[128].mxu1 %vm206_vm2, %v5164_v45  ;;  %v1112_v45 = vld [vmem:[#allocation3 + $0x50] sm:$0xff] }
 0x129   : > { %v1318_v63 = vpop.f32.mrb[21].mxu0  ;;  %1493 = vst.msk [vmem:[#allocation3] sm:$0xff] %vm838_vm7, %v1461_v26  ;;  %v1462_v62 = vadd.f32 %v1430_v48, %v1305_v54  ;;  %1171 = vst.msk [vmem:[#allocation3 + $0x28] sm:$0xff] %vm838_vm7, %v1139_v25  ;;  %4275 = vmatprep.mubr.msk.bf16.mxu1 %vm206_vm2, %v5166_v44  ;;  %v3173_v48 = vld [vmem:[#allocation2 + $0x1a8] sm:$0xff] }
 0x12a   : > { %v4092_v61 = vpop.f32.mrb[22].mxu0  ;;  %1496 = vst.msk [vmem:[#allocation3 + $0x18] sm:$0xff] %vm838_vm7, %v1464_v38  ;;  %v1121_v38 = vld [vmem:[#allocation3 + $0x98] sm:$0xff] }
 0x12b   : > { %v1321_v15 = vpop.f32.mrb[23].mxu0  ;;  %1494 = vst.msk [vmem:[#allocation3 + $0x8] sm:$0xff] %vm838_vm7, %v1462_v62  ;;  %v4061_v46 = vpop.f32.mrb[24].mxu1 }
 0x12c   : > { %v1144_v58 = vadd.f32 %v4061_v46, %v1112_v45 }
 0x12d   : > { %4306 = vmatmul.mubr.msk.bf16.gmra.mrb[128].mxu0 %vm206_vm2, %v5060_v51  ;;  %v1007_v51 = vpop.f32.mrb[25].mxu1  ;;  %v1435_v33 = vld [vmem:[#allocation3 + $0x30] sm:$0xff] }
 0x12e   : > { %4309 = vmatprep.mubr.msk.bf16.mxu0 %vm206_vm2, %v5064_v34  ;;  %v1142_v42 = vadd.f32 %v1110_v0, %v1007_v51  ;;  %v4062_v16 = vpop.f32.mrb[26].mxu1  ;;  %v1467_v44 = vadd.f32 %v4091_v57, %v1435_v33  ;;  %1176 = vst.msk [vmem:[#allocation3 + $0x50] sm:$0xff] %vm838_vm7, %v1144_v58  ;;  %v1433_v34 = vld [vmem:[#allocation3 + $0x20] sm:$0xff] }
 0x12f   : > { %v1145_v53 = vadd.f32 %v4062_v16, %v1113_v17  ;;  %v1010_v52 = vpop.f32.mrb[27].mxu1  ;;  %v1465_v37 = vadd.f32 %v1433_v34, %v1318_v63  ;;  %v1436_v32 = vld [vmem:[#allocation3 + $0x38] sm:$0xff] }
 0x130   : > { %v4095_v9 = vpop.f32.mrb[24].mxu0  ;;  %1174 = vst.msk [vmem:[#allocation3 + $0x40] sm:$0xff] %vm838_vm7, %v1142_v42  ;;  %v1143_v13 = vadd.f32 %v1111_v28, %v1010_v52  ;;  %1499 = vst.msk [vmem:[#allocation3 + $0x30] sm:$0xff] %vm838_vm7, %v1467_v44  ;;  %v1468_v43 = vadd.f32 %v4092_v61, %v1436_v32  ;;  %v1434_v21 = vld [vmem:[#allocation3 + $0x28] sm:$0xff]  ;;  %4276 = vmatmul.mubr.msk.bf16.gmra.mrb[132].mxu1 %vm206_vm2, %v5176_v3  ;;  %v1116_v3 = vld [vmem:[#allocation3 + $0x70] sm:$0xff] }
 0x131   : > { %v1334_v2 = vpop.f32.mrb[25].mxu0  ;;  %1177 = vst.msk [vmem:[#allocation3 + $0x58] sm:$0xff] %vm838_vm7, %v1145_v53  ;;  %1497 = vst.msk [vmem:[#allocation3 + $0x20] sm:$0xff] %vm838_vm7, %v1465_v37  ;;  %v1466_v27 = vadd.f32 %v1434_v21, %v1321_v15  ;;  %4279 = vmatprep.mubr.msk.bf16.mxu1 %vm206_vm2, %v5178_v8  ;;  %v1122_v52 = vld [vmem:[#allocation3 + $0xa0] sm:$0xff] }
 0x132   : > { %v4096_v47 = vpop.f32.mrb[26].mxu0  ;;  %1175 = vst.msk [vmem:[#allocation3 + $0x48] sm:$0xff] %vm838_vm7, %v1143_v13  ;;  %1500 = vst.msk [vmem:[#allocation3 + $0x38] sm:$0xff] %vm838_vm7, %v1468_v43  ;;  %v1125_v13 = vld [vmem:[#allocation3 + $0xb8] sm:$0xff] }
 0x133   : > { %v1337_v30 = vpop.f32.mrb[27].mxu0  ;;  %1498 = vst.msk [vmem:[#allocation3 + $0x28] sm:$0xff] %vm838_vm7, %v1466_v27  ;;  %v4065_v4 = vpop.f32.mrb[28].mxu1 }
 0x134   : > { %v1148_v56 = vadd.f32 %v4065_v4, %v1116_v3 }
 0x135   : > { %4310 = vmatmul.mubr.msk.bf16.gmra.mrb[132].mxu0 %vm206_vm2, %v5068_v35  ;;  %v1023_v35 = vpop.f32.mrb[29].mxu1  ;;  %v1439_v12 = vld [vmem:[#allocation3 + $0x50] sm:$0xff] }
 0x136   : > { %4313 = vmatprep.mubr.msk.bf16.mxu0 %vm206_vm2, %v5077_v18  ;;  %v1146_v54 = vadd.f32 %v1114_v7, %v1023_v35  ;;  %v4066_v49 = vpop.f32.mrb[30].mxu1  ;;  %v1471_v8 = vadd.f32 %v4095_v9, %v1439_v12  ;;  %1180 = vst.msk [vmem:[#allocation3 + $0x70] sm:$0xff] %vm838_vm7, %v1148_v56  ;;  %v1119_v9 = vld [vmem:[#allocation3 + $0x88] sm:$0xff] }
 0x137   : > { %v1437_v18 = vld [vmem:[#allocation3 + $0x40] sm:$0xff]  ;;  %v1149_v57 = vadd.f32 %v4066_v49, %v1117_v19  ;;  %v1026_v14 = vpop.f32.mrb[31].mxu1 }
 0x138   : > { %v4099_v24 = vpop.f32.mrb[28].mxu0  ;;  %v1469_v63 = vadd.f32 %v1437_v18, %v1334_v2  ;;  %1178 = vst.msk [vmem:[#allocation3 + $0x60] sm:$0xff] %vm838_vm7, %v1146_v54  ;;  %v1440_v6 = vld [vmem:[#allocation3 + $0x58] sm:$0xff]  ;;  %v1147_v10 = vadd.f32 %v1115_v1, %v1026_v14  ;;  %1503 = vst.msk [vmem:[#allocation3 + $0x50] sm:$0xff] %vm838_vm7, %v1471_v8  ;;  %4280 = vmatmul.mubr.msk.bf16.gmra.mrb[136].mxu1 %vm206_vm2, %v5190_v36  ;;  %v1120_v36 = vld [vmem:[#allocation3 + $0x90] sm:$0xff] }
 0x139   : > { %v1350_v11 = vpop.f32.mrb[29].mxu0  ;;  %v1472_v23 = vadd.f32 %v4096_v47, %v1440_v6  ;;  %1181 = vst.msk [vmem:[#allocation3 + $0x78] sm:$0xff] %vm838_vm7, %v1149_v57  ;;  %v1438_v40 = vld [vmem:[#allocation3 + $0x48] sm:$0xff]  ;;  %4283 = vmatprep.mubr.msk.bf16.mxu1 %vm206_vm2, %v5271_v5  ;;  %v1124_v47 = vld [vmem:[#allocation3 + $0xb0] sm:$0xff]  ;;  %v1126_v14 = vld [vmem:[#allocation3 + $0xc0] sm:$0xff] }
 0x13a   : > { %v4100_v20 = vpop.f32.mrb[30].mxu0  ;;  %1501 = vst.msk [vmem:[#allocation3 + $0x40] sm:$0xff] %vm838_vm7, %v1469_v63  ;;  %v1470_v61 = vadd.f32 %v1438_v40, %v1337_v30  ;;  %1179 = vst.msk [vmem:[#allocation3 + $0x68] sm:$0xff] %vm838_vm7, %v1147_v10  ;;  %v1129_v10 = vld [vmem:[#allocation3 + $0xd8] sm:$0xff] }
 0x13b   : > { %v1353_v60 = vpop.f32.mrb[31].mxu0  ;;  %1504 = vst.msk [vmem:[#allocation3 + $0x58] sm:$0xff] %vm838_vm7, %v1472_v23  ;;  %v4069_v50 = vpop.f32.mrb[32].mxu1 }
 0x13c   : > { %1502 = vst.msk [vmem:[#allocation3 + $0x48] sm:$0xff] %vm838_vm7, %v1470_v61  ;;  %v1152_v31 = vadd.f32 %v4069_v50, %v1120_v36 }
 0x13d   : > { %4314 = vmatmul.mubr.msk.bf16.gmra.mrb[136].mxu0 %vm206_vm2, %v5081_v22  ;;  %v1039_v22 = vpop.f32.mrb[33].mxu1  ;;  %v1443_v26 = vld [vmem:[#allocation3 + $0x70] sm:$0xff] }
 0x13e   : > { %4317 = vmatprep.mubr.msk.bf16.mxu0 %vm206_vm2, %v5196_v29  ;;  %v1150_v41 = vadd.f32 %v1118_v59, %v1039_v22  ;;  %v4070_v25 = vpop.f32.mrb[34].mxu1  ;;  %v1475_v62 = vadd.f32 %v4099_v24, %v1443_v26  ;;  %1184 = vst.msk [vmem:[#allocation3 + $0x90] sm:$0xff] %vm838_vm7, %v1152_v31  ;;  %v1123_v24 = vld [vmem:[#allocation3 + $0xa8] sm:$0xff] }
 0x13f   : > { %v1441_v29 = vld [vmem:[#allocation3 + $0x60] sm:$0xff]  ;;  %v1153_v46 = vadd.f32 %v4070_v25, %v1121_v38  ;;  %v1042_v45 = vpop.f32.mrb[35].mxu1  ;;  %v1132_v38 = vld [vmem:[#allocation3 + $0xf0] sm:$0xff] }
 0x140   : > { %v4103_v55 = vpop.f32.mrb[32].mxu0  ;;  %v1473_v51 = vadd.f32 %v1441_v29, %v1350_v11  ;;  %1182 = vst.msk [vmem:[#allocation3 + $0x80] sm:$0xff] %vm838_vm7, %v1150_v41  ;;  %v1444_v0 = vld [vmem:[#allocation3 + $0x78] sm:$0xff]  ;;  %v1151_v2 = vadd.f32 %v1119_v9, %v1042_v45  ;;  %1507 = vst.msk [vmem:[#allocation3 + $0x70] sm:$0xff] %vm838_vm7, %v1475_v62  ;;  %4284 = vmatmul.mubr.msk.bf16.gmra.mrb[140].mxu1 %vm206_vm2, %v2846_v39  ;;  %v1130_v29 = vld [vmem:[#allocation3 + $0xe0] sm:$0xff] }
 0x141   : > { %v1366_v15 = vpop.f32.mrb[33].mxu0  ;;  %v1476_v33 = vadd.f32 %v4100_v20, %v1444_v0  ;;  %1185 = vst.msk [vmem:[#allocation3 + $0x98] sm:$0xff] %vm838_vm7, %v1153_v46  ;;  %v1442_v42 = vld [vmem:[#allocation3 + $0x68] sm:$0xff]  ;;  %v1128_v20 = vld [vmem:[#allocation3 + $0xd0] sm:$0xff] }
 0x142   : > { %v4104_v5 = vpop.f32.mrb[34].mxu0  ;;  %1505 = vst.msk [vmem:[#allocation3 + $0x60] sm:$0xff] %vm838_vm7, %v1473_v51  ;;  %v1474_v16 = vadd.f32 %v1442_v42, %v1353_v60  ;;  %1183 = vst.msk [vmem:[#allocation3 + $0x88] sm:$0xff] %vm838_vm7, %v1151_v2  ;;  %v1133_v51 = vld [vmem:[#allocation3 + $0xf8] sm:$0xff] }
 0x143   : > { %v1369_v58 = vpop.f32.mrb[35].mxu0  ;;  %1508 = vst.msk [vmem:[#allocation3 + $0x78] sm:$0xff] %vm838_vm7, %v1476_v33  ;;  %v4073_v17 = vpop.f32.mrb[36].mxu1 }
 0x144   : > { %1506 = vst.msk [vmem:[#allocation3 + $0x68] sm:$0xff] %vm838_vm7, %v1474_v16  ;;  %v1156_v34 = vadd.f32 %v4073_v17, %v1124_v47  ;;  %v1055_v53 = vpop.f32.mrb[37].mxu1  ;;  %v1131_v17 = vld [vmem:[#allocation3 + $0xe8] sm:$0xff] }
 0x145   : > { %4318 = vmatmul.mubr.msk.bf16.gmra.mrb[140].mxu0 %vm206_vm2, %v3173_v48  ;;  %v1447_v30 = vld [vmem:[#allocation3 + $0x90] sm:$0xff]  ;;  %v1154_v37 = vadd.f32 %v1122_v52, %v1055_v53  ;;  %v4074_v32 = vpop.f32.mrb[38].mxu1 }
 0x146   : > { %v1479_v21 = vadd.f32 %v4103_v55, %v1447_v30  ;;  %1188 = vst.msk [vmem:[#allocation3 + $0xb0] sm:$0xff] %vm838_vm7, %v1156_v34  ;;  %v1157_v4 = vadd.f32 %v4074_v32, %v1125_v13  ;;  %v1058_v3 = vpop.f32.mrb[39].mxu1  ;;  %v1127_v55 = vld [vmem:[#allocation3 + $0xc8] sm:$0xff]  ;;  %v1757_v32 = vld [vmem:[#allocation3 + $0x10] sm:$0xff] }
 0x147   : > { %v1445_v27 = vld [vmem:[#allocation3 + $0x80] sm:$0xff]  ;;  %1186 = vst.msk [vmem:[#allocation3 + $0xa0] sm:$0xff] %vm838_vm7, %v1154_v37  ;;  %v1155_v11 = vadd.f32 %v1123_v24, %v1058_v3 }
 0x148   : > { %v4107_v44 = vpop.f32.mrb[36].mxu0  ;;  %v1477_v35 = vadd.f32 %v1445_v27, %v1366_v15  ;;  %v1448_v7 = vld [vmem:[#allocation3 + $0x98] sm:$0xff]  ;;  %1511 = vst.msk [vmem:[#allocation3 + $0x90] sm:$0xff] %vm838_vm7, %v1479_v21  ;;  %1189 = vst.msk [vmem:[#allocation3 + $0xb8] sm:$0xff] %vm838_vm7, %v1157_v4  ;;  %v1755_v27 = vld [vmem:[#allocation3] sm:$0xff] }
 0x149   : > { %v1382_v28 = vpop.f32.mrb[37].mxu0  ;;  %v1480_v12 = vadd.f32 %v4104_v5, %v1448_v7  ;;  %v1446_v54 = vld [vmem:[#allocation3 + $0x88] sm:$0xff]  ;;  %1187 = vst.msk [vmem:[#allocation3 + $0xa8] sm:$0xff] %vm838_vm7, %v1155_v11 }
 0x14a   : > { %v4108_v43 = vpop.f32.mrb[38].mxu0  ;;  %1509 = vst.msk [vmem:[#allocation3 + $0x80] sm:$0xff] %vm838_vm7, %v1477_v35  ;;  %v1478_v49 = vadd.f32 %v1446_v54, %v1369_v58  ;;  %v1758_v35 = vld [vmem:[#allocation3 + $0x18] sm:$0xff] }
 0x14b   : > { %v1385_v56 = vpop.f32.mrb[39].mxu0  ;;  %1512 = vst.msk [vmem:[#allocation3 + $0x98] sm:$0xff] %vm838_vm7, %v1480_v12  ;;  %v4077_v19 = vpop.f32.mrb[40].mxu1 }
 0x14c   : > { %1510 = vst.msk [vmem:[#allocation3 + $0x88] sm:$0xff] %vm838_vm7, %v1478_v49  ;;  %v1160_v18 = vadd.f32 %v4077_v19, %v1128_v20  ;;  %v1071_v57 = vpop.f32.mrb[41].mxu1  ;;  %v1756_v19 = vld [vmem:[#allocation3 + $0x8] sm:$0xff] }
 0x14d   : > { %v1451_v60 = vld [vmem:[#allocation3 + $0xb0] sm:$0xff]  ;;  %v1158_v63 = vadd.f32 %v1126_v14, %v1071_v57  ;;  %v4078_v6 = vpop.f32.mrb[42].mxu1 }
 0x14e   : > { %v1483_v40 = vadd.f32 %v4107_v44, %v1451_v60  ;;  %1192 = vst.msk [vmem:[#allocation3 + $0xd0] sm:$0xff] %vm838_vm7, %v1160_v18  ;;  %v1449_v61 = vld [vmem:[#allocation3 + $0xa0] sm:$0xff]  ;;  %v1161_v50 = vadd.f32 %v4078_v6, %v1129_v10  ;;  %v1074_v36 = vpop.f32.mrb[43].mxu1  ;;  %v1761_v6 = vld [vmem:[#allocation3 + $0x30] sm:$0xff] }
 0x14f   : > { %v1481_v22 = vadd.f32 %v1449_v61, %v1382_v28  ;;  %1190 = vst.msk [vmem:[#allocation3 + $0xc0] sm:$0xff] %vm838_vm7, %v1158_v63  ;;  %v1452_v59 = vld [vmem:[#allocation3 + $0xb8] sm:$0xff]  ;;  %v1159_v39 = vadd.f32 %v1127_v55, %v1074_v36  ;;  %v1759_v61 = vld [vmem:[#allocation3 + $0x20] sm:$0xff] }
 0x150   : > { %v4111_v8 = vpop.f32.mrb[40].mxu0  ;;  %1515 = vst.msk [vmem:[#allocation3 + $0xb0] sm:$0xff] %vm838_vm7, %v1483_v40  ;;  %v1484_v15 = vadd.f32 %v4108_v43, %v1452_v59  ;;  %1193 = vst.msk [vmem:[#allocation3 + $0xd8] sm:$0xff] %vm838_vm7, %v1161_v50  ;;  %v1450_v26 = vld [vmem:[#allocation3 + $0xa8] sm:$0xff] }
 0x151   : > { %v1398_v1 = vpop.f32.mrb[41].mxu0  ;;  %1513 = vst.msk [vmem:[#allocation3 + $0xa0] sm:$0xff] %vm838_vm7, %v1481_v22  ;;  %v1482_v41 = vadd.f32 %v1450_v26, %v1385_v56  ;;  %1191 = vst.msk [vmem:[#allocation3 + $0xc8] sm:$0xff] %vm838_vm7, %v1159_v39  ;;  %v1762_v22 = vld [vmem:[#allocation3 + $0x38] sm:$0xff] }
 0x152   : > { %v4112_v23 = vpop.f32.mrb[42].mxu0  ;;  %1516 = vst.msk [vmem:[#allocation3 + $0xb8] sm:$0xff] %vm838_vm7, %v1484_v15 }
 0x153   : > { %v1401_v31 = vpop.f32.mrb[43].mxu0  ;;  %1514 = vst.msk [vmem:[#allocation3 + $0xa8] sm:$0xff] %vm838_vm7, %v1482_v41  ;;  %v4081_v25 = vpop.f32.mrb[44].mxu1 }
 0x154   : > { %v1164_v48 = vadd.f32 %v4081_v25, %v1132_v38  ;;  %v1087_v62 = vpop.f32.mrb[45].mxu1  ;;  %v1760_v25 = vld [vmem:[#allocation3 + $0x28] sm:$0xff] }
 0x155   : > { %v1455_v45 = vld [vmem:[#allocation3 + $0xd0] sm:$0xff]  ;;  %v1162_v9 = vadd.f32 %v1130_v29, %v1087_v62  ;;  %v4082_v58 = vpop.f32.mrb[46].mxu1 }
 0x156   : > { %v1487_v2 = vadd.f32 %v4111_v8, %v1455_v45  ;;  %1196 = vst.msk [vmem:[#allocation3 + $0xf0] sm:$0xff] %vm838_vm7, %v1164_v48  ;;  %v1453_v33 = vld [vmem:[#allocation3 + $0xc0] sm:$0xff]  ;;  %v1165_v42 = vadd.f32 %v4082_v58, %v1133_v51  ;;  %v1090_v16 = vpop.f32.mrb[47].mxu1  ;;  %v1765_v58 = vld [vmem:[#allocation3 + $0x50] sm:$0xff] }
 0x157   : > { %v1485_v44 = vadd.f32 %v1453_v33, %v1398_v1  ;;  %1194 = vst.msk [vmem:[#allocation3 + $0xe0] sm:$0xff] %vm838_vm7, %v1162_v9  ;;  %v1456_v34 = vld [vmem:[#allocation3 + $0xd8] sm:$0xff]  ;;  %v1163_v53 = vadd.f32 %v1131_v17, %v1090_v16  ;;  %v1763_v33 = vld [vmem:[#allocation3 + $0x40] sm:$0xff] }
 0x158   : > { %v4115_v5 = vpop.f32.mrb[44].mxu0  ;;  %1519 = vst.msk [vmem:[#allocation3 + $0xd0] sm:$0xff] %vm838_vm7, %v1487_v2  ;;  %v1488_v52 = vadd.f32 %v4112_v23, %v1456_v34  ;;  %1197 = vst.msk [vmem:[#allocation3 + $0xf8] sm:$0xff] %vm838_vm7, %v1165_v42  ;;  %v1454_v28 = vld [vmem:[#allocation3 + $0xc8] sm:$0xff] }
 0x159   : > { %v1414_v46 = vpop.f32.mrb[45].mxu0  ;;  %1517 = vst.msk [vmem:[#allocation3 + $0xc0] sm:$0xff] %vm838_vm7, %v1485_v44  ;;  %v1486_v30 = vadd.f32 %v1454_v28, %v1401_v31  ;;  %1195 = vst.msk [vmem:[#allocation3 + $0xe8] sm:$0xff] %vm838_vm7, %v1163_v53  ;;  %v1766_v44 = vld [vmem:[#allocation3 + $0x58] sm:$0xff] }
 0x15a   : > { %v4116_v0 = vpop.f32.mrb[46].mxu0  ;;  %1520 = vst.msk [vmem:[#allocation3 + $0xd8] sm:$0xff] %vm838_vm7, %v1488_v52 }
 0x15b   : > { %v1417_v47 = vpop.f32.mrb[47].mxu0  ;;  %1518 = vst.msk [vmem:[#allocation3 + $0xc8] sm:$0xff] %vm838_vm7, %v1486_v30  ;;  %v4121_v37 = vpop.f32.mrb[48].mxu1 }
 0x15c   : > { %v1789_v43 = vadd.f32 %v4121_v37, %v1757_v32  ;;  %v1628_v21 = vpop.f32.mrb[49].mxu1  ;;  %v1764_v37 = vld [vmem:[#allocation3 + $0x48] sm:$0xff] }
 0x15d   : > { %v1459_v3 = vld [vmem:[#allocation3 + $0xf0] sm:$0xff]  ;;  %v1787_v24 = vadd.f32 %v1755_v27, %v1628_v21  ;;  %v4122_v56 = vpop.f32.mrb[50].mxu1 }
 0x15e   : > { %v1491_v11 = vadd.f32 %v4115_v5, %v1459_v3  ;;  %v1457_v12 = vld [vmem:[#allocation3 + $0xe0] sm:$0xff]  ;;  %1821 = vst.msk [vmem:[#allocation3 + $0x10] sm:$0xff] %vm838_vm7, %v1789_v43  ;;  %v1790_v54 = vadd.f32 %v4122_v56, %v1758_v35  ;;  %v1631_v49 = vpop.f32.mrb[51].mxu1  ;;  %v1769_v56 = vld [vmem:[#allocation3 + $0x70] sm:$0xff] }
 0x15f   : > { %v1489_v8 = vadd.f32 %v1457_v12, %v1414_v46  ;;  %v1460_v18 = vld [vmem:[#allocation3 + $0xf8] sm:$0xff]  ;;  %1819 = vst.msk [vmem:[#allocation3] sm:$0xff] %vm838_vm7, %v1787_v24  ;;  %v1788_v57 = vadd.f32 %v1756_v19, %v1631_v49  ;;  %v1767_v12 = vld [vmem:[#allocation3 + $0x60] sm:$0xff] }
 0x160   : > { %v4155_v13 = vpop.f32.mrb[48].mxu0  ;;  %1523 = vst.msk [vmem:[#allocation3 + $0xf0] sm:$0xff] %vm838_vm7, %v1491_v11  ;;  %v1492_v14 = vadd.f32 %v4116_v0, %v1460_v18  ;;  %v1458_v1 = vld [vmem:[#allocation3 + $0xe8] sm:$0xff]  ;;  %1822 = vst.msk [vmem:[#allocation3 + $0x18] sm:$0xff] %vm838_vm7, %v1790_v54 }
 0x161   : > { %v1954_v4 = vpop.f32.mrb[49].mxu0  ;;  %1521 = vst.msk [vmem:[#allocation3 + $0xe0] sm:$0xff] %vm838_vm7, %v1489_v8  ;;  %v1490_v60 = vadd.f32 %v1458_v1, %v1417_v47  ;;  %1820 = vst.msk [vmem:[#allocation3 + $0x8] sm:$0xff] %vm838_vm7, %v1788_v57  ;;  %v1770_v8 = vld [vmem:[#allocation3 + $0x78] sm:$0xff] }
 0x162   : > { %v4156_v7 = vpop.f32.mrb[50].mxu0  ;;  %1524 = vst.msk [vmem:[#allocation3 + $0xf8] sm:$0xff] %vm838_vm7, %v1492_v14 }
 0x163   : > { %v1957_v20 = vpop.f32.mrb[51].mxu0  ;;  %1522 = vst.msk [vmem:[#allocation3 + $0xe8] sm:$0xff] %vm838_vm7, %v1490_v60  ;;  %v4125_v63 = vpop.f32.mrb[52].mxu1 }
 0x164   : > { %v1793_v23 = vadd.f32 %v4125_v63, %v1761_v6  ;;  %v1644_v40 = vpop.f32.mrb[53].mxu1  ;;  %v1768_v63 = vld [vmem:[#allocation3 + $0x68] sm:$0xff] }
 0x165   : > { %v2083_v36 = vld [vmem:[#allocation3 + $0x10] sm:$0xff]  ;;  %v1791_v55 = vadd.f32 %v1759_v61, %v1644_v40  ;;  %v4126_v31 = vpop.f32.mrb[54].mxu1 }
 0x166   : > { %v2115_v39 = vadd.f32 %v4155_v13, %v2083_v36  ;;  %1825 = vst.msk [vmem:[#allocation3 + $0x30] sm:$0xff] %vm838_vm7, %v1793_v23  ;;  %v2081_v15 = vld [vmem:[#allocation3] sm:$0xff]  ;;  %v1794_v26 = vadd.f32 %v4126_v31, %v1762_v22  ;;  %v1647_v41 = vpop.f32.mrb[55].mxu1  ;;  %v1773_v31 = vld [vmem:[#allocation3 + $0x90] sm:$0xff] }
 0x167   : > { %v2113_v5 = vadd.f32 %v2081_v15, %v1954_v4  ;;  %1823 = vst.msk [vmem:[#allocation3 + $0x20] sm:$0xff] %vm838_vm7, %v1791_v55  ;;  %v2084_v48 = vld [vmem:[#allocation3 + $0x18] sm:$0xff]  ;;  %v1792_v62 = vadd.f32 %v1760_v25, %v1647_v41  ;;  %v1771_v15 = vld [vmem:[#allocation3 + $0x80] sm:$0xff] }
 0x168   : > { %v4159_v10 = vpop.f32.mrb[52].mxu0  ;;  %2147 = vst.msk [vmem:[#allocation3 + $0x10] sm:$0xff] %vm838_vm7, %v2115_v39  ;;  %v2116_v29 = vadd.f32 %v4156_v7, %v2084_v48  ;;  %1826 = vst.msk [vmem:[#allocation3 + $0x38] sm:$0xff] %vm838_vm7, %v1794_v26  ;;  %v2082_v46 = vld [vmem:[#allocation3 + $0x8] sm:$0xff] }
 0x169   : > { %v1970_v50 = vpop.f32.mrb[53].mxu0  ;;  %2145 = vst.msk [vmem:[#allocation3] sm:$0xff] %vm838_vm7, %v2113_v5  ;;  %v2114_v45 = vadd.f32 %v2082_v46, %v1957_v20  ;;  %1824 = vst.msk [vmem:[#allocation3 + $0x28] sm:$0xff] %vm838_vm7, %v1792_v62  ;;  %v1774_v5 = vld [vmem:[#allocation3 + $0x98] sm:$0xff] }
 0x16a   : > { %v4160_v59 = vpop.f32.mrb[54].mxu0  ;;  %2148 = vst.msk [vmem:[#allocation3 + $0x18] sm:$0xff] %vm838_vm7, %v2116_v29 }
 0x16b   : > { %v1973_v38 = vpop.f32.mrb[55].mxu0  ;;  %2146 = vst.msk [vmem:[#allocation3 + $0x8] sm:$0xff] %vm838_vm7, %v2114_v45  ;;  %v4129_v9 = vpop.f32.mrb[56].mxu1 }
 0x16c   : > { %v1797_v0 = vadd.f32 %v4129_v9, %v1765_v58  ;;  %v1660_v2 = vpop.f32.mrb[57].mxu1  ;;  %v1772_v9 = vld [vmem:[#allocation3 + $0x88] sm:$0xff] }
 0x16d   : > { %v2087_v16 = vld [vmem:[#allocation3 + $0x30] sm:$0xff]  ;;  %v1795_v17 = vadd.f32 %v1763_v33, %v1660_v2  ;;  %v4130_v47 = vpop.f32.mrb[58].mxu1 }
 0x16e   : > { %v2119_v53 = vadd.f32 %v4159_v10, %v2087_v16  ;;  %1829 = vst.msk [vmem:[#allocation3 + $0x50] sm:$0xff] %vm838_vm7, %v1797_v0  ;;  %v2085_v52 = vld [vmem:[#allocation3 + $0x20] sm:$0xff]  ;;  %v1798_v28 = vadd.f32 %v4130_v47, %v1766_v44  ;;  %v1663_v30 = vpop.f32.mrb[59].mxu1  ;;  %v1777_v47 = vld [vmem:[#allocation3 + $0xb0] sm:$0xff] }
 0x16f   : > { %v2117_v13 = vadd.f32 %v2085_v52, %v1970_v50  ;;  %1827 = vst.msk [vmem:[#allocation3 + $0x40] sm:$0xff] %vm838_vm7, %v1795_v17  ;;  %v2088_v43 = vld [vmem:[#allocation3 + $0x38] sm:$0xff]  ;;  %v1796_v21 = vadd.f32 %v1764_v37, %v1663_v30  ;;  %v1775_v52 = vld [vmem:[#allocation3 + $0xa0] sm:$0xff] }
 0x170   : > { %v4163_v51 = vpop.f32.mrb[56].mxu0  ;;  %2151 = vst.msk [vmem:[#allocation3 + $0x30] sm:$0xff] %vm838_vm7, %v2119_v53  ;;  %v2120_v27 = vadd.f32 %v4160_v59, %v2088_v43  ;;  %1830 = vst.msk [vmem:[#allocation3 + $0x58] sm:$0xff] %vm838_vm7, %v1798_v28  ;;  %v2086_v4 = vld [vmem:[#allocation3 + $0x28] sm:$0xff] }
 0x171   : > { %v1986_v42 = vpop.f32.mrb[57].mxu0  ;;  %2149 = vst.msk [vmem:[#allocation3 + $0x20] sm:$0xff] %vm838_vm7, %v2117_v13  ;;  %v2118_v3 = vadd.f32 %v2086_v4, %v1973_v38  ;;  %1828 = vst.msk [vmem:[#allocation3 + $0x48] sm:$0xff] %vm838_vm7, %v1796_v21  ;;  %v1778_v13 = vld [vmem:[#allocation3 + $0xb8] sm:$0xff] }
 0x172   : > { %v4164_v34 = vpop.f32.mrb[58].mxu0  ;;  %2152 = vst.msk [vmem:[#allocation3 + $0x38] sm:$0xff] %vm838_vm7, %v2120_v27 }
 0x173   : > { %v1989_v32 = vpop.f32.mrb[59].mxu0  ;;  %2150 = vst.msk [vmem:[#allocation3 + $0x28] sm:$0xff] %vm838_vm7, %v2118_v3  ;;  %v4133_v24 = vpop.f32.mrb[60].mxu1 }
 0x174   : > { %v1801_v7 = vadd.f32 %v4133_v24, %v1769_v56  ;;  %v1676_v11 = vpop.f32.mrb[61].mxu1  ;;  %v1776_v24 = vld [vmem:[#allocation3 + $0xa8] sm:$0xff] }
 0x175   : > { %v2091_v49 = vld [vmem:[#allocation3 + $0x50] sm:$0xff]  ;;  %v1799_v19 = vadd.f32 %v1767_v12, %v1676_v11  ;;  %v4134_v20 = vpop.f32.mrb[62].mxu1 }
 0x176   : > { %v2123_v57 = vadd.f32 %v4163_v51, %v2091_v49  ;;  %1833 = vst.msk [vmem:[#allocation3 + $0x70] sm:$0xff] %vm838_vm7, %v1801_v7  ;;  %v2089_v14 = vld [vmem:[#allocation3 + $0x40] sm:$0xff]  ;;  %v1802_v1 = vadd.f32 %v4134_v20, %v1770_v8  ;;  %v1679_v60 = vpop.f32.mrb[63].mxu1  ;;  %v1781_v20 = vld [vmem:[#allocation3 + $0xd0] sm:$0xff] }
 0x177   : > { %v2121_v10 = vadd.f32 %v2089_v14, %v1986_v42  ;;  %1831 = vst.msk [vmem:[#allocation3 + $0x60] sm:$0xff] %vm838_vm7, %v1799_v19  ;;  %v2092_v23 = vld [vmem:[#allocation3 + $0x58] sm:$0xff]  ;;  %v1800_v40 = vadd.f32 %v1768_v63, %v1679_v60  ;;  %v1779_v14 = vld [vmem:[#allocation3 + $0xc0] sm:$0xff] }
 0x178   : > { %v4167_v35 = vpop.f32.mrb[60].mxu0  ;;  %2155 = vst.msk [vmem:[#allocation3 + $0x50] sm:$0xff] %vm838_vm7, %v2123_v57  ;;  %v2124_v61 = vadd.f32 %v4164_v34, %v2092_v23  ;;  %1834 = vst.msk [vmem:[#allocation3 + $0x78] sm:$0xff] %vm838_vm7, %v1802_v1  ;;  %v2090_v50 = vld [vmem:[#allocation3 + $0x48] sm:$0xff] }
 0x179   : > { %v2002_v54 = vpop.f32.mrb[61].mxu0  ;;  %2153 = vst.msk [vmem:[#allocation3 + $0x40] sm:$0xff] %vm838_vm7, %v2121_v10  ;;  %v2122_v36 = vadd.f32 %v2090_v50, %v1989_v32  ;;  %1832 = vst.msk [vmem:[#allocation3 + $0x68] sm:$0xff] %vm838_vm7, %v1800_v40  ;;  %v1782_v10 = vld [vmem:[#allocation3 + $0xd8] sm:$0xff] }
 0x17a   : > { %v4168_v18 = vpop.f32.mrb[62].mxu0  ;;  %2156 = vst.msk [vmem:[#allocation3 + $0x58] sm:$0xff] %vm838_vm7, %v2124_v61 }
 0x17b   : > { %v2005_v6 = vpop.f32.mrb[63].mxu0  ;;  %2154 = vst.msk [vmem:[#allocation3 + $0x48] sm:$0xff] %vm838_vm7, %v2122_v36  ;;  %v4137_v55 = vpop.f32.mrb[64].mxu1 }
 0x17c   : > { %v1805_v59 = vadd.f32 %v4137_v55, %v1773_v31  ;;  %v1692_v39 = vpop.f32.mrb[65].mxu1  ;;  %v1780_v55 = vld [vmem:[#allocation3 + $0xc8] sm:$0xff] }
 0x17d   : > { %v2095_v41 = vld [vmem:[#allocation3 + $0x70] sm:$0xff]  ;;  %v1803_v25 = vadd.f32 %v1771_v15, %v1692_v39  ;;  %v4138_v38 = vpop.f32.mrb[66].mxu1 }
 0x17e   : > { %v2127_v62 = vadd.f32 %v4167_v35, %v2095_v41  ;;  %1837 = vst.msk [vmem:[#allocation3 + $0x90] sm:$0xff] %vm838_vm7, %v1805_v59  ;;  %v2093_v29 = vld [vmem:[#allocation3 + $0x60] sm:$0xff]  ;;  %v1806_v46 = vadd.f32 %v4138_v38, %v1774_v5  ;;  %v1695_v45 = vpop.f32.mrb[67].mxu1  ;;  %v1785_v38 = vld [vmem:[#allocation3 + $0xf0] sm:$0xff] }
 0x17f   : > { %v2125_v51 = vadd.f32 %v2093_v29, %v2002_v54  ;;  %1835 = vst.msk [vmem:[#allocation3 + $0x80] sm:$0xff] %vm838_vm7, %v1803_v25  ;;  %v2096_v0 = vld [vmem:[#allocation3 + $0x78] sm:$0xff]  ;;  %v1804_v2 = vadd.f32 %v1772_v9, %v1695_v45  ;;  %v1783_v29 = vld [vmem:[#allocation3 + $0xe0] sm:$0xff] }
 0x180   : > { %v4171_v22 = vpop.f32.mrb[64].mxu0  ;;  %2159 = vst.msk [vmem:[#allocation3 + $0x70] sm:$0xff] %vm838_vm7, %v2127_v62  ;;  %v2128_v33 = vadd.f32 %v4168_v18, %v2096_v0  ;;  %1838 = vst.msk [vmem:[#allocation3 + $0x98] sm:$0xff] %vm838_vm7, %v1806_v46  ;;  %v2094_v42 = vld [vmem:[#allocation3 + $0x68] sm:$0xff] }
 0x181   : > { %v2018_v26 = vpop.f32.mrb[65].mxu0  ;;  %2157 = vst.msk [vmem:[#allocation3 + $0x60] sm:$0xff] %vm838_vm7, %v2125_v51  ;;  %v2126_v16 = vadd.f32 %v2094_v42, %v2005_v6  ;;  %1836 = vst.msk [vmem:[#allocation3 + $0x88] sm:$0xff] %vm838_vm7, %v1804_v2  ;;  %v1786_v51 = vld [vmem:[#allocation3 + $0xf8] sm:$0xff] }
 0x182   : > { %v4172_v48 = vpop.f32.mrb[66].mxu0  ;;  %2160 = vst.msk [vmem:[#allocation3 + $0x78] sm:$0xff] %vm838_vm7, %v2128_v33 }
 0x183   : > { %v2021_v58 = vpop.f32.mrb[67].mxu0  ;;  %2158 = vst.msk [vmem:[#allocation3 + $0x68] sm:$0xff] %vm838_vm7, %v2126_v16  ;;  %v4141_v17 = vpop.f32.mrb[68].mxu1 }
 0x184   : > { %v1809_v34 = vadd.f32 %v4141_v17, %v1777_v47  ;;  %v1708_v53 = vpop.f32.mrb[69].mxu1  ;;  %v1784_v17 = vld [vmem:[#allocation3 + $0xe8] sm:$0xff] }
 0x185   : > { %v2099_v30 = vld [vmem:[#allocation3 + $0x90] sm:$0xff]  ;;  %v1807_v37 = vadd.f32 %v1775_v52, %v1708_v53  ;;  %v4142_v32 = vpop.f32.mrb[70].mxu1 }
 0x186   : > { %v2131_v21 = vadd.f32 %v4171_v22, %v2099_v30  ;;  %1841 = vst.msk [vmem:[#allocation3 + $0xb0] sm:$0xff] %vm838_vm7, %v1809_v34  ;;  %v2097_v27 = vld [vmem:[#allocation3 + $0x80] sm:$0xff]  ;;  %v1810_v4 = vadd.f32 %v4142_v32, %v1778_v13  ;;  %v1711_v3 = vpop.f32.mrb[71].mxu1  ;;  %v2409_v32 = vld [vmem:[#allocation3 + $0x10] sm:$0xff] }
 0x187   : > { %v2129_v35 = vadd.f32 %v2097_v27, %v2018_v26  ;;  %1839 = vst.msk [vmem:[#allocation3 + $0xa0] sm:$0xff] %vm838_vm7, %v1807_v37  ;;  %v2100_v7 = vld [vmem:[#allocation3 + $0x98] sm:$0xff]  ;;  %v1808_v11 = vadd.f32 %v1776_v24, %v1711_v3  ;;  %v2407_v27 = vld [vmem:[#allocation3] sm:$0xff] }
 0x188   : > { %v4175_v44 = vpop.f32.mrb[68].mxu0  ;;  %2163 = vst.msk [vmem:[#allocation3 + $0x90] sm:$0xff] %vm838_vm7, %v2131_v21  ;;  %v2132_v12 = vadd.f32 %v4172_v48, %v2100_v7  ;;  %1842 = vst.msk [vmem:[#allocation3 + $0xb8] sm:$0xff] %vm838_vm7, %v1810_v4  ;;  %v2098_v54 = vld [vmem:[#allocation3 + $0x88] sm:$0xff] }
 0x189   : > { %v2034_v28 = vpop.f32.mrb[69].mxu0  ;;  %2161 = vst.msk [vmem:[#allocation3 + $0x80] sm:$0xff] %vm838_vm7, %v2129_v35  ;;  %v2130_v49 = vadd.f32 %v2098_v54, %v2021_v58  ;;  %1840 = vst.msk [vmem:[#allocation3 + $0xa8] sm:$0xff] %vm838_vm7, %v1808_v11  ;;  %v2410_v35 = vld [vmem:[#allocation3 + $0x18] sm:$0xff] }
 0x18a   : > { %v4176_v43 = vpop.f32.mrb[70].mxu0  ;;  %2164 = vst.msk [vmem:[#allocation3 + $0x98] sm:$0xff] %vm838_vm7, %v2132_v12 }
 0x18b   : > { %v2037_v56 = vpop.f32.mrb[71].mxu0  ;;  %2162 = vst.msk [vmem:[#allocation3 + $0x88] sm:$0xff] %vm838_vm7, %v2130_v49  ;;  %v4145_v19 = vpop.f32.mrb[72].mxu1 }
 0x18c   : > { %v1813_v18 = vadd.f32 %v4145_v19, %v1781_v20  ;;  %v1724_v57 = vpop.f32.mrb[73].mxu1  ;;  %v2408_v19 = vld [vmem:[#allocation3 + $0x8] sm:$0xff] }
 0x18d   : > { %v2103_v60 = vld [vmem:[#allocation3 + $0xb0] sm:$0xff]  ;;  %v1811_v63 = vadd.f32 %v1779_v14, %v1724_v57  ;;  %v4146_v6 = vpop.f32.mrb[74].mxu1 }
 0x18e   : > { %v2135_v40 = vadd.f32 %v4175_v44, %v2103_v60  ;;  %1845 = vst.msk [vmem:[#allocation3 + $0xd0] sm:$0xff] %vm838_vm7, %v1813_v18  ;;  %v2101_v61 = vld [vmem:[#allocation3 + $0xa0] sm:$0xff]  ;;  %v1814_v50 = vadd.f32 %v4146_v6, %v1782_v10  ;;  %v1727_v36 = vpop.f32.mrb[75].mxu1  ;;  %v2413_v6 = vld [vmem:[#allocation3 + $0x30] sm:$0xff] }
 0x18f   : > { %v2133_v22 = vadd.f32 %v2101_v61, %v2034_v28  ;;  %1843 = vst.msk [vmem:[#allocation3 + $0xc0] sm:$0xff] %vm838_vm7, %v1811_v63  ;;  %v2104_v59 = vld [vmem:[#allocation3 + $0xb8] sm:$0xff]  ;;  %v1812_v39 = vadd.f32 %v1780_v55, %v1727_v36  ;;  %v2411_v61 = vld [vmem:[#allocation3 + $0x20] sm:$0xff] }
 0x190   : > { %v4179_v8 = vpop.f32.mrb[72].mxu0  ;;  %2167 = vst.msk [vmem:[#allocation3 + $0xb0] sm:$0xff] %vm838_vm7, %v2135_v40  ;;  %v2136_v15 = vadd.f32 %v4176_v43, %v2104_v59  ;;  %1846 = vst.msk [vmem:[#allocation3 + $0xd8] sm:$0xff] %vm838_vm7, %v1814_v50  ;;  %v2102_v26 = vld [vmem:[#allocation3 + $0xa8] sm:$0xff] }
 0x191   : > { %v2050_v1 = vpop.f32.mrb[73].mxu0  ;;  %2165 = vst.msk [vmem:[#allocation3 + $0xa0] sm:$0xff] %vm838_vm7, %v2133_v22  ;;  %v2134_v41 = vadd.f32 %v2102_v26, %v2037_v56  ;;  %1844 = vst.msk [vmem:[#allocation3 + $0xc8] sm:$0xff] %vm838_vm7, %v1812_v39  ;;  %v2414_v22 = vld [vmem:[#allocation3 + $0x38] sm:$0xff] }
 0x192   : > { %v4180_v23 = vpop.f32.mrb[74].mxu0  ;;  %2168 = vst.msk [vmem:[#allocation3 + $0xb8] sm:$0xff] %vm838_vm7, %v2136_v15 }
 0x193   : > { %v2053_v31 = vpop.f32.mrb[75].mxu0  ;;  %2166 = vst.msk [vmem:[#allocation3 + $0xa8] sm:$0xff] %vm838_vm7, %v2134_v41  ;;  %v4149_v25 = vpop.f32.mrb[76].mxu1 }
 0x194   : > { %v1817_v48 = vadd.f32 %v4149_v25, %v1785_v38  ;;  %v1740_v62 = vpop.f32.mrb[77].mxu1  ;;  %v2412_v25 = vld [vmem:[#allocation3 + $0x28] sm:$0xff] }
 0x195   : > { %v2107_v45 = vld [vmem:[#allocation3 + $0xd0] sm:$0xff]  ;;  %v1815_v9 = vadd.f32 %v1783_v29, %v1740_v62  ;;  %v4150_v58 = vpop.f32.mrb[78].mxu1 }
 0x196   : > { %v2139_v2 = vadd.f32 %v4179_v8, %v2107_v45  ;;  %1849 = vst.msk [vmem:[#allocation3 + $0xf0] sm:$0xff] %vm838_vm7, %v1817_v48  ;;  %v2105_v33 = vld [vmem:[#allocation3 + $0xc0] sm:$0xff]  ;;  %v1818_v42 = vadd.f32 %v4150_v58, %v1786_v51  ;;  %v1743_v16 = vpop.f32.mrb[79].mxu1  ;;  %v2417_v58 = vld [vmem:[#allocation3 + $0x50] sm:$0xff] }
 0x197   : > { %v2137_v44 = vadd.f32 %v2105_v33, %v2050_v1  ;;  %1847 = vst.msk [vmem:[#allocation3 + $0xe0] sm:$0xff] %vm838_vm7, %v1815_v9  ;;  %v2108_v34 = vld [vmem:[#allocation3 + $0xd8] sm:$0xff]  ;;  %v1816_v53 = vadd.f32 %v1784_v17, %v1743_v16  ;;  %v2415_v33 = vld [vmem:[#allocation3 + $0x40] sm:$0xff] }
 0x198   : > { %v4183_v5 = vpop.f32.mrb[76].mxu0  ;;  %2171 = vst.msk [vmem:[#allocation3 + $0xd0] sm:$0xff] %vm838_vm7, %v2139_v2  ;;  %v2140_v52 = vadd.f32 %v4180_v23, %v2108_v34  ;;  %1850 = vst.msk [vmem:[#allocation3 + $0xf8] sm:$0xff] %vm838_vm7, %v1818_v42  ;;  %v2106_v28 = vld [vmem:[#allocation3 + $0xc8] sm:$0xff] }
 0x199   : > { %v2066_v46 = vpop.f32.mrb[77].mxu0  ;;  %2169 = vst.msk [vmem:[#allocation3 + $0xc0] sm:$0xff] %vm838_vm7, %v2137_v44  ;;  %v2138_v30 = vadd.f32 %v2106_v28, %v2053_v31  ;;  %1848 = vst.msk [vmem:[#allocation3 + $0xe8] sm:$0xff] %vm838_vm7, %v1816_v53  ;;  %v2418_v44 = vld [vmem:[#allocation3 + $0x58] sm:$0xff] }
 0x19a   : > { %v4184_v0 = vpop.f32.mrb[78].mxu0  ;;  %2172 = vst.msk [vmem:[#allocation3 + $0xd8] sm:$0xff] %vm838_vm7, %v2140_v52 }
 0x19b   : > { %v2069_v47 = vpop.f32.mrb[79].mxu0  ;;  %2170 = vst.msk [vmem:[#allocation3 + $0xc8] sm:$0xff] %vm838_vm7, %v2138_v30  ;;  %v4189_v37 = vpop.f32.mrb[80].mxu1 }
 0x19c   : > { %v2441_v43 = vadd.f32 %v4189_v37, %v2409_v32  ;;  %v2280_v21 = vpop.f32.mrb[81].mxu1  ;;  %v2416_v37 = vld [vmem:[#allocation3 + $0x48] sm:$0xff] }
 0x19d   : > { %v2111_v3 = vld [vmem:[#allocation3 + $0xf0] sm:$0xff]  ;;  %v2439_v24 = vadd.f32 %v2407_v27, %v2280_v21  ;;  %v4190_v56 = vpop.f32.mrb[82].mxu1 }
 0x19e   : > { %v2143_v11 = vadd.f32 %v4183_v5, %v2111_v3  ;;  %v2109_v12 = vld [vmem:[#allocation3 + $0xe0] sm:$0xff]  ;;  %2473 = vst.msk [vmem:[#allocation3 + $0x10] sm:$0xff] %vm838_vm7, %v2441_v43  ;;  %v2442_v54 = vadd.f32 %v4190_v56, %v2410_v35  ;;  %v2283_v49 = vpop.f32.mrb[83].mxu1  ;;  %v2421_v56 = vld [vmem:[#allocation3 + $0x70] sm:$0xff] }
 0x19f   : > { %v2141_v8 = vadd.f32 %v2109_v12, %v2066_v46  ;;  %v2112_v18 = vld [vmem:[#allocation3 + $0xf8] sm:$0xff]  ;;  %2471 = vst.msk [vmem:[#allocation3] sm:$0xff] %vm838_vm7, %v2439_v24  ;;  %v2440_v57 = vadd.f32 %v2408_v19, %v2283_v49  ;;  %v2419_v12 = vld [vmem:[#allocation3 + $0x60] sm:$0xff] }
 0x1a0   : > { %v4223_v13 = vpop.f32.mrb[80].mxu0  ;;  %2175 = vst.msk [vmem:[#allocation3 + $0xf0] sm:$0xff] %vm838_vm7, %v2143_v11  ;;  %v2144_v14 = vadd.f32 %v4184_v0, %v2112_v18  ;;  %v2110_v1 = vld [vmem:[#allocation3 + $0xe8] sm:$0xff]  ;;  %2474 = vst.msk [vmem:[#allocation3 + $0x18] sm:$0xff] %vm838_vm7, %v2442_v54 }
 0x1a1   : > { %v2607_v4 = vpop.f32.mrb[81].mxu0  ;;  %2173 = vst.msk [vmem:[#allocation3 + $0xe0] sm:$0xff] %vm838_vm7, %v2141_v8  ;;  %v2142_v60 = vadd.f32 %v2110_v1, %v2069_v47  ;;  %2472 = vst.msk [vmem:[#allocation3 + $0x8] sm:$0xff] %vm838_vm7, %v2440_v57  ;;  %v2422_v8 = vld [vmem:[#allocation3 + $0x78] sm:$0xff] }
 0x1a2   : > { %v4224_v7 = vpop.f32.mrb[82].mxu0  ;;  %2176 = vst.msk [vmem:[#allocation3 + $0xf8] sm:$0xff] %vm838_vm7, %v2144_v14 }
 0x1a3   : > { %v2610_v20 = vpop.f32.mrb[83].mxu0  ;;  %2174 = vst.msk [vmem:[#allocation3 + $0xe8] sm:$0xff] %vm838_vm7, %v2142_v60  ;;  %v4193_v63 = vpop.f32.mrb[84].mxu1 }
 0x1a4   : > { %v2445_v23 = vadd.f32 %v4193_v63, %v2413_v6  ;;  %v2296_v40 = vpop.f32.mrb[85].mxu1  ;;  %v2420_v63 = vld [vmem:[#allocation3 + $0x68] sm:$0xff] }
 0x1a5   : > { %v2736_v36 = vld [vmem:[#allocation3 + $0x10] sm:$0xff]  ;;  %v2443_v55 = vadd.f32 %v2411_v61, %v2296_v40  ;;  %v4194_v31 = vpop.f32.mrb[86].mxu1 }
 0x1a6   : > { %v2768_v39 = vadd.f32 %v4223_v13, %v2736_v36  ;;  %2477 = vst.msk [vmem:[#allocation3 + $0x30] sm:$0xff] %vm838_vm7, %v2445_v23  ;;  %v2734_v15 = vld [vmem:[#allocation3] sm:$0xff]  ;;  %v2446_v26 = vadd.f32 %v4194_v31, %v2414_v22  ;;  %v2299_v41 = vpop.f32.mrb[87].mxu1  ;;  %v2425_v31 = vld [vmem:[#allocation3 + $0x90] sm:$0xff] }
 0x1a7   : > { %v2766_v5 = vadd.f32 %v2734_v15, %v2607_v4  ;;  %2475 = vst.msk [vmem:[#allocation3 + $0x20] sm:$0xff] %vm838_vm7, %v2443_v55  ;;  %v2737_v48 = vld [vmem:[#allocation3 + $0x18] sm:$0xff]  ;;  %v2444_v62 = vadd.f32 %v2412_v25, %v2299_v41  ;;  %v2423_v15 = vld [vmem:[#allocation3 + $0x80] sm:$0xff] }
 0x1a8   : > { %v4227_v10 = vpop.f32.mrb[84].mxu0  ;;  %2800 = vst.msk [vmem:[#allocation3 + $0x10] sm:$0xff] %vm838_vm7, %v2768_v39  ;;  %v2769_v29 = vadd.f32 %v4224_v7, %v2737_v48  ;;  %2478 = vst.msk [vmem:[#allocation3 + $0x38] sm:$0xff] %vm838_vm7, %v2446_v26  ;;  %v2735_v46 = vld [vmem:[#allocation3 + $0x8] sm:$0xff] }
 0x1a9   : > { %v2623_v50 = vpop.f32.mrb[85].mxu0  ;;  %2798 = vst.msk [vmem:[#allocation3] sm:$0xff] %vm838_vm7, %v2766_v5  ;;  %v2767_v45 = vadd.f32 %v2735_v46, %v2610_v20  ;;  %2476 = vst.msk [vmem:[#allocation3 + $0x28] sm:$0xff] %vm838_vm7, %v2444_v62  ;;  %v2426_v5 = vld [vmem:[#allocation3 + $0x98] sm:$0xff] }
 0x1aa   : > { %v4228_v59 = vpop.f32.mrb[86].mxu0  ;;  %2801 = vst.msk [vmem:[#allocation3 + $0x18] sm:$0xff] %vm838_vm7, %v2769_v29 }
 0x1ab   : > { %v2626_v38 = vpop.f32.mrb[87].mxu0  ;;  %2799 = vst.msk [vmem:[#allocation3 + $0x8] sm:$0xff] %vm838_vm7, %v2767_v45  ;;  %v4197_v9 = vpop.f32.mrb[88].mxu1 }
 0x1ac   : > { %v2449_v0 = vadd.f32 %v4197_v9, %v2417_v58  ;;  %v2312_v2 = vpop.f32.mrb[89].mxu1  ;;  %v2424_v9 = vld [vmem:[#allocation3 + $0x88] sm:$0xff] }
 0x1ad   : > { %v2740_v16 = vld [vmem:[#allocation3 + $0x30] sm:$0xff]  ;;  %v2447_v17 = vadd.f32 %v2415_v33, %v2312_v2  ;;  %v4198_v47 = vpop.f32.mrb[90].mxu1 }
 0x1ae   : > { %v2772_v53 = vadd.f32 %v4227_v10, %v2740_v16  ;;  %2481 = vst.msk [vmem:[#allocation3 + $0x50] sm:$0xff] %vm838_vm7, %v2449_v0  ;;  %v2738_v52 = vld [vmem:[#allocation3 + $0x20] sm:$0xff]  ;;  %v2450_v28 = vadd.f32 %v4198_v47, %v2418_v44  ;;  %v2315_v30 = vpop.f32.mrb[91].mxu1  ;;  %v2429_v47 = vld [vmem:[#allocation3 + $0xb0] sm:$0xff] }
 0x1af   : > { %v2770_v13 = vadd.f32 %v2738_v52, %v2623_v50  ;;  %2479 = vst.msk [vmem:[#allocation3 + $0x40] sm:$0xff] %vm838_vm7, %v2447_v17  ;;  %v2741_v43 = vld [vmem:[#allocation3 + $0x38] sm:$0xff]  ;;  %v2448_v21 = vadd.f32 %v2416_v37, %v2315_v30  ;;  %v2427_v52 = vld [vmem:[#allocation3 + $0xa0] sm:$0xff] }
 0x1b0   : > { %v4231_v51 = vpop.f32.mrb[88].mxu0  ;;  %2804 = vst.msk [vmem:[#allocation3 + $0x30] sm:$0xff] %vm838_vm7, %v2772_v53  ;;  %v2773_v27 = vadd.f32 %v4228_v59, %v2741_v43  ;;  %2482 = vst.msk [vmem:[#allocation3 + $0x58] sm:$0xff] %vm838_vm7, %v2450_v28  ;;  %v2739_v4 = vld [vmem:[#allocation3 + $0x28] sm:$0xff] }
 0x1b1   : > { %v2639_v42 = vpop.f32.mrb[89].mxu0  ;;  %2802 = vst.msk [vmem:[#allocation3 + $0x20] sm:$0xff] %vm838_vm7, %v2770_v13  ;;  %v2771_v3 = vadd.f32 %v2739_v4, %v2626_v38  ;;  %2480 = vst.msk [vmem:[#allocation3 + $0x48] sm:$0xff] %vm838_vm7, %v2448_v21  ;;  %v2430_v13 = vld [vmem:[#allocation3 + $0xb8] sm:$0xff] }
 0x1b2   : > { %v4232_v34 = vpop.f32.mrb[90].mxu0  ;;  %2805 = vst.msk [vmem:[#allocation3 + $0x38] sm:$0xff] %vm838_vm7, %v2773_v27 }
 0x1b3   : > { %v2642_v32 = vpop.f32.mrb[91].mxu0  ;;  %2803 = vst.msk [vmem:[#allocation3 + $0x28] sm:$0xff] %vm838_vm7, %v2771_v3  ;;  %v4201_v24 = vpop.f32.mrb[92].mxu1 }
 0x1b4   : > { %v2453_v7 = vadd.f32 %v4201_v24, %v2421_v56  ;;  %v2328_v11 = vpop.f32.mrb[93].mxu1  ;;  %v2428_v24 = vld [vmem:[#allocation3 + $0xa8] sm:$0xff] }
 0x1b5   : > { %v2744_v49 = vld [vmem:[#allocation3 + $0x50] sm:$0xff]  ;;  %v2451_v19 = vadd.f32 %v2419_v12, %v2328_v11  ;;  %v4202_v20 = vpop.f32.mrb[94].mxu1 }
 0x1b6   : > { %v2776_v57 = vadd.f32 %v4231_v51, %v2744_v49  ;;  %2485 = vst.msk [vmem:[#allocation3 + $0x70] sm:$0xff] %vm838_vm7, %v2453_v7  ;;  %v2742_v14 = vld [vmem:[#allocation3 + $0x40] sm:$0xff]  ;;  %v2454_v1 = vadd.f32 %v4202_v20, %v2422_v8  ;;  %v2331_v60 = vpop.f32.mrb[95].mxu1  ;;  %v2433_v20 = vld [vmem:[#allocation3 + $0xd0] sm:$0xff] }
 0x1b7   : > { %v2774_v10 = vadd.f32 %v2742_v14, %v2639_v42  ;;  %2483 = vst.msk [vmem:[#allocation3 + $0x60] sm:$0xff] %vm838_vm7, %v2451_v19  ;;  %v2745_v23 = vld [vmem:[#allocation3 + $0x58] sm:$0xff]  ;;  %v2452_v40 = vadd.f32 %v2420_v63, %v2331_v60  ;;  %v2431_v14 = vld [vmem:[#allocation3 + $0xc0] sm:$0xff] }
 0x1b8   : > { %v4235_v35 = vpop.f32.mrb[92].mxu0  ;;  %2808 = vst.msk [vmem:[#allocation3 + $0x50] sm:$0xff] %vm838_vm7, %v2776_v57  ;;  %v2777_v61 = vadd.f32 %v4232_v34, %v2745_v23  ;;  %2486 = vst.msk [vmem:[#allocation3 + $0x78] sm:$0xff] %vm838_vm7, %v2454_v1  ;;  %v2743_v50 = vld [vmem:[#allocation3 + $0x48] sm:$0xff] }
 0x1b9   : > { %v2655_v54 = vpop.f32.mrb[93].mxu0  ;;  %2806 = vst.msk [vmem:[#allocation3 + $0x40] sm:$0xff] %vm838_vm7, %v2774_v10  ;;  %v2775_v36 = vadd.f32 %v2743_v50, %v2642_v32  ;;  %2484 = vst.msk [vmem:[#allocation3 + $0x68] sm:$0xff] %vm838_vm7, %v2452_v40  ;;  %v2434_v10 = vld [vmem:[#allocation3 + $0xd8] sm:$0xff] }
 0x1ba   : > { %v4236_v18 = vpop.f32.mrb[94].mxu0  ;;  %2809 = vst.msk [vmem:[#allocation3 + $0x58] sm:$0xff] %vm838_vm7, %v2777_v61 }
 0x1bb   : > { %v2658_v6 = vpop.f32.mrb[95].mxu0  ;;  %2807 = vst.msk [vmem:[#allocation3 + $0x48] sm:$0xff] %vm838_vm7, %v2775_v36  ;;  %v4205_v55 = vpop.f32.mrb[96].mxu1 }
 0x1bc   : > { %v2457_v59 = vadd.f32 %v4205_v55, %v2425_v31  ;;  %v2344_v39 = vpop.f32.mrb[97].mxu1  ;;  %v2432_v55 = vld [vmem:[#allocation3 + $0xc8] sm:$0xff] }
 0x1bd   : > { %v2748_v41 = vld [vmem:[#allocation3 + $0x70] sm:$0xff]  ;;  %v2455_v25 = vadd.f32 %v2423_v15, %v2344_v39  ;;  %v4206_v38 = vpop.f32.mrb[98].mxu1 }
 0x1be   : > { %v2780_v62 = vadd.f32 %v4235_v35, %v2748_v41  ;;  %2489 = vst.msk [vmem:[#allocation3 + $0x90] sm:$0xff] %vm838_vm7, %v2457_v59  ;;  %v2746_v29 = vld [vmem:[#allocation3 + $0x60] sm:$0xff]  ;;  %v2458_v46 = vadd.f32 %v4206_v38, %v2426_v5  ;;  %v2347_v45 = vpop.f32.mrb[99].mxu1  ;;  %v2437_v38 = vld [vmem:[#allocation3 + $0xf0] sm:$0xff] }
 0x1bf   : > { %v2778_v51 = vadd.f32 %v2746_v29, %v2655_v54  ;;  %2487 = vst.msk [vmem:[#allocation3 + $0x80] sm:$0xff] %vm838_vm7, %v2455_v25  ;;  %v2749_v0 = vld [vmem:[#allocation3 + $0x78] sm:$0xff]  ;;  %v2456_v2 = vadd.f32 %v2424_v9, %v2347_v45  ;;  %v2435_v29 = vld [vmem:[#allocation3 + $0xe0] sm:$0xff] }
 0x1c0   : > { %v4239_v22 = vpop.f32.mrb[96].mxu0  ;;  %2812 = vst.msk [vmem:[#allocation3 + $0x70] sm:$0xff] %vm838_vm7, %v2780_v62  ;;  %v2781_v33 = vadd.f32 %v4236_v18, %v2749_v0  ;;  %2490 = vst.msk [vmem:[#allocation3 + $0x98] sm:$0xff] %vm838_vm7, %v2458_v46  ;;  %v2747_v42 = vld [vmem:[#allocation3 + $0x68] sm:$0xff] }
 0x1c1   : > { %v2671_v26 = vpop.f32.mrb[97].mxu0  ;;  %2810 = vst.msk [vmem:[#allocation3 + $0x60] sm:$0xff] %vm838_vm7, %v2778_v51  ;;  %v2779_v16 = vadd.f32 %v2747_v42, %v2658_v6  ;;  %2488 = vst.msk [vmem:[#allocation3 + $0x88] sm:$0xff] %vm838_vm7, %v2456_v2  ;;  %v2438_v51 = vld [vmem:[#allocation3 + $0xf8] sm:$0xff] }
 0x1c2   : > { %v4240_v48 = vpop.f32.mrb[98].mxu0  ;;  %2813 = vst.msk [vmem:[#allocation3 + $0x78] sm:$0xff] %vm838_vm7, %v2781_v33 }
 0x1c3   : > { %v2674_v58 = vpop.f32.mrb[99].mxu0  ;;  %2811 = vst.msk [vmem:[#allocation3 + $0x68] sm:$0xff] %vm838_vm7, %v2779_v16  ;;  %v4209_v17 = vpop.f32.mrb[100].mxu1 }
 0x1c4   : > { %v2461_v34 = vadd.f32 %v4209_v17, %v2429_v47  ;;  %v2360_v53 = vpop.f32.mrb[101].mxu1  ;;  %v2436_v17 = vld [vmem:[#allocation3 + $0xe8] sm:$0xff] }
 0x1c5   : > { %v2752_v30 = vld [vmem:[#allocation3 + $0x90] sm:$0xff]  ;;  %v2459_v37 = vadd.f32 %v2427_v52, %v2360_v53  ;;  %v4210_v32 = vpop.f32.mrb[102].mxu1 }
 0x1c6   : > { %v2784_v21 = vadd.f32 %v4239_v22, %v2752_v30  ;;  %2493 = vst.msk [vmem:[#allocation3 + $0xb0] sm:$0xff] %vm838_vm7, %v2461_v34  ;;  %v2750_v27 = vld [vmem:[#allocation3 + $0x80] sm:$0xff]  ;;  %v2462_v4 = vadd.f32 %v4210_v32, %v2430_v13  ;;  %v2363_v3 = vpop.f32.mrb[103].mxu1  ;;  %v3063_v32 = vld [vmem:[#allocation3 + $0x10] sm:$0xff] }
 0x1c7   : > { %v2782_v35 = vadd.f32 %v2750_v27, %v2671_v26  ;;  %2491 = vst.msk [vmem:[#allocation3 + $0xa0] sm:$0xff] %vm838_vm7, %v2459_v37  ;;  %v2753_v7 = vld [vmem:[#allocation3 + $0x98] sm:$0xff]  ;;  %v2460_v11 = vadd.f32 %v2428_v24, %v2363_v3  ;;  %v3061_v27 = vld [vmem:[#allocation3] sm:$0xff] }
 0x1c8   : > { %v4243_v44 = vpop.f32.mrb[100].mxu0  ;;  %2816 = vst.msk [vmem:[#allocation3 + $0x90] sm:$0xff] %vm838_vm7, %v2784_v21  ;;  %v2785_v12 = vadd.f32 %v4240_v48, %v2753_v7  ;;  %2494 = vst.msk [vmem:[#allocation3 + $0xb8] sm:$0xff] %vm838_vm7, %v2462_v4  ;;  %v2751_v54 = vld [vmem:[#allocation3 + $0x88] sm:$0xff] }
 0x1c9   : > { %v2687_v28 = vpop.f32.mrb[101].mxu0  ;;  %2814 = vst.msk [vmem:[#allocation3 + $0x80] sm:$0xff] %vm838_vm7, %v2782_v35  ;;  %v2783_v49 = vadd.f32 %v2751_v54, %v2674_v58  ;;  %2492 = vst.msk [vmem:[#allocation3 + $0xa8] sm:$0xff] %vm838_vm7, %v2460_v11  ;;  %v3064_v35 = vld [vmem:[#allocation3 + $0x18] sm:$0xff] }
 0x1ca   : > { %v4244_v43 = vpop.f32.mrb[102].mxu0  ;;  %2817 = vst.msk [vmem:[#allocation3 + $0x98] sm:$0xff] %vm838_vm7, %v2785_v12 }
 0x1cb   : > { %v2690_v56 = vpop.f32.mrb[103].mxu0  ;;  %2815 = vst.msk [vmem:[#allocation3 + $0x88] sm:$0xff] %vm838_vm7, %v2783_v49  ;;  %v4213_v19 = vpop.f32.mrb[104].mxu1 }
 0x1cc   : > { %v2465_v18 = vadd.f32 %v4213_v19, %v2433_v20  ;;  %v2376_v57 = vpop.f32.mrb[105].mxu1  ;;  %v3062_v19 = vld [vmem:[#allocation3 + $0x8] sm:$0xff] }
 0x1cd   : > { %v2756_v60 = vld [vmem:[#allocation3 + $0xb0] sm:$0xff]  ;;  %v2463_v63 = vadd.f32 %v2431_v14, %v2376_v57  ;;  %v4214_v6 = vpop.f32.mrb[106].mxu1 }
 0x1ce   : > { %v2788_v40 = vadd.f32 %v4243_v44, %v2756_v60  ;;  %2497 = vst.msk [vmem:[#allocation3 + $0xd0] sm:$0xff] %vm838_vm7, %v2465_v18  ;;  %v2754_v61 = vld [vmem:[#allocation3 + $0xa0] sm:$0xff]  ;;  %v2466_v50 = vadd.f32 %v4214_v6, %v2434_v10  ;;  %v2379_v36 = vpop.f32.mrb[107].mxu1  ;;  %v3067_v6 = vld [vmem:[#allocation3 + $0x30] sm:$0xff] }
 0x1cf   : > { %v2786_v22 = vadd.f32 %v2754_v61, %v2687_v28  ;;  %2495 = vst.msk [vmem:[#allocation3 + $0xc0] sm:$0xff] %vm838_vm7, %v2463_v63  ;;  %v2757_v59 = vld [vmem:[#allocation3 + $0xb8] sm:$0xff]  ;;  %v2464_v39 = vadd.f32 %v2432_v55, %v2379_v36  ;;  %v3065_v61 = vld [vmem:[#allocation3 + $0x20] sm:$0xff] }
 0x1d0   : > { %v4247_v8 = vpop.f32.mrb[104].mxu0  ;;  %2820 = vst.msk [vmem:[#allocation3 + $0xb0] sm:$0xff] %vm838_vm7, %v2788_v40  ;;  %v2789_v15 = vadd.f32 %v4244_v43, %v2757_v59  ;;  %2498 = vst.msk [vmem:[#allocation3 + $0xd8] sm:$0xff] %vm838_vm7, %v2466_v50  ;;  %v2755_v26 = vld [vmem:[#allocation3 + $0xa8] sm:$0xff] }
 0x1d1   : > { %v2703_v1 = vpop.f32.mrb[105].mxu0  ;;  %2818 = vst.msk [vmem:[#allocation3 + $0xa0] sm:$0xff] %vm838_vm7, %v2786_v22  ;;  %v2787_v41 = vadd.f32 %v2755_v26, %v2690_v56  ;;  %2496 = vst.msk [vmem:[#allocation3 + $0xc8] sm:$0xff] %vm838_vm7, %v2464_v39  ;;  %v3068_v22 = vld [vmem:[#allocation3 + $0x38] sm:$0xff] }
 0x1d2   : > { %v4248_v23 = vpop.f32.mrb[106].mxu0  ;;  %2821 = vst.msk [vmem:[#allocation3 + $0xb8] sm:$0xff] %vm838_vm7, %v2789_v15 }
 0x1d3   : > { %v2706_v31 = vpop.f32.mrb[107].mxu0  ;;  %2819 = vst.msk [vmem:[#allocation3 + $0xa8] sm:$0xff] %vm838_vm7, %v2787_v41  ;;  %v4217_v25 = vpop.f32.mrb[108].mxu1 }
 0x1d4   : > { %v2469_v48 = vadd.f32 %v4217_v25, %v2437_v38  ;;  %v2392_v62 = vpop.f32.mrb[109].mxu1  ;;  %v3066_v25 = vld [vmem:[#allocation3 + $0x28] sm:$0xff] }
 0x1d5   : > { %v2760_v45 = vld [vmem:[#allocation3 + $0xd0] sm:$0xff]  ;;  %v2467_v9 = vadd.f32 %v2435_v29, %v2392_v62  ;;  %v4218_v58 = vpop.f32.mrb[110].mxu1 }
 0x1d6   : > { %v2792_v2 = vadd.f32 %v4247_v8, %v2760_v45  ;;  %2501 = vst.msk [vmem:[#allocation3 + $0xf0] sm:$0xff] %vm838_vm7, %v2469_v48  ;;  %v2758_v33 = vld [vmem:[#allocation3 + $0xc0] sm:$0xff]  ;;  %v2470_v42 = vadd.f32 %v4218_v58, %v2438_v51  ;;  %v2395_v16 = vpop.f32.mrb[111].mxu1  ;;  %v3071_v58 = vld [vmem:[#allocation3 + $0x50] sm:$0xff] }
 0x1d7   : > { %v2790_v44 = vadd.f32 %v2758_v33, %v2703_v1  ;;  %2499 = vst.msk [vmem:[#allocation3 + $0xe0] sm:$0xff] %vm838_vm7, %v2467_v9  ;;  %v2761_v34 = vld [vmem:[#allocation3 + $0xd8] sm:$0xff]  ;;  %v2468_v53 = vadd.f32 %v2436_v17, %v2395_v16  ;;  %v3069_v33 = vld [vmem:[#allocation3 + $0x40] sm:$0xff]  ;;  %v5643_v16 = vld [vmem:[%s5909_s2] ss:$0 sm:$0xff] }
 0x1d8   : > { %v4251_v5 = vpop.f32.mrb[108].mxu0  ;;  %2824 = vst.msk [vmem:[#allocation3 + $0xd0] sm:$0xff] %vm838_vm7, %v2792_v2  ;;  %v2793_v52 = vadd.f32 %v4248_v23, %v2761_v34  ;;  %2502 = vst.msk [vmem:[#allocation3 + $0xf8] sm:$0xff] %vm838_vm7, %v2470_v42  ;;  %v2759_v28 = vld [vmem:[#allocation3 + $0xc8] sm:$0xff]  ;;  %v3072_v34 = vld [vmem:[#allocation3 + $0x58] sm:$0xff] }
 0x1d9   : > { %v2719_v46 = vpop.f32.mrb[109].mxu0  ;;  %2822 = vst.msk [vmem:[#allocation3 + $0xc0] sm:$0xff] %vm838_vm7, %v2790_v44  ;;  %v2791_v30 = vadd.f32 %v2759_v28, %v2706_v31  ;;  %2500 = vst.msk [vmem:[#allocation3 + $0xe8] sm:$0xff] %vm838_vm7, %v2468_v53 }
 0x1da   : > { %v4252_v0 = vpop.f32.mrb[110].mxu0  ;;  %2825 = vst.msk [vmem:[#allocation3 + $0xd8] sm:$0xff] %vm838_vm7, %v2793_v52 }
 0x1db   : > { %v2722_v47 = vpop.f32.mrb[111].mxu0  ;;  %2823 = vst.msk [vmem:[#allocation3 + $0xc8] sm:$0xff] %vm838_vm7, %v2791_v30  ;;  %v4257_v37 = vpop.f32.mrb[112].mxu1 }
 0x1dc   : > { %v3095_v43 = vadd.f32 %v4257_v37, %v3063_v32  ;;  %v2934_v21 = vpop.f32.mrb[113].mxu1  ;;  %v3070_v32 = vld [vmem:[#allocation3 + $0x48] sm:$0xff] }
 0x1dd   : > { %v2764_v3 = vld [vmem:[#allocation3 + $0xf0] sm:$0xff]  ;;  %v3093_v24 = vadd.f32 %v3061_v27, %v2934_v21  ;;  %v4258_v56 = vpop.f32.mrb[114].mxu1 }
 0x1de   : > { %v2796_v11 = vadd.f32 %v4251_v5, %v2764_v3  ;;  %v2762_v12 = vld [vmem:[#allocation3 + $0xe0] sm:$0xff]  ;;  %3127 = vst.msk [vmem:[#allocation3 + $0x10] sm:$0xff] %vm838_vm7, %v3095_v43  ;;  %v3096_v54 = vadd.f32 %v4258_v56, %v3064_v35  ;;  %v2937_v49 = vpop.f32.mrb[115].mxu1 }
 0x1df   : > { %v2794_v8 = vadd.f32 %v2762_v12, %v2719_v46  ;;  %v2765_v18 = vld [vmem:[#allocation3 + $0xf8] sm:$0xff]  ;;  %3125 = vst.msk [vmem:[#allocation3] sm:$0xff] %vm838_vm7, %v3093_v24  ;;  %v3094_v57 = vadd.f32 %v3062_v19, %v2937_v49 }
 0x1e0   : > { %v4291_v13 = vpop.f32.mrb[112].mxu0  ;;  %2828 = vst.msk [vmem:[#allocation3 + $0xf0] sm:$0xff] %vm838_vm7, %v2796_v11  ;;  %v2797_v14 = vadd.f32 %v4252_v0, %v2765_v18  ;;  %v2763_v1 = vld [vmem:[#allocation3 + $0xe8] sm:$0xff]  ;;  %3128 = vst.msk [vmem:[#allocation3 + $0x18] sm:$0xff] %vm838_vm7, %v3096_v54 }
 0x1e1   : > { %v3261_v4 = vpop.f32.mrb[113].mxu0  ;;  %2826 = vst.msk [vmem:[#allocation3 + $0xe0] sm:$0xff] %vm838_vm7, %v2794_v8  ;;  %v2795_v60 = vadd.f32 %v2763_v1, %v2722_v47  ;;  %3126 = vst.msk [vmem:[#allocation3 + $0x8] sm:$0xff] %vm838_vm7, %v3094_v57  ;;  %v3075_v57 = vld [vmem:[#allocation3 + $0x70] sm:$0xff] }
 0x1e2   : > { %v4292_v7 = vpop.f32.mrb[114].mxu0  ;;  %2829 = vst.msk [vmem:[#allocation3 + $0xf8] sm:$0xff] %vm838_vm7, %v2797_v14 }
 0x1e3   : > { %v3264_v20 = vpop.f32.mrb[115].mxu0  ;;  %2827 = vst.msk [vmem:[#allocation3 + $0xe8] sm:$0xff] %vm838_vm7, %v2795_v60  ;;  %v4261_v63 = vpop.f32.mrb[116].mxu1 }
 0x1e4   : > { %v3099_v23 = vadd.f32 %v4261_v63, %v3067_v6  ;;  %v2950_v40 = vpop.f32.mrb[117].mxu1  ;;  %v3073_v6 = vld [vmem:[#allocation3 + $0x60] sm:$0xff] }
 0x1e5   : > { %v3390_v36 = vld [vmem:[#allocation3 + $0x10] sm:$0xff]  ;;  %v3097_v55 = vadd.f32 %v3065_v61, %v2950_v40  ;;  %v4262_v31 = vpop.f32.mrb[118].mxu1 }
 0x1e6   : > { %v3422_v39 = vadd.f32 %v4291_v13, %v3390_v36  ;;  %3131 = vst.msk [vmem:[#allocation3 + $0x30] sm:$0xff] %vm838_vm7, %v3099_v23  ;;  %v3388_v15 = vld [vmem:[#allocation3] sm:$0xff]  ;;  %v3100_v26 = vadd.f32 %v4262_v31, %v3068_v22  ;;  %v2953_v41 = vpop.f32.mrb[119].mxu1  ;;  %v3076_v36 = vld [vmem:[#allocation3 + $0x78] sm:$0xff] }
 0x1e7   : > { %v3420_v5 = vadd.f32 %v3388_v15, %v3261_v4  ;;  %3129 = vst.msk [vmem:[#allocation3 + $0x20] sm:$0xff] %vm838_vm7, %v3097_v55  ;;  %v3391_v48 = vld [vmem:[#allocation3 + $0x18] sm:$0xff]  ;;  %v3098_v62 = vadd.f32 %v3066_v25, %v2953_v41  ;;  %v3074_v15 = vld [vmem:[#allocation3 + $0x68] sm:$0xff] }
 0x1e8   : > { %v4295_v10 = vpop.f32.mrb[116].mxu0  ;;  %3454 = vst.msk [vmem:[#allocation3 + $0x10] sm:$0xff] %vm838_vm7, %v3422_v39  ;;  %v3423_v29 = vadd.f32 %v4292_v7, %v3391_v48  ;;  %3132 = vst.msk [vmem:[#allocation3 + $0x38] sm:$0xff] %vm838_vm7, %v3100_v26  ;;  %v3389_v46 = vld [vmem:[#allocation3 + $0x8] sm:$0xff] }
 0x1e9   : > { %v3277_v50 = vpop.f32.mrb[117].mxu0  ;;  %3452 = vst.msk [vmem:[#allocation3] sm:$0xff] %vm838_vm7, %v3420_v5  ;;  %v3421_v45 = vadd.f32 %v3389_v46, %v3264_v20  ;;  %3130 = vst.msk [vmem:[#allocation3 + $0x28] sm:$0xff] %vm838_vm7, %v3098_v62 }
 0x1ea   : > { %v4296_v59 = vpop.f32.mrb[118].mxu0  ;;  %3455 = vst.msk [vmem:[#allocation3 + $0x18] sm:$0xff] %vm838_vm7, %v3423_v29 }
 0x1eb   : > { %v3280_v38 = vpop.f32.mrb[119].mxu0  ;;  %3453 = vst.msk [vmem:[#allocation3 + $0x8] sm:$0xff] %vm838_vm7, %v3421_v45  ;;  %v4265_v9 = vpop.f32.mrb[120].mxu1 }
 0x1ec   : > { %v3103_v0 = vadd.f32 %v4265_v9, %v3071_v58  ;;  %v2966_v2 = vpop.f32.mrb[121].mxu1 }
 0x1ed   : > { %v3394_v17 = vld [vmem:[#allocation3 + $0x30] sm:$0xff]  ;;  %v3101_v47 = vadd.f32 %v3069_v33, %v2966_v2  ;;  %v4266_v44 = vpop.f32.mrb[122].mxu1 }
 0x1ee   : > { %v3426_v52 = vadd.f32 %v4295_v10, %v3394_v17  ;;  %3135 = vst.msk [vmem:[#allocation3 + $0x50] sm:$0xff] %vm838_vm7, %v3103_v0  ;;  %v3392_v28 = vld [vmem:[#allocation3 + $0x20] sm:$0xff]  ;;  %v3104_v30 = vadd.f32 %v4266_v44, %v3072_v34  ;;  %v2969_v37 = vpop.f32.mrb[123].mxu1 }
 0x1ef   : > { %v3486_v43 = vld [vmem:[#allocation3 + $0x10] sm:$0xff]  ;;  %v3424_v21 = vadd.f32 %v3392_v28, %v3277_v50  ;;  %3133 = vst.msk [vmem:[#allocation3 + $0x40] sm:$0xff] %vm838_vm7, %v3101_v47  ;;  %v3395_v27 = vld [vmem:[#allocation3 + $0x38] sm:$0xff]  ;;  %v3102_v4 = vadd.f32 %v3070_v32, %v2969_v37  ;;  %v3077_v28 = vld [vmem:[#allocation3 + $0x80] sm:$0xff] }
 0x1f0   : > { %v4299_v51 = vpop.f32.mrb[120].mxu0  ;;  %v3525_v3 = vadd.f32 %v5643_v16, %v3486_v43  ;;  %v3484_v24 = vld [vmem:[#allocation3] sm:$0xff]  ;;  %3458 = vst.msk [vmem:[#allocation3 + $0x30] sm:$0xff] %vm838_vm7, %v3426_v52  ;;  %v3427_v56 = vadd.f32 %v4296_v59, %v3395_v27  ;;  %3136 = vst.msk [vmem:[#allocation3 + $0x58] sm:$0xff] %vm838_vm7, %v3104_v30  ;;  %v3393_v35 = vld [vmem:[#allocation3 + $0x28] sm:$0xff] }
 0x1f1   : > { %v5638_v42 = vpop.f32.mrb[121].mxu0  ;;  %v3523_v7 = vadd.f32 %v5643_v16, %v3484_v24  ;;  %v3487_v11 = vld [vmem:[#allocation3 + $0x18] sm:$0xff]  ;;  %3456 = vst.msk [vmem:[#allocation3 + $0x20] sm:$0xff] %vm838_vm7, %v3424_v21  ;;  %v3425_v12 = vadd.f32 %v3393_v35, %v3280_v38  ;;  %3134 = vst.msk [vmem:[#allocation3 + $0x48] sm:$0xff] %vm838_vm7, %v3102_v4  ;;  %v3079_v47 = vld [vmem:[#allocation3 + $0x90] sm:$0xff] }
 0x1f2   : > { %v5645_v53 = vpop.f32.mrb[122].mxu0  ;;  %v3557_v54 = vmax.f32 %v3525_v3, 0.0  ;;  %v3526_v49 = vadd.f32 %v5643_v16, %v3487_v11  ;;  %v3485_v19 = vld [vmem:[#allocation3 + $0x8] sm:$0xff]  ;;  %3459 = vst.msk [vmem:[#allocation3 + $0x38] sm:$0xff] %vm838_vm7, %v3427_v56  ;;  %v3080_v21 = vld [vmem:[#allocation3 + $0x98] sm:$0xff] }
 0x1f3   : > { %v5652_v13 = vpop.f32.mrb[123].mxu0  ;;  %v3555_v20 = vmax.f32 %v3523_v7, 0.0  ;;  %v3524_v8 = vadd.f32 %v5643_v16, %v3485_v19  ;;  %3457 = vst.msk [vmem:[#allocation3 + $0x28] sm:$0xff] %vm838_vm7, %v3425_v12  ;;  %v4269_v18 = vpop.f32.mrb[124].mxu1  ;;  %v3078_v35 = vld [vmem:[#allocation3 + $0x88] sm:$0xff] }
 0x1f4   : > { %3589 = vst.msk [vmem:[%s5668_s13 + $0x10] sm:$0xff] %vm838_vm7, %v3557_v54  ;;  %v3558_v1 = vmax.f32 %v3526_v49, 0.0  ;;  %v3107_v60 = vadd.f32 %v4269_v18, %v3075_v57  ;;  %v2982_v63 = vpop.f32.mrb[125].mxu1 }
 0x1f5   : > { %3587 = vst.msk [vmem:[%s5668_s13] sm:$0xff] %vm838_vm7, %v3555_v20  ;;  %v3556_v23 = vmax.f32 %v3524_v8, 0.0  ;;  %v3398_v40 = vld [vmem:[#allocation3 + $0x50] sm:$0xff]  ;;  %v3105_v61 = vadd.f32 %v3073_v6, %v2982_v63  ;;  %v4270_v50 = vpop.f32.mrb[126].mxu1 }
 0x1f6   : > { %3590 = vst.msk [vmem:[%s5668_s13 + $0x18] sm:$0xff] %vm838_vm7, %v3558_v1  ;;  %v3430_v31 = vadd.f32 %v4299_v51, %v3398_v40  ;;  %3139 = vst.msk [vmem:[#allocation3 + $0x70] sm:$0xff] %vm838_vm7, %v3107_v60  ;;  %v3396_v22 = vld [vmem:[#allocation3 + $0x40] sm:$0xff]  ;;  %v3108_v59 = vadd.f32 %v4270_v50, %v3076_v36  ;;  %v2985_v39 = vpop.f32.mrb[127].mxu1 }
 0x1f7   : > { %3588 = vst.msk [vmem:[%s5668_s13 + $0x8] sm:$0xff] %vm838_vm7, %v3556_v23  ;;  %v3490_v41 = vld [vmem:[#allocation3 + $0x30] sm:$0xff]  ;;  %v3428_v25 = vadd.f32 %v3396_v22, %v5638_v42  ;;  %3137 = vst.msk [vmem:[#allocation3 + $0x60] sm:$0xff] %vm838_vm7, %v3105_v61  ;;  %v3399_v38 = vld [vmem:[#allocation3 + $0x58] sm:$0xff]  ;;  %v3106_v5 = vadd.f32 %v3074_v15, %v2985_v39 }
 0x1f8   : > { %v5665_v14 = vpop.f32.mrb[124].mxu0  ;;  %v3529_v48 = vadd.f32 %v5643_v16, %v3490_v41  ;;  %v3488_v62 = vld [vmem:[#allocation3 + $0x20] sm:$0xff]  ;;  %3462 = vst.msk [vmem:[#allocation3 + $0x50] sm:$0xff] %vm838_vm7, %v3430_v31  ;;  %v3431_v29 = vadd.f32 %v5645_v53, %v3399_v38  ;;  %3140 = vst.msk [vmem:[#allocation3 + $0x78] sm:$0xff] %vm838_vm7, %v3108_v59  ;;  %v3397_v46 = vld [vmem:[#allocation3 + $0x48] sm:$0xff] }
 0x1f9   : > { %v5672_v10 = vpop.f32.mrb[125].mxu0  ;;  %v3527_v45 = vadd.f32 %v5643_v16, %v3488_v62  ;;  %v3491_v9 = vld [vmem:[#allocation3 + $0x38] sm:$0xff]  ;;  %3460 = vst.msk [vmem:[#allocation3 + $0x40] sm:$0xff] %vm838_vm7, %v3428_v25  ;;  %v3429_v58 = vadd.f32 %v3397_v46, %v5652_v13  ;;  %3138 = vst.msk [vmem:[#allocation3 + $0x68] sm:$0xff] %vm838_vm7, %v3106_v5  ;;  %v3083_v61 = vld [vmem:[#allocation3 + $0xb0] sm:$0xff] }
 0x1fa   : > { %v5676_v55 = vpop.f32.mrb[126].mxu0  ;;  %v3561_v51 = vmax.f32 %v3529_v48, 0.0  ;;  %v3530_v0 = vadd.f32 %v5643_v16, %v3491_v9  ;;  %v3489_v2 = vld [vmem:[#allocation3 + $0x28] sm:$0xff]  ;;  %3463 = vst.msk [vmem:[#allocation3 + $0x58] sm:$0xff] %vm838_vm7, %v3431_v29  ;;  %v3081_v22 = vld [vmem:[#allocation3 + $0xa0] sm:$0xff]  ;;  %v3084_v25 = vld [vmem:[#allocation3 + $0xb8] sm:$0xff] }
 0x1fb   : > { %v5681_v26 = vpop.f32.mrb[127].mxu0  ;;  %v3559_v33 = vmax.f32 %v3527_v45, 0.0  ;;  %v3528_v42 = vadd.f32 %v5643_v16, %v3489_v2  ;;  %3461 = vst.msk [vmem:[#allocation3 + $0x48] sm:$0xff] %vm838_vm7, %v3429_v58  ;;  %v4273_v17 = vpop.f32.mrb[128].mxu1  ;;  %v3082_v46 = vld [vmem:[#allocation3 + $0xa8] sm:$0xff] }
 0x1fc   : > { %3593 = vst.msk [vmem:[%s5668_s13 + $0x30] sm:$0xff] %vm838_vm7, %v3561_v51  ;;  %v3562_v34 = vmax.f32 %v3530_v0, 0.0  ;;  %v3111_v53 = vadd.f32 %v4273_v17, %v3079_v47  ;;  %v2998_v52 = vpop.f32.mrb[129].mxu1 }
 0x1fd   : > { %3591 = vst.msk [vmem:[%s5668_s13 + $0x20] sm:$0xff] %vm838_vm7, %v3559_v33  ;;  %v3560_v37 = vmax.f32 %v3528_v42, 0.0  ;;  %v3402_v32 = vld [vmem:[#allocation3 + $0x70] sm:$0xff]  ;;  %v3109_v13 = vadd.f32 %v3077_v28, %v2998_v52  ;;  %v4274_v43 = vpop.f32.mrb[130].mxu1 }
 0x1fe   : > { %3594 = vst.msk [vmem:[%s5668_s13 + $0x38] sm:$0xff] %vm838_vm7, %v3562_v34  ;;  %v3434_v4 = vadd.f32 %v5665_v14, %v3402_v32  ;;  %3143 = vst.msk [vmem:[#allocation3 + $0x90] sm:$0xff] %vm838_vm7, %v3111_v53  ;;  %v3400_v3 = vld [vmem:[#allocation3 + $0x60] sm:$0xff]  ;;  %v3112_v24 = vadd.f32 %v4274_v43, %v3080_v21  ;;  %v3001_v56 = vpop.f32.mrb[131].mxu1 }
 0x1ff   : > { %3592 = vst.msk [vmem:[%s5668_s13 + $0x28] sm:$0xff] %vm838_vm7, %v3560_v37  ;;  %v3494_v11 = vld [vmem:[#allocation3 + $0x50] sm:$0xff]  ;;  %v3432_v12 = vadd.f32 %v3400_v3, %v5672_v10  ;;  %3141 = vst.msk [vmem:[#allocation3 + $0x80] sm:$0xff] %vm838_vm7, %v3109_v13  ;;  %v3403_v54 = vld [vmem:[#allocation3 + $0x78] sm:$0xff]  ;;  %v3110_v49 = vadd.f32 %v3078_v35, %v3001_v56 }
 0x200   : > { %v5699_v44 = vpop.f32.mrb[128].mxu0  ;;  %v3533_v19 = vadd.f32 %v5643_v16, %v3494_v11  ;;  %v3492_v20 = vld [vmem:[#allocation3 + $0x40] sm:$0xff]  ;;  %3466 = vst.msk [vmem:[#allocation3 + $0x70] sm:$0xff] %vm838_vm7, %v3434_v4  ;;  %v3435_v8 = vadd.f32 %v5676_v55, %v3403_v54  ;;  %3144 = vst.msk [vmem:[#allocation3 + $0x98] sm:$0xff] %vm838_vm7, %v3112_v24  ;;  %v3401_v18 = vld [vmem:[#allocation3 + $0x68] sm:$0xff] }
 0x201   : > { %v5703_v30 = vpop.f32.mrb[129].mxu0  ;;  %v3531_v57 = vadd.f32 %v5643_v16, %v3492_v20  ;;  %v3495_v14 = vld [vmem:[#allocation3 + $0x58] sm:$0xff]  ;;  %3464 = vst.msk [vmem:[#allocation3 + $0x60] sm:$0xff] %vm838_vm7, %v3432_v12  ;;  %v3433_v1 = vadd.f32 %v3401_v18, %v5681_v26  ;;  %3142 = vst.msk [vmem:[#allocation3 + $0x88] sm:$0xff] %vm838_vm7, %v3110_v49  ;;  %v3087_v13 = vld [vmem:[#allocation3 + $0xd0] sm:$0xff] }
 0x202   : > { %v5707_v27 = vpop.f32.mrb[130].mxu0  ;;  %v3565_v60 = vmax.f32 %v3533_v19, 0.0  ;;  %v3534_v63 = vadd.f32 %v5643_v16, %v3495_v14  ;;  %v3493_v6 = vld [vmem:[#allocation3 + $0x48] sm:$0xff]  ;;  %3467 = vst.msk [vmem:[#allocation3 + $0x78] sm:$0xff] %vm838_vm7, %v3435_v8  ;;  %v3085_v3 = vld [vmem:[#allocation3 + $0xc0] sm:$0xff]  ;;  %v3088_v12 = vld [vmem:[#allocation3 + $0xd8] sm:$0xff] }
 0x203   : > { %v5713_v7 = vpop.f32.mrb[131].mxu0  ;;  %v3563_v10 = vmax.f32 %v3531_v57, 0.0  ;;  %v3532_v23 = vadd.f32 %v5643_v16, %v3493_v6  ;;  %3465 = vst.msk [vmem:[#allocation3 + $0x68] sm:$0xff] %vm838_vm7, %v3433_v1  ;;  %v4277_v40 = vpop.f32.mrb[132].mxu1  ;;  %v3086_v18 = vld [vmem:[#allocation3 + $0xc8] sm:$0xff] }
 0x204   : > { %3597 = vst.msk [vmem:[%s5668_s13 + $0x50] sm:$0xff] %vm838_vm7, %v3565_v60  ;;  %v3566_v36 = vmax.f32 %v3534_v63, 0.0  ;;  %v3115_v55 = vadd.f32 %v4277_v40, %v3083_v61  ;;  %v3014_v31 = vpop.f32.mrb[133].mxu1 }
 0x205   : > { %3595 = vst.msk [vmem:[%s5668_s13 + $0x40] sm:$0xff] %vm838_vm7, %v3563_v10  ;;  %v3564_v39 = vmax.f32 %v3532_v23, 0.0  ;;  %v3406_v15 = vld [vmem:[#allocation3 + $0x90] sm:$0xff]  ;;  %v3113_v26 = vadd.f32 %v3081_v22, %v3014_v31  ;;  %v4278_v41 = vpop.f32.mrb[134].mxu1 }
 0x206   : > { %3598 = vst.msk [vmem:[%s5668_s13 + $0x58] sm:$0xff] %vm838_vm7, %v3566_v36  ;;  %v3438_v5 = vadd.f32 %v5699_v44, %v3406_v15  ;;  %3147 = vst.msk [vmem:[#allocation3 + $0xb0] sm:$0xff] %vm838_vm7, %v3115_v55  ;;  %v3404_v48 = vld [vmem:[#allocation3 + $0x80] sm:$0xff]  ;;  %v3116_v62 = vadd.f32 %v4278_v41, %v3084_v25  ;;  %v3017_v29 = vpop.f32.mrb[135].mxu1 }
 0x207   : > { %3596 = vst.msk [vmem:[%s5668_s13 + $0x48] sm:$0xff] %vm838_vm7, %v3564_v39  ;;  %v3498_v9 = vld [vmem:[#allocation3 + $0x70] sm:$0xff]  ;;  %v3436_v58 = vadd.f32 %v3404_v48, %v5703_v30  ;;  %3145 = vst.msk [vmem:[#allocation3 + $0xa0] sm:$0xff] %vm838_vm7, %v3113_v26  ;;  %v3407_v51 = vld [vmem:[#allocation3 + $0x98] sm:$0xff]  ;;  %v3114_v0 = vadd.f32 %v3082_v46, %v3017_v29 }
 0x208   : > { %v5731_v50 = vpop.f32.mrb[132].mxu0  ;;  %v3537_v2 = vadd.f32 %v5643_v16, %v3498_v9  ;;  %v3496_v33 = vld [vmem:[#allocation3 + $0x60] sm:$0xff]  ;;  %3470 = vst.msk [vmem:[#allocation3 + $0x90] sm:$0xff] %vm838_vm7, %v3438_v5  ;;  %v3439_v42 = vadd.f32 %v5707_v27, %v3407_v51  ;;  %3148 = vst.msk [vmem:[#allocation3 + $0xb8] sm:$0xff] %vm838_vm7, %v3116_v62  ;;  %v3405_v17 = vld [vmem:[#allocation3 + $0x88] sm:$0xff] }
 0x209   : > { %v5735_v59 = vpop.f32.mrb[133].mxu0  ;;  %v3535_v47 = vadd.f32 %v5643_v16, %v3496_v33  ;;  %v3499_v44 = vld [vmem:[#allocation3 + $0x78] sm:$0xff]  ;;  %3468 = vst.msk [vmem:[#allocation3 + $0x80] sm:$0xff] %vm838_vm7, %v3436_v58  ;;  %v3437_v34 = vadd.f32 %v3405_v17, %v5713_v7  ;;  %3146 = vst.msk [vmem:[#allocation3 + $0xa8] sm:$0xff] %vm838_vm7, %v3114_v0  ;;  %v3091_v26 = vld [vmem:[#allocation3 + $0xf0] sm:$0xff] }
 0x20a   : > { %v5739_v38 = vpop.f32.mrb[134].mxu0  ;;  %v3569_v53 = vmax.f32 %v3537_v2, 0.0  ;;  %v3538_v52 = vadd.f32 %v5643_v16, %v3499_v44  ;;  %v3497_v28 = vld [vmem:[#allocation3 + $0x68] sm:$0xff]  ;;  %3471 = vst.msk [vmem:[#allocation3 + $0x98] sm:$0xff] %vm838_vm7, %v3439_v42  ;;  %v3089_v48 = vld [vmem:[#allocation3 + $0xe0] sm:$0xff]  ;;  %v3092_v58 = vld [vmem:[#allocation3 + $0xf8] sm:$0xff] }
 0x20b   : > { %v5745_v45 = vpop.f32.mrb[135].mxu0  ;;  %v3567_v30 = vmax.f32 %v3535_v47, 0.0  ;;  %v3536_v37 = vadd.f32 %v5643_v16, %v3497_v28  ;;  %3469 = vst.msk [vmem:[#allocation3 + $0x88] sm:$0xff] %vm838_vm7, %v3437_v34  ;;  %v4281_v32 = vpop.f32.mrb[136].mxu1  ;;  %v3090_v17 = vld [vmem:[#allocation3 + $0xe8] sm:$0xff] }
 0x20c   : > { %3601 = vst.msk [vmem:[%s5668_s13 + $0x70] sm:$0xff] %vm838_vm7, %v3569_v53  ;;  %v3570_v21 = vmax.f32 %v3538_v52, 0.0  ;;  %v3119_v27 = vadd.f32 %v4281_v32, %v3087_v13  ;;  %v3030_v4 = vpop.f32.mrb[137].mxu1 }
 0x20d   : > { %3599 = vst.msk [vmem:[%s5668_s13 + $0x60] sm:$0xff] %vm838_vm7, %v3567_v30  ;;  %v3568_v56 = vmax.f32 %v3536_v37, 0.0  ;;  %v3410_v35 = vld [vmem:[#allocation3 + $0xb0] sm:$0xff]  ;;  %v3117_v7 = vadd.f32 %v3085_v3, %v3030_v4  ;;  %v4282_v11 = vpop.f32.mrb[138].mxu1 }
 0x20e   : > { %3602 = vst.msk [vmem:[%s5668_s13 + $0x78] sm:$0xff] %vm838_vm7, %v3570_v21  ;;  %v3442_v49 = vadd.f32 %v5731_v50, %v3410_v35  ;;  %3151 = vst.msk [vmem:[#allocation3 + $0xd0] sm:$0xff] %vm838_vm7, %v3119_v27  ;;  %v3408_v19 = vld [vmem:[#allocation3 + $0xa0] sm:$0xff]  ;;  %v3120_v20 = vadd.f32 %v4282_v11, %v3088_v12  ;;  %v3033_v8 = vpop.f32.mrb[139].mxu1 }
 0x20f   : > { %3600 = vst.msk [vmem:[%s5668_s13 + $0x68] sm:$0xff] %vm838_vm7, %v3568_v56  ;;  %v3502_v14 = vld [vmem:[#allocation3 + $0x90] sm:$0xff]  ;;  %v3440_v1 = vadd.f32 %v3408_v19, %v5735_v59  ;;  %3149 = vst.msk [vmem:[#allocation3 + $0xc0] sm:$0xff] %vm838_vm7, %v3117_v7  ;;  %v3411_v60 = vld [vmem:[#allocation3 + $0xb8] sm:$0xff]  ;;  %v3118_v63 = vadd.f32 %v3086_v18, %v3033_v8 }
 0x210   : > { %v5763_v43 = vpop.f32.mrb[136].mxu0  ;;  %v3541_v6 = vadd.f32 %v5643_v16, %v3502_v14  ;;  %v3500_v10 = vld [vmem:[#allocation3 + $0x80] sm:$0xff]  ;;  %3474 = vst.msk [vmem:[#allocation3 + $0xb0] sm:$0xff] %vm838_vm7, %v3442_v49  ;;  %v3443_v23 = vadd.f32 %v5739_v38, %v3411_v60  ;;  %3152 = vst.msk [vmem:[#allocation3 + $0xd8] sm:$0xff] %vm838_vm7, %v3120_v20  ;;  %v3409_v40 = vld [vmem:[#allocation3 + $0xa8] sm:$0xff] }
 0x211   : > { %v5767_v24 = vpop.f32.mrb[137].mxu0  ;;  %v3539_v61 = vadd.f32 %v5643_v16, %v3500_v10  ;;  %v3503_v50 = vld [vmem:[#allocation3 + $0x98] sm:$0xff]  ;;  %3472 = vst.msk [vmem:[#allocation3 + $0xa0] sm:$0xff] %vm838_vm7, %v3440_v1  ;;  %v3441_v36 = vadd.f32 %v3409_v40, %v5745_v45  ;;  %3150 = vst.msk [vmem:[#allocation3 + $0xc8] sm:$0xff] %vm838_vm7, %v3118_v63 }
 0x212   : > { %v5771_v54 = vpop.f32.mrb[138].mxu0  ;;  %v3573_v55 = vmax.f32 %v3541_v6, 0.0  ;;  %v3542_v31 = vadd.f32 %v5643_v16, %v3503_v50  ;;  %v3501_v22 = vld [vmem:[#allocation3 + $0x88] sm:$0xff]  ;;  %3475 = vst.msk [vmem:[#allocation3 + $0xb8] sm:$0xff] %vm838_vm7, %v3443_v23 }
 0x213   : > { %v5777_v57 = vpop.f32.mrb[139].mxu0  ;;  %v3571_v59 = vmax.f32 %v3539_v61, 0.0  ;;  %v3540_v39 = vadd.f32 %v5643_v16, %v3501_v22  ;;  %3473 = vst.msk [vmem:[#allocation3 + $0xa8] sm:$0xff] %vm838_vm7, %v3441_v36  ;;  %v4285_v15 = vpop.f32.mrb[140].mxu1 }
 0x214   : > { %3605 = vst.msk [vmem:[%s5668_s13 + $0x90] sm:$0xff] %vm838_vm7, %v3573_v55  ;;  %v3574_v25 = vmax.f32 %v3542_v31, 0.0  ;;  %v3123_v38 = vadd.f32 %v4285_v15, %v3091_v26  ;;  %v3046_v5 = vpop.f32.mrb[141].mxu1 }
 0x215   : > { %3603 = vst.msk [vmem:[%s5668_s13 + $0x80] sm:$0xff] %vm838_vm7, %v3571_v59  ;;  %v3572_v29 = vmax.f32 %v3540_v39, 0.0  ;;  %v3414_v46 = vld [vmem:[#allocation3 + $0xd0] sm:$0xff]  ;;  %v3121_v45 = vadd.f32 %v3089_v48, %v3046_v5  ;;  %v4286_v9 = vpop.f32.mrb[142].mxu1 }
 0x216   : > { %3606 = vst.msk [vmem:[%s5668_s13 + $0x98] sm:$0xff] %vm838_vm7, %v3574_v25  ;;  %v3446_v0 = vadd.f32 %v5763_v43, %v3414_v46  ;;  %3155 = vst.msk [vmem:[#allocation3 + $0xf0] sm:$0xff] %vm838_vm7, %v3123_v38  ;;  %v3412_v2 = vld [vmem:[#allocation3 + $0xc0] sm:$0xff]  ;;  %v3124_v33 = vadd.f32 %v4286_v9, %v3092_v58  ;;  %v3049_v42 = vpop.f32.mrb[143].mxu1 }
 0x217   : > { %3604 = vst.msk [vmem:[%s5668_s13 + $0x88] sm:$0xff] %vm838_vm7, %v3572_v29  ;;  %v3506_v44 = vld [vmem:[#allocation3 + $0xb0] sm:$0xff]  ;;  %v3444_v34 = vadd.f32 %v3412_v2, %v5767_v24  ;;  %3153 = vst.msk [vmem:[#allocation3 + $0xe0] sm:$0xff] %vm838_vm7, %v3121_v45  ;;  %v3415_v53 = vld [vmem:[#allocation3 + $0xd8] sm:$0xff]  ;;  %v3122_v52 = vadd.f32 %v3090_v17, %v3049_v42 }
 0x218   : > { %v4319_v41 = vpop.f32.mrb[140].mxu0  ;;  %v3545_v28 = vadd.f32 %v5643_v16, %v3506_v44  ;;  %v3504_v30 = vld [vmem:[#allocation3 + $0xa0] sm:$0xff]  ;;  %3478 = vst.msk [vmem:[#allocation3 + $0xd0] sm:$0xff] %vm838_vm7, %v3446_v0  ;;  %v3447_v37 = vadd.f32 %v5771_v54, %v3415_v53  ;;  %3156 = vst.msk [vmem:[#allocation3 + $0xf8] sm:$0xff] %vm838_vm7, %v3124_v33  ;;  %v3413_v32 = vld [vmem:[#allocation3 + $0xc8] sm:$0xff] }
 0x219   : > { %v3373_v62 = vpop.f32.mrb[141].mxu0  ;;  %v3543_v13 = vadd.f32 %v5643_v16, %v3504_v30  ;;  %v3507_v43 = vld [vmem:[#allocation3 + $0xb8] sm:$0xff]  ;;  %3476 = vst.msk [vmem:[#allocation3 + $0xc0] sm:$0xff] %vm838_vm7, %v3444_v34  ;;  %v3445_v21 = vadd.f32 %v3413_v32, %v5777_v57  ;;  %3154 = vst.msk [vmem:[#allocation3 + $0xe8] sm:$0xff] %vm838_vm7, %v3122_v52 }
 0x21a   : > { %v4320_v51 = vpop.f32.mrb[142].mxu0  ;;  %v3577_v27 = vmax.f32 %v3545_v28, 0.0  ;;  %v3546_v4 = vadd.f32 %v5643_v16, %v3507_v43  ;;  %v3505_v3 = vld [vmem:[#allocation3 + $0xa8] sm:$0xff]  ;;  %3479 = vst.msk [vmem:[#allocation3 + $0xd8] sm:$0xff] %vm838_vm7, %v3447_v37 }
 0x21b   : > { %v3376_v47 = vpop.f32.mrb[143].mxu0  ;;  %v3575_v24 = vmax.f32 %v3543_v13, 0.0  ;;  %v3544_v56 = vadd.f32 %v5643_v16, %v3505_v3  ;;  %3477 = vst.msk [vmem:[#allocation3 + $0xc8] sm:$0xff] %vm838_vm7, %v3445_v21 }
 0x21c   : > { %3609 = vst.msk [vmem:[%s5668_s13 + $0xb0] sm:$0xff] %vm838_vm7, %v3577_v27  ;;  %v3578_v35 = vmax.f32 %v3546_v4, 0.0 }
 0x21d   : > { %3607 = vst.msk [vmem:[%s5668_s13 + $0xa0] sm:$0xff] %vm838_vm7, %v3575_v24  ;;  %v3576_v7 = vmax.f32 %v3544_v56, 0.0  ;;  %v3418_v11 = vld [vmem:[#allocation3 + $0xf0] sm:$0xff] }
 0x21e   : > { %3610 = vst.msk [vmem:[%s5668_s13 + $0xb8] sm:$0xff] %vm838_vm7, %v3578_v35  ;;  %v3450_v12 = vadd.f32 %v4319_v41, %v3418_v11  ;;  %v3416_v54 = vld [vmem:[#allocation3 + $0xe0] sm:$0xff] }
 0x21f   : > { %3608 = vst.msk [vmem:[%s5668_s13 + $0xa8] sm:$0xff] %vm838_vm7, %v3576_v7  ;;  %v3510_v49 = vld [vmem:[#allocation3 + $0xd0] sm:$0xff]  ;;  %v3448_v19 = vadd.f32 %v3416_v54, %v3373_v62  ;;  %v3419_v20 = vld [vmem:[#allocation3 + $0xf8] sm:$0xff] }
 0x220   : > { %v3549_v8 = vadd.f32 %v5643_v16, %v3510_v49  ;;  %v3508_v18 = vld [vmem:[#allocation3 + $0xc0] sm:$0xff]  ;;  %3482 = vst.msk [vmem:[#allocation3 + $0xf0] sm:$0xff] %vm838_vm7, %v3450_v12  ;;  %v3451_v57 = vadd.f32 %v4320_v51, %v3419_v20  ;;  %v3417_v14 = vld [vmem:[#allocation3 + $0xe8] sm:$0xff] }
 0x221   : > { %v3547_v1 = vadd.f32 %v5643_v16, %v3508_v18  ;;  %v3511_v60 = vld [vmem:[#allocation3 + $0xd8] sm:$0xff]  ;;  %3480 = vst.msk [vmem:[#allocation3 + $0xe0] sm:$0xff] %vm838_vm7, %v3448_v19  ;;  %v3449_v63 = vadd.f32 %v3417_v14, %v3376_v47 }
 0x222   : > { %v3581_v6 = vmax.f32 %v3549_v8, 0.0  ;;  %v3550_v10 = vadd.f32 %v5643_v16, %v3511_v60  ;;  %v3509_v23 = vld [vmem:[#allocation3 + $0xc8] sm:$0xff]  ;;  %3483 = vst.msk [vmem:[#allocation3 + $0xf8] sm:$0xff] %vm838_vm7, %v3451_v57 }
 0x223   : > { %v3579_v40 = vmax.f32 %v3547_v1, 0.0  ;;  %v3548_v61 = vadd.f32 %v5643_v16, %v3509_v23  ;;  %3481 = vst.msk [vmem:[#allocation3 + $0xe8] sm:$0xff] %vm838_vm7, %v3449_v63 }
 0x224   : > { %3613 = vst.msk [vmem:[%s5668_s13 + $0xd0] sm:$0xff] %vm838_vm7, %v3581_v6  ;;  %v3582_v50 = vmax.f32 %v3550_v10, 0.0 }
 0x225   : > { %3611 = vst.msk [vmem:[%s5668_s13 + $0xc0] sm:$0xff] %vm838_vm7, %v3579_v40  ;;  %v3580_v36 = vmax.f32 %v3548_v61, 0.0 }
 0x226   : > { %3614 = vst.msk [vmem:[%s5668_s13 + $0xd8] sm:$0xff] %vm838_vm7, %v3582_v50 }
 0x227   : > { %3612 = vst.msk [vmem:[%s5668_s13 + $0xc8] sm:$0xff] %vm838_vm7, %v3580_v36  ;;  %v3514_v55 = vld [vmem:[#allocation3 + $0xf0] sm:$0xff] }
 0x228   : > { %v3553_v31 = vadd.f32 %v5643_v16, %v3514_v55  ;;  %v3512_v22 = vld [vmem:[#allocation3 + $0xe0] sm:$0xff] }
 0x229   : > { %v3551_v59 = vadd.f32 %v5643_v16, %v3512_v22  ;;  %v3515_v39 = vld [vmem:[#allocation3 + $0xf8] sm:$0xff] }
 0x22a   : > { %v3585_v15 = vmax.f32 %v3553_v31, 0.0  ;;  %v3554_v26 = vadd.f32 %v5643_v16, %v3515_v39  ;;  %v3513_v41 = vld [vmem:[#allocation3 + $0xe8] sm:$0xff] }
 0x22b   : > { %v3583_v25 = vmax.f32 %v3551_v59, 0.0  ;;  %v3552_v38 = vadd.f32 %v5643_v16, %v3513_v41 }
 0x22c   : > { %3617 = vst.msk [vmem:[%s5668_s13 + $0xf0] sm:$0xff] %vm838_vm7, %v3585_v15  ;;  %v3586_v5 = vmax.f32 %v3554_v26, 0.0 }
 0x22d   : > { %3615 = vst.msk [vmem:[%s5668_s13 + $0xe0] sm:$0xff] %vm838_vm7, %v3583_v25  ;;  %v3584_v48 = vmax.f32 %v3552_v38, 0.0 }
 0x22e   : > { %3618 = vst.msk [vmem:[%s5668_s13 + $0xf8] sm:$0xff] %vm838_vm7, %v3586_v5 }
 0x22f   : > { %3616 = vst.msk [vmem:[%s5668_s13 + $0xe8] sm:$0xff] %vm838_vm7, %v3584_v48 }
 0x230   : > { %4378 = shalt.err (!%p4375_p3)
}
 0x231   : > { %s4379_s6 = scalar_lea.hbm %s5854_s27, 4096  ;;  %s4383_s9 = scalar_lea.hbm %s5911_s4, 8192 }
 0x232   : > { %p4380_p4 = scmp.ne.s32.totalorder %s5854_s27, %s4379_s6  ;;  %p4384_p9 = scmp.lt.u32.totalorder %s5854_s27, %s5911_s4 }
 0x233   : > { %p4385_p10 = scmp.lt.u32.totalorder %s4383_s9, %s4379_s6  ;;  %p4387_p12 = scmp.lt.u32.totalorder %s4379_s6, %s5854_s27 }
 0x234   : > { %p4381_p7 = pnand %p4380_p4, %p4496_p5 }
 0x235   : > { %p4386_p11 = por %p4385_p10, %p4384_p9 }
 0x236   : > { %p4382_p8 = pneg %p4381_p7 }
 0x237   : > { %p4388_p13 = por %p4387_p12, %p4386_p11 }
 0x239   : > { %p4389_p0 = pnand %p4388_p13, %p4382_p8 }
 0x23b   : > { %4392 = shalt.err (!%p4389_p0)
}
 0x23c   : > { %s4431_s12 = smov 128   ;;  %s4432_s13 = smov 8  }
 0x23d   : > { %4323 = dma.vmem_to_hbm [thread:$0]  (%p4496_p5), %s5856_s20, 4096, %s5854_s27, %s5866_s19, %s4431_s12, %s4431_s12, %s4432_s13  }
 0x23e PF: > { %p4329_p1 = scmp.ge.s32.totalorder %s4427_s18, 2  ;;  %s3648_s14 = sand.u32 1, %s4415_s15  }
 0x23f   : > { %s3649_s22 = scalar_lea.sflag [#allocation5], %s3648_s14 }
 0x240   : > { %p4326_p2 = pnand %p4329_p1, %p4500_p6 }
 0x242   : > { %4410 = dma.done.wait (!%p4326_p2), %s3649_s22, 4096  }
 0x243   : > { %4412 = vsyncadd (!%p4326_p2), %s3649_s22, 4294963200  ;;  %p14_p3 = scmp.ge.s32.totalorder %s4483_s21, 4   ;;  %s5936_s15 = smov %s4419_s16 }
 0x244   : > { %s5937_s16 = smov %s4423_s17  ;;  %s5938_s17 = smov %s4494_s24 }
 0x245   : > { %s5939_s18 = smov %s4483_s21  ;;  %16 = sbr.rel (!%p14_p3) target bundleno = 3 (0x3), region = 87 }
 0x24c   :  { %3654 = vsyncpa [#allocation5], 1 }
 0x24d   :  { %3656 = vsyncpa [#allocation5 + $0x1], 1 }

// kernel: tpu_custom_call.1
= control target key start
LH: loop header
LB: loop body
LE: loop exit
PB: predicated region body
PF: predicated region fallthrough
CT: control target
= control target key end

     0   :  { %9 = vsyncpa [#allocation5], 0  ;;  %s5907_s0 = inlined_call_operand.vmem [shape: f32[2,16,16,3], index: 0, kind: input, shape index: {}]   ;;  %s5908_s1 = inlined_call_operand.vmem [shape: bf16[9,3,64], index: 1, kind: input, shape index: {}]   ;;  %s5909_s2 = inlined_call_operand.vmem [shape: f32[1,64], index: 2, kind: input, shape index: {}]   ;;  %s5910_s3 = inlined_call_operand.vmem [shape: f32[1,3], index: 3, kind: input, shape index: {}]   ;;  %s5911_s4 = inlined_call_operand.hbm [shape: f32[2,16,16,64], index: 4, kind: output, shape index: {}]  }
   0x1   :  { %11 = vsyncpa [#allocation5 + $0x1], 0  ;;  %s4458_s15 = smov 0   ;;  %s4460_s16 = smov 0  }
   0x2   :  { %s4462_s17 = smov 0   ;;  %s4464_s18 = smov 0  }
   0x3 LB: > { %s4479_s19 = sadd.s32 4294967295, %s4427_s18   ;;  %s3695_s20 = sadd.s32 4294967294, %s4427_s18   ;;  %s4427_s18 = sphi %s4464_s18, %s5939_s18   ;;  %s4423_s17 = sphi %s4462_s17, %s5938_s17   ;;  %s4419_s16 = sphi %s4460_s16, %s5937_s16   ;;  %s4415_s15 = sphi %s4458_s15, %s5936_s15  }
   0x4   : > { %s4483_s21 = sadd.s32 1, %s4427_s18   ;;  %s113_s22 = sadd.s32 1, %s4423_s17 }
   0x5   : > { %s110_s23 = ssub.s32 %s4427_s18, %s4483_s21  ;;  %p123_p0 = scmp.ne.s32.totalorder %s4423_s17, %s4419_s16 }
   0x6   : > { %p111_p1 = scmp.eq.s32.totalorder %s110_s23, 0  ;;  %p124_p2 = scmp.eq.s32.totalorder %s4479_s19, 1 }
   0x7   : > { %p129_p3 = scmp.ne.s32.totalorder %s4419_s16, %s4415_s15  ;;  %p130_p4 = scmp.eq.s32.totalorder %s3695_s20, 1 }
   0x8   : > { %s4494_s24 = scalar_select %p111_p1, %s4423_s17, %s113_s22  }
   0x9   : > { %p4496_p5 = por %p124_p2, %p123_p0  ;;  %p4500_p6 = por %p130_p4, %p129_p3 }
   0xa   : > { %p3698_p7 = scmp.ge.s32.totalorder %s4427_s18, 1  ;;  %p165_p8 = scmp.lt.s32.totalorder %s4427_s18, 3 }
   0xc   : > { %p166_p9 = pnand %p3698_p7, %p165_p8 }
   0xd   : > { %v621_v0 = vld [vmem:[%s5908_s1] sm:$0x3] (!%p166_p9)  ;;  %vm670_vm0 = vcmask (!%p166_p9), 1040384   ;;  %vm671_vm1 = vcmask (!%p166_p9), 1041408   ;;  %p191_p10 = scmp.lt.s32.totalorder (!%p166_p9), %s4479_s19, 1  ;;  %v202_v1 = vlaneseq (!%p166_p9)  ;;  %v4429_v2 = vmov (!%p166_p9), 65535  }
   0xe   : > { %169 = sbr.rel (%p166_p9) target bundleno = 574 (0x23e), region = 36  ;;  %v672_v3 = vsel (!%p166_p9), %vm670_vm0, 4294967295, %v4429_v2  ;;  %v197_v4 = vld [vmem:[%s5910_s3] sm:$0x1] (!%p166_p9)  ;;  %v3718_v8 = vld [vmem:[%s5908_s1 + $0x2] sm:$0x3] (!%p166_p9) }
   0xf   : > { %v4513_v5 = vsel (!%p166_p9), %vm671_vm1, %v672_v3, 0  ;;  %v198_v6 = vpack.c.bf16 (!%p166_p9), %v197_v4, %v197_v4  ;;  %v203_v7 = vshrl.u32 (!%p166_p9), %v202_v1, 7  ;;  %v3735_v11 = vld [vmem:[%s5908_s1 + $0x4] sm:$0x3] (!%p166_p9)  ;;  %vm206_vm2 = vcmask (!%p166_p9), 23552   ;;  %s188_s9 = sand.u32 (!%p166_p9), 1, %s4419_s16  }
  0x10   : > { %v675_v9 = vand.u32 (!%p166_p9), %v4513_v5, %v621_v0  ;;  %v4521_v10 = vand.u32 (!%p166_p9), %v3718_v8, %v4513_v5  ;;  %v4527_v14 = vand.u32 (!%p166_p9), %v3735_v11, %v4513_v5  ;;  %v4537_v15 = vld [vmem:[%s5908_s1 + $0x6] sm:$0x3] (!%p166_p9)  ;;  %v4542_v16 = vld [vmem:[%s5908_s1 + $0x8] sm:$0x3] (!%p166_p9)  ;;  %vm456_vm3 = vsmask.f32 (!%p166_p9), 7938 }
  0x11   : > { %v200_v12 = vpack.i.b16 (!%p166_p9), %v198_v6, %v198_v6  ;;  %v204_v13 = vsub.s32 (!%p166_p9), 0, %v203_v7  ;;  %v4676_v30 = vand.u32 (!%p166_p9), %v4537_v15, %v4513_v5  ;;  %v4689_v37 = vand.u32 (!%p166_p9), %v4542_v16, %v4513_v5  ;;  %vm4719_vm4 = vmand (!%p166_p9), %vm206_vm2, %vm456_vm3  ;;  %s5649_s12 = sshll.u32 (!%p166_p9), %s188_s9, 8  ;;  %s3861_s14 = sshll.u32 (!%p166_p9), %s4479_s19, 12 }
  0x12   : > { %4321 = vmatprep.subr.bf16.mxu1 (!%p166_p9), %v675_v9  ;;  %4015 = vmatprep.subr.bf16.mxu0 (!%p166_p9), %v675_v9  ;;  %vm555_vm5 = vsmask.f32 (!%p166_p9), 7424  ;;  %vm838_vm7 = vcmask (!%p166_p9), 523264   ;;  %s5854_s27 = scalar_lea.hbm (!%p166_p9), %s5911_s4, %s3861_s14  ;;  %s4430_s29 = smov (!%p166_p9), [#allocation4]  }
  0x13   : > { %4322 = vmatpush3.bf16.msra.mxu1 (!%p166_p9), %v675_v9  ;;  %v4544_v17 = vrot.slane (!%p166_p9), %v200_v12, %v204_v13  ;;  %4016 = vmatpush3.bf16.msra.mxu0 (!%p166_p9), %v675_v9  ;;  %vm4904_vm6 = vmand (!%p166_p9), %vm206_vm2, %vm555_vm5  ;;  %s4369_s30 = sshll.u32 (!%p166_p9), %s4430_s29, 4  ;;  %s4370_s30 = int_to_ptr.vmem [resolvable:$false] %s4369_s30 }
  0x14   : > { %4049 = vmatprep.subr.bf16.mxu1 (!%p166_p9), %v4521_v10  ;;  %4083 = vmatprep.subr.bf16.mxu0 (!%p166_p9), %v4527_v14 }
  0x15   : > { %s192_s5 = scalar_select %p191_p10, %s4479_s19, 1  ;;  %215 = vst.msk [vmem:[#allocation2 + $0x40] sm:$0xff] %vm206_vm2, %v4544_v17  ;;  %207 = vst.msk [vmem:[#allocation2] sm:$0xff] %vm206_vm2, %v4544_v17 }
  0x16   : > { %208 = vst.msk [vmem:[#allocation2 + $0x8] sm:$0xff] %vm206_vm2, %v4544_v17  ;;  %209 = vst.msk [vmem:[#allocation2 + $0x10] sm:$0xff] %vm206_vm2, %v4544_v17  ;;  %s5866_s19 = scalar_lea.sflag [#allocation5], %s188_s9 }
  0x17   : > { %s3860_s10 = sshll.u32 %s192_s5, 8  ;;  %210 = vst.msk [vmem:[#allocation2 + $0x18] sm:$0xff] %vm206_vm2, %v4544_v17  ;;  %211 = vst.msk [vmem:[#allocation2 + $0x20] sm:$0xff] %vm206_vm2, %v4544_v17  ;;  %s4371_s5 = scalar_lea.vmem %s4370_s30, 8192 }
  0x18   : > { %s4532_s13 = scalar_lea.vmem %s5907_s0, %s3860_s10  ;;  %212 = vst.msk [vmem:[#allocation2 + $0x28] sm:$0xff] %vm206_vm2, %v4544_v17  ;;  %213 = vst.msk [vmem:[#allocation2 + $0x30] sm:$0xff] %vm206_vm2, %v4544_v17 }
  0x19   : > { %v275_v18 = vld [vmem:[%s4532_s13 + $0x70] sm:$0xff]  ;;  %v276_v19 = vld [vmem:[%s4532_s13 + $0x78] sm:$0xff]  ;;  %v4549_v20 = vld [vmem:[%s4532_s13 + $0x80] sm:$0xff]  ;;  %214 = vst.msk [vmem:[#allocation2 + $0x38] sm:$0xff] %vm206_vm2, %v4544_v17 }
  0x1a   : > { %v4551_v21 = vpack.c.bf16 %v276_v19, %v275_v18  ;;  %v278_v22 = vld [vmem:[%s4532_s13 + $0x88] sm:$0xff]  ;;  %v261_v23 = vld [vmem:[%s4532_s13] sm:$0xff]  ;;  %216 = vst.msk [vmem:[#allocation2 + $0x48] sm:$0xff] %vm206_vm2, %v4544_v17  ;;  %217 = vst.msk [vmem:[#allocation2 + $0x50] sm:$0xff] %vm206_vm2, %v4544_v17 }
  0x1b   : > { %v262_v24 = vld [vmem:[%s4532_s13 + $0x8] sm:$0xff]  ;;  %218 = vst.msk [vmem:[#allocation2 + $0x58] sm:$0xff] %vm206_vm2, %v4544_v17  ;;  %219 = vst.msk [vmem:[#allocation2 + $0x60] sm:$0xff] %vm206_vm2, %v4544_v17  ;;  %v4667_v25 = vpack.c.bf16 %v278_v22, %v4549_v20  ;;  %v279_v27 = vld [vmem:[%s4532_s13 + $0x90] sm:$0xff] }
  0x1c   : > { %220 = vst.msk [vmem:[#allocation2 + $0x68] sm:$0xff] %vm206_vm2, %v4544_v17  ;;  %221 = vst.msk [vmem:[#allocation2 + $0x70] sm:$0xff] %vm206_vm2, %v4544_v17  ;;  %v4669_v26 = vpack.c.bf16 %v262_v24, %v261_v23  ;;  %v280_v28 = vld [vmem:[%s4532_s13 + $0x98] sm:$0xff]  ;;  %v281_v29 = vld [vmem:[%s4532_s13 + $0xa0] sm:$0xff]  ;;  %v376_v31 = vshrl.u32 %v4551_v21, 16  ;;  %v379_v32 = vshll.u32 %v4551_v21, 16 }
  0x1d   : > { %222 = vst.msk [vmem:[#allocation2 + $0x78] sm:$0xff] %vm206_vm2, %v4544_v17  ;;  %223 = vst.msk [vmem:[#allocation2 + $0x80] sm:$0xff] %vm206_vm2, %v4544_v17  ;;  %v4682_v33 = vpack.c.bf16 %v280_v28, %v279_v27  ;;  %v282_v34 = vld [vmem:[%s4532_s13 + $0xa8] sm:$0xff]  ;;  %v263_v35 = vld [vmem:[%s4532_s13 + $0x10] sm:$0xff]  ;;  %v383_v38 = vshrl.u32 %v4667_v25, 16  ;;  %v386_v39 = vshll.u32 %v4667_v25, 16 }
  0x1e   : > { %224 = vst.msk [vmem:[#allocation2 + $0x88] sm:$0xff] %vm206_vm2, %v4544_v17  ;;  %225 = vst.msk [vmem:[#allocation2 + $0x90] sm:$0xff] %vm206_vm2, %v4544_v17  ;;  %v264_v36 = vld [vmem:[%s4532_s13 + $0x18] sm:$0xff]  ;;  %v327_v40 = vshrl.u32 %v4669_v26, 16  ;;  %v330_v41 = vshll.u32 %v4669_v26, 16  ;;  %v265_v42 = vld [vmem:[%s4532_s13 + $0x20] sm:$0xff]  ;;  %v4715_v51 = vpack.c.bf16 %v282_v34, %v281_v29 }
  0x1f   : > { %226 = vst.msk [vmem:[#allocation2 + $0x98] sm:$0xff] %vm206_vm2, %v4544_v17  ;;  %227 = vst.msk [vmem:[#allocation2 + $0xa0] sm:$0xff] %vm206_vm2, %v4544_v17  ;;  %v266_v43 = vld [vmem:[%s4532_s13 + $0x28] sm:$0xff]  ;;  %v378_v44 = vrot.slane %v376_v31, 7  ;;  %v4703_v45 = vrot.slane %v379_v32, 1  ;;  %v5920_v46 = vshrl.u32 %v4682_v33, 16  ;;  %v4725_v55 = vpack.c.bf16 %v264_v36, %v263_v35 }
  0x20   : > { %228 = vst.msk [vmem:[#allocation2 + $0xa8] sm:$0xff] %vm206_vm2, %v4544_v17  ;;  %229 = vst.msk [vmem:[#allocation2 + $0xb0] sm:$0xff] %vm206_vm2, %v4544_v17  ;;  %v393_v47 = vshll.u32 %v4682_v33, 16  ;;  %v385_v48 = vrot.slane %v383_v38, 7  ;;  %v329_v49 = vrot.slane %v327_v40, 7  ;;  %v4713_v50 = vrot.slane %v330_v41, 1 }
  0x21   : > { %230 = vst.msk [vmem:[#allocation2 + $0xb8] sm:$0xff] %vm206_vm2, %v4544_v17  ;;  %231 = vst.msk [vmem:[#allocation2 + $0xc0] sm:$0xff] %vm206_vm2, %v4544_v17  ;;  %v381_v52 = vor.u32 %v379_v32, %v378_v44  ;;  %v392_v54 = vrot.slane %v5920_v46, 7  ;;  %v4727_v56 = vpack.c.bf16 %v266_v43, %v265_v42  ;;  %v283_v57 = vld [vmem:[%s4532_s13 + $0xb0] sm:$0xff]  ;;  %v284_v58 = vld [vmem:[%s4532_s13 + $0xb8] sm:$0xff]  ;;  %v5916_v61 = vshrl.u32 %v4715_v51, 16 }
  0x22   : > { %232 = vst.msk [vmem:[#allocation2 + $0xc8] sm:$0xff] %vm206_vm2, %v4544_v17  ;;  %233 = vst.msk [vmem:[#allocation2 + $0xd0] sm:$0xff] %vm206_vm2, %v4544_v17  ;;  %v388_v59 = vor.u32 %v386_v39, %v385_v48  ;;  %v332_v60 = vor.u32 %v330_v41, %v329_v49  ;;  %v5919_v62 = vshll.u32 %v4715_v51, 16  ;;  %v285_v63 = vld [vmem:[%s4532_s13 + $0xc0] sm:$0xff]  ;;  %v286_v0 = vld [vmem:[%s4532_s13 + $0xc8] sm:$0xff]  ;;  %v334_v7 = vshrl.u32 %v4725_v55, 16 }
  0x23   : > { %234 = vst.msk [vmem:[#allocation2 + $0xd8] sm:$0xff] %vm206_vm2, %v4544_v17  ;;  %235 = vst.msk [vmem:[#allocation2 + $0xe0] sm:$0xff] %vm206_vm2, %v4544_v17  ;;  %v267_v1 = vld [vmem:[%s4532_s13 + $0x30] sm:$0xff]  ;;  %v479_v2 = vld [vmem:[#allocation2 + $0x40] sm:$0xff]  ;;  %v395_v6 = vor.u32 %v393_v47, %v392_v54  ;;  %v337_v8 = vshll.u32 %v4725_v55, 16  ;;  %v341_v9 = vshrl.u32 %v4727_v56, 16  ;;  %v4787_v34 = vpack.c.bf16 %v284_v58, %v283_v57 }
  0x24   : > { %236 = vst.msk [vmem:[#allocation2 + $0xe8] sm:$0xff] %vm206_vm2, %v4544_v17  ;;  %237 = vst.msk [vmem:[#allocation2 + $0xf0] sm:$0xff] %vm206_vm2, %v4544_v17  ;;  %v482_v3 = vld [vmem:[#allocation2 + $0x48] sm:$0xff]  ;;  %v605_v4 = vld [vmem:[#allocation2] sm:$0xff]  ;;  %v4751_v11 = vsel %vm4719_vm4, %v381_v52, %v479_v2  ;;  %v399_v16 = vrot.slane %v5916_v61, 7  ;;  %v336_v23 = vrot.slane %v334_v7, 7  ;;  %v4789_v35 = vpack.c.bf16 %v286_v0, %v285_v63 }
  0x25   : > { %238 = vst.msk [vmem:[#allocation2 + $0xf8] sm:$0xff] %vm206_vm2, %v4544_v17  ;;  %239 = vst.msk [vmem:[#allocation2 + $0x100] sm:$0xff] %vm206_vm2, %v4544_v17  ;;  %v4755_v12 = vsel %vm4719_vm4, %v388_v59, %v482_v3  ;;  %4017 = vmatprep.mubr.msk.bf16.mxu0 %vm206_vm2, %v605_v4  ;;  %v458_v13 = vld [vmem:[#allocation2 + $0x8] sm:$0xff]  ;;  %v485_v15 = vld [vmem:[#allocation2 + $0x50] sm:$0xff]  ;;  %4033 = vmatprep.mubr.msk.bf16.mxu1 %vm206_vm2, %v4751_v11  ;;  %v343_v24 = vrot.slane %v341_v9, 7  ;;  %v4792_v41 = vrot.slane %v337_v8, 1 }
  0x26   : > { %240 = vst.msk [vmem:[#allocation2 + $0x108] sm:$0xff] %vm206_vm2, %v4544_v17  ;;  %241 = vst.msk [vmem:[#allocation2 + $0x110] sm:$0xff] %vm206_vm2, %v4544_v17  ;;  %v268_v18 = vld [vmem:[%s4532_s13 + $0x38] sm:$0xff]  ;;  %v4768_v19 = vsel %vm4719_vm4, %v332_v60, %v458_v13  ;;  %v4772_v20 = vsel %vm4719_vm4, %v395_v6, %v485_v15  ;;  %v269_v27 = vld [vmem:[%s4532_s13 + $0x40] sm:$0xff]  ;;  %4034 = vmatmul.mubr.msk.bf16.vlgmr.msra.gmra.mrb[0].mxu1 %vm206_vm2, %v4755_v12  ;;  %v402_v28 = vor.u32 %v5919_v62, %v399_v16 }
  0x27   : > { %242 = vst.msk [vmem:[#allocation2 + $0x118] sm:$0xff] %vm206_vm2, %v4544_v17  ;;  %243 = vst.msk [vmem:[#allocation2 + $0x120] sm:$0xff] %vm206_vm2, %v4544_v17  ;;  %v488_v22 = vld [vmem:[#allocation2 + $0x58] sm:$0xff]  ;;  %4018 = vmatmul.mubr.msk.bf16.vlgmr.msra.gmra.mrb[0].mxu0 %vm206_vm2, %v4768_v19  ;;  %v461_v29 = vld [vmem:[#allocation2 + $0x10] sm:$0xff]  ;;  %4050 = vmatpush3.bf16.msra.mxu1 %v4521_v10  ;;  %v339_v42 = vor.u32 %v337_v8, %v336_v23  ;;  %v4797_v44 = vpack.c.bf16 %v268_v18, %v267_v1  ;;  %v5914_v10 = vshrl.u32 %v4787_v34, 16 }
  0x28   : > { %244 = vst.msk [vmem:[#allocation2 + $0x128] sm:$0xff] %vm206_vm2, %v4544_v17  ;;  %245 = vst.msk [vmem:[#allocation2 + $0x130] sm:$0xff] %vm206_vm2, %v4544_v17  ;;  %v464_v32 = vld [vmem:[#allocation2 + $0x18] sm:$0xff]  ;;  %v270_v36 = vld [vmem:[%s4532_s13 + $0x48] sm:$0xff]  ;;  %4037 = vmatprep.mubr.msk.bf16.mxu1 %vm206_vm2, %v4772_v20  ;;  %v4806_v57 = vsel %vm4719_vm4, %v402_v28, %v488_v22  ;;  %4084 = vmatpush3.bf16.msra.mxu0 %v4527_v14  ;;  %v5918_v58 = vshll.u32 %v4787_v34, 16  ;;  %v5912_v59 = vshrl.u32 %v4789_v35, 16 }
  0x29   : > { %246 = vst.msk [vmem:[#allocation2 + $0x138] sm:$0xff] %vm206_vm2, %v4544_v17  ;;  %247 = vst.msk [vmem:[#allocation2 + $0x140] sm:$0xff] %vm206_vm2, %v4544_v17  ;;  %v287_v48 = vld [vmem:[%s4532_s13 + $0xd0] sm:$0xff]  ;;  %v288_v49 = vld [vmem:[%s4532_s13 + $0xd8] sm:$0xff]  ;;  %4117 = vmatprep.subr.bf16.mxu1 %v4676_v30  ;;  %v4823_v14 = vsel %vm4719_vm4, %v339_v42, %v461_v29  ;;  %v5917_v2 = vshll.u32 %v4789_v35, 16  ;;  %v348_v3 = vshrl.u32 %v4797_v44, 16  ;;  %4151 = vmatprep.subr.bf16.mxu0 %v4689_v37 }
  0x2a   : > { %248 = vst.msk [vmem:[#allocation2 + $0x148] sm:$0xff] %vm206_vm2, %v4544_v17  ;;  %249 = vst.msk [vmem:[#allocation2 + $0x150] sm:$0xff] %vm206_vm2, %v4544_v17  ;;  %v289_v52 = vld [vmem:[%s4532_s13 + $0xe0] sm:$0xff]  ;;  %v290_v60 = vld [vmem:[%s4532_s13 + $0xe8] sm:$0xff]  ;;  %4021 = vmatprep.mubr.msk.bf16.mxu0 %vm206_vm2, %v4823_v14  ;;  %v406_v4 = vrot.slane %v5914_v10, 7  ;;  %v413_v6 = vrot.slane %v5912_v59, 7  ;;  %v4843_v13 = vpack.c.bf16 %v270_v36, %v269_v27  ;;  %v4847_v18 = vpack.c.bf16 %v288_v49, %v287_v48 }
  0x2b   : > { %250 = vst.msk [vmem:[#allocation2 + $0x158] sm:$0xff] %vm206_vm2, %v4544_v17  ;;  %251 = vst.msk [vmem:[#allocation2 + $0x160] sm:$0xff] %vm206_vm2, %v4544_v17  ;;  %v271_v63 = vld [vmem:[%s4532_s13 + $0x50] sm:$0xff]  ;;  %v272_v0 = vld [vmem:[%s4532_s13 + $0x58] sm:$0xff]  ;;  %v351_v8 = vshll.u32 %v4797_v44, 16  ;;  %v4849_v22 = vpack.c.bf16 %v290_v60, %v289_v52  ;;  %v507_v61 = vor.u32 %v4713_v50, %v327_v40 }
  0x2c   : > { %252 = vst.msk [vmem:[#allocation2 + $0x168] sm:$0xff] %vm206_vm2, %v4544_v17  ;;  %253 = vst.msk [vmem:[#allocation2 + $0x170] sm:$0xff] %vm206_vm2, %v4544_v17  ;;  %v491_v15 = vld [vmem:[#allocation2 + $0x60] sm:$0xff]  ;;  %v494_v16 = vld [vmem:[#allocation2 + $0x68] sm:$0xff]  ;;  %v4851_v23 = vpack.c.bf16 %v272_v0, %v271_v63  ;;  %v416_v27 = vor.u32 %v5917_v2, %v413_v6  ;;  %v355_v29 = vshrl.u32 %v4843_v13, 16  ;;  %v5913_v42 = vshrl.u32 %v4847_v18, 16 }
  0x2d   : > { %254 = vst.msk [vmem:[#allocation2 + $0x178] sm:$0xff] %vm206_vm2, %v4544_v17  ;;  %255 = vst.msk [vmem:[#allocation2 + $0x180] sm:$0xff] %vm206_vm2, %v4544_v17  ;;  %v467_v28 = vld [vmem:[#allocation2 + $0x20] sm:$0xff]  ;;  %v5915_v48 = vshrl.u32 %v4849_v22, 16  ;;  %v274_v52 = vld [vmem:[%s4532_s13 + $0x68] sm:$0xff] }
  0x2e   : > { %256 = vst.msk [vmem:[#allocation2 + $0x188] sm:$0xff] %vm206_vm2, %v4544_v17  ;;  %257 = vst.msk [vmem:[#allocation2 + $0x190] sm:$0xff] %vm206_vm2, %v4544_v17  ;;  %v273_v49 = vld [vmem:[%s4532_s13 + $0x60] sm:$0xff]  ;;  %4038 = vmatmul.mubr.msk.bf16.gmra.mrb[4].mxu1 %vm206_vm2, %v4806_v57  ;;  %v4884_v63 = vsel %vm4719_vm4, %v416_v27, %v494_v16  ;;  %v357_v0 = vrot.slane %v355_v29, 7  ;;  %v420_v16 = vrot.slane %v5913_v42, 7  ;;  %v500_v42 = vld [vmem:[#allocation2 + $0x78] sm:$0xff] }
  0x2f   : > { %258 = vst.msk [vmem:[#allocation2 + $0x198] sm:$0xff] %vm206_vm2, %v4544_v17  ;;  %259 = vst.msk [vmem:[#allocation2 + $0x1a0] sm:$0xff] %vm206_vm2, %v4544_v17  ;;  %v557_v59 = vld [vmem:[#allocation2 + $0x128] sm:$0xff]  ;;  %v365_v10 = vshll.u32 %v4851_v23, 16  ;;  %v560_v2 = vld [vmem:[#allocation2 + $0x130] sm:$0xff] }
  0x30   : > { %260 = vst.msk [vmem:[#allocation2 + $0x1a8] sm:$0xff] %vm206_vm2, %v4544_v17  ;;  %317 = vst.msk [vmem:[#allocation2 + $0xd0] sm:$0xff] %vm206_vm2, %v4551_v21  ;;  %v344_v17 = vshll.u32 %v4727_v56, 16  ;;  %v4929_v40 = vsel %vm4904_vm6, %v507_v61, %v557_v59  ;;  %v3837_v27 = vld [vmem:[%s5908_s1 + $0x10] sm:$0x3] }
  0x31   : > { %318 = vst.msk [vmem:[#allocation2 + $0xd8] sm:$0xff] %vm206_vm2, %v4667_v25  ;;  %310 = vst.msk [vmem:[#allocation2 + $0x98] sm:$0xff] %vm206_vm2, %v4669_v26  ;;  %v569_v21 = vld [vmem:[#allocation2 + $0x148] sm:$0xff]  ;;  %v5927_v25 = vshrl.u32 %v4682_v33, 16 }
  0x32   : > { %319 = vst.msk [vmem:[#allocation2 + $0xe0] sm:$0xff] %vm206_vm2, %v4682_v33  ;;  %320 = vst.msk [vmem:[#allocation2 + $0xe8] sm:$0xff] %vm206_vm2, %v4715_v51  ;;  %v346_v43 = vor.u32 %v344_v17, %v343_v24  ;;  %v4802_v54 = vrot.slane %v344_v17, 1  ;;  %v350_v17 = vrot.slane %v348_v3, 7  ;;  %v409_v24 = vor.u32 %v5918_v58, %v406_v4 }
  0x33   : > { %311 = vst.msk [vmem:[#allocation2 + $0xa0] sm:$0xff] %vm206_vm2, %v4725_v55  ;;  %312 = vst.msk [vmem:[#allocation2 + $0xa8] sm:$0xff] %vm206_vm2, %v4727_v56  ;;  %v428_v4 = vshll.u32 %v4849_v22, 16  ;;  %v5930_v33 = vshll.u32 %v4789_v35, 16 }
  0x34   : > { %481 = vst [vmem:[#allocation2 + $0x40] sm:$0xff] %v4751_v11  ;;  %484 = vst [vmem:[#allocation2 + $0x48] sm:$0xff] %v4755_v12  ;;  %v4827_v1 = vsel %vm4719_vm4, %v346_v43, %v464_v32  ;;  %v358_v32 = vshll.u32 %v4843_v13, 16  ;;  %v353_v36 = vor.u32 %v351_v8, %v350_v17  ;;  %v421_v43 = vshll.u32 %v4847_v18, 16 }
  0x35   : > { %460 = vst [vmem:[#allocation2 + $0x8] sm:$0xff] %v4768_v19  ;;  %487 = vst [vmem:[#allocation2 + $0x50] sm:$0xff] %v4772_v20  ;;  %4022 = vmatmul.mubr.msk.bf16.gmra.mrb[4].mxu0 %vm206_vm2, %v4827_v1  ;;  %v4880_v60 = vsel %vm4719_vm4, %v409_v24, %v491_v15  ;;  %v470_v15 = vld [vmem:[#allocation2 + $0x28] sm:$0xff]  ;;  %v427_v17 = vrot.slane %v5915_v48, 7  ;;  %v362_v24 = vshrl.u32 %v4851_v23, 16  ;;  %v299_v48 = vpack.c.bf16 %v274_v52, %v273_v49  ;;  %v473_v49 = vld [vmem:[#allocation2 + $0x30] sm:$0xff] }
  0x36   : > { %321 = vst.msk [vmem:[#allocation2 + $0xf0] sm:$0xff] %vm206_vm2, %v4787_v34  ;;  %322 = vst.msk [vmem:[#allocation2 + $0xf8] sm:$0xff] %vm206_vm2, %v4789_v35  ;;  %4041 = vmatprep.mubr.msk.bf16.mxu1 %vm206_vm2, %v4880_v60  ;;  %v4895_v6 = vsel %vm4719_vm4, %v353_v36, %v467_v28  ;;  %v360_v28 = vor.u32 %v358_v32, %v357_v0  ;;  %v497_v36 = vld [vmem:[#allocation2 + $0x70] sm:$0xff]  ;;  %v423_v58 = vor.u32 %v421_v43, %v420_v16 }
  0x37   : > { %490 = vst [vmem:[#allocation2 + $0x58] sm:$0xff] %v4806_v57  ;;  %313 = vst.msk [vmem:[#allocation2 + $0xb0] sm:$0xff] %vm206_vm2, %v4797_v44  ;;  %4025 = vmatprep.mubr.msk.bf16.mxu0 %vm206_vm2, %v4895_v6  ;;  %v430_v62 = vor.u32 %v428_v4, %v427_v17  ;;  %v364_v46 = vrot.slane %v362_v24, 7  ;;  %v509_v0 = vor.u32 %v4792_v41, %v334_v7  ;;  %v369_v26 = vshrl.u32 %v299_v48, 16 }
  0x38   : > { %463 = vst [vmem:[#allocation2 + $0x10] sm:$0xff] %v4823_v14  ;;  %466 = vst [vmem:[#allocation2 + $0x18] sm:$0xff] %v4827_v1  ;;  %v372_v52 = vshll.u32 %v299_v48, 16  ;;  %v4934_v50 = vsel %vm4719_vm4, %v423_v58, %v497_v36  ;;  %v514_v58 = vrot.slane %v358_v32, 1  ;;  %v521_v17 = vor.u32 %v4703_v45, %v376_v31  ;;  %4042 = vmatmul.mubr.msk.bf16.gmra.mrb[8].mxu1 %vm206_vm2, %v4884_v63  ;;  %v575_v31 = vld [vmem:[#allocation2 + $0x158] sm:$0xff]  ;;  %v581_v32 = vld [vmem:[#allocation2 + $0x168] sm:$0xff] }
  0x39   : > { %314 = vst.msk [vmem:[#allocation2 + $0xb8] sm:$0xff] %vm206_vm2, %v4843_v13  ;;  %323 = vst.msk [vmem:[#allocation2 + $0x100] sm:$0xff] %vm206_vm2, %v4847_v18  ;;  %v4938_v55 = vsel %vm4719_vm4, %v430_v62, %v500_v42  ;;  %v367_v7 = vor.u32 %v365_v10, %v364_v46  ;;  %v4943_v41 = vsel %vm4904_vm6, %v509_v0, %v560_v2  ;;  %v371_v61 = vrot.slane %v369_v26, 7  ;;  %v476_v2 = vld [vmem:[#allocation2 + $0x38] sm:$0xff]  ;;  %v566_v42 = vld [vmem:[#allocation2 + $0x140] sm:$0xff] }
  0x3a   : > { %324 = vst.msk [vmem:[#allocation2 + $0x108] sm:$0xff] %vm206_vm2, %v4849_v22  ;;  %315 = vst.msk [vmem:[#allocation2 + $0xc0] sm:$0xff] %vm206_vm2, %v4851_v23  ;;  %v4924_v23 = vsel %vm4719_vm4, %v360_v28, %v470_v15  ;;  %v511_v62 = vor.u32 %v4802_v54, %v341_v9  ;;  %v512_v46 = vrot.slane %v351_v8, 1  ;;  %v516_v15 = vrot.slane %v365_v10, 1  ;;  %v578_v28 = vld [vmem:[#allocation2 + $0x160] sm:$0xff]  ;;  %v572_v10 = vld [vmem:[#allocation2 + $0x150] sm:$0xff]  ;;  %4045 = vmatprep.mubr.msk.bf16.mxu1 %vm206_vm2, %v4934_v50 }
  0x3b   : > { %493 = vst [vmem:[#allocation2 + $0x60] sm:$0xff] %v4880_v60  ;;  %496 = vst [vmem:[#allocation2 + $0x68] sm:$0xff] %v4884_v63  ;;  %v4955_v59 = vsel %vm4719_vm4, %v367_v7, %v473_v49  ;;  %v518_v16 = vrot.slane %v372_v52, 1  ;;  %v374_v56 = vor.u32 %v372_v52, %v371_v61  ;;  %v522_v45 = vrot.slane %v386_v39, 1  ;;  %v5116_v53 = vld [vmem:[#allocation2 + $0xa8] sm:$0xff] }
  0x3c   : > { %469 = vst [vmem:[#allocation2 + $0x20] sm:$0xff] %v4895_v6  ;;  %316 = vst.msk [vmem:[#allocation2 + $0xc8] sm:$0xff] %vm206_vm2, %v299_v48  ;;  %v563_v48 = vld [vmem:[#allocation2 + $0x138] sm:$0xff]  ;;  %v513_v54 = vor.u32 %v512_v46, %v348_v3  ;;  %v515_v44 = vor.u32 %v514_v58, %v355_v29  ;;  %v517_v3 = vor.u32 %v516_v15, %v362_v24  ;;  %v524_v36 = vrot.slane %v393_v47, 1  ;;  %v584_v29 = vld [vmem:[#allocation2 + $0x170] sm:$0xff] }
  0x3d   : > { %472 = vst [vmem:[#allocation2 + $0x28] sm:$0xff] %v4924_v23  ;;  %559 = vst [vmem:[#allocation2 + $0x128] sm:$0xff] %v4929_v40  ;;  %4026 = vmatmul.mubr.msk.bf16.gmra.mrb[8].mxu0 %vm206_vm2, %v4924_v23  ;;  %v4967_v9 = vsel %vm4904_vm6, %v511_v62, %v563_v48  ;;  %v519_v8 = vor.u32 %v518_v16, %v369_v26  ;;  %v4984_v39 = vsel %vm4719_vm4, %v374_v56, %v476_v2  ;;  %v291_v24 = vld [vmem:[%s4532_s13 + $0xf0] sm:$0xff]  ;;  %v292_v26 = vld [vmem:[%s4532_s13 + $0xf8] sm:$0xff]  ;;  %s5668_s13 = scalar_lea.vmem [#allocation4], %s5649_s12 }
  0x3e   : > { %499 = vst [vmem:[#allocation2 + $0x70] sm:$0xff] %v4934_v50  ;;  %502 = vst [vmem:[#allocation2 + $0x78] sm:$0xff] %v4938_v55  ;;  %4029 = vmatprep.mubr.msk.bf16.mxu0 %vm206_vm2, %v4955_v59  ;;  %v4988_v0 = vsel %vm4904_vm6, %v513_v54, %v566_v42  ;;  %v4992_v49 = vsel %vm4904_vm6, %v521_v17, %v578_v28  ;;  %v523_v13 = vor.u32 %v522_v45, %v383_v38  ;;  %v872_v48 = vld [vmem:[#allocation2 + $0x90] sm:$0xff]  ;;  %v587_v16 = vld [vmem:[#allocation2 + $0x178] sm:$0xff]  ;;  %s3633_s20 = sshll.u32 %s5668_s13, 4  ;;  %s5856_s20 = int_to_ptr.vmem [resolvable:$true] %s3633_s20 }
  0x3f   : > { %562 = vst [vmem:[#allocation2 + $0x130] sm:$0xff] %v4943_v41  ;;  %475 = vst [vmem:[#allocation2 + $0x30] sm:$0xff] %v4955_v59  ;;  %v5002_v47 = vsel %vm4904_vm6, %v515_v44, %v569_v21  ;;  %v5006_v52 = vsel %vm4904_vm6, %v517_v3, %v572_v10  ;;  %v5010_v7 = vsel %vm4904_vm6, %v519_v8, %v575_v31  ;;  %v5928_v62 = vshll.u32 %v4715_v51, 16  ;;  %v590_v17 = vld [vmem:[#allocation2 + $0x180] sm:$0xff]  ;;  %v593_v28 = vld [vmem:[#allocation2 + $0x188] sm:$0xff]  ;;  %s4365_s28 = scalar_lea.vmem %s5856_s20, 4096  ;;  %p4372_p0 = scmp.lt.s32.totalorder %s5856_s20, %s4370_s30 }
  0x40   : > { %565 = vst [vmem:[#allocation2 + $0x138] sm:$0xff] %v4967_v9  ;;  %478 = vst [vmem:[#allocation2 + $0x38] sm:$0xff] %v4984_v39  ;;  %v525_v38 = vor.u32 %v524_v36, %v5927_v25  ;;  %v5020_v61 = vsel %vm4904_vm6, %v523_v13, %v581_v32  ;;  %v5929_v58 = vshll.u32 %v4787_v34, 16  ;;  %v530_v42 = vrot.slane %v5930_v33, 1  ;;  %v1199_v10 = vld [vmem:[#allocation2 + $0x120] sm:$0xff]  ;;  %v596_v36 = vld [vmem:[#allocation2 + $0x190] sm:$0xff]  ;;  %4046 = vmatmul.mubr.msk.bf16.gmra.mrb[12].mxu1 %vm206_vm2, %v4938_v55  ;;  %p4366_p11 = scmp.ne.s32.totalorder %s5856_s20, %s4365_s28  ;;  %p4373_p1 = scmp.lt.s32.totalorder %s4371_s5, %s4365_s28 }
  0x41   : > { %568 = vst [vmem:[#allocation2 + $0x140] sm:$0xff] %v4988_v0  ;;  %580 = vst [vmem:[#allocation2 + $0x160] sm:$0xff] %v4992_v49  ;;  %v526_v46 = vrot.slane %v5928_v62, 1  ;;  %v532_v56 = vrot.slane %v421_v43, 1  ;;  %v534_v54 = vrot.slane %v428_v4, 1  ;;  %v5037_v21 = vpack.c.bf16 %v292_v26, %v291_v24  ;;  %v599_v13 = vld [vmem:[#allocation2 + $0x198] sm:$0xff]  ;;  %4051 = vmatprep.mubr.msk.bf16.mxu1 %vm206_vm2, %v872_v48 }
  0x42   : > { %571 = vst [vmem:[#allocation2 + $0x148] sm:$0xff] %v5002_v47  ;;  %574 = vst [vmem:[#allocation2 + $0x150] sm:$0xff] %v5006_v52  ;;  %v528_v2 = vrot.slane %v5929_v58, 1  ;;  %v5031_v15 = vsel %vm4904_vm6, %v525_v38, %v584_v29  ;;  %v5931_v31 = vshrl.u32 %v4715_v51, 16  ;;  %v5932_v44 = vshrl.u32 %v4787_v34, 16  ;;  %v503_v48 = vld [vmem:[#allocation2 + $0x80] sm:$0xff]  ;;  %p4367_p12 = pnand %p4366_p11, %p4496_p5  ;;  %p4374_p2 = por %p4373_p1, %p4372_p0 }
  0x43   : > { %577 = vst [vmem:[#allocation2 + $0x158] sm:$0xff] %v5010_v7  ;;  %583 = vst [vmem:[#allocation2 + $0x168] sm:$0xff] %v5020_v61  ;;  %v5933_v8 = vshrl.u32 %v4789_v35, 16  ;;  %v5934_v43 = vshrl.u32 %v4847_v18, 16  ;;  %v5935_v4 = vshrl.u32 %v4849_v22, 16  ;;  %v432_v26 = vshrl.u32 %v5037_v21, 16 }
  0x44   : > { %586 = vst [vmem:[#allocation2 + $0x170] sm:$0xff] %v5031_v15  ;;  %v527_v45 = vor.u32 %v526_v46, %v5931_v31  ;;  %v529_v3 = vor.u32 %v528_v2, %v5932_v44  ;;  %v435_v25 = vshll.u32 %v5037_v21, 16  ;;  %325 = vst.msk [vmem:[#allocation2 + $0x110] sm:$0xff] %vm206_vm2, %v5037_v21  ;;  %v3786_v46 = vld [vmem:[%s5908_s1 + $0xa] sm:$0x3]  ;;  %v873_v2 = vld [vmem:[#allocation2 + $0x98] sm:$0xff]  ;;  %p4368_p13 = pneg %p4367_p12 }
  0x45   : > { %v531_v32 = vor.u32 %v530_v42, %v5933_v8  ;;  %v533_v29 = vor.u32 %v532_v56, %v5934_v43  ;;  %v535_v24 = vor.u32 %v534_v54, %v5935_v4  ;;  %4030 = vmatmul.mubr.msk.bf16.gmra.mrb[12].mxu0 %vm206_vm2, %v4984_v39  ;;  %v434_v38 = vrot.slane %v432_v26, 7  ;;  %v3803_v58 = vld [vmem:[%s5908_s1 + $0xc] sm:$0x3]  ;;  %v5099_v42 = vld [vmem:[#allocation2 + $0xa0] sm:$0xff]  ;;  %v5142_v54 = vld [vmem:[#allocation2 + $0xd0] sm:$0xff] }
  0x46   : > { %v5060_v51 = vsel %vm4904_vm6, %v527_v45, %v587_v16  ;;  %v5064_v34 = vsel %vm4904_vm6, %v529_v3, %v590_v17  ;;  %4085 = vmatprep.mubr.msk.bf16.mxu0 %vm206_vm2, %v1199_v10  ;;  %v2244_v16 = vand.u32 %v3786_v46, %v4513_v5  ;;  %v5104_v17 = vand.u32 %v3803_v58, %v4513_v5  ;;  %v5140_v56 = vld [vmem:[#allocation2 + $0xc8] sm:$0xff]  ;;  %v5152_v10 = vld [vmem:[#allocation2 + $0xd8] sm:$0xff]  ;;  %v5154_v31 = vld [vmem:[#allocation2 + $0xe0] sm:$0xff]  ;;  %p4375_p3 = pnand %p4374_p2, %p4368_p13 }
  0x47   : > { %v5068_v35 = vsel %vm4904_vm6, %v531_v32, %v593_v28  ;;  %589 = vst [vmem:[#allocation2 + $0x178] sm:$0xff] %v5060_v51  ;;  %592 = vst [vmem:[#allocation2 + $0x180] sm:$0xff] %v5064_v34  ;;  %v5077_v18 = vsel %vm4904_vm6, %v533_v29, %v596_v36  ;;  %v5081_v22 = vsel %vm4904_vm6, %v535_v24, %v599_v13  ;;  %v5118_v28 = vld [vmem:[#allocation2 + $0xb0] sm:$0xff]  ;;  %v5164_v45 = vld [vmem:[#allocation2 + $0xe8] sm:$0xff]  ;;  %v536_v32 = vrot.slane %v435_v25, 1 }
  0x48   : > { %595 = vst [vmem:[#allocation2 + $0x188] sm:$0xff] %v5068_v35  ;;  %598 = vst [vmem:[#allocation2 + $0x190] sm:$0xff] %v5077_v18  ;;  %v437_v62 = vor.u32 %v435_v25, %v434_v38  ;;  %4052 = vmatmul.mubr.msk.bf16.vlgmr.msra.gmra.mrb[16].mxu1 %vm206_vm2, %v873_v2  ;;  %v5166_v44 = vld [vmem:[#allocation2 + $0xf0] sm:$0xff]  ;;  %v5176_v3 = vld [vmem:[#allocation2 + $0xf8] sm:$0xff]  ;;  %v3225_v24 = vand.u32 %v3837_v27, %v4513_v5 }
  0x49   : > { %601 = vst [vmem:[#allocation2 + $0x198] sm:$0xff] %v5081_v22  ;;  %4118 = vmatpush3.bf16.msra.mxu1 %v4676_v30  ;;  %4055 = vmatprep.mubr.msk.bf16.mxu1 %vm206_vm2, %v5099_v42  ;;  %v5128_v30 = vld [vmem:[#allocation2 + $0xb8] sm:$0xff]  ;;  %v5178_v8 = vld [vmem:[#allocation2 + $0x100] sm:$0xff]  ;;  %v5190_v36 = vld [vmem:[#allocation2 + $0x108] sm:$0xff]  ;;  %v537_v13 = vor.u32 %v536_v32, %v432_v26 }
  0x4a   : > { %v5097_v33 = vsel %vm4719_vm4, %v437_v62, %v503_v48  ;;  %4185 = vmatprep.subr.bf16.mxu1 %v2244_v16  ;;  %v602_v43 = vld [vmem:[#allocation2 + $0x1a0] sm:$0xff]  ;;  %v3820_v21 = vld [vmem:[%s5908_s1 + $0xe] sm:$0x3] }
  0x4b   : > { %505 = vst [vmem:[#allocation2 + $0x80] sm:$0xff] %v5097_v33  ;;  %v5196_v29 = vsel %vm4904_vm6, %v537_v13, %v602_v43  ;;  %v2898_v4 = vand.u32 %v3820_v21, %v4513_v5  ;;  %v5271_v5 = vld [vmem:[#allocation2 + $0x110] sm:$0xff] }
  0x4c   : > { %604 = vst [vmem:[#allocation2 + $0x1a0] sm:$0xff] %v5196_v29 }
  0x4d   : > { %4086 = vmatmul.mubr.msk.bf16.vlgmr.msra.gmra.mrb[16].mxu0 %vm206_vm2, %v4929_v40 }
  0x4e   : > { %4152 = vmatpush3.bf16.msra.mxu0 %v4689_v37  ;;  %4089 = vmatprep.mubr.msk.bf16.mxu0 %vm206_vm2, %v4943_v41  ;;  %v5130_v37 = vld [vmem:[#allocation2 + $0xc0] sm:$0xff] }
  0x4f   : > { %4219 = vmatprep.subr.bf16.mxu0 %v5104_v17 }
  0x50   : > { %4056 = vmatmul.mubr.msk.bf16.gmra.mrb[20].mxu1 %vm206_vm2, %v5116_v53 }
  0x51   : > { %4059 = vmatprep.mubr.msk.bf16.mxu1 %vm206_vm2, %v5118_v28 }
  0x55   : > { %4090 = vmatmul.mubr.msk.bf16.gmra.mrb[20].mxu0 %vm206_vm2, %v4967_v9 }
  0x56   : > { %4093 = vmatprep.mubr.msk.bf16.mxu0 %vm206_vm2, %v4988_v0 }
  0x58   : > { %4060 = vmatmul.mubr.msk.bf16.gmra.mrb[24].mxu1 %vm206_vm2, %v5128_v30 }
  0x59   : > { %4063 = vmatprep.mubr.msk.bf16.mxu1 %vm206_vm2, %v5130_v37 }
  0x5d   : > { %4094 = vmatmul.mubr.msk.bf16.gmra.mrb[24].mxu0 %vm206_vm2, %v5002_v47 }
  0x5e   : > { %4097 = vmatprep.mubr.msk.bf16.mxu0 %vm206_vm2, %v5006_v52 }
  0x60   : > { %4064 = vmatmul.mubr.msk.bf16.gmra.mrb[28].mxu1 %vm206_vm2, %v5140_v56 }
  0x61   : > { %4067 = vmatprep.mubr.msk.bf16.mxu1 %vm206_vm2, %v5142_v54 }
  0x65   : > { %4098 = vmatmul.mubr.msk.bf16.gmra.mrb[28].mxu0 %vm206_vm2, %v5010_v7 }
  0x66   : > { %4101 = vmatprep.mubr.msk.bf16.mxu0 %vm206_vm2, %v4992_v49 }
  0x68   : > { %4068 = vmatmul.mubr.msk.bf16.gmra.mrb[32].mxu1 %vm206_vm2, %v5152_v10 }
  0x69   : > { %4071 = vmatprep.mubr.msk.bf16.mxu1 %vm206_vm2, %v5154_v31 }
  0x6d   : > { %4102 = vmatmul.mubr.msk.bf16.gmra.mrb[32].mxu0 %vm206_vm2, %v5020_v61 }
  0x6e   : > { %4105 = vmatprep.mubr.msk.bf16.mxu0 %vm206_vm2, %v5031_v15 }
  0x70   : > { %4072 = vmatmul.mubr.msk.bf16.gmra.mrb[36].mxu1 %vm206_vm2, %v5164_v45 }
  0x71   : > { %4075 = vmatprep.mubr.msk.bf16.mxu1 %vm206_vm2, %v5166_v44 }
  0x75   : > { %4106 = vmatmul.mubr.msk.bf16.gmra.mrb[36].mxu0 %vm206_vm2, %v5060_v51 }
  0x76   : > { %4109 = vmatprep.mubr.msk.bf16.mxu0 %vm206_vm2, %v5064_v34 }
  0x78   : > { %4076 = vmatmul.mubr.msk.bf16.gmra.mrb[40].mxu1 %vm206_vm2, %v5176_v3 }
  0x79   : > { %4079 = vmatprep.mubr.msk.bf16.mxu1 %vm206_vm2, %v5178_v8 }
  0x7d   : > { %4110 = vmatmul.mubr.msk.bf16.gmra.mrb[40].mxu0 %vm206_vm2, %v5068_v35 }
  0x7e   : > { %4113 = vmatprep.mubr.msk.bf16.mxu0 %vm206_vm2, %v5077_v18 }
  0x80   : > { %4080 = vmatmul.mubr.msk.bf16.gmra.mrb[44].mxu1 %vm206_vm2, %v5190_v36 }
  0x81   : > { %4119 = vmatprep.mubr.msk.bf16.mxu1 %vm206_vm2, %v4768_v19 }
  0x85   : > { %4114 = vmatmul.mubr.msk.bf16.gmra.mrb[44].mxu0 %vm206_vm2, %v5081_v22 }
  0x86   : > { %4153 = vmatprep.mubr.msk.bf16.mxu0 %vm206_vm2, %v873_v2 }
  0x88   : > { %4120 = vmatmul.mubr.msk.bf16.vlgmr.msra.gmra.mrb[48].mxu1 %vm206_vm2, %v4823_v14 }
  0x89   : > { %4186 = vmatpush3.bf16.msra.mxu1 %v2244_v16  ;;  %4123 = vmatprep.mubr.msk.bf16.mxu1 %vm206_vm2, %v4827_v1 }
  0x8a   : > { %4253 = vmatprep.subr.bf16.mxu1 %v2898_v4 }
  0x8d   : > { %4154 = vmatmul.mubr.msk.bf16.vlgmr.msra.gmra.mrb[48].mxu0 %vm206_vm2, %v5099_v42 }
  0x8e   : > { %4220 = vmatpush3.bf16.msra.mxu0 %v5104_v17  ;;  %4157 = vmatprep.mubr.msk.bf16.mxu0 %vm206_vm2, %v5116_v53 }
  0x8f   : > { %4287 = vmatprep.subr.bf16.mxu0 %v3225_v24 }
  0x90   : > { %4124 = vmatmul.mubr.msk.bf16.gmra.mrb[52].mxu1 %vm206_vm2, %v4895_v6 }
  0x91   : > { %4127 = vmatprep.mubr.msk.bf16.mxu1 %vm206_vm2, %v4924_v23 }
  0x95   : > { %4158 = vmatmul.mubr.msk.bf16.gmra.mrb[52].mxu0 %vm206_vm2, %v5118_v28 }
  0x96   : > { %4161 = vmatprep.mubr.msk.bf16.mxu0 %vm206_vm2, %v5128_v30 }
  0x98   : > { %4128 = vmatmul.mubr.msk.bf16.gmra.mrb[56].mxu1 %vm206_vm2, %v4955_v59 }
  0x99   : > { %4131 = vmatprep.mubr.msk.bf16.mxu1 %vm206_vm2, %v4984_v39 }
  0x9d   : > { %4162 = vmatmul.mubr.msk.bf16.gmra.mrb[56].mxu0 %vm206_vm2, %v5130_v37 }
  0x9e   : > { %4165 = vmatprep.mubr.msk.bf16.mxu0 %vm206_vm2, %v5140_v56 }
  0xa0   : > { %4132 = vmatmul.mubr.msk.bf16.gmra.mrb[60].mxu1 %vm206_vm2, %v4751_v11  ;;  %v2510_v11 = vld [vmem:[#allocation2 + $0x40] sm:$0xff] }
  0xa1   : > { %4135 = vmatprep.mubr.msk.bf16.mxu1 %vm206_vm2, %v4755_v12 }
  0xa5   : > { %4166 = vmatmul.mubr.msk.bf16.gmra.mrb[60].mxu0 %vm206_vm2, %v5142_v54 }
  0xa6   : > { %4169 = vmatprep.mubr.msk.bf16.mxu0 %vm206_vm2, %v5152_v10 }
  0xa8   : > { %4136 = vmatmul.mubr.msk.bf16.gmra.mrb[64].mxu1 %vm206_vm2, %v4772_v20 }
  0xa9   : > { %4139 = vmatprep.mubr.msk.bf16.mxu1 %vm206_vm2, %v4806_v57 }
  0xad   : > { %4170 = vmatmul.mubr.msk.bf16.gmra.mrb[64].mxu0 %vm206_vm2, %v5154_v31 }
  0xae   : > { %4173 = vmatprep.mubr.msk.bf16.mxu0 %vm206_vm2, %v5164_v45 }
  0xb0   : > { %4140 = vmatmul.mubr.msk.bf16.gmra.mrb[68].mxu1 %vm206_vm2, %v4880_v60 }
  0xb1   : > { %4143 = vmatprep.mubr.msk.bf16.mxu1 %vm206_vm2, %v4884_v63 }
  0xb5   : > { %4174 = vmatmul.mubr.msk.bf16.gmra.mrb[68].mxu0 %vm206_vm2, %v5166_v44 }
  0xb6   : > { %4177 = vmatprep.mubr.msk.bf16.mxu0 %vm206_vm2, %v5176_v3 }
  0xb8   : > { %4144 = vmatmul.mubr.msk.bf16.gmra.mrb[72].mxu1 %vm206_vm2, %v4934_v50 }
  0xb9   : > { %4147 = vmatprep.mubr.msk.bf16.mxu1 %vm206_vm2, %v4938_v55 }
  0xbd   : > { %4178 = vmatmul.mubr.msk.bf16.gmra.mrb[72].mxu0 %vm206_vm2, %v5178_v8 }
  0xbe   : > { %4181 = vmatprep.mubr.msk.bf16.mxu0 %vm206_vm2, %v5190_v36 }
  0xc0   : > { %4148 = vmatmul.mubr.msk.bf16.gmra.mrb[76].mxu1 %vm206_vm2, %v5097_v33 }
  0xc1   : > { %4187 = vmatprep.mubr.msk.bf16.mxu1 %vm206_vm2, %v4929_v40 }
  0xc5   : > { %4182 = vmatmul.mubr.msk.bf16.gmra.mrb[76].mxu0 %vm206_vm2, %v5271_v5 }
  0xc6   : > { %4221 = vmatprep.mubr.msk.bf16.mxu0 %vm206_vm2, %v4823_v14 }
  0xc8   : > { %4188 = vmatmul.mubr.msk.bf16.vlgmr.msra.gmra.mrb[80].mxu1 %vm206_vm2, %v4943_v41 }
  0xc9   : > { %4254 = vmatpush3.bf16.msra.mxu1 %v2898_v4  ;;  %4191 = vmatprep.mubr.msk.bf16.mxu1 %vm206_vm2, %v4967_v9 }
  0xcd   : > { %4222 = vmatmul.mubr.msk.bf16.vlgmr.msra.gmra.mrb[80].mxu0 %vm206_vm2, %v4827_v1 }
  0xce   : > { %4288 = vmatpush3.bf16.msra.mxu0 %v3225_v24  ;;  %4225 = vmatprep.mubr.msk.bf16.mxu0 %vm206_vm2, %v4895_v6 }
  0xd0   : > { %4192 = vmatmul.mubr.msk.bf16.gmra.mrb[84].mxu1 %vm206_vm2, %v4988_v0 }
  0xd1   : > { %4195 = vmatprep.mubr.msk.bf16.mxu1 %vm206_vm2, %v5002_v47 }
  0xd5   : > { %4226 = vmatmul.mubr.msk.bf16.gmra.mrb[84].mxu0 %vm206_vm2, %v4924_v23 }
  0xd6   : > { %4229 = vmatprep.mubr.msk.bf16.mxu0 %vm206_vm2, %v4955_v59 }
  0xd8   : > { %4196 = vmatmul.mubr.msk.bf16.gmra.mrb[88].mxu1 %vm206_vm2, %v5006_v52 }
  0xd9   : > { %4199 = vmatprep.mubr.msk.bf16.mxu1 %vm206_vm2, %v5010_v7 }
  0xdd   : > { %4230 = vmatmul.mubr.msk.bf16.gmra.mrb[88].mxu0 %vm206_vm2, %v4984_v39 }
  0xde   : > { %4233 = vmatprep.mubr.msk.bf16.mxu0 %vm206_vm2, %v2510_v11 }
  0xe0   : > { %4200 = vmatmul.mubr.msk.bf16.gmra.mrb[92].mxu1 %vm206_vm2, %v4992_v49 }
  0xe1   : > { %4203 = vmatprep.mubr.msk.bf16.mxu1 %vm206_vm2, %v5020_v61 }
  0xe5   : > { %4234 = vmatmul.mubr.msk.bf16.gmra.mrb[92].mxu0 %vm206_vm2, %v4755_v12 }
  0xe6   : > { %4237 = vmatprep.mubr.msk.bf16.mxu0 %vm206_vm2, %v4772_v20 }
  0xe8   : > { %4204 = vmatmul.mubr.msk.bf16.gmra.mrb[96].mxu1 %vm206_vm2, %v5031_v15 }
  0xe9   : > { %4207 = vmatprep.mubr.msk.bf16.mxu1 %vm206_vm2, %v5060_v51 }
  0xed   : > { %4238 = vmatmul.mubr.msk.bf16.gmra.mrb[96].mxu0 %vm206_vm2, %v4806_v57 }
  0xee   : > { %4241 = vmatprep.mubr.msk.bf16.mxu0 %vm206_vm2, %v4880_v60  ;;  %v2519_v60 = vld [vmem:[#allocation2 + $0x88] sm:$0xff] }
  0xf0   : > { %4208 = vmatmul.mubr.msk.bf16.gmra.mrb[100].mxu1 %vm206_vm2, %v5064_v34 }
  0xf1   : > { %4211 = vmatprep.mubr.msk.bf16.mxu1 %vm206_vm2, %v5068_v35 }
  0xf5   : > { %4242 = vmatmul.mubr.msk.bf16.gmra.mrb[100].mxu0 %vm206_vm2, %v4884_v63 }
  0xf6   : > { %4245 = vmatprep.mubr.msk.bf16.mxu0 %vm206_vm2, %v4934_v50 }
  0xf8   : > { %4212 = vmatmul.mubr.msk.bf16.gmra.mrb[104].mxu1 %vm206_vm2, %v5077_v18 }
  0xf9   : > { %4215 = vmatprep.mubr.msk.bf16.mxu1 %vm206_vm2, %v5081_v22  ;;  %v4035_v12 = vpop.f32.mrb[0].mxu1 }
  0xfa   : > { %v4019_v19 = vpop.f32.mrb[0].mxu0  ;;  %857 = vst.msk [vmem:[#allocation3 + $0x90] sm:$0xff] %vm838_vm7, %v4035_v12  ;;  %v775_v20 = vpop.f32.mrb[1].mxu1 }
  0xfb   : > { %841 = vst.msk [vmem:[#allocation3 + $0x10] sm:$0xff] %vm838_vm7, %v4019_v19  ;;  %v711_v57 = vpop.f32.mrb[1].mxu0  ;;  %855 = vst.msk [vmem:[#allocation3 + $0x80] sm:$0xff] %vm838_vm7, %v775_v20  ;;  %v4036_v14 = vpop.f32.mrb[2].mxu1 }
  0xfc   : > { %839 = vst.msk [vmem:[#allocation3] sm:$0xff] %vm838_vm7, %v711_v57  ;;  %v4020_v1 = vpop.f32.mrb[2].mxu0  ;;  %858 = vst.msk [vmem:[#allocation3 + $0x98] sm:$0xff] %vm838_vm7, %v4036_v14  ;;  %v778_v63 = vpop.f32.mrb[3].mxu1 }
  0xfd   : > { %4246 = vmatmul.mubr.msk.bf16.gmra.mrb[104].mxu0 %vm206_vm2, %v4938_v55  ;;  %842 = vst.msk [vmem:[#allocation3 + $0x18] sm:$0xff] %vm838_vm7, %v4020_v1  ;;  %v714_v6 = vpop.f32.mrb[3].mxu0  ;;  %856 = vst.msk [vmem:[#allocation3 + $0x88] sm:$0xff] %vm838_vm7, %v778_v63 }
  0xfe   : > { %4249 = vmatprep.mubr.msk.bf16.mxu0 %vm206_vm2, %v5097_v33  ;;  %840 = vst.msk [vmem:[#allocation3 + $0x8] sm:$0xff] %vm838_vm7, %v714_v6 }
 0x100   : > { %4216 = vmatmul.mubr.msk.bf16.gmra.mrb[108].mxu1 %vm206_vm2, %v5196_v29 }
 0x101   : > { %4255 = vmatprep.mubr.msk.bf16.mxu1 %vm206_vm2, %v5099_v42  ;;  %v4039_v23 = vpop.f32.mrb[4].mxu1 }
 0x102   : > { %861 = vst.msk [vmem:[#allocation3 + $0xb0] sm:$0xff] %vm838_vm7, %v4039_v23  ;;  %v791_v50 = vpop.f32.mrb[5].mxu1 }
 0x103   : > { %859 = vst.msk [vmem:[#allocation3 + $0xa0] sm:$0xff] %vm838_vm7, %v791_v50  ;;  %v4040_v59 = vpop.f32.mrb[6].mxu1  ;;  %v1102_v43 = vld [vmem:[#allocation3] sm:$0xff] }
 0x104   : > { %862 = vst.msk [vmem:[#allocation3 + $0xb8] sm:$0xff] %vm838_vm7, %v4040_v59  ;;  %v794_v26 = vpop.f32.mrb[7].mxu1  ;;  %v1105_v24 = vld [vmem:[#allocation3 + $0x18] sm:$0xff] }
 0x105   : > { %4250 = vmatmul.mubr.msk.bf16.gmra.mrb[108].mxu0 %vm206_vm2, %v2519_v60  ;;  %860 = vst.msk [vmem:[#allocation3 + $0xa8] sm:$0xff] %vm838_vm7, %v794_v26  ;;  %v1103_v12 = vld [vmem:[#allocation3 + $0x8] sm:$0xff] }
 0x106   : > { %4289 = vmatprep.mubr.msk.bf16.mxu0 %vm206_vm2, %v4943_v41 }
 0x108   : > { %v4023_v40 = vpop.f32.mrb[4].mxu0  ;;  %4256 = vmatmul.mubr.msk.bf16.vlgmr.msra.gmra.mrb[112].mxu1 %vm206_vm2, %v5116_v53 }
 0x109   : > { %845 = vst.msk [vmem:[#allocation3 + $0x30] sm:$0xff] %vm838_vm7, %v4023_v40  ;;  %v727_v55 = vpop.f32.mrb[5].mxu0  ;;  %4259 = vmatprep.mubr.msk.bf16.mxu1 %vm206_vm2, %v5118_v28 }
 0x10a   : > { %843 = vst.msk [vmem:[#allocation3 + $0x20] sm:$0xff] %vm838_vm7, %v727_v55  ;;  %v4024_v39 = vpop.f32.mrb[6].mxu0 }
 0x10b   : > { %846 = vst.msk [vmem:[#allocation3 + $0x38] sm:$0xff] %vm838_vm7, %v4024_v39  ;;  %v730_v41 = vpop.f32.mrb[7].mxu0  ;;  %v4043_v25 = vpop.f32.mrb[8].mxu1 }
 0x10c   : > { %844 = vst.msk [vmem:[#allocation3 + $0x28] sm:$0xff] %vm838_vm7, %v730_v41  ;;  %865 = vst.msk [vmem:[#allocation3 + $0xd0] sm:$0xff] %vm838_vm7, %v4043_v25  ;;  %v807_v48 = vpop.f32.mrb[9].mxu1 }
 0x10d   : > { %4290 = vmatmul.mubr.msk.bf16.vlgmr.msra.gmra.mrb[112].mxu0 %vm206_vm2, %v4967_v9  ;;  %863 = vst.msk [vmem:[#allocation3 + $0xc0] sm:$0xff] %vm838_vm7, %v807_v48  ;;  %v4044_v46 = vpop.f32.mrb[10].mxu1 }
 0x10e   : > { %4293 = vmatprep.mubr.msk.bf16.mxu0 %vm206_vm2, %v4988_v0  ;;  %866 = vst.msk [vmem:[#allocation3 + $0xd8] sm:$0xff] %vm838_vm7, %v4044_v46  ;;  %v810_v58 = vpop.f32.mrb[11].mxu1 }
 0x10f   : > { %864 = vst.msk [vmem:[#allocation3 + $0xc8] sm:$0xff] %vm838_vm7, %v810_v58 }
 0x110   : > { %v4027_v38 = vpop.f32.mrb[8].mxu0  ;;  %4260 = vmatmul.mubr.msk.bf16.gmra.mrb[116].mxu1 %vm206_vm2, %v5128_v30  ;;  %v1104_v30 = vld [vmem:[#allocation3 + $0x10] sm:$0xff] }
 0x111   : > { %849 = vst.msk [vmem:[#allocation3 + $0x50] sm:$0xff] %vm838_vm7, %v4027_v38  ;;  %v743_v62 = vpop.f32.mrb[9].mxu0  ;;  %4263 = vmatprep.mubr.msk.bf16.mxu1 %vm206_vm2, %v5130_v37  ;;  %v1108_v20 = vld [vmem:[#allocation3 + $0x30] sm:$0xff]  ;;  %v1106_v60 = vld [vmem:[#allocation3 + $0x20] sm:$0xff] }
 0x112   : > { %847 = vst.msk [vmem:[#allocation3 + $0x40] sm:$0xff] %vm838_vm7, %v743_v62  ;;  %v4028_v9 = vpop.f32.mrb[10].mxu0  ;;  %v1109_v40 = vld [vmem:[#allocation3 + $0x38] sm:$0xff] }
 0x113   : > { %850 = vst.msk [vmem:[#allocation3 + $0x58] sm:$0xff] %vm838_vm7, %v4028_v9  ;;  %v746_v0 = vpop.f32.mrb[11].mxu0  ;;  %v4047_v2 = vpop.f32.mrb[12].mxu1  ;;  %v1107_v39 = vld [vmem:[#allocation3 + $0x28] sm:$0xff] }
 0x114   : > { %848 = vst.msk [vmem:[#allocation3 + $0x48] sm:$0xff] %vm838_vm7, %v746_v0  ;;  %869 = vst.msk [vmem:[#allocation3 + $0xf0] sm:$0xff] %vm838_vm7, %v4047_v2  ;;  %v823_v42 = vpop.f32.mrb[13].mxu1 }
 0x115   : > { %4294 = vmatmul.mubr.msk.bf16.gmra.mrb[116].mxu0 %vm206_vm2, %v5002_v47  ;;  %867 = vst.msk [vmem:[#allocation3 + $0xe0] sm:$0xff] %vm838_vm7, %v823_v42  ;;  %v4048_v17 = vpop.f32.mrb[14].mxu1 }
 0x116   : > { %4297 = vmatprep.mubr.msk.bf16.mxu0 %vm206_vm2, %v5006_v52  ;;  %870 = vst.msk [vmem:[#allocation3 + $0xf8] sm:$0xff] %vm838_vm7, %v4048_v17  ;;  %v826_v53 = vpop.f32.mrb[15].mxu1 }
 0x117   : > { %868 = vst.msk [vmem:[#allocation3 + $0xe8] sm:$0xff] %vm838_vm7, %v826_v53 }
 0x118   : > { %v4031_v33 = vpop.f32.mrb[12].mxu0  ;;  %4264 = vmatmul.mubr.msk.bf16.gmra.mrb[120].mxu1 %vm206_vm2, %v5140_v56 }
 0x119   : > { %853 = vst.msk [vmem:[#allocation3 + $0x70] sm:$0xff] %vm838_vm7, %v4031_v33  ;;  %v759_v16 = vpop.f32.mrb[13].mxu0  ;;  %4267 = vmatprep.mubr.msk.bf16.mxu1 %vm206_vm2, %v5142_v54  ;;  %v1110_v0 = vld [vmem:[#allocation3 + $0x40] sm:$0xff] }
 0x11a   : > { %851 = vst.msk [vmem:[#allocation3 + $0x60] sm:$0xff] %vm838_vm7, %v759_v16  ;;  %v4032_v47 = vpop.f32.mrb[14].mxu0  ;;  %v1113_v17 = vld [vmem:[#allocation3 + $0x58] sm:$0xff] }
 0x11b   : > { %854 = vst.msk [vmem:[#allocation3 + $0x78] sm:$0xff] %vm838_vm7, %v4032_v47  ;;  %v762_v52 = vpop.f32.mrb[15].mxu0  ;;  %v4053_v28 = vpop.f32.mrb[16].mxu1 }
 0x11c   : > { %852 = vst.msk [vmem:[#allocation3 + $0x68] sm:$0xff] %vm838_vm7, %v762_v52  ;;  %v1136_v32 = vadd.f32 %v4053_v28, %v1104_v30  ;;  %v975_v13 = vpop.f32.mrb[17].mxu1  ;;  %v1111_v28 = vld [vmem:[#allocation3 + $0x48] sm:$0xff] }
 0x11d   : > { %4298 = vmatmul.mubr.msk.bf16.gmra.mrb[120].mxu0 %vm206_vm2, %v5010_v7  ;;  %v1134_v27 = vadd.f32 %v1102_v43, %v975_v13  ;;  %v4054_v4 = vpop.f32.mrb[18].mxu1 }
 0x11e   : > { %4301 = vmatprep.mubr.msk.bf16.mxu0 %vm206_vm2, %v4992_v49  ;;  %1168 = vst.msk [vmem:[#allocation3 + $0x10] sm:$0xff] %vm838_vm7, %v1136_v32  ;;  %v1137_v7 = vadd.f32 %v4054_v4, %v1105_v24  ;;  %v978_v11 = vpop.f32.mrb[19].mxu1 }
 0x11f   : > { %1166 = vst.msk [vmem:[#allocation3] sm:$0xff] %vm838_vm7, %v1134_v27  ;;  %v1135_v49 = vadd.f32 %v1103_v12, %v978_v11 }
 0x120   : > { %v4087_v37 = vpop.f32.mrb[16].mxu0  ;;  %1169 = vst.msk [vmem:[#allocation3 + $0x18] sm:$0xff] %vm838_vm7, %v1137_v7  ;;  %4268 = vmatmul.mubr.msk.bf16.gmra.mrb[124].mxu1 %vm206_vm2, %v5152_v10 }
 0x121   : > { %v1302_v21 = vpop.f32.mrb[17].mxu0  ;;  %1167 = vst.msk [vmem:[#allocation3 + $0x8] sm:$0xff] %vm838_vm7, %v1135_v49  ;;  %4271 = vmatprep.mubr.msk.bf16.mxu1 %vm206_vm2, %v5154_v31  ;;  %v1114_v7 = vld [vmem:[#allocation3 + $0x60] sm:$0xff] }
 0x122   : > { %v4088_v56 = vpop.f32.mrb[18].mxu0 }
 0x123   : > { %v1305_v54 = vpop.f32.mrb[19].mxu0  ;;  %v4057_v19 = vpop.f32.mrb[20].mxu1 }
 0x124   : > { %v1140_v14 = vadd.f32 %v4057_v19, %v1108_v20  ;;  %v991_v1 = vpop.f32.mrb[21].mxu1  ;;  %v1117_v19 = vld [vmem:[#allocation3 + $0x78] sm:$0xff] }
 0x125   : > { %4302 = vmatmul.mubr.msk.bf16.gmra.mrb[124].mxu0 %vm206_vm2, %v5020_v61  ;;  %v1431_v6 = vld [vmem:[#allocation3 + $0x10] sm:$0xff]  ;;  %v1138_v10 = vadd.f32 %v1106_v60, %v991_v1  ;;  %v4058_v23 = vpop.f32.mrb[22].mxu1  ;;  %v1115_v1 = vld [vmem:[#allocation3 + $0x68] sm:$0xff] }
 0x126   : > { %4305 = vmatprep.mubr.msk.bf16.mxu0 %vm206_vm2, %v5031_v15  ;;  %v1463_v50 = vadd.f32 %v4087_v37, %v1431_v6  ;;  %1172 = vst.msk [vmem:[#allocation3 + $0x30] sm:$0xff] %vm838_vm7, %v1140_v14  ;;  %v1429_v55 = vld [vmem:[#allocation3] sm:$0xff]  ;;  %v1141_v31 = vadd.f32 %v4058_v23, %v1109_v40  ;;  %v994_v59 = vpop.f32.mrb[23].mxu1 }
 0x127   : > { %v1461_v26 = vadd.f32 %v1429_v55, %v1302_v21  ;;  %1170 = vst.msk [vmem:[#allocation3 + $0x20] sm:$0xff] %vm838_vm7, %v1138_v10  ;;  %v1432_v41 = vld [vmem:[#allocation3 + $0x18] sm:$0xff]  ;;  %v1139_v25 = vadd.f32 %v1107_v39, %v994_v59  ;;  %v1118_v59 = vld [vmem:[#allocation3 + $0x80] sm:$0xff]  ;;  %v2846_v39 = vld [vmem:[#allocation2 + $0x118] sm:$0xff] }
 0x128   : > { %v4091_v57 = vpop.f32.mrb[20].mxu0  ;;  %1495 = vst.msk [vmem:[#allocation3 + $0x10] sm:$0xff] %vm838_vm7, %v1463_v50  ;;  %v1464_v38 = vadd.f32 %v4088_v56, %v1432_v41  ;;  %1173 = vst.msk [vmem:[#allocation3 + $0x38] sm:$0xff] %vm838_vm7, %v1141_v31  ;;  %v1430_v48 = vld [vmem:[#allocation3 + $0x8] sm:$0xff]  ;;  %4272 = vmatmul.mubr.msk.bf16.gmra.mrb[128].mxu1 %vm206_vm2, %v5164_v45  ;;  %v1112_v45 = vld [vmem:[#allocation3 + $0x50] sm:$0xff] }
 0x129   : > { %v1318_v63 = vpop.f32.mrb[21].mxu0  ;;  %1493 = vst.msk [vmem:[#allocation3] sm:$0xff] %vm838_vm7, %v1461_v26  ;;  %v1462_v62 = vadd.f32 %v1430_v48, %v1305_v54  ;;  %1171 = vst.msk [vmem:[#allocation3 + $0x28] sm:$0xff] %vm838_vm7, %v1139_v25  ;;  %4275 = vmatprep.mubr.msk.bf16.mxu1 %vm206_vm2, %v5166_v44  ;;  %v3173_v48 = vld [vmem:[#allocation2 + $0x1a8] sm:$0xff] }
 0x12a   : > { %v4092_v61 = vpop.f32.mrb[22].mxu0  ;;  %1496 = vst.msk [vmem:[#allocation3 + $0x18] sm:$0xff] %vm838_vm7, %v1464_v38  ;;  %v1121_v38 = vld [vmem:[#allocation3 + $0x98] sm:$0xff] }
 0x12b   : > { %v1321_v15 = vpop.f32.mrb[23].mxu0  ;;  %1494 = vst.msk [vmem:[#allocation3 + $0x8] sm:$0xff] %vm838_vm7, %v1462_v62  ;;  %v4061_v46 = vpop.f32.mrb[24].mxu1 }
 0x12c   : > { %v1144_v58 = vadd.f32 %v4061_v46, %v1112_v45 }
 0x12d   : > { %4306 = vmatmul.mubr.msk.bf16.gmra.mrb[128].mxu0 %vm206_vm2, %v5060_v51  ;;  %v1007_v51 = vpop.f32.mrb[25].mxu1  ;;  %v1435_v33 = vld [vmem:[#allocation3 + $0x30] sm:$0xff] }
 0x12e   : > { %4309 = vmatprep.mubr.msk.bf16.mxu0 %vm206_vm2, %v5064_v34  ;;  %v1142_v42 = vadd.f32 %v1110_v0, %v1007_v51  ;;  %v4062_v16 = vpop.f32.mrb[26].mxu1  ;;  %v1467_v44 = vadd.f32 %v4091_v57, %v1435_v33  ;;  %1176 = vst.msk [vmem:[#allocation3 + $0x50] sm:$0xff] %vm838_vm7, %v1144_v58  ;;  %v1433_v34 = vld [vmem:[#allocation3 + $0x20] sm:$0xff] }
 0x12f   : > { %v1145_v53 = vadd.f32 %v4062_v16, %v1113_v17  ;;  %v1010_v52 = vpop.f32.mrb[27].mxu1  ;;  %v1465_v37 = vadd.f32 %v1433_v34, %v1318_v63  ;;  %v1436_v32 = vld [vmem:[#allocation3 + $0x38] sm:$0xff] }
 0x130   : > { %v4095_v9 = vpop.f32.mrb[24].mxu0  ;;  %1174 = vst.msk [vmem:[#allocation3 + $0x40] sm:$0xff] %vm838_vm7, %v1142_v42  ;;  %v1143_v13 = vadd.f32 %v1111_v28, %v1010_v52  ;;  %1499 = vst.msk [vmem:[#allocation3 + $0x30] sm:$0xff] %vm838_vm7, %v1467_v44  ;;  %v1468_v43 = vadd.f32 %v4092_v61, %v1436_v32  ;;  %v1434_v21 = vld [vmem:[#allocation3 + $0x28] sm:$0xff]  ;;  %4276 = vmatmul.mubr.msk.bf16.gmra.mrb[132].mxu1 %vm206_vm2, %v5176_v3  ;;  %v1116_v3 = vld [vmem:[#allocation3 + $0x70] sm:$0xff] }
 0x131   : > { %v1334_v2 = vpop.f32.mrb[25].mxu0  ;;  %1177 = vst.msk [vmem:[#allocation3 + $0x58] sm:$0xff] %vm838_vm7, %v1145_v53  ;;  %1497 = vst.msk [vmem:[#allocation3 + $0x20] sm:$0xff] %vm838_vm7, %v1465_v37  ;;  %v1466_v27 = vadd.f32 %v1434_v21, %v1321_v15  ;;  %4279 = vmatprep.mubr.msk.bf16.mxu1 %vm206_vm2, %v5178_v8  ;;  %v1122_v52 = vld [vmem:[#allocation3 + $0xa0] sm:$0xff] }
 0x132   : > { %v4096_v47 = vpop.f32.mrb[26].mxu0  ;;  %1175 = vst.msk [vmem:[#allocation3 + $0x48] sm:$0xff] %vm838_vm7, %v1143_v13  ;;  %1500 = vst.msk [vmem:[#allocation3 + $0x38] sm:$0xff] %vm838_vm7, %v1468_v43  ;;  %v1125_v13 = vld [vmem:[#allocation3 + $0xb8] sm:$0xff] }
 0x133   : > { %v1337_v30 = vpop.f32.mrb[27].mxu0  ;;  %1498 = vst.msk [vmem:[#allocation3 + $0x28] sm:$0xff] %vm838_vm7, %v1466_v27  ;;  %v4065_v4 = vpop.f32.mrb[28].mxu1 }
 0x134   : > { %v1148_v56 = vadd.f32 %v4065_v4, %v1116_v3 }
 0x135   : > { %4310 = vmatmul.mubr.msk.bf16.gmra.mrb[132].mxu0 %vm206_vm2, %v5068_v35  ;;  %v1023_v35 = vpop.f32.mrb[29].mxu1  ;;  %v1439_v12 = vld [vmem:[#allocation3 + $0x50] sm:$0xff] }
 0x136   : > { %4313 = vmatprep.mubr.msk.bf16.mxu0 %vm206_vm2, %v5077_v18  ;;  %v1146_v54 = vadd.f32 %v1114_v7, %v1023_v35  ;;  %v4066_v49 = vpop.f32.mrb[30].mxu1  ;;  %v1471_v8 = vadd.f32 %v4095_v9, %v1439_v12  ;;  %1180 = vst.msk [vmem:[#allocation3 + $0x70] sm:$0xff] %vm838_vm7, %v1148_v56  ;;  %v1119_v9 = vld [vmem:[#allocation3 + $0x88] sm:$0xff] }
 0x137   : > { %v1437_v18 = vld [vmem:[#allocation3 + $0x40] sm:$0xff]  ;;  %v1149_v57 = vadd.f32 %v4066_v49, %v1117_v19  ;;  %v1026_v14 = vpop.f32.mrb[31].mxu1 }
 0x138   : > { %v4099_v24 = vpop.f32.mrb[28].mxu0  ;;  %v1469_v63 = vadd.f32 %v1437_v18, %v1334_v2  ;;  %1178 = vst.msk [vmem:[#allocation3 + $0x60] sm:$0xff] %vm838_vm7, %v1146_v54  ;;  %v1440_v6 = vld [vmem:[#allocation3 + $0x58] sm:$0xff]  ;;  %v1147_v10 = vadd.f32 %v1115_v1, %v1026_v14  ;;  %1503 = vst.msk [vmem:[#allocation3 + $0x50] sm:$0xff] %vm838_vm7, %v1471_v8  ;;  %4280 = vmatmul.mubr.msk.bf16.gmra.mrb[136].mxu1 %vm206_vm2, %v5190_v36  ;;  %v1120_v36 = vld [vmem:[#allocation3 + $0x90] sm:$0xff] }
 0x139   : > { %v1350_v11 = vpop.f32.mrb[29].mxu0  ;;  %v1472_v23 = vadd.f32 %v4096_v47, %v1440_v6  ;;  %1181 = vst.msk [vmem:[#allocation3 + $0x78] sm:$0xff] %vm838_vm7, %v1149_v57  ;;  %v1438_v40 = vld [vmem:[#allocation3 + $0x48] sm:$0xff]  ;;  %4283 = vmatprep.mubr.msk.bf16.mxu1 %vm206_vm2, %v5271_v5  ;;  %v1124_v47 = vld [vmem:[#allocation3 + $0xb0] sm:$0xff]  ;;  %v1126_v14 = vld [vmem:[#allocation3 + $0xc0] sm:$0xff] }
 0x13a   : > { %v4100_v20 = vpop.f32.mrb[30].mxu0  ;;  %1501 = vst.msk [vmem:[#allocation3 + $0x40] sm:$0xff] %vm838_vm7, %v1469_v63  ;;  %v1470_v61 = vadd.f32 %v1438_v40, %v1337_v30  ;;  %1179 = vst.msk [vmem:[#allocation3 + $0x68] sm:$0xff] %vm838_vm7, %v1147_v10  ;;  %v1129_v10 = vld [vmem:[#allocation3 + $0xd8] sm:$0xff] }
 0x13b   : > { %v1353_v60 = vpop.f32.mrb[31].mxu0  ;;  %1504 = vst.msk [vmem:[#allocation3 + $0x58] sm:$0xff] %vm838_vm7, %v1472_v23  ;;  %v4069_v50 = vpop.f32.mrb[32].mxu1 }
 0x13c   : > { %1502 = vst.msk [vmem:[#allocation3 + $0x48] sm:$0xff] %vm838_vm7, %v1470_v61  ;;  %v1152_v31 = vadd.f32 %v4069_v50, %v1120_v36 }
 0x13d   : > { %4314 = vmatmul.mubr.msk.bf16.gmra.mrb[136].mxu0 %vm206_vm2, %v5081_v22  ;;  %v1039_v22 = vpop.f32.mrb[33].mxu1  ;;  %v1443_v26 = vld [vmem:[#allocation3 + $0x70] sm:$0xff] }
 0x13e   : > { %4317 = vmatprep.mubr.msk.bf16.mxu0 %vm206_vm2, %v5196_v29  ;;  %v1150_v41 = vadd.f32 %v1118_v59, %v1039_v22  ;;  %v4070_v25 = vpop.f32.mrb[34].mxu1  ;;  %v1475_v62 = vadd.f32 %v4099_v24, %v1443_v26  ;;  %1184 = vst.msk [vmem:[#allocation3 + $0x90] sm:$0xff] %vm838_vm7, %v1152_v31  ;;  %v1123_v24 = vld [vmem:[#allocation3 + $0xa8] sm:$0xff] }
 0x13f   : > { %v1441_v29 = vld [vmem:[#allocation3 + $0x60] sm:$0xff]  ;;  %v1153_v46 = vadd.f32 %v4070_v25, %v1121_v38  ;;  %v1042_v45 = vpop.f32.mrb[35].mxu1  ;;  %v1132_v38 = vld [vmem:[#allocation3 + $0xf0] sm:$0xff] }
 0x140   : > { %v4103_v55 = vpop.f32.mrb[32].mxu0  ;;  %v1473_v51 = vadd.f32 %v1441_v29, %v1350_v11  ;;  %1182 = vst.msk [vmem:[#allocation3 + $0x80] sm:$0xff] %vm838_vm7, %v1150_v41  ;;  %v1444_v0 = vld [vmem:[#allocation3 + $0x78] sm:$0xff]  ;;  %v1151_v2 = vadd.f32 %v1119_v9, %v1042_v45  ;;  %1507 = vst.msk [vmem:[#allocation3 + $0x70] sm:$0xff] %vm838_vm7, %v1475_v62  ;;  %4284 = vmatmul.mubr.msk.bf16.gmra.mrb[140].mxu1 %vm206_vm2, %v2846_v39  ;;  %v1130_v29 = vld [vmem:[#allocation3 + $0xe0] sm:$0xff] }
 0x141   : > { %v1366_v15 = vpop.f32.mrb[33].mxu0  ;;  %v1476_v33 = vadd.f32 %v4100_v20, %v1444_v0  ;;  %1185 = vst.msk [vmem:[#allocation3 + $0x98] sm:$0xff] %vm838_vm7, %v1153_v46  ;;  %v1442_v42 = vld [vmem:[#allocation3 + $0x68] sm:$0xff]  ;;  %v1128_v20 = vld [vmem:[#allocation3 + $0xd0] sm:$0xff] }
 0x142   : > { %v4104_v5 = vpop.f32.mrb[34].mxu0  ;;  %1505 = vst.msk [vmem:[#allocation3 + $0x60] sm:$0xff] %vm838_vm7, %v1473_v51  ;;  %v1474_v16 = vadd.f32 %v1442_v42, %v1353_v60  ;;  %1183 = vst.msk [vmem:[#allocation3 + $0x88] sm:$0xff] %vm838_vm7, %v1151_v2  ;;  %v1133_v51 = vld [vmem:[#allocation3 + $0xf8] sm:$0xff] }
 0x143   : > { %v1369_v58 = vpop.f32.mrb[35].mxu0  ;;  %1508 = vst.msk [vmem:[#allocation3 + $0x78] sm:$0xff] %vm838_vm7, %v1476_v33  ;;  %v4073_v17 = vpop.f32.mrb[36].mxu1 }
 0x144   : > { %1506 = vst.msk [vmem:[#allocation3 + $0x68] sm:$0xff] %vm838_vm7, %v1474_v16  ;;  %v1156_v34 = vadd.f32 %v4073_v17, %v1124_v47  ;;  %v1055_v53 = vpop.f32.mrb[37].mxu1  ;;  %v1131_v17 = vld [vmem:[#allocation3 + $0xe8] sm:$0xff] }
 0x145   : > { %4318 = vmatmul.mubr.msk.bf16.gmra.mrb[140].mxu0 %vm206_vm2, %v3173_v48  ;;  %v1447_v30 = vld [vmem:[#allocation3 + $0x90] sm:$0xff]  ;;  %v1154_v37 = vadd.f32 %v1122_v52, %v1055_v53  ;;  %v4074_v32 = vpop.f32.mrb[38].mxu1 }
 0x146   : > { %v1479_v21 = vadd.f32 %v4103_v55, %v1447_v30  ;;  %1188 = vst.msk [vmem:[#allocation3 + $0xb0] sm:$0xff] %vm838_vm7, %v1156_v34  ;;  %v1157_v4 = vadd.f32 %v4074_v32, %v1125_v13  ;;  %v1058_v3 = vpop.f32.mrb[39].mxu1  ;;  %v1127_v55 = vld [vmem:[#allocation3 + $0xc8] sm:$0xff]  ;;  %v1757_v32 = vld [vmem:[#allocation3 + $0x10] sm:$0xff] }
 0x147   : > { %v1445_v27 = vld [vmem:[#allocation3 + $0x80] sm:$0xff]  ;;  %1186 = vst.msk [vmem:[#allocation3 + $0xa0] sm:$0xff] %vm838_vm7, %v1154_v37  ;;  %v1155_v11 = vadd.f32 %v1123_v24, %v1058_v3 }
 0x148   : > { %v4107_v44 = vpop.f32.mrb[36].mxu0  ;;  %v1477_v35 = vadd.f32 %v1445_v27, %v1366_v15  ;;  %v1448_v7 = vld [vmem:[#allocation3 + $0x98] sm:$0xff]  ;;  %1511 = vst.msk [vmem:[#allocation3 + $0x90] sm:$0xff] %vm838_vm7, %v1479_v21  ;;  %1189 = vst.msk [vmem:[#allocation3 + $0xb8] sm:$0xff] %vm838_vm7, %v1157_v4  ;;  %v1755_v27 = vld [vmem:[#allocation3] sm:$0xff] }
 0x149   : > { %v1382_v28 = vpop.f32.mrb[37].mxu0  ;;  %v1480_v12 = vadd.f32 %v4104_v5, %v1448_v7  ;;  %v1446_v54 = vld [vmem:[#allocation3 + $0x88] sm:$0xff]  ;;  %1187 = vst.msk [vmem:[#allocation3 + $0xa8] sm:$0xff] %vm838_vm7, %v1155_v11 }
 0x14a   : > { %v4108_v43 = vpop.f32.mrb[38].mxu0  ;;  %1509 = vst.msk [vmem:[#allocation3 + $0x80] sm:$0xff] %vm838_vm7, %v1477_v35  ;;  %v1478_v49 = vadd.f32 %v1446_v54, %v1369_v58  ;;  %v1758_v35 = vld [vmem:[#allocation3 + $0x18] sm:$0xff] }
 0x14b   : > { %v1385_v56 = vpop.f32.mrb[39].mxu0  ;;  %1512 = vst.msk [vmem:[#allocation3 + $0x98] sm:$0xff] %vm838_vm7, %v1480_v12  ;;  %v4077_v19 = vpop.f32.mrb[40].mxu1 }
 0x14c   : > { %1510 = vst.msk [vmem:[#allocation3 + $0x88] sm:$0xff] %vm838_vm7, %v1478_v49  ;;  %v1160_v18 = vadd.f32 %v4077_v19, %v1128_v20  ;;  %v1071_v57 = vpop.f32.mrb[41].mxu1  ;;  %v1756_v19 = vld [vmem:[#allocation3 + $0x8] sm:$0xff] }
 0x14d   : > { %v1451_v60 = vld [vmem:[#allocation3 + $0xb0] sm:$0xff]  ;;  %v1158_v63 = vadd.f32 %v1126_v14, %v1071_v57  ;;  %v4078_v6 = vpop.f32.mrb[42].mxu1 }
 0x14e   : > { %v1483_v40 = vadd.f32 %v4107_v44, %v1451_v60  ;;  %1192 = vst.msk [vmem:[#allocation3 + $0xd0] sm:$0xff] %vm838_vm7, %v1160_v18  ;;  %v1449_v61 = vld [vmem:[#allocation3 + $0xa0] sm:$0xff]  ;;  %v1161_v50 = vadd.f32 %v4078_v6, %v1129_v10  ;;  %v1074_v36 = vpop.f32.mrb[43].mxu1  ;;  %v1761_v6 = vld [vmem:[#allocation3 + $0x30] sm:$0xff] }
 0x14f   : > { %v1481_v22 = vadd.f32 %v1449_v61, %v1382_v28  ;;  %1190 = vst.msk [vmem:[#allocation3 + $0xc0] sm:$0xff] %vm838_vm7, %v1158_v63  ;;  %v1452_v59 = vld [vmem:[#allocation3 + $0xb8] sm:$0xff]  ;;  %v1159_v39 = vadd.f32 %v1127_v55, %v1074_v36  ;;  %v1759_v61 = vld [vmem:[#allocation3 + $0x20] sm:$0xff] }
 0x150   : > { %v4111_v8 = vpop.f32.mrb[40].mxu0  ;;  %1515 = vst.msk [vmem:[#allocation3 + $0xb0] sm:$0xff] %vm838_vm7, %v1483_v40  ;;  %v1484_v15 = vadd.f32 %v4108_v43, %v1452_v59  ;;  %1193 = vst.msk [vmem:[#allocation3 + $0xd8] sm:$0xff] %vm838_vm7, %v1161_v50  ;;  %v1450_v26 = vld [vmem:[#allocation3 + $0xa8] sm:$0xff] }
 0x151   : > { %v1398_v1 = vpop.f32.mrb[41].mxu0  ;;  %1513 = vst.msk [vmem:[#allocation3 + $0xa0] sm:$0xff] %vm838_vm7, %v1481_v22  ;;  %v1482_v41 = vadd.f32 %v1450_v26, %v1385_v56  ;;  %1191 = vst.msk [vmem:[#allocation3 + $0xc8] sm:$0xff] %vm838_vm7, %v1159_v39  ;;  %v1762_v22 = vld [vmem:[#allocation3 + $0x38] sm:$0xff] }
 0x152   : > { %v4112_v23 = vpop.f32.mrb[42].mxu0  ;;  %1516 = vst.msk [vmem:[#allocation3 + $0xb8] sm:$0xff] %vm838_vm7, %v1484_v15 }
 0x153   : > { %v1401_v31 = vpop.f32.mrb[43].mxu0  ;;  %1514 = vst.msk [vmem:[#allocation3 + $0xa8] sm:$0xff] %vm838_vm7, %v1482_v41  ;;  %v4081_v25 = vpop.f32.mrb[44].mxu1 }
 0x154   : > { %v1164_v48 = vadd.f32 %v4081_v25, %v1132_v38  ;;  %v1087_v62 = vpop.f32.mrb[45].mxu1  ;;  %v1760_v25 = vld [vmem:[#allocation3 + $0x28] sm:$0xff] }
 0x155   : > { %v1455_v45 = vld [vmem:[#allocation3 + $0xd0] sm:$0xff]  ;;  %v1162_v9 = vadd.f32 %v1130_v29, %v1087_v62  ;;  %v4082_v58 = vpop.f32.mrb[46].mxu1 }
 0x156   : > { %v1487_v2 = vadd.f32 %v4111_v8, %v1455_v45  ;;  %1196 = vst.msk [vmem:[#allocation3 + $0xf0] sm:$0xff] %vm838_vm7, %v1164_v48  ;;  %v1453_v33 = vld [vmem:[#allocation3 + $0xc0] sm:$0xff]  ;;  %v1165_v42 = vadd.f32 %v4082_v58, %v1133_v51  ;;  %v1090_v16 = vpop.f32.mrb[47].mxu1  ;;  %v1765_v58 = vld [vmem:[#allocation3 + $0x50] sm:$0xff] }
 0x157   : > { %v1485_v44 = vadd.f32 %v1453_v33, %v1398_v1  ;;  %1194 = vst.msk [vmem:[#allocation3 + $0xe0] sm:$0xff] %vm838_vm7, %v1162_v9  ;;  %v1456_v34 = vld [vmem:[#allocation3 + $0xd8] sm:$0xff]  ;;  %v1163_v53 = vadd.f32 %v1131_v17, %v1090_v16  ;;  %v1763_v33 = vld [vmem:[#allocation3 + $0x40] sm:$0xff] }
 0x158   : > { %v4115_v5 = vpop.f32.mrb[44].mxu0  ;;  %1519 = vst.msk [vmem:[#allocation3 + $0xd0] sm:$0xff] %vm838_vm7, %v1487_v2  ;;  %v1488_v52 = vadd.f32 %v4112_v23, %v1456_v34  ;;  %1197 = vst.msk [vmem:[#allocation3 + $0xf8] sm:$0xff] %vm838_vm7, %v1165_v42  ;;  %v1454_v28 = vld [vmem:[#allocation3 + $0xc8] sm:$0xff] }
 0x159   : > { %v1414_v46 = vpop.f32.mrb[45].mxu0  ;;  %1517 = vst.msk [vmem:[#allocation3 + $0xc0] sm:$0xff] %vm838_vm7, %v1485_v44  ;;  %v1486_v30 = vadd.f32 %v1454_v28, %v1401_v31  ;;  %1195 = vst.msk [vmem:[#allocation3 + $0xe8] sm:$0xff] %vm838_vm7, %v1163_v53  ;;  %v1766_v44 = vld [vmem:[#allocation3 + $0x58] sm:$0xff] }
 0x15a   : > { %v4116_v0 = vpop.f32.mrb[46].mxu0  ;;  %1520 = vst.msk [vmem:[#allocation3 + $0xd8] sm:$0xff] %vm838_vm7, %v1488_v52 }
 0x15b   : > { %v1417_v47 = vpop.f32.mrb[47].mxu0  ;;  %1518 = vst.msk [vmem:[#allocation3 + $0xc8] sm:$0xff] %vm838_vm7, %v1486_v30  ;;  %v4121_v37 = vpop.f32.mrb[48].mxu1 }
 0x15c   : > { %v1789_v43 = vadd.f32 %v4121_v37, %v1757_v32  ;;  %v1628_v21 = vpop.f32.mrb[49].mxu1  ;;  %v1764_v37 = vld [vmem:[#allocation3 + $0x48] sm:$0xff] }
 0x15d   : > { %v1459_v3 = vld [vmem:[#allocation3 + $0xf0] sm:$0xff]  ;;  %v1787_v24 = vadd.f32 %v1755_v27, %v1628_v21  ;;  %v4122_v56 = vpop.f32.mrb[50].mxu1 }
 0x15e   : > { %v1491_v11 = vadd.f32 %v4115_v5, %v1459_v3  ;;  %v1457_v12 = vld [vmem:[#allocation3 + $0xe0] sm:$0xff]  ;;  %1821 = vst.msk [vmem:[#allocation3 + $0x10] sm:$0xff] %vm838_vm7, %v1789_v43  ;;  %v1790_v54 = vadd.f32 %v4122_v56, %v1758_v35  ;;  %v1631_v49 = vpop.f32.mrb[51].mxu1  ;;  %v1769_v56 = vld [vmem:[#allocation3 + $0x70] sm:$0xff] }
 0x15f   : > { %v1489_v8 = vadd.f32 %v1457_v12, %v1414_v46  ;;  %v1460_v18 = vld [vmem:[#allocation3 + $0xf8] sm:$0xff]  ;;  %1819 = vst.msk [vmem:[#allocation3] sm:$0xff] %vm838_vm7, %v1787_v24  ;;  %v1788_v57 = vadd.f32 %v1756_v19, %v1631_v49  ;;  %v1767_v12 = vld [vmem:[#allocation3 + $0x60] sm:$0xff] }
 0x160   : > { %v4155_v13 = vpop.f32.mrb[48].mxu0  ;;  %1523 = vst.msk [vmem:[#allocation3 + $0xf0] sm:$0xff] %vm838_vm7, %v1491_v11  ;;  %v1492_v14 = vadd.f32 %v4116_v0, %v1460_v18  ;;  %v1458_v1 = vld [vmem:[#allocation3 + $0xe8] sm:$0xff]  ;;  %1822 = vst.msk [vmem:[#allocation3 + $0x18] sm:$0xff] %vm838_vm7, %v1790_v54 }
 0x161   : > { %v1954_v4 = vpop.f32.mrb[49].mxu0  ;;  %1521 = vst.msk [vmem:[#allocation3 + $0xe0] sm:$0xff] %vm838_vm7, %v1489_v8  ;;  %v1490_v60 = vadd.f32 %v1458_v1, %v1417_v47  ;;  %1820 = vst.msk [vmem:[#allocation3 + $0x8] sm:$0xff] %vm838_vm7, %v1788_v57  ;;  %v1770_v8 = vld [vmem:[#allocation3 + $0x78] sm:$0xff] }
 0x162   : > { %v4156_v7 = vpop.f32.mrb[50].mxu0  ;;  %1524 = vst.msk [vmem:[#allocation3 + $0xf8] sm:$0xff] %vm838_vm7, %v1492_v14 }
 0x163   : > { %v1957_v20 = vpop.f32.mrb[51].mxu0  ;;  %1522 = vst.msk [vmem:[#allocation3 + $0xe8] sm:$0xff] %vm838_vm7, %v1490_v60  ;;  %v4125_v63 = vpop.f32.mrb[52].mxu1 }
 0x164   : > { %v1793_v23 = vadd.f32 %v4125_v63, %v1761_v6  ;;  %v1644_v40 = vpop.f32.mrb[53].mxu1  ;;  %v1768_v63 = vld [vmem:[#allocation3 + $0x68] sm:$0xff] }
 0x165   : > { %v2083_v36 = vld [vmem:[#allocation3 + $0x10] sm:$0xff]  ;;  %v1791_v55 = vadd.f32 %v1759_v61, %v1644_v40  ;;  %v4126_v31 = vpop.f32.mrb[54].mxu1 }
 0x166   : > { %v2115_v39 = vadd.f32 %v4155_v13, %v2083_v36  ;;  %1825 = vst.msk [vmem:[#allocation3 + $0x30] sm:$0xff] %vm838_vm7, %v1793_v23  ;;  %v2081_v15 = vld [vmem:[#allocation3] sm:$0xff]  ;;  %v1794_v26 = vadd.f32 %v4126_v31, %v1762_v22  ;;  %v1647_v41 = vpop.f32.mrb[55].mxu1  ;;  %v1773_v31 = vld [vmem:[#allocation3 + $0x90] sm:$0xff] }
 0x167   : > { %v2113_v5 = vadd.f32 %v2081_v15, %v1954_v4  ;;  %1823 = vst.msk [vmem:[#allocation3 + $0x20] sm:$0xff] %vm838_vm7, %v1791_v55  ;;  %v2084_v48 = vld [vmem:[#allocation3 + $0x18] sm:$0xff]  ;;  %v1792_v62 = vadd.f32 %v1760_v25, %v1647_v41  ;;  %v1771_v15 = vld [vmem:[#allocation3 + $0x80] sm:$0xff] }
 0x168   : > { %v4159_v10 = vpop.f32.mrb[52].mxu0  ;;  %2147 = vst.msk [vmem:[#allocation3 + $0x10] sm:$0xff] %vm838_vm7, %v2115_v39  ;;  %v2116_v29 = vadd.f32 %v4156_v7, %v2084_v48  ;;  %1826 = vst.msk [vmem:[#allocation3 + $0x38] sm:$0xff] %vm838_vm7, %v1794_v26  ;;  %v2082_v46 = vld [vmem:[#allocation3 + $0x8] sm:$0xff] }
 0x169   : > { %v1970_v50 = vpop.f32.mrb[53].mxu0  ;;  %2145 = vst.msk [vmem:[#allocation3] sm:$0xff] %vm838_vm7, %v2113_v5  ;;  %v2114_v45 = vadd.f32 %v2082_v46, %v1957_v20  ;;  %1824 = vst.msk [vmem:[#allocation3 + $0x28] sm:$0xff] %vm838_vm7, %v1792_v62  ;;  %v1774_v5 = vld [vmem:[#allocation3 + $0x98] sm:$0xff] }
 0x16a   : > { %v4160_v59 = vpop.f32.mrb[54].mxu0  ;;  %2148 = vst.msk [vmem:[#allocation3 + $0x18] sm:$0xff] %vm838_vm7, %v2116_v29 }
 0x16b   : > { %v1973_v38 = vpop.f32.mrb[55].mxu0  ;;  %2146 = vst.msk [vmem:[#allocation3 + $0x8] sm:$0xff] %vm838_vm7, %v2114_v45  ;;  %v4129_v9 = vpop.f32.mrb[56].mxu1 }
 0x16c   : > { %v1797_v0 = vadd.f32 %v4129_v9, %v1765_v58  ;;  %v1660_v2 = vpop.f32.mrb[57].mxu1  ;;  %v1772_v9 = vld [vmem:[#allocation3 + $0x88] sm:$0xff] }
 0x16d   : > { %v2087_v16 = vld [vmem:[#allocation3 + $0x30] sm:$0xff]  ;;  %v1795_v17 = vadd.f32 %v1763_v33, %v1660_v2  ;;  %v4130_v47 = vpop.f32.mrb[58].mxu1 }
 0x16e   : > { %v2119_v53 = vadd.f32 %v4159_v10, %v2087_v16  ;;  %1829 = vst.msk [vmem:[#allocation3 + $0x50] sm:$0xff] %vm838_vm7, %v1797_v0  ;;  %v2085_v52 = vld [vmem:[#allocation3 + $0x20] sm:$0xff]  ;;  %v1798_v28 = vadd.f32 %v4130_v47, %v1766_v44  ;;  %v1663_v30 = vpop.f32.mrb[59].mxu1  ;;  %v1777_v47 = vld [vmem:[#allocation3 + $0xb0] sm:$0xff] }
 0x16f   : > { %v2117_v13 = vadd.f32 %v2085_v52, %v1970_v50  ;;  %1827 = vst.msk [vmem:[#allocation3 + $0x40] sm:$0xff] %vm838_vm7, %v1795_v17  ;;  %v2088_v43 = vld [vmem:[#allocation3 + $0x38] sm:$0xff]  ;;  %v1796_v21 = vadd.f32 %v1764_v37, %v1663_v30  ;;  %v1775_v52 = vld [vmem:[#allocation3 + $0xa0] sm:$0xff] }
 0x170   : > { %v4163_v51 = vpop.f32.mrb[56].mxu0  ;;  %2151 = vst.msk [vmem:[#allocation3 + $0x30] sm:$0xff] %vm838_vm7, %v2119_v53  ;;  %v2120_v27 = vadd.f32 %v4160_v59, %v2088_v43  ;;  %1830 = vst.msk [vmem:[#allocation3 + $0x58] sm:$0xff] %vm838_vm7, %v1798_v28  ;;  %v2086_v4 = vld [vmem:[#allocation3 + $0x28] sm:$0xff] }
 0x171   : > { %v1986_v42 = vpop.f32.mrb[57].mxu0  ;;  %2149 = vst.msk [vmem:[#allocation3 + $0x20] sm:$0xff] %vm838_vm7, %v2117_v13  ;;  %v2118_v3 = vadd.f32 %v2086_v4, %v1973_v38  ;;  %1828 = vst.msk [vmem:[#allocation3 + $0x48] sm:$0xff] %vm838_vm7, %v1796_v21  ;;  %v1778_v13 = vld [vmem:[#allocation3 + $0xb8] sm:$0xff] }
 0x172   : > { %v4164_v34 = vpop.f32.mrb[58].mxu0  ;;  %2152 = vst.msk [vmem:[#allocation3 + $0x38] sm:$0xff] %vm838_vm7, %v2120_v27 }
 0x173   : > { %v1989_v32 = vpop.f32.mrb[59].mxu0  ;;  %2150 = vst.msk [vmem:[#allocation3 + $0x28] sm:$0xff] %vm838_vm7, %v2118_v3  ;;  %v4133_v24 = vpop.f32.mrb[60].mxu1 }
 0x174   : > { %v1801_v7 = vadd.f32 %v4133_v24, %v1769_v56  ;;  %v1676_v11 = vpop.f32.mrb[61].mxu1  ;;  %v1776_v24 = vld [vmem:[#allocation3 + $0xa8] sm:$0xff] }
 0x175   : > { %v2091_v49 = vld [vmem:[#allocation3 + $0x50] sm:$0xff]  ;;  %v1799_v19 = vadd.f32 %v1767_v12, %v1676_v11  ;;  %v4134_v20 = vpop.f32.mrb[62].mxu1 }
 0x176   : > { %v2123_v57 = vadd.f32 %v4163_v51, %v2091_v49  ;;  %1833 = vst.msk [vmem:[#allocation3 + $0x70] sm:$0xff] %vm838_vm7, %v1801_v7  ;;  %v2089_v14 = vld [vmem:[#allocation3 + $0x40] sm:$0xff]  ;;  %v1802_v1 = vadd.f32 %v4134_v20, %v1770_v8  ;;  %v1679_v60 = vpop.f32.mrb[63].mxu1  ;;  %v1781_v20 = vld [vmem:[#allocation3 + $0xd0] sm:$0xff] }
 0x177   : > { %v2121_v10 = vadd.f32 %v2089_v14, %v1986_v42  ;;  %1831 = vst.msk [vmem:[#allocation3 + $0x60] sm:$0xff] %vm838_vm7, %v1799_v19  ;;  %v2092_v23 = vld [vmem:[#allocation3 + $0x58] sm:$0xff]  ;;  %v1800_v40 = vadd.f32 %v1768_v63, %v1679_v60  ;;  %v1779_v14 = vld [vmem:[#allocation3 + $0xc0] sm:$0xff] }
 0x178   : > { %v4167_v35 = vpop.f32.mrb[60].mxu0  ;;  %2155 = vst.msk [vmem:[#allocation3 + $0x50] sm:$0xff] %vm838_vm7, %v2123_v57  ;;  %v2124_v61 = vadd.f32 %v4164_v34, %v2092_v23  ;;  %1834 = vst.msk [vmem:[#allocation3 + $0x78] sm:$0xff] %vm838_vm7, %v1802_v1  ;;  %v2090_v50 = vld [vmem:[#allocation3 + $0x48] sm:$0xff] }
 0x179   : > { %v2002_v54 = vpop.f32.mrb[61].mxu0  ;;  %2153 = vst.msk [vmem:[#allocation3 + $0x40] sm:$0xff] %vm838_vm7, %v2121_v10  ;;  %v2122_v36 = vadd.f32 %v2090_v50, %v1989_v32  ;;  %1832 = vst.msk [vmem:[#allocation3 + $0x68] sm:$0xff] %vm838_vm7, %v1800_v40  ;;  %v1782_v10 = vld [vmem:[#allocation3 + $0xd8] sm:$0xff] }
 0x17a   : > { %v4168_v18 = vpop.f32.mrb[62].mxu0  ;;  %2156 = vst.msk [vmem:[#allocation3 + $0x58] sm:$0xff] %vm838_vm7, %v2124_v61 }
 0x17b   : > { %v2005_v6 = vpop.f32.mrb[63].mxu0  ;;  %2154 = vst.msk [vmem:[#allocation3 + $0x48] sm:$0xff] %vm838_vm7, %v2122_v36  ;;  %v4137_v55 = vpop.f32.mrb[64].mxu1 }
 0x17c   : > { %v1805_v59 = vadd.f32 %v4137_v55, %v1773_v31  ;;  %v1692_v39 = vpop.f32.mrb[65].mxu1  ;;  %v1780_v55 = vld [vmem:[#allocation3 + $0xc8] sm:$0xff] }
 0x17d   : > { %v2095_v41 = vld [vmem:[#allocation3 + $0x70] sm:$0xff]  ;;  %v1803_v25 = vadd.f32 %v1771_v15, %v1692_v39  ;;  %v4138_v38 = vpop.f32.mrb[66].mxu1 }
 0x17e   : > { %v2127_v62 = vadd.f32 %v4167_v35, %v2095_v41  ;;  %1837 = vst.msk [vmem:[#allocation3 + $0x90] sm:$0xff] %vm838_vm7, %v1805_v59  ;;  %v2093_v29 = vld [vmem:[#allocation3 + $0x60] sm:$0xff]  ;;  %v1806_v46 = vadd.f32 %v4138_v38, %v1774_v5  ;;  %v1695_v45 = vpop.f32.mrb[67].mxu1  ;;  %v1785_v38 = vld [vmem:[#allocation3 + $0xf0] sm:$0xff] }
 0x17f   : > { %v2125_v51 = vadd.f32 %v2093_v29, %v2002_v54  ;;  %1835 = vst.msk [vmem:[#allocation3 + $0x80] sm:$0xff] %vm838_vm7, %v1803_v25  ;;  %v2096_v0 = vld [vmem:[#allocation3 + $0x78] sm:$0xff]  ;;  %v1804_v2 = vadd.f32 %v1772_v9, %v1695_v45  ;;  %v1783_v29 = vld [vmem:[#allocation3 + $0xe0] sm:$0xff] }
 0x180   : > { %v4171_v22 = vpop.f32.mrb[64].mxu0  ;;  %2159 = vst.msk [vmem:[#allocation3 + $0x70] sm:$0xff] %vm838_vm7, %v2127_v62  ;;  %v2128_v33 = vadd.f32 %v4168_v18, %v2096_v0  ;;  %1838 = vst.msk [vmem:[#allocation3 + $0x98] sm:$0xff] %vm838_vm7, %v1806_v46  ;;  %v2094_v42 = vld [vmem:[#allocation3 + $0x68] sm:$0xff] }
 0x181   : > { %v2018_v26 = vpop.f32.mrb[65].mxu0  ;;  %2157 = vst.msk [vmem:[#allocation3 + $0x60] sm:$0xff] %vm838_vm7, %v2125_v51  ;;  %v2126_v16 = vadd.f32 %v2094_v42, %v2005_v6  ;;  %1836 = vst.msk [vmem:[#allocation3 + $0x88] sm:$0xff] %vm838_vm7, %v1804_v2  ;;  %v1786_v51 = vld [vmem:[#allocation3 + $0xf8] sm:$0xff] }
 0x182   : > { %v4172_v48 = vpop.f32.mrb[66].mxu0  ;;  %2160 = vst.msk [vmem:[#allocation3 + $0x78] sm:$0xff] %vm838_vm7, %v2128_v33 }
 0x183   : > { %v2021_v58 = vpop.f32.mrb[67].mxu0  ;;  %2158 = vst.msk [vmem:[#allocation3 + $0x68] sm:$0xff] %vm838_vm7, %v2126_v16  ;;  %v4141_v17 = vpop.f32.mrb[68].mxu1 }
 0x184   : > { %v1809_v34 = vadd.f32 %v4141_v17, %v1777_v47  ;;  %v1708_v53 = vpop.f32.mrb[69].mxu1  ;;  %v1784_v17 = vld [vmem:[#allocation3 + $0xe8] sm:$0xff] }
 0x185   : > { %v2099_v30 = vld [vmem:[#allocation3 + $0x90] sm:$0xff]  ;;  %v1807_v37 = vadd.f32 %v1775_v52, %v1708_v53  ;;  %v4142_v32 = vpop.f32.mrb[70].mxu1 }
 0x186   : > { %v2131_v21 = vadd.f32 %v4171_v22, %v2099_v30  ;;  %1841 = vst.msk [vmem:[#allocation3 + $0xb0] sm:$0xff] %vm838_vm7, %v1809_v34  ;;  %v2097_v27 = vld [vmem:[#allocation3 + $0x80] sm:$0xff]  ;;  %v1810_v4 = vadd.f32 %v4142_v32, %v1778_v13  ;;  %v1711_v3 = vpop.f32.mrb[71].mxu1  ;;  %v2409_v32 = vld [vmem:[#allocation3 + $0x10] sm:$0xff] }
 0x187   : > { %v2129_v35 = vadd.f32 %v2097_v27, %v2018_v26  ;;  %1839 = vst.msk [vmem:[#allocation3 + $0xa0] sm:$0xff] %vm838_vm7, %v1807_v37  ;;  %v2100_v7 = vld [vmem:[#allocation3 + $0x98] sm:$0xff]  ;;  %v1808_v11 = vadd.f32 %v1776_v24, %v1711_v3  ;;  %v2407_v27 = vld [vmem:[#allocation3] sm:$0xff] }
 0x188   : > { %v4175_v44 = vpop.f32.mrb[68].mxu0  ;;  %2163 = vst.msk [vmem:[#allocation3 + $0x90] sm:$0xff] %vm838_vm7, %v2131_v21  ;;  %v2132_v12 = vadd.f32 %v4172_v48, %v2100_v7  ;;  %1842 = vst.msk [vmem:[#allocation3 + $0xb8] sm:$0xff] %vm838_vm7, %v1810_v4  ;;  %v2098_v54 = vld [vmem:[#allocation3 + $0x88] sm:$0xff] }
 0x189   : > { %v2034_v28 = vpop.f32.mrb[69].mxu0  ;;  %2161 = vst.msk [vmem:[#allocation3 + $0x80] sm:$0xff] %vm838_vm7, %v2129_v35  ;;  %v2130_v49 = vadd.f32 %v2098_v54, %v2021_v58  ;;  %1840 = vst.msk [vmem:[#allocation3 + $0xa8] sm:$0xff] %vm838_vm7, %v1808_v11  ;;  %v2410_v35 = vld [vmem:[#allocation3 + $0x18] sm:$0xff] }
 0x18a   : > { %v4176_v43 = vpop.f32.mrb[70].mxu0  ;;  %2164 = vst.msk [vmem:[#allocation3 + $0x98] sm:$0xff] %vm838_vm7, %v2132_v12 }
 0x18b   : > { %v2037_v56 = vpop.f32.mrb[71].mxu0  ;;  %2162 = vst.msk [vmem:[#allocation3 + $0x88] sm:$0xff] %vm838_vm7, %v2130_v49  ;;  %v4145_v19 = vpop.f32.mrb[72].mxu1 }
 0x18c   : > { %v1813_v18 = vadd.f32 %v4145_v19, %v1781_v20  ;;  %v1724_v57 = vpop.f32.mrb[73].mxu1  ;;  %v2408_v19 = vld [vmem:[#allocation3 + $0x8] sm:$0xff] }
 0x18d   : > { %v2103_v60 = vld [vmem:[#allocation3 + $0xb0] sm:$0xff]  ;;  %v1811_v63 = vadd.f32 %v1779_v14, %v1724_v57  ;;  %v4146_v6 = vpop.f32.mrb[74].mxu1 }
 0x18e   : > { %v2135_v40 = vadd.f32 %v4175_v44, %v2103_v60  ;;  %1845 = vst.msk [vmem:[#allocation3 + $0xd0] sm:$0xff] %vm838_vm7, %v1813_v18  ;;  %v2101_v61 = vld [vmem:[#allocation3 + $0xa0] sm:$0xff]  ;;  %v1814_v50 = vadd.f32 %v4146_v6, %v1782_v10  ;;  %v1727_v36 = vpop.f32.mrb[75].mxu1  ;;  %v2413_v6 = vld [vmem:[#allocation3 + $0x30] sm:$0xff] }
 0x18f   : > { %v2133_v22 = vadd.f32 %v2101_v61, %v2034_v28  ;;  %1843 = vst.msk [vmem:[#allocation3 + $0xc0] sm:$0xff] %vm838_vm7, %v1811_v63  ;;  %v2104_v59 = vld [vmem:[#allocation3 + $0xb8] sm:$0xff]  ;;  %v1812_v39 = vadd.f32 %v1780_v55, %v1727_v36  ;;  %v2411_v61 = vld [vmem:[#allocation3 + $0x20] sm:$0xff] }
 0x190   : > { %v4179_v8 = vpop.f32.mrb[72].mxu0  ;;  %2167 = vst.msk [vmem:[#allocation3 + $0xb0] sm:$0xff] %vm838_vm7, %v2135_v40  ;;  %v2136_v15 = vadd.f32 %v4176_v43, %v2104_v59  ;;  %1846 = vst.msk [vmem:[#allocation3 + $0xd8] sm:$0xff] %vm838_vm7, %v1814_v50  ;;  %v2102_v26 = vld [vmem:[#allocation3 + $0xa8] sm:$0xff] }
 0x191   : > { %v2050_v1 = vpop.f32.mrb[73].mxu0  ;;  %2165 = vst.msk [vmem:[#allocation3 + $0xa0] sm:$0xff] %vm838_vm7, %v2133_v22  ;;  %v2134_v41 = vadd.f32 %v2102_v26, %v2037_v56  ;;  %1844 = vst.msk [vmem:[#allocation3 + $0xc8] sm:$0xff] %vm838_vm7, %v1812_v39  ;;  %v2414_v22 = vld [vmem:[#allocation3 + $0x38] sm:$0xff] }
 0x192   : > { %v4180_v23 = vpop.f32.mrb[74].mxu0  ;;  %2168 = vst.msk [vmem:[#allocation3 + $0xb8] sm:$0xff] %vm838_vm7, %v2136_v15 }
 0x193   : > { %v2053_v31 = vpop.f32.mrb[75].mxu0  ;;  %2166 = vst.msk [vmem:[#allocation3 + $0xa8] sm:$0xff] %vm838_vm7, %v2134_v41  ;;  %v4149_v25 = vpop.f32.mrb[76].mxu1 }
 0x194   : > { %v1817_v48 = vadd.f32 %v4149_v25, %v1785_v38  ;;  %v1740_v62 = vpop.f32.mrb[77].mxu1  ;;  %v2412_v25 = vld [vmem:[#allocation3 + $0x28] sm:$0xff] }
 0x195   : > { %v2107_v45 = vld [vmem:[#allocation3 + $0xd0] sm:$0xff]  ;;  %v1815_v9 = vadd.f32 %v1783_v29, %v1740_v62  ;;  %v4150_v58 = vpop.f32.mrb[78].mxu1 }
 0x196   : > { %v2139_v2 = vadd.f32 %v4179_v8, %v2107_v45  ;;  %1849 = vst.msk [vmem:[#allocation3 + $0xf0] sm:$0xff] %vm838_vm7, %v1817_v48  ;;  %v2105_v33 = vld [vmem:[#allocation3 + $0xc0] sm:$0xff]  ;;  %v1818_v42 = vadd.f32 %v4150_v58, %v1786_v51  ;;  %v1743_v16 = vpop.f32.mrb[79].mxu1  ;;  %v2417_v58 = vld [vmem:[#allocation3 + $0x50] sm:$0xff] }
 0x197   : > { %v2137_v44 = vadd.f32 %v2105_v33, %v2050_v1  ;;  %1847 = vst.msk [vmem:[#allocation3 + $0xe0] sm:$0xff] %vm838_vm7, %v1815_v9  ;;  %v2108_v34 = vld [vmem:[#allocation3 + $0xd8] sm:$0xff]  ;;  %v1816_v53 = vadd.f32 %v1784_v17, %v1743_v16  ;;  %v2415_v33 = vld [vmem:[#allocation3 + $0x40] sm:$0xff] }
 0x198   : > { %v4183_v5 = vpop.f32.mrb[76].mxu0  ;;  %2171 = vst.msk [vmem:[#allocation3 + $0xd0] sm:$0xff] %vm838_vm7, %v2139_v2  ;;  %v2140_v52 = vadd.f32 %v4180_v23, %v2108_v34  ;;  %1850 = vst.msk [vmem:[#allocation3 + $0xf8] sm:$0xff] %vm838_vm7, %v1818_v42  ;;  %v2106_v28 = vld [vmem:[#allocation3 + $0xc8] sm:$0xff] }
 0x199   : > { %v2066_v46 = vpop.f32.mrb[77].mxu0  ;;  %2169 = vst.msk [vmem:[#allocation3 + $0xc0] sm:$0xff] %vm838_vm7, %v2137_v44  ;;  %v2138_v30 = vadd.f32 %v2106_v28, %v2053_v31  ;;  %1848 = vst.msk [vmem:[#allocation3 + $0xe8] sm:$0xff] %vm838_vm7, %v1816_v53  ;;  %v2418_v44 = vld [vmem:[#allocation3 + $0x58] sm:$0xff] }
 0x19a   : > { %v4184_v0 = vpop.f32.mrb[78].mxu0  ;;  %2172 = vst.msk [vmem:[#allocation3 + $0xd8] sm:$0xff] %vm838_vm7, %v2140_v52 }
 0x19b   : > { %v2069_v47 = vpop.f32.mrb[79].mxu0  ;;  %2170 = vst.msk [vmem:[#allocation3 + $0xc8] sm:$0xff] %vm838_vm7, %v2138_v30  ;;  %v4189_v37 = vpop.f32.mrb[80].mxu1 }
 0x19c   : > { %v2441_v43 = vadd.f32 %v4189_v37, %v2409_v32  ;;  %v2280_v21 = vpop.f32.mrb[81].mxu1  ;;  %v2416_v37 = vld [vmem:[#allocation3 + $0x48] sm:$0xff] }
 0x19d   : > { %v2111_v3 = vld [vmem:[#allocation3 + $0xf0] sm:$0xff]  ;;  %v2439_v24 = vadd.f32 %v2407_v27, %v2280_v21  ;;  %v4190_v56 = vpop.f32.mrb[82].mxu1 }
 0x19e   : > { %v2143_v11 = vadd.f32 %v4183_v5, %v2111_v3  ;;  %v2109_v12 = vld [vmem:[#allocation3 + $0xe0] sm:$0xff]  ;;  %2473 = vst.msk [vmem:[#allocation3 + $0x10] sm:$0xff] %vm838_vm7, %v2441_v43  ;;  %v2442_v54 = vadd.f32 %v4190_v56, %v2410_v35  ;;  %v2283_v49 = vpop.f32.mrb[83].mxu1  ;;  %v2421_v56 = vld [vmem:[#allocation3 + $0x70] sm:$0xff] }
 0x19f   : > { %v2141_v8 = vadd.f32 %v2109_v12, %v2066_v46  ;;  %v2112_v18 = vld [vmem:[#allocation3 + $0xf8] sm:$0xff]  ;;  %2471 = vst.msk [vmem:[#allocation3] sm:$0xff] %vm838_vm7, %v2439_v24  ;;  %v2440_v57 = vadd.f32 %v2408_v19, %v2283_v49  ;;  %v2419_v12 = vld [vmem:[#allocation3 + $0x60] sm:$0xff] }
 0x1a0   : > { %v4223_v13 = vpop.f32.mrb[80].mxu0  ;;  %2175 = vst.msk [vmem:[#allocation3 + $0xf0] sm:$0xff] %vm838_vm7, %v2143_v11  ;;  %v2144_v14 = vadd.f32 %v4184_v0, %v2112_v18  ;;  %v2110_v1 = vld [vmem:[#allocation3 + $0xe8] sm:$0xff]  ;;  %2474 = vst.msk [vmem:[#allocation3 + $0x18] sm:$0xff] %vm838_vm7, %v2442_v54 }
 0x1a1   : > { %v2607_v4 = vpop.f32.mrb[81].mxu0  ;;  %2173 = vst.msk [vmem:[#allocation3 + $0xe0] sm:$0xff] %vm838_vm7, %v2141_v8  ;;  %v2142_v60 = vadd.f32 %v2110_v1, %v2069_v47  ;;  %2472 = vst.msk [vmem:[#allocation3 + $0x8] sm:$0xff] %vm838_vm7, %v2440_v57  ;;  %v2422_v8 = vld [vmem:[#allocation3 + $0x78] sm:$0xff] }
 0x1a2   : > { %v4224_v7 = vpop.f32.mrb[82].mxu0  ;;  %2176 = vst.msk [vmem:[#allocation3 + $0xf8] sm:$0xff] %vm838_vm7, %v2144_v14 }
 0x1a3   : > { %v2610_v20 = vpop.f32.mrb[83].mxu0  ;;  %2174 = vst.msk [vmem:[#allocation3 + $0xe8] sm:$0xff] %vm838_vm7, %v2142_v60  ;;  %v4193_v63 = vpop.f32.mrb[84].mxu1 }
 0x1a4   : > { %v2445_v23 = vadd.f32 %v4193_v63, %v2413_v6  ;;  %v2296_v40 = vpop.f32.mrb[85].mxu1  ;;  %v2420_v63 = vld [vmem:[#allocation3 + $0x68] sm:$0xff] }
 0x1a5   : > { %v2736_v36 = vld [vmem:[#allocation3 + $0x10] sm:$0xff]  ;;  %v2443_v55 = vadd.f32 %v2411_v61, %v2296_v40  ;;  %v4194_v31 = vpop.f32.mrb[86].mxu1 }
 0x1a6   : > { %v2768_v39 = vadd.f32 %v4223_v13, %v2736_v36  ;;  %2477 = vst.msk [vmem:[#allocation3 + $0x30] sm:$0xff] %vm838_vm7, %v2445_v23  ;;  %v2734_v15 = vld [vmem:[#allocation3] sm:$0xff]  ;;  %v2446_v26 = vadd.f32 %v4194_v31, %v2414_v22  ;;  %v2299_v41 = vpop.f32.mrb[87].mxu1  ;;  %v2425_v31 = vld [vmem:[#allocation3 + $0x90] sm:$0xff] }
 0x1a7   : > { %v2766_v5 = vadd.f32 %v2734_v15, %v2607_v4  ;;  %2475 = vst.msk [vmem:[#allocation3 + $0x20] sm:$0xff] %vm838_vm7, %v2443_v55  ;;  %v2737_v48 = vld [vmem:[#allocation3 + $0x18] sm:$0xff]  ;;  %v2444_v62 = vadd.f32 %v2412_v25, %v2299_v41  ;;  %v2423_v15 = vld [vmem:[#allocation3 + $0x80] sm:$0xff] }
 0x1a8   : > { %v4227_v10 = vpop.f32.mrb[84].mxu0  ;;  %2800 = vst.msk [vmem:[#allocation3 + $0x10] sm:$0xff] %vm838_vm7, %v2768_v39  ;;  %v2769_v29 = vadd.f32 %v4224_v7, %v2737_v48  ;;  %2478 = vst.msk [vmem:[#allocation3 + $0x38] sm:$0xff] %vm838_vm7, %v2446_v26  ;;  %v2735_v46 = vld [vmem:[#allocation3 + $0x8] sm:$0xff] }
 0x1a9   : > { %v2623_v50 = vpop.f32.mrb[85].mxu0  ;;  %2798 = vst.msk [vmem:[#allocation3] sm:$0xff] %vm838_vm7, %v2766_v5  ;;  %v2767_v45 = vadd.f32 %v2735_v46, %v2610_v20  ;;  %2476 = vst.msk [vmem:[#allocation3 + $0x28] sm:$0xff] %vm838_vm7, %v2444_v62  ;;  %v2426_v5 = vld [vmem:[#allocation3 + $0x98] sm:$0xff] }
 0x1aa   : > { %v4228_v59 = vpop.f32.mrb[86].mxu0  ;;  %2801 = vst.msk [vmem:[#allocation3 + $0x18] sm:$0xff] %vm838_vm7, %v2769_v29 }
 0x1ab   : > { %v2626_v38 = vpop.f32.mrb[87].mxu0  ;;  %2799 = vst.msk [vmem:[#allocation3 + $0x8] sm:$0xff] %vm838_vm7, %v2767_v45  ;;  %v4197_v9 = vpop.f32.mrb[88].mxu1 }
 0x1ac   : > { %v2449_v0 = vadd.f32 %v4197_v9, %v2417_v58  ;;  %v2312_v2 = vpop.f32.mrb[89].mxu1  ;;  %v2424_v9 = vld [vmem:[#allocation3 + $0x88] sm:$0xff] }
 0x1ad   : > { %v2740_v16 = vld [vmem:[#allocation3 + $0x30] sm:$0xff]  ;;  %v2447_v17 = vadd.f32 %v2415_v33, %v2312_v2  ;;  %v4198_v47 = vpop.f32.mrb[90].mxu1 }
 0x1ae   : > { %v2772_v53 = vadd.f32 %v4227_v10, %v2740_v16  ;;  %2481 = vst.msk [vmem:[#allocation3 + $0x50] sm:$0xff] %vm838_vm7, %v2449_v0  ;;  %v2738_v52 = vld [vmem:[#allocation3 + $0x20] sm:$0xff]  ;;  %v2450_v28 = vadd.f32 %v4198_v47, %v2418_v44  ;;  %v2315_v30 = vpop.f32.mrb[91].mxu1  ;;  %v2429_v47 = vld [vmem:[#allocation3 + $0xb0] sm:$0xff] }
 0x1af   : > { %v2770_v13 = vadd.f32 %v2738_v52, %v2623_v50  ;;  %2479 = vst.msk [vmem:[#allocation3 + $0x40] sm:$0xff] %vm838_vm7, %v2447_v17  ;;  %v2741_v43 = vld [vmem:[#allocation3 + $0x38] sm:$0xff]  ;;  %v2448_v21 = vadd.f32 %v2416_v37, %v2315_v30  ;;  %v2427_v52 = vld [vmem:[#allocation3 + $0xa0] sm:$0xff] }
 0x1b0   : > { %v4231_v51 = vpop.f32.mrb[88].mxu0  ;;  %2804 = vst.msk [vmem:[#allocation3 + $0x30] sm:$0xff] %vm838_vm7, %v2772_v53  ;;  %v2773_v27 = vadd.f32 %v4228_v59, %v2741_v43  ;;  %2482 = vst.msk [vmem:[#allocation3 + $0x58] sm:$0xff] %vm838_vm7, %v2450_v28  ;;  %v2739_v4 = vld [vmem:[#allocation3 + $0x28] sm:$0xff] }
 0x1b1   : > { %v2639_v42 = vpop.f32.mrb[89].mxu0  ;;  %2802 = vst.msk [vmem:[#allocation3 + $0x20] sm:$0xff] %vm838_vm7, %v2770_v13  ;;  %v2771_v3 = vadd.f32 %v2739_v4, %v2626_v38  ;;  %2480 = vst.msk [vmem:[#allocation3 + $0x48] sm:$0xff] %vm838_vm7, %v2448_v21  ;;  %v2430_v13 = vld [vmem:[#allocation3 + $0xb8] sm:$0xff] }
 0x1b2   : > { %v4232_v34 = vpop.f32.mrb[90].mxu0  ;;  %2805 = vst.msk [vmem:[#allocation3 + $0x38] sm:$0xff] %vm838_vm7, %v2773_v27 }
 0x1b3   : > { %v2642_v32 = vpop.f32.mrb[91].mxu0  ;;  %2803 = vst.msk [vmem:[#allocation3 + $0x28] sm:$0xff] %vm838_vm7, %v2771_v3  ;;  %v4201_v24 = vpop.f32.mrb[92].mxu1 }
 0x1b4   : > { %v2453_v7 = vadd.f32 %v4201_v24, %v2421_v56  ;;  %v2328_v11 = vpop.f32.mrb[93].mxu1  ;;  %v2428_v24 = vld [vmem:[#allocation3 + $0xa8] sm:$0xff] }
 0x1b5   : > { %v2744_v49 = vld [vmem:[#allocation3 + $0x50] sm:$0xff]  ;;  %v2451_v19 = vadd.f32 %v2419_v12, %v2328_v11  ;;  %v4202_v20 = vpop.f32.mrb[94].mxu1 }
 0x1b6   : > { %v2776_v57 = vadd.f32 %v4231_v51, %v2744_v49  ;;  %2485 = vst.msk [vmem:[#allocation3 + $0x70] sm:$0xff] %vm838_vm7, %v2453_v7  ;;  %v2742_v14 = vld [vmem:[#allocation3 + $0x40] sm:$0xff]  ;;  %v2454_v1 = vadd.f32 %v4202_v20, %v2422_v8  ;;  %v2331_v60 = vpop.f32.mrb[95].mxu1  ;;  %v2433_v20 = vld [vmem:[#allocation3 + $0xd0] sm:$0xff] }
 0x1b7   : > { %v2774_v10 = vadd.f32 %v2742_v14, %v2639_v42  ;;  %2483 = vst.msk [vmem:[#allocation3 + $0x60] sm:$0xff] %vm838_vm7, %v2451_v19  ;;  %v2745_v23 = vld [vmem:[#allocation3 + $0x58] sm:$0xff]  ;;  %v2452_v40 = vadd.f32 %v2420_v63, %v2331_v60  ;;  %v2431_v14 = vld [vmem:[#allocation3 + $0xc0] sm:$0xff] }
 0x1b8   : > { %v4235_v35 = vpop.f32.mrb[92].mxu0  ;;  %2808 = vst.msk [vmem:[#allocation3 + $0x50] sm:$0xff] %vm838_vm7, %v2776_v57  ;;  %v2777_v61 = vadd.f32 %v4232_v34, %v2745_v23  ;;  %2486 = vst.msk [vmem:[#allocation3 + $0x78] sm:$0xff] %vm838_vm7, %v2454_v1  ;;  %v2743_v50 = vld [vmem:[#allocation3 + $0x48] sm:$0xff] }
 0x1b9   : > { %v2655_v54 = vpop.f32.mrb[93].mxu0  ;;  %2806 = vst.msk [vmem:[#allocation3 + $0x40] sm:$0xff] %vm838_vm7, %v2774_v10  ;;  %v2775_v36 = vadd.f32 %v2743_v50, %v2642_v32  ;;  %2484 = vst.msk [vmem:[#allocation3 + $0x68] sm:$0xff] %vm838_vm7, %v2452_v40  ;;  %v2434_v10 = vld [vmem:[#allocation3 + $0xd8] sm:$0xff] }
 0x1ba   : > { %v4236_v18 = vpop.f32.mrb[94].mxu0  ;;  %2809 = vst.msk [vmem:[#allocation3 + $0x58] sm:$0xff] %vm838_vm7, %v2777_v61 }
 0x1bb   : > { %v2658_v6 = vpop.f32.mrb[95].mxu0  ;;  %2807 = vst.msk [vmem:[#allocation3 + $0x48] sm:$0xff] %vm838_vm7, %v2775_v36  ;;  %v4205_v55 = vpop.f32.mrb[96].mxu1 }
 0x1bc   : > { %v2457_v59 = vadd.f32 %v4205_v55, %v2425_v31  ;;  %v2344_v39 = vpop.f32.mrb[97].mxu1  ;;  %v2432_v55 = vld [vmem:[#allocation3 + $0xc8] sm:$0xff] }
 0x1bd   : > { %v2748_v41 = vld [vmem:[#allocation3 + $0x70] sm:$0xff]  ;;  %v2455_v25 = vadd.f32 %v2423_v15, %v2344_v39  ;;  %v4206_v38 = vpop.f32.mrb[98].mxu1 }
 0x1be   : > { %v2780_v62 = vadd.f32 %v4235_v35, %v2748_v41  ;;  %2489 = vst.msk [vmem:[#allocation3 + $0x90] sm:$0xff] %vm838_vm7, %v2457_v59  ;;  %v2746_v29 = vld [vmem:[#allocation3 + $0x60] sm:$0xff]  ;;  %v2458_v46 = vadd.f32 %v4206_v38, %v2426_v5  ;;  %v2347_v45 = vpop.f32.mrb[99].mxu1  ;;  %v2437_v38 = vld [vmem:[#allocation3 + $0xf0] sm:$0xff] }
 0x1bf   : > { %v2778_v51 = vadd.f32 %v2746_v29, %v2655_v54  ;;  %2487 = vst.msk [vmem:[#allocation3 + $0x80] sm:$0xff] %vm838_vm7, %v2455_v25  ;;  %v2749_v0 = vld [vmem:[#allocation3 + $0x78] sm:$0xff]  ;;  %v2456_v2 = vadd.f32 %v2424_v9, %v2347_v45  ;;  %v2435_v29 = vld [vmem:[#allocation3 + $0xe0] sm:$0xff] }
 0x1c0   : > { %v4239_v22 = vpop.f32.mrb[96].mxu0  ;;  %2812 = vst.msk [vmem:[#allocation3 + $0x70] sm:$0xff] %vm838_vm7, %v2780_v62  ;;  %v2781_v33 = vadd.f32 %v4236_v18, %v2749_v0  ;;  %2490 = vst.msk [vmem:[#allocation3 + $0x98] sm:$0xff] %vm838_vm7, %v2458_v46  ;;  %v2747_v42 = vld [vmem:[#allocation3 + $0x68] sm:$0xff] }
 0x1c1   : > { %v2671_v26 = vpop.f32.mrb[97].mxu0  ;;  %2810 = vst.msk [vmem:[#allocation3 + $0x60] sm:$0xff] %vm838_vm7, %v2778_v51  ;;  %v2779_v16 = vadd.f32 %v2747_v42, %v2658_v6  ;;  %2488 = vst.msk [vmem:[#allocation3 + $0x88] sm:$0xff] %vm838_vm7, %v2456_v2  ;;  %v2438_v51 = vld [vmem:[#allocation3 + $0xf8] sm:$0xff] }
 0x1c2   : > { %v4240_v48 = vpop.f32.mrb[98].mxu0  ;;  %2813 = vst.msk [vmem:[#allocation3 + $0x78] sm:$0xff] %vm838_vm7, %v2781_v33 }
 0x1c3   : > { %v2674_v58 = vpop.f32.mrb[99].mxu0  ;;  %2811 = vst.msk [vmem:[#allocation3 + $0x68] sm:$0xff] %vm838_vm7, %v2779_v16  ;;  %v4209_v17 = vpop.f32.mrb[100].mxu1 }
 0x1c4   : > { %v2461_v34 = vadd.f32 %v4209_v17, %v2429_v47  ;;  %v2360_v53 = vpop.f32.mrb[101].mxu1  ;;  %v2436_v17 = vld [vmem:[#allocation3 + $0xe8] sm:$0xff] }
 0x1c5   : > { %v2752_v30 = vld [vmem:[#allocation3 + $0x90] sm:$0xff]  ;;  %v2459_v37 = vadd.f32 %v2427_v52, %v2360_v53  ;;  %v4210_v32 = vpop.f32.mrb[102].mxu1 }
 0x1c6   : > { %v2784_v21 = vadd.f32 %v4239_v22, %v2752_v30  ;;  %2493 = vst.msk [vmem:[#allocation3 + $0xb0] sm:$0xff] %vm838_vm7, %v2461_v34  ;;  %v2750_v27 = vld [vmem:[#allocation3 + $0x80] sm:$0xff]  ;;  %v2462_v4 = vadd.f32 %v4210_v32, %v2430_v13  ;;  %v2363_v3 = vpop.f32.mrb[103].mxu1  ;;  %v3063_v32 = vld [vmem:[#allocation3 + $0x10] sm:$0xff] }
 0x1c7   : > { %v2782_v35 = vadd.f32 %v2750_v27, %v2671_v26  ;;  %2491 = vst.msk [vmem:[#allocation3 + $0xa0] sm:$0xff] %vm838_vm7, %v2459_v37  ;;  %v2753_v7 = vld [vmem:[#allocation3 + $0x98] sm:$0xff]  ;;  %v2460_v11 = vadd.f32 %v2428_v24, %v2363_v3  ;;  %v3061_v27 = vld [vmem:[#allocation3] sm:$0xff] }
 0x1c8   : > { %v4243_v44 = vpop.f32.mrb[100].mxu0  ;;  %2816 = vst.msk [vmem:[#allocation3 + $0x90] sm:$0xff] %vm838_vm7, %v2784_v21  ;;  %v2785_v12 = vadd.f32 %v4240_v48, %v2753_v7  ;;  %2494 = vst.msk [vmem:[#allocation3 + $0xb8] sm:$0xff] %vm838_vm7, %v2462_v4  ;;  %v2751_v54 = vld [vmem:[#allocation3 + $0x88] sm:$0xff] }
 0x1c9   : > { %v2687_v28 = vpop.f32.mrb[101].mxu0  ;;  %2814 = vst.msk [vmem:[#allocation3 + $0x80] sm:$0xff] %vm838_vm7, %v2782_v35  ;;  %v2783_v49 = vadd.f32 %v2751_v54, %v2674_v58  ;;  %2492 = vst.msk [vmem:[#allocation3 + $0xa8] sm:$0xff] %vm838_vm7, %v2460_v11  ;;  %v3064_v35 = vld [vmem:[#allocation3 + $0x18] sm:$0xff] }
 0x1ca   : > { %v4244_v43 = vpop.f32.mrb[102].mxu0  ;;  %2817 = vst.msk [vmem:[#allocation3 + $0x98] sm:$0xff] %vm838_vm7, %v2785_v12 }
 0x1cb   : > { %v2690_v56 = vpop.f32.mrb[103].mxu0  ;;  %2815 = vst.msk [vmem:[#allocation3 + $0x88] sm:$0xff] %vm838_vm7, %v2783_v49  ;;  %v4213_v19 = vpop.f32.mrb[104].mxu1 }
 0x1cc   : > { %v2465_v18 = vadd.f32 %v4213_v19, %v2433_v20  ;;  %v2376_v57 = vpop.f32.mrb[105].mxu1  ;;  %v3062_v19 = vld [vmem:[#allocation3 + $0x8] sm:$0xff] }
 0x1cd   : > { %v2756_v60 = vld [vmem:[#allocation3 + $0xb0] sm:$0xff]  ;;  %v2463_v63 = vadd.f32 %v2431_v14, %v2376_v57  ;;  %v4214_v6 = vpop.f32.mrb[106].mxu1 }
 0x1ce   : > { %v2788_v40 = vadd.f32 %v4243_v44, %v2756_v60  ;;  %2497 = vst.msk [vmem:[#allocation3 + $0xd0] sm:$0xff] %vm838_vm7, %v2465_v18  ;;  %v2754_v61 = vld [vmem:[#allocation3 + $0xa0] sm:$0xff]  ;;  %v2466_v50 = vadd.f32 %v4214_v6, %v2434_v10  ;;  %v2379_v36 = vpop.f32.mrb[107].mxu1  ;;  %v3067_v6 = vld [vmem:[#allocation3 + $0x30] sm:$0xff] }
 0x1cf   : > { %v2786_v22 = vadd.f32 %v2754_v61, %v2687_v28  ;;  %2495 = vst.msk [vmem:[#allocation3 + $0xc0] sm:$0xff] %vm838_vm7, %v2463_v63  ;;  %v2757_v59 = vld [vmem:[#allocation3 + $0xb8] sm:$0xff]  ;;  %v2464_v39 = vadd.f32 %v2432_v55, %v2379_v36  ;;  %v3065_v61 = vld [vmem:[#allocation3 + $0x20] sm:$0xff] }
 0x1d0   : > { %v4247_v8 = vpop.f32.mrb[104].mxu0  ;;  %2820 = vst.msk [vmem:[#allocation3 + $0xb0] sm:$0xff] %vm838_vm7, %v2788_v40  ;;  %v2789_v15 = vadd.f32 %v4244_v43, %v2757_v59  ;;  %2498 = vst.msk [vmem:[#allocation3 + $0xd8] sm:$0xff] %vm838_vm7, %v2466_v50  ;;  %v2755_v26 = vld [vmem:[#allocation3 + $0xa8] sm:$0xff] }
 0x1d1   : > { %v2703_v1 = vpop.f32.mrb[105].mxu0  ;;  %2818 = vst.msk [vmem:[#allocation3 + $0xa0] sm:$0xff] %vm838_vm7, %v2786_v22  ;;  %v2787_v41 = vadd.f32 %v2755_v26, %v2690_v56  ;;  %2496 = vst.msk [vmem:[#allocation3 + $0xc8] sm:$0xff] %vm838_vm7, %v2464_v39  ;;  %v3068_v22 = vld [vmem:[#allocation3 + $0x38] sm:$0xff] }
 0x1d2   : > { %v4248_v23 = vpop.f32.mrb[106].mxu0  ;;  %2821 = vst.msk [vmem:[#allocation3 + $0xb8] sm:$0xff] %vm838_vm7, %v2789_v15 }
 0x1d3   : > { %v2706_v31 = vpop.f32.mrb[107].mxu0  ;;  %2819 = vst.msk [vmem:[#allocation3 + $0xa8] sm:$0xff] %vm838_vm7, %v2787_v41  ;;  %v4217_v25 = vpop.f32.mrb[108].mxu1 }
 0x1d4   : > { %v2469_v48 = vadd.f32 %v4217_v25, %v2437_v38  ;;  %v2392_v62 = vpop.f32.mrb[109].mxu1  ;;  %v3066_v25 = vld [vmem:[#allocation3 + $0x28] sm:$0xff] }
 0x1d5   : > { %v2760_v45 = vld [vmem:[#allocation3 + $0xd0] sm:$0xff]  ;;  %v2467_v9 = vadd.f32 %v2435_v29, %v2392_v62  ;;  %v4218_v58 = vpop.f32.mrb[110].mxu1 }
 0x1d6   : > { %v2792_v2 = vadd.f32 %v4247_v8, %v2760_v45  ;;  %2501 = vst.msk [vmem:[#allocation3 + $0xf0] sm:$0xff] %vm838_vm7, %v2469_v48  ;;  %v2758_v33 = vld [vmem:[#allocation3 + $0xc0] sm:$0xff]  ;;  %v2470_v42 = vadd.f32 %v4218_v58, %v2438_v51  ;;  %v2395_v16 = vpop.f32.mrb[111].mxu1  ;;  %v3071_v58 = vld [vmem:[#allocation3 + $0x50] sm:$0xff] }
 0x1d7   : > { %v2790_v44 = vadd.f32 %v2758_v33, %v2703_v1  ;;  %2499 = vst.msk [vmem:[#allocation3 + $0xe0] sm:$0xff] %vm838_vm7, %v2467_v9  ;;  %v2761_v34 = vld [vmem:[#allocation3 + $0xd8] sm:$0xff]  ;;  %v2468_v53 = vadd.f32 %v2436_v17, %v2395_v16  ;;  %v3069_v33 = vld [vmem:[#allocation3 + $0x40] sm:$0xff]  ;;  %v5643_v16 = vld [vmem:[%s5909_s2] ss:$0 sm:$0xff] }
 0x1d8   : > { %v4251_v5 = vpop.f32.mrb[108].mxu0  ;;  %2824 = vst.msk [vmem:[#allocation3 + $0xd0] sm:$0xff] %vm838_vm7, %v2792_v2  ;;  %v2793_v52 = vadd.f32 %v4248_v23, %v2761_v34  ;;  %2502 = vst.msk [vmem:[#allocation3 + $0xf8] sm:$0xff] %vm838_vm7, %v2470_v42  ;;  %v2759_v28 = vld [vmem:[#allocation3 + $0xc8] sm:$0xff]  ;;  %v3072_v34 = vld [vmem:[#allocation3 + $0x58] sm:$0xff] }
 0x1d9   : > { %v2719_v46 = vpop.f32.mrb[109].mxu0  ;;  %2822 = vst.msk [vmem:[#allocation3 + $0xc0] sm:$0xff] %vm838_vm7, %v2790_v44  ;;  %v2791_v30 = vadd.f32 %v2759_v28, %v2706_v31  ;;  %2500 = vst.msk [vmem:[#allocation3 + $0xe8] sm:$0xff] %vm838_vm7, %v2468_v53 }
 0x1da   : > { %v4252_v0 = vpop.f32.mrb[110].mxu0  ;;  %2825 = vst.msk [vmem:[#allocation3 + $0xd8] sm:$0xff] %vm838_vm7, %v2793_v52 }
 0x1db   : > { %v2722_v47 = vpop.f32.mrb[111].mxu0  ;;  %2823 = vst.msk [vmem:[#allocation3 + $0xc8] sm:$0xff] %vm838_vm7, %v2791_v30  ;;  %v4257_v37 = vpop.f32.mrb[112].mxu1 }
 0x1dc   : > { %v3095_v43 = vadd.f32 %v4257_v37, %v3063_v32  ;;  %v2934_v21 = vpop.f32.mrb[113].mxu1  ;;  %v3070_v32 = vld [vmem:[#allocation3 + $0x48] sm:$0xff] }
 0x1dd   : > { %v2764_v3 = vld [vmem:[#allocation3 + $0xf0] sm:$0xff]  ;;  %v3093_v24 = vadd.f32 %v3061_v27, %v2934_v21  ;;  %v4258_v56 = vpop.f32.mrb[114].mxu1 }
 0x1de   : > { %v2796_v11 = vadd.f32 %v4251_v5, %v2764_v3  ;;  %v2762_v12 = vld [vmem:[#allocation3 + $0xe0] sm:$0xff]  ;;  %3127 = vst.msk [vmem:[#allocation3 + $0x10] sm:$0xff] %vm838_vm7, %v3095_v43  ;;  %v3096_v54 = vadd.f32 %v4258_v56, %v3064_v35  ;;  %v2937_v49 = vpop.f32.mrb[115].mxu1 }
 0x1df   : > { %v2794_v8 = vadd.f32 %v2762_v12, %v2719_v46  ;;  %v2765_v18 = vld [vmem:[#allocation3 + $0xf8] sm:$0xff]  ;;  %3125 = vst.msk [vmem:[#allocation3] sm:$0xff] %vm838_vm7, %v3093_v24  ;;  %v3094_v57 = vadd.f32 %v3062_v19, %v2937_v49 }
 0x1e0   : > { %v4291_v13 = vpop.f32.mrb[112].mxu0  ;;  %2828 = vst.msk [vmem:[#allocation3 + $0xf0] sm:$0xff] %vm838_vm7, %v2796_v11  ;;  %v2797_v14 = vadd.f32 %v4252_v0, %v2765_v18  ;;  %v2763_v1 = vld [vmem:[#allocation3 + $0xe8] sm:$0xff]  ;;  %3128 = vst.msk [vmem:[#allocation3 + $0x18] sm:$0xff] %vm838_vm7, %v3096_v54 }
 0x1e1   : > { %v3261_v4 = vpop.f32.mrb[113].mxu0  ;;  %2826 = vst.msk [vmem:[#allocation3 + $0xe0] sm:$0xff] %vm838_vm7, %v2794_v8  ;;  %v2795_v60 = vadd.f32 %v2763_v1, %v2722_v47  ;;  %3126 = vst.msk [vmem:[#allocation3 + $0x8] sm:$0xff] %vm838_vm7, %v3094_v57  ;;  %v3075_v57 = vld [vmem:[#allocation3 + $0x70] sm:$0xff] }
 0x1e2   : > { %v4292_v7 = vpop.f32.mrb[114].mxu0  ;;  %2829 = vst.msk [vmem:[#allocation3 + $0xf8] sm:$0xff] %vm838_vm7, %v2797_v14 }
 0x1e3   : > { %v3264_v20 = vpop.f32.mrb[115].mxu0  ;;  %2827 = vst.msk [vmem:[#allocation3 + $0xe8] sm:$0xff] %vm838_vm7, %v2795_v60  ;;  %v4261_v63 = vpop.f32.mrb[116].mxu1 }
 0x1e4   : > { %v3099_v23 = vadd.f32 %v4261_v63, %v3067_v6  ;;  %v2950_v40 = vpop.f32.mrb[117].mxu1  ;;  %v3073_v6 = vld [vmem:[#allocation3 + $0x60] sm:$0xff] }
 0x1e5   : > { %v3390_v36 = vld [vmem:[#allocation3 + $0x10] sm:$0xff]  ;;  %v3097_v55 = vadd.f32 %v3065_v61, %v2950_v40  ;;  %v4262_v31 = vpop.f32.mrb[118].mxu1 }
 0x1e6   : > { %v3422_v39 = vadd.f32 %v4291_v13, %v3390_v36  ;;  %3131 = vst.msk [vmem:[#allocation3 + $0x30] sm:$0xff] %vm838_vm7, %v3099_v23  ;;  %v3388_v15 = vld [vmem:[#allocation3] sm:$0xff]  ;;  %v3100_v26 = vadd.f32 %v4262_v31, %v3068_v22  ;;  %v2953_v41 = vpop.f32.mrb[119].mxu1  ;;  %v3076_v36 = vld [vmem:[#allocation3 + $0x78] sm:$0xff] }
 0x1e7   : > { %v3420_v5 = vadd.f32 %v3388_v15, %v3261_v4  ;;  %3129 = vst.msk [vmem:[#allocation3 + $0x20] sm:$0xff] %vm838_vm7, %v3097_v55  ;;  %v3391_v48 = vld [vmem:[#allocation3 + $0x18] sm:$0xff]  ;;  %v3098_v62 = vadd.f32 %v3066_v25, %v2953_v41  ;;  %v3074_v15 = vld [vmem:[#allocation3 + $0x68] sm:$0xff] }
 0x1e8   : > { %v4295_v10 = vpop.f32.mrb[116].mxu0  ;;  %3454 = vst.msk [vmem:[#allocation3 + $0x10] sm:$0xff] %vm838_vm7, %v3422_v39  ;;  %v3423_v29 = vadd.f32 %v4292_v7, %v3391_v48  ;;  %3132 = vst.msk [vmem:[#allocation3 + $0x38] sm:$0xff] %vm838_vm7, %v3100_v26  ;;  %v3389_v46 = vld [vmem:[#allocation3 + $0x8] sm:$0xff] }
 0x1e9   : > { %v3277_v50 = vpop.f32.mrb[117].mxu0  ;;  %3452 = vst.msk [vmem:[#allocation3] sm:$0xff] %vm838_vm7, %v3420_v5  ;;  %v3421_v45 = vadd.f32 %v3389_v46, %v3264_v20  ;;  %3130 = vst.msk [vmem:[#allocation3 + $0x28] sm:$0xff] %vm838_vm7, %v3098_v62 }
 0x1ea   : > { %v4296_v59 = vpop.f32.mrb[118].mxu0  ;;  %3455 = vst.msk [vmem:[#allocation3 + $0x18] sm:$0xff] %vm838_vm7, %v3423_v29 }
 0x1eb   : > { %v3280_v38 = vpop.f32.mrb[119].mxu0  ;;  %3453 = vst.msk [vmem:[#allocation3 + $0x8] sm:$0xff] %vm838_vm7, %v3421_v45  ;;  %v4265_v9 = vpop.f32.mrb[120].mxu1 }
 0x1ec   : > { %v3103_v0 = vadd.f32 %v4265_v9, %v3071_v58  ;;  %v2966_v2 = vpop.f32.mrb[121].mxu1 }
 0x1ed   : > { %v3394_v17 = vld [vmem:[#allocation3 + $0x30] sm:$0xff]  ;;  %v3101_v47 = vadd.f32 %v3069_v33, %v2966_v2  ;;  %v4266_v44 = vpop.f32.mrb[122].mxu1 }
 0x1ee   : > { %v3426_v52 = vadd.f32 %v4295_v10, %v3394_v17  ;;  %3135 = vst.msk [vmem:[#allocation3 + $0x50] sm:$0xff] %vm838_vm7, %v3103_v0  ;;  %v3392_v28 = vld [vmem:[#allocation3 + $0x20] sm:$0xff]  ;;  %v3104_v30 = vadd.f32 %v4266_v44, %v3072_v34  ;;  %v2969_v37 = vpop.f32.mrb[123].mxu1 }
 0x1ef   : > { %v3486_v43 = vld [vmem:[#allocation3 + $0x10] sm:$0xff]  ;;  %v3424_v21 = vadd.f32 %v3392_v28, %v3277_v50  ;;  %3133 = vst.msk [vmem:[#allocation3 + $0x40] sm:$0xff] %vm838_vm7, %v3101_v47  ;;  %v3395_v27 = vld [vmem:[#allocation3 + $0x38] sm:$0xff]  ;;  %v3102_v4 = vadd.f32 %v3070_v32, %v2969_v37  ;;  %v3077_v28 = vld [vmem:[#allocation3 + $0x80] sm:$0xff] }
 0x1f0   : > { %v4299_v51 = vpop.f32.mrb[120].mxu0  ;;  %v3525_v3 = vadd.f32 %v5643_v16, %v3486_v43  ;;  %v3484_v24 = vld [vmem:[#allocation3] sm:$0xff]  ;;  %3458 = vst.msk [vmem:[#allocation3 + $0x30] sm:$0xff] %vm838_vm7, %v3426_v52  ;;  %v3427_v56 = vadd.f32 %v4296_v59, %v3395_v27  ;;  %3136 = vst.msk [vmem:[#allocation3 + $0x58] sm:$0xff] %vm838_vm7, %v3104_v30  ;;  %v3393_v35 = vld [vmem:[#allocation3 + $0x28] sm:$0xff] }
 0x1f1   : > { %v5638_v42 = vpop.f32.mrb[121].mxu0  ;;  %v3523_v7 = vadd.f32 %v5643_v16, %v3484_v24  ;;  %v3487_v11 = vld [vmem:[#allocation3 + $0x18] sm:$0xff]  ;;  %3456 = vst.msk [vmem:[#allocation3 + $0x20] sm:$0xff] %vm838_vm7, %v3424_v21  ;;  %v3425_v12 = vadd.f32 %v3393_v35, %v3280_v38  ;;  %3134 = vst.msk [vmem:[#allocation3 + $0x48] sm:$0xff] %vm838_vm7, %v3102_v4  ;;  %v3079_v47 = vld [vmem:[#allocation3 + $0x90] sm:$0xff] }
 0x1f2   : > { %v5645_v53 = vpop.f32.mrb[122].mxu0  ;;  %v3557_v54 = vmax.f32 %v3525_v3, 0.0  ;;  %v3526_v49 = vadd.f32 %v5643_v16, %v3487_v11  ;;  %v3485_v19 = vld [vmem:[#allocation3 + $0x8] sm:$0xff]  ;;  %3459 = vst.msk [vmem:[#allocation3 + $0x38] sm:$0xff] %vm838_vm7, %v3427_v56  ;;  %v3080_v21 = vld [vmem:[#allocation3 + $0x98] sm:$0xff] }
 0x1f3   : > { %v5652_v13 = vpop.f32.mrb[123].mxu0  ;;  %v3555_v20 = vmax.f32 %v3523_v7, 0.0  ;;  %v3524_v8 = vadd.f32 %v5643_v16, %v3485_v19  ;;  %3457 = vst.msk [vmem:[#allocation3 + $0x28] sm:$0xff] %vm838_vm7, %v3425_v12  ;;  %v4269_v18 = vpop.f32.mrb[124].mxu1  ;;  %v3078_v35 = vld [vmem:[#allocation3 + $0x88] sm:$0xff] }
 0x1f4   : > { %3589 = vst.msk [vmem:[%s5668_s13 + $0x10] sm:$0xff] %vm838_vm7, %v3557_v54  ;;  %v3558_v1 = vmax.f32 %v3526_v49, 0.0  ;;  %v3107_v60 = vadd.f32 %v4269_v18, %v3075_v57  ;;  %v2982_v63 = vpop.f32.mrb[125].mxu1 }
 0x1f5   : > { %3587 = vst.msk [vmem:[%s5668_s13] sm:$0xff] %vm838_vm7, %v3555_v20  ;;  %v3556_v23 = vmax.f32 %v3524_v8, 0.0  ;;  %v3398_v40 = vld [vmem:[#allocation3 + $0x50] sm:$0xff]  ;;  %v3105_v61 = vadd.f32 %v3073_v6, %v2982_v63  ;;  %v4270_v50 = vpop.f32.mrb[126].mxu1 }
 0x1f6   : > { %3590 = vst.msk [vmem:[%s5668_s13 + $0x18] sm:$0xff] %vm838_vm7, %v3558_v1  ;;  %v3430_v31 = vadd.f32 %v4299_v51, %v3398_v40  ;;  %3139 = vst.msk [vmem:[#allocation3 + $0x70] sm:$0xff] %vm838_vm7, %v3107_v60  ;;  %v3396_v22 = vld [vmem:[#allocation3 + $0x40] sm:$0xff]  ;;  %v3108_v59 = vadd.f32 %v4270_v50, %v3076_v36  ;;  %v2985_v39 = vpop.f32.mrb[127].mxu1 }
 0x1f7   : > { %3588 = vst.msk [vmem:[%s5668_s13 + $0x8] sm:$0xff] %vm838_vm7, %v3556_v23  ;;  %v3490_v41 = vld [vmem:[#allocation3 + $0x30] sm:$0xff]  ;;  %v3428_v25 = vadd.f32 %v3396_v22, %v5638_v42  ;;  %3137 = vst.msk [vmem:[#allocation3 + $0x60] sm:$0xff] %vm838_vm7, %v3105_v61  ;;  %v3399_v38 = vld [vmem:[#allocation3 + $0x58] sm:$0xff]  ;;  %v3106_v5 = vadd.f32 %v3074_v15, %v2985_v39 }
 0x1f8   : > { %v5665_v14 = vpop.f32.mrb[124].mxu0  ;;  %v3529_v48 = vadd.f32 %v5643_v16, %v3490_v41  ;;  %v3488_v62 = vld [vmem:[#allocation3 + $0x20] sm:$0xff]  ;;  %3462 = vst.msk [vmem:[#allocation3 + $0x50] sm:$0xff] %vm838_vm7, %v3430_v31  ;;  %v3431_v29 = vadd.f32 %v5645_v53, %v3399_v38  ;;  %3140 = vst.msk [vmem:[#allocation3 + $0x78] sm:$0xff] %vm838_vm7, %v3108_v59  ;;  %v3397_v46 = vld [vmem:[#allocation3 + $0x48] sm:$0xff] }
 0x1f9   : > { %v5672_v10 = vpop.f32.mrb[125].mxu0  ;;  %v3527_v45 = vadd.f32 %v5643_v16, %v3488_v62  ;;  %v3491_v9 = vld [vmem:[#allocation3 + $0x38] sm:$0xff]  ;;  %3460 = vst.msk [vmem:[#allocation3 + $0x40] sm:$0xff] %vm838_vm7, %v3428_v25  ;;  %v3429_v58 = vadd.f32 %v3397_v46, %v5652_v13  ;;  %3138 = vst.msk [vmem:[#allocation3 + $0x68] sm:$0xff] %vm838_vm7, %v3106_v5  ;;  %v3083_v61 = vld [vmem:[#allocation3 + $0xb0] sm:$0xff] }
 0x1fa   : > { %v5676_v55 = vpop.f32.mrb[126].mxu0  ;;  %v3561_v51 = vmax.f32 %v3529_v48, 0.0  ;;  %v3530_v0 = vadd.f32 %v5643_v16, %v3491_v9  ;;  %v3489_v2 = vld [vmem:[#allocation3 + $0x28] sm:$0xff]  ;;  %3463 = vst.msk [vmem:[#allocation3 + $0x58] sm:$0xff] %vm838_vm7, %v3431_v29  ;;  %v3081_v22 = vld [vmem:[#allocation3 + $0xa0] sm:$0xff]  ;;  %v3084_v25 = vld [vmem:[#allocation3 + $0xb8] sm:$0xff] }
 0x1fb   : > { %v5681_v26 = vpop.f32.mrb[127].mxu0  ;;  %v3559_v33 = vmax.f32 %v3527_v45, 0.0  ;;  %v3528_v42 = vadd.f32 %v5643_v16, %v3489_v2  ;;  %3461 = vst.msk [vmem:[#allocation3 + $0x48] sm:$0xff] %vm838_vm7, %v3429_v58  ;;  %v4273_v17 = vpop.f32.mrb[128].mxu1  ;;  %v3082_v46 = vld [vmem:[#allocation3 + $0xa8] sm:$0xff] }
 0x1fc   : > { %3593 = vst.msk [vmem:[%s5668_s13 + $0x30] sm:$0xff] %vm838_vm7, %v3561_v51  ;;  %v3562_v34 = vmax.f32 %v3530_v0, 0.0  ;;  %v3111_v53 = vadd.f32 %v4273_v17, %v3079_v47  ;;  %v2998_v52 = vpop.f32.mrb[129].mxu1 }
 0x1fd   : > { %3591 = vst.msk [vmem:[%s5668_s13 + $0x20] sm:$0xff] %vm838_vm7, %v3559_v33  ;;  %v3560_v37 = vmax.f32 %v3528_v42, 0.0  ;;  %v3402_v32 = vld [vmem:[#allocation3 + $0x70] sm:$0xff]  ;;  %v3109_v13 = vadd.f32 %v3077_v28, %v2998_v52  ;;  %v4274_v43 = vpop.f32.mrb[130].mxu1 }
 0x1fe   : > { %3594 = vst.msk [vmem:[%s5668_s13 + $0x38] sm:$0xff] %vm838_vm7, %v3562_v34  ;;  %v3434_v4 = vadd.f32 %v5665_v14, %v3402_v32  ;;  %3143 = vst.msk [vmem:[#allocation3 + $0x90] sm:$0xff] %vm838_vm7, %v3111_v53  ;;  %v3400_v3 = vld [vmem:[#allocation3 + $0x60] sm:$0xff]  ;;  %v3112_v24 = vadd.f32 %v4274_v43, %v3080_v21  ;;  %v3001_v56 = vpop.f32.mrb[131].mxu1 }
 0x1ff   : > { %3592 = vst.msk [vmem:[%s5668_s13 + $0x28] sm:$0xff] %vm838_vm7, %v3560_v37  ;;  %v3494_v11 = vld [vmem:[#allocation3 + $0x50] sm:$0xff]  ;;  %v3432_v12 = vadd.f32 %v3400_v3, %v5672_v10  ;;  %3141 = vst.msk [vmem:[#allocation3 + $0x80] sm:$0xff] %vm838_vm7, %v3109_v13  ;;  %v3403_v54 = vld [vmem:[#allocation3 + $0x78] sm:$0xff]  ;;  %v3110_v49 = vadd.f32 %v3078_v35, %v3001_v56 }
 0x200   : > { %v5699_v44 = vpop.f32.mrb[128].mxu0  ;;  %v3533_v19 = vadd.f32 %v5643_v16, %v3494_v11  ;;  %v3492_v20 = vld [vmem:[#allocation3 + $0x40] sm:$0xff]  ;;  %3466 = vst.msk [vmem:[#allocation3 + $0x70] sm:$0xff] %vm838_vm7, %v3434_v4  ;;  %v3435_v8 = vadd.f32 %v5676_v55, %v3403_v54  ;;  %3144 = vst.msk [vmem:[#allocation3 + $0x98] sm:$0xff] %vm838_vm7, %v3112_v24  ;;  %v3401_v18 = vld [vmem:[#allocation3 + $0x68] sm:$0xff] }
 0x201   : > { %v5703_v30 = vpop.f32.mrb[129].mxu0  ;;  %v3531_v57 = vadd.f32 %v5643_v16, %v3492_v20  ;;  %v3495_v14 = vld [vmem:[#allocation3 + $0x58] sm:$0xff]  ;;  %3464 = vst.msk [vmem:[#allocation3 + $0x60] sm:$0xff] %vm838_vm7, %v3432_v12  ;;  %v3433_v1 = vadd.f32 %v3401_v18, %v5681_v26  ;;  %3142 = vst.msk [vmem:[#allocation3 + $0x88] sm:$0xff] %vm838_vm7, %v3110_v49  ;;  %v3087_v13 = vld [vmem:[#allocation3 + $0xd0] sm:$0xff] }
 0x202   : > { %v5707_v27 = vpop.f32.mrb[130].mxu0  ;;  %v3565_v60 = vmax.f32 %v3533_v19, 0.0  ;;  %v3534_v63 = vadd.f32 %v5643_v16, %v3495_v14  ;;  %v3493_v6 = vld [vmem:[#allocation3 + $0x48] sm:$0xff]  ;;  %3467 = vst.msk [vmem:[#allocation3 + $0x78] sm:$0xff] %vm838_vm7, %v3435_v8  ;;  %v3085_v3 = vld [vmem:[#allocation3 + $0xc0] sm:$0xff]  ;;  %v3088_v12 = vld [vmem:[#allocation3 + $0xd8] sm:$0xff] }
 0x203   : > { %v5713_v7 = vpop.f32.mrb[131].mxu0  ;;  %v3563_v10 = vmax.f32 %v3531_v57, 0.0  ;;  %v3532_v23 = vadd.f32 %v5643_v16, %v3493_v6  ;;  %3465 = vst.msk [vmem:[#allocation3 + $0x68] sm:$0xff] %vm838_vm7, %v3433_v1  ;;  %v4277_v40 = vpop.f32.mrb[132].mxu1  ;;  %v3086_v18 = vld [vmem:[#allocation3 + $0xc8] sm:$0xff] }
 0x204   : > { %3597 = vst.msk [vmem:[%s5668_s13 + $0x50] sm:$0xff] %vm838_vm7, %v3565_v60  ;;  %v3566_v36 = vmax.f32 %v3534_v63, 0.0  ;;  %v3115_v55 = vadd.f32 %v4277_v40, %v3083_v61  ;;  %v3014_v31 = vpop.f32.mrb[133].mxu1 }
 0x205   : > { %3595 = vst.msk [vmem:[%s5668_s13 + $0x40] sm:$0xff] %vm838_vm7, %v3563_v10  ;;  %v3564_v39 = vmax.f32 %v3532_v23, 0.0  ;;  %v3406_v15 = vld [vmem:[#allocation3 + $0x90] sm:$0xff]  ;;  %v3113_v26 = vadd.f32 %v3081_v22, %v3014_v31  ;;  %v4278_v41 = vpop.f32.mrb[134].mxu1 }
 0x206   : > { %3598 = vst.msk [vmem:[%s5668_s13 + $0x58] sm:$0xff] %vm838_vm7, %v3566_v36  ;;  %v3438_v5 = vadd.f32 %v5699_v44, %v3406_v15  ;;  %3147 = vst.msk [vmem:[#allocation3 + $0xb0] sm:$0xff] %vm838_vm7, %v3115_v55  ;;  %v3404_v48 = vld [vmem:[#allocation3 + $0x80] sm:$0xff]  ;;  %v3116_v62 = vadd.f32 %v4278_v41, %v3084_v25  ;;  %v3017_v29 = vpop.f32.mrb[135].mxu1 }
 0x207   : > { %3596 = vst.msk [vmem:[%s5668_s13 + $0x48] sm:$0xff] %vm838_vm7, %v3564_v39  ;;  %v3498_v9 = vld [vmem:[#allocation3 + $0x70] sm:$0xff]  ;;  %v3436_v58 = vadd.f32 %v3404_v48, %v5703_v30  ;;  %3145 = vst.msk [vmem:[#allocation3 + $0xa0] sm:$0xff] %vm838_vm7, %v3113_v26  ;;  %v3407_v51 = vld [vmem:[#allocation3 + $0x98] sm:$0xff]  ;;  %v3114_v0 = vadd.f32 %v3082_v46, %v3017_v29 }
 0x208   : > { %v5731_v50 = vpop.f32.mrb[132].mxu0  ;;  %v3537_v2 = vadd.f32 %v5643_v16, %v3498_v9  ;;  %v3496_v33 = vld [vmem:[#allocation3 + $0x60] sm:$0xff]  ;;  %3470 = vst.msk [vmem:[#allocation3 + $0x90] sm:$0xff] %vm838_vm7, %v3438_v5  ;;  %v3439_v42 = vadd.f32 %v5707_v27, %v3407_v51  ;;  %3148 = vst.msk [vmem:[#allocation3 + $0xb8] sm:$0xff] %vm838_vm7, %v3116_v62  ;;  %v3405_v17 = vld [vmem:[#allocation3 + $0x88] sm:$0xff] }
 0x209   : > { %v5735_v59 = vpop.f32.mrb[133].mxu0  ;;  %v3535_v47 = vadd.f32 %v5643_v16, %v3496_v33  ;;  %v3499_v44 = vld [vmem:[#allocation3 + $0x78] sm:$0xff]  ;;  %3468 = vst.msk [vmem:[#allocation3 + $0x80] sm:$0xff] %vm838_vm7, %v3436_v58  ;;  %v3437_v34 = vadd.f32 %v3405_v17, %v5713_v7  ;;  %3146 = vst.msk [vmem:[#allocation3 + $0xa8] sm:$0xff] %vm838_vm7, %v3114_v0  ;;  %v3091_v26 = vld [vmem:[#allocation3 + $0xf0] sm:$0xff] }
 0x20a   : > { %v5739_v38 = vpop.f32.mrb[134].mxu0  ;;  %v3569_v53 = vmax.f32 %v3537_v2, 0.0  ;;  %v3538_v52 = vadd.f32 %v5643_v16, %v3499_v44  ;;  %v3497_v28 = vld [vmem:[#allocation3 + $0x68] sm:$0xff]  ;;  %3471 = vst.msk [vmem:[#allocation3 + $0x98] sm:$0xff] %vm838_vm7, %v3439_v42  ;;  %v3089_v48 = vld [vmem:[#allocation3 + $0xe0] sm:$0xff]  ;;  %v3092_v58 = vld [vmem:[#allocation3 + $0xf8] sm:$0xff] }
 0x20b   : > { %v5745_v45 = vpop.f32.mrb[135].mxu0  ;;  %v3567_v30 = vmax.f32 %v3535_v47, 0.0  ;;  %v3536_v37 = vadd.f32 %v5643_v16, %v3497_v28  ;;  %3469 = vst.msk [vmem:[#allocation3 + $0x88] sm:$0xff] %vm838_vm7, %v3437_v34  ;;  %v4281_v32 = vpop.f32.mrb[136].mxu1  ;;  %v3090_v17 = vld [vmem:[#allocation3 + $0xe8] sm:$0xff] }
 0x20c   : > { %3601 = vst.msk [vmem:[%s5668_s13 + $0x70] sm:$0xff] %vm838_vm7, %v3569_v53  ;;  %v3570_v21 = vmax.f32 %v3538_v52, 0.0  ;;  %v3119_v27 = vadd.f32 %v4281_v32, %v3087_v13  ;;  %v3030_v4 = vpop.f32.mrb[137].mxu1 }
 0x20d   : > { %3599 = vst.msk [vmem:[%s5668_s13 + $0x60] sm:$0xff] %vm838_vm7, %v3567_v30  ;;  %v3568_v56 = vmax.f32 %v3536_v37, 0.0  ;;  %v3410_v35 = vld [vmem:[#allocation3 + $0xb0] sm:$0xff]  ;;  %v3117_v7 = vadd.f32 %v3085_v3, %v3030_v4  ;;  %v4282_v11 = vpop.f32.mrb[138].mxu1 }
 0x20e   : > { %3602 = vst.msk [vmem:[%s5668_s13 + $0x78] sm:$0xff] %vm838_vm7, %v3570_v21  ;;  %v3442_v49 = vadd.f32 %v5731_v50, %v3410_v35  ;;  %3151 = vst.msk [vmem:[#allocation3 + $0xd0] sm:$0xff] %vm838_vm7, %v3119_v27  ;;  %v3408_v19 = vld [vmem:[#allocation3 + $0xa0] sm:$0xff]  ;;  %v3120_v20 = vadd.f32 %v4282_v11, %v3088_v12  ;;  %v3033_v8 = vpop.f32.mrb[139].mxu1 }
 0x20f   : > { %3600 = vst.msk [vmem:[%s5668_s13 + $0x68] sm:$0xff] %vm838_vm7, %v3568_v56  ;;  %v3502_v14 = vld [vmem:[#allocation3 + $0x90] sm:$0xff]  ;;  %v3440_v1 = vadd.f32 %v3408_v19, %v5735_v59  ;;  %3149 = vst.msk [vmem:[#allocation3 + $0xc0] sm:$0xff] %vm838_vm7, %v3117_v7  ;;  %v3411_v60 = vld [vmem:[#allocation3 + $0xb8] sm:$0xff]  ;;  %v3118_v63 = vadd.f32 %v3086_v18, %v3033_v8 }
 0x210   : > { %v5763_v43 = vpop.f32.mrb[136].mxu0  ;;  %v3541_v6 = vadd.f32 %v5643_v16, %v3502_v14  ;;  %v3500_v10 = vld [vmem:[#allocation3 + $0x80] sm:$0xff]  ;;  %3474 = vst.msk [vmem:[#allocation3 + $0xb0] sm:$0xff] %vm838_vm7, %v3442_v49  ;;  %v3443_v23 = vadd.f32 %v5739_v38, %v3411_v60  ;;  %3152 = vst.msk [vmem:[#allocation3 + $0xd8] sm:$0xff] %vm838_vm7, %v3120_v20  ;;  %v3409_v40 = vld [vmem:[#allocation3 + $0xa8] sm:$0xff] }
 0x211   : > { %v5767_v24 = vpop.f32.mrb[137].mxu0  ;;  %v3539_v61 = vadd.f32 %v5643_v16, %v3500_v10  ;;  %v3503_v50 = vld [vmem:[#allocation3 + $0x98] sm:$0xff]  ;;  %3472 = vst.msk [vmem:[#allocation3 + $0xa0] sm:$0xff] %vm838_vm7, %v3440_v1  ;;  %v3441_v36 = vadd.f32 %v3409_v40, %v5745_v45  ;;  %3150 = vst.msk [vmem:[#allocation3 + $0xc8] sm:$0xff] %vm838_vm7, %v3118_v63 }
 0x212   : > { %v5771_v54 = vpop.f32.mrb[138].mxu0  ;;  %v3573_v55 = vmax.f32 %v3541_v6, 0.0  ;;  %v3542_v31 = vadd.f32 %v5643_v16, %v3503_v50  ;;  %v3501_v22 = vld [vmem:[#allocation3 + $0x88] sm:$0xff]  ;;  %3475 = vst.msk [vmem:[#allocation3 + $0xb8] sm:$0xff] %vm838_vm7, %v3443_v23 }
 0x213   : > { %v5777_v57 = vpop.f32.mrb[139].mxu0  ;;  %v3571_v59 = vmax.f32 %v3539_v61, 0.0  ;;  %v3540_v39 = vadd.f32 %v5643_v16, %v3501_v22  ;;  %3473 = vst.msk [vmem:[#allocation3 + $0xa8] sm:$0xff] %vm838_vm7, %v3441_v36  ;;  %v4285_v15 = vpop.f32.mrb[140].mxu1 }
 0x214   : > { %3605 = vst.msk [vmem:[%s5668_s13 + $0x90] sm:$0xff] %vm838_vm7, %v3573_v55  ;;  %v3574_v25 = vmax.f32 %v3542_v31, 0.0  ;;  %v3123_v38 = vadd.f32 %v4285_v15, %v3091_v26  ;;  %v3046_v5 = vpop.f32.mrb[141].mxu1 }
 0x215   : > { %3603 = vst.msk [vmem:[%s5668_s13 + $0x80] sm:$0xff] %vm838_vm7, %v3571_v59  ;;  %v3572_v29 = vmax.f32 %v3540_v39, 0.0  ;;  %v3414_v46 = vld [vmem:[#allocation3 + $0xd0] sm:$0xff]  ;;  %v3121_v45 = vadd.f32 %v3089_v48, %v3046_v5  ;;  %v4286_v9 = vpop.f32.mrb[142].mxu1 }
 0x216   : > { %3606 = vst.msk [vmem:[%s5668_s13 + $0x98] sm:$0xff] %vm838_vm7, %v3574_v25  ;;  %v3446_v0 = vadd.f32 %v5763_v43, %v3414_v46  ;;  %3155 = vst.msk [vmem:[#allocation3 + $0xf0] sm:$0xff] %vm838_vm7, %v3123_v38  ;;  %v3412_v2 = vld [vmem:[#allocation3 + $0xc0] sm:$0xff]  ;;  %v3124_v33 = vadd.f32 %v4286_v9, %v3092_v58  ;;  %v3049_v42 = vpop.f32.mrb[143].mxu1 }
 0x217   : > { %3604 = vst.msk [vmem:[%s5668_s13 + $0x88] sm:$0xff] %vm838_vm7, %v3572_v29  ;;  %v3506_v44 = vld [vmem:[#allocation3 + $0xb0] sm:$0xff]  ;;  %v3444_v34 = vadd.f32 %v3412_v2, %v5767_v24  ;;  %3153 = vst.msk [vmem:[#allocation3 + $0xe0] sm:$0xff] %vm838_vm7, %v3121_v45  ;;  %v3415_v53 = vld [vmem:[#allocation3 + $0xd8] sm:$0xff]  ;;  %v3122_v52 = vadd.f32 %v3090_v17, %v3049_v42 }
 0x218   : > { %v4319_v41 = vpop.f32.mrb[140].mxu0  ;;  %v3545_v28 = vadd.f32 %v5643_v16, %v3506_v44  ;;  %v3504_v30 = vld [vmem:[#allocation3 + $0xa0] sm:$0xff]  ;;  %3478 = vst.msk [vmem:[#allocation3 + $0xd0] sm:$0xff] %vm838_vm7, %v3446_v0  ;;  %v3447_v37 = vadd.f32 %v5771_v54, %v3415_v53  ;;  %3156 = vst.msk [vmem:[#allocation3 + $0xf8] sm:$0xff] %vm838_vm7, %v3124_v33  ;;  %v3413_v32 = vld [vmem:[#allocation3 + $0xc8] sm:$0xff] }
 0x219   : > { %v3373_v62 = vpop.f32.mrb[141].mxu0  ;;  %v3543_v13 = vadd.f32 %v5643_v16, %v3504_v30  ;;  %v3507_v43 = vld [vmem:[#allocation3 + $0xb8] sm:$0xff]  ;;  %3476 = vst.msk [vmem:[#allocation3 + $0xc0] sm:$0xff] %vm838_vm7, %v3444_v34  ;;  %v3445_v21 = vadd.f32 %v3413_v32, %v5777_v57  ;;  %3154 = vst.msk [vmem:[#allocation3 + $0xe8] sm:$0xff] %vm838_vm7, %v3122_v52 }
 0x21a   : > { %v4320_v51 = vpop.f32.mrb[142].mxu0  ;;  %v3577_v27 = vmax.f32 %v3545_v28, 0.0  ;;  %v3546_v4 = vadd.f32 %v5643_v16, %v3507_v43  ;;  %v3505_v3 = vld [vmem:[#allocation3 + $0xa8] sm:$0xff]  ;;  %3479 = vst.msk [vmem:[#allocation3 + $0xd8] sm:$0xff] %vm838_vm7, %v3447_v37 }
 0x21b   : > { %v3376_v47 = vpop.f32.mrb[143].mxu0  ;;  %v3575_v24 = vmax.f32 %v3543_v13, 0.0  ;;  %v3544_v56 = vadd.f32 %v5643_v16, %v3505_v3  ;;  %3477 = vst.msk [vmem:[#allocation3 + $0xc8] sm:$0xff] %vm838_vm7, %v3445_v21 }
 0x21c   : > { %3609 = vst.msk [vmem:[%s5668_s13 + $0xb0] sm:$0xff] %vm838_vm7, %v3577_v27  ;;  %v3578_v35 = vmax.f32 %v3546_v4, 0.0 }
 0x21d   : > { %3607 = vst.msk [vmem:[%s5668_s13 + $0xa0] sm:$0xff] %vm838_vm7, %v3575_v24  ;;  %v3576_v7 = vmax.f32 %v3544_v56, 0.0  ;;  %v3418_v11 = vld [vmem:[#allocation3 + $0xf0] sm:$0xff] }
 0x21e   : > { %3610 = vst.msk [vmem:[%s5668_s13 + $0xb8] sm:$0xff] %vm838_vm7, %v3578_v35  ;;  %v3450_v12 = vadd.f32 %v4319_v41, %v3418_v11  ;;  %v3416_v54 = vld [vmem:[#allocation3 + $0xe0] sm:$0xff] }
 0x21f   : > { %3608 = vst.msk [vmem:[%s5668_s13 + $0xa8] sm:$0xff] %vm838_vm7, %v3576_v7  ;;  %v3510_v49 = vld [vmem:[#allocation3 + $0xd0] sm:$0xff]  ;;  %v3448_v19 = vadd.f32 %v3416_v54, %v3373_v62  ;;  %v3419_v20 = vld [vmem:[#allocation3 + $0xf8] sm:$0xff] }
 0x220   : > { %v3549_v8 = vadd.f32 %v5643_v16, %v3510_v49  ;;  %v3508_v18 = vld [vmem:[#allocation3 + $0xc0] sm:$0xff]  ;;  %3482 = vst.msk [vmem:[#allocation3 + $0xf0] sm:$0xff] %vm838_vm7, %v3450_v12  ;;  %v3451_v57 = vadd.f32 %v4320_v51, %v3419_v20  ;;  %v3417_v14 = vld [vmem:[#allocation3 + $0xe8] sm:$0xff] }
 0x221   : > { %v3547_v1 = vadd.f32 %v5643_v16, %v3508_v18  ;;  %v3511_v60 = vld [vmem:[#allocation3 + $0xd8] sm:$0xff]  ;;  %3480 = vst.msk [vmem:[#allocation3 + $0xe0] sm:$0xff] %vm838_vm7, %v3448_v19  ;;  %v3449_v63 = vadd.f32 %v3417_v14, %v3376_v47 }
 0x222   : > { %v3581_v6 = vmax.f32 %v3549_v8, 0.0  ;;  %v3550_v10 = vadd.f32 %v5643_v16, %v3511_v60  ;;  %v3509_v23 = vld [vmem:[#allocation3 + $0xc8] sm:$0xff]  ;;  %3483 = vst.msk [vmem:[#allocation3 + $0xf8] sm:$0xff] %vm838_vm7, %v3451_v57 }
 0x223   : > { %v3579_v40 = vmax.f32 %v3547_v1, 0.0  ;;  %v3548_v61 = vadd.f32 %v5643_v16, %v3509_v23  ;;  %3481 = vst.msk [vmem:[#allocation3 + $0xe8] sm:$0xff] %vm838_vm7, %v3449_v63 }
 0x224   : > { %3613 = vst.msk [vmem:[%s5668_s13 + $0xd0] sm:$0xff] %vm838_vm7, %v3581_v6  ;;  %v3582_v50 = vmax.f32 %v3550_v10, 0.0 }
 0x225   : > { %3611 = vst.msk [vmem:[%s5668_s13 + $0xc0] sm:$0xff] %vm838_vm7, %v3579_v40  ;;  %v3580_v36 = vmax.f32 %v3548_v61, 0.0 }
 0x226   : > { %3614 = vst.msk [vmem:[%s5668_s13 + $0xd8] sm:$0xff] %vm838_vm7, %v3582_v50 }
 0x227   : > { %3612 = vst.msk [vmem:[%s5668_s13 + $0xc8] sm:$0xff] %vm838_vm7, %v3580_v36  ;;  %v3514_v55 = vld [vmem:[#allocation3 + $0xf0] sm:$0xff] }
 0x228   : > { %v3553_v31 = vadd.f32 %v5643_v16, %v3514_v55  ;;  %v3512_v22 = vld [vmem:[#allocation3 + $0xe0] sm:$0xff] }
 0x229   : > { %v3551_v59 = vadd.f32 %v5643_v16, %v3512_v22  ;;  %v3515_v39 = vld [vmem:[#allocation3 + $0xf8] sm:$0xff] }
 0x22a   : > { %v3585_v15 = vmax.f32 %v3553_v31, 0.0  ;;  %v3554_v26 = vadd.f32 %v5643_v16, %v3515_v39  ;;  %v3513_v41 = vld [vmem:[#allocation3 + $0xe8] sm:$0xff] }
 0x22b   : > { %v3583_v25 = vmax.f32 %v3551_v59, 0.0  ;;  %v3552_v38 = vadd.f32 %v5643_v16, %v3513_v41 }
 0x22c   : > { %3617 = vst.msk [vmem:[%s5668_s13 + $0xf0] sm:$0xff] %vm838_vm7, %v3585_v15  ;;  %v3586_v5 = vmax.f32 %v3554_v26, 0.0 }
 0x22d   : > { %3615 = vst.msk [vmem:[%s5668_s13 + $0xe0] sm:$0xff] %vm838_vm7, %v3583_v25  ;;  %v3584_v48 = vmax.f32 %v3552_v38, 0.0 }
 0x22e   : > { %3618 = vst.msk [vmem:[%s5668_s13 + $0xf8] sm:$0xff] %vm838_vm7, %v3586_v5 }
 0x22f   : > { %3616 = vst.msk [vmem:[%s5668_s13 + $0xe8] sm:$0xff] %vm838_vm7, %v3584_v48 }
 0x230   : > { %4378 = shalt.err (!%p4375_p3)
}
 0x231   : > { %s4379_s6 = scalar_lea.hbm %s5854_s27, 4096  ;;  %s4383_s9 = scalar_lea.hbm %s5911_s4, 8192 }
 0x232   : > { %p4380_p4 = scmp.ne.s32.totalorder %s5854_s27, %s4379_s6  ;;  %p4384_p9 = scmp.lt.u32.totalorder %s5854_s27, %s5911_s4 }
 0x233   : > { %p4385_p10 = scmp.lt.u32.totalorder %s4383_s9, %s4379_s6  ;;  %p4387_p12 = scmp.lt.u32.totalorder %s4379_s6, %s5854_s27 }
 0x234   : > { %p4381_p7 = pnand %p4380_p4, %p4496_p5 }
 0x235   : > { %p4386_p11 = por %p4385_p10, %p4384_p9 }
 0x236   : > { %p4382_p8 = pneg %p4381_p7 }
 0x237   : > { %p4388_p13 = por %p4387_p12, %p4386_p11 }
 0x239   : > { %p4389_p0 = pnand %p4388_p13, %p4382_p8 }
 0x23b   : > { %4392 = shalt.err (!%p4389_p0)
}
 0x23c   : > { %s4431_s12 = smov 128   ;;  %s4432_s13 = smov 8  }
 0x23d   : > { %4323 = dma.vmem_to_hbm [thread:$0]  (%p4496_p5), %s5856_s20, 4096, %s5854_s27, %s5866_s19, %s4431_s12, %s4431_s12, %s4432_s13  }
 0x23e PF: > { %p4329_p1 = scmp.ge.s32.totalorder %s4427_s18, 2  ;;  %s3648_s14 = sand.u32 1, %s4415_s15  }
 0x23f   : > { %s3649_s22 = scalar_lea.sflag [#allocation5], %s3648_s14 }
 0x240   : > { %p4326_p2 = pnand %p4329_p1, %p4500_p6 }
 0x242   : > { %4410 = dma.done.wait (!%p4326_p2), %s3649_s22, 4096  }
 0x243   : > { %4412 = vsyncadd (!%p4326_p2), %s3649_s22, 4294963200  ;;  %p14_p3 = scmp.ge.s32.totalorder %s4483_s21, 4   ;;  %s5936_s15 = smov %s4419_s16 }
 0x244   : > { %s5937_s16 = smov %s4423_s17  ;;  %s5938_s17 = smov %s4494_s24 }
 0x245   : > { %s5939_s18 = smov %s4483_s21  ;;  %16 = sbr.rel (!%p14_p3) target bundleno = 3 (0x3), region = 87 }
 0x24c   :  { %3654 = vsyncpa [#allocation5], 1 }
 0x24d   :  { %3656 = vsyncpa [#allocation5 + $0x1], 1 }

</bundles_post_ra>
